<compile_context>
chip_gen: v7x
topology: tpu7x:2x2x1
jax: 0.10.0
libtpu: 0.0.40
codegen_flags: <defaults>
</compile_context>

<pallas_src>
import functools

import jax
import jax.numpy as jnp
from jax.experimental import pallas as pl
from jax.experimental.pallas import tpu as pltpu


def _round_up(x, m):
    return ((x + m - 1) // m) * m


def _hw_budget():
    """Generation-aware VMEM limit and max point-tile (v7x: 64 MiB VMEM)."""
    vmem = 64 * 1024 * 1024  # conservative fallback (v7x-sized)
    try:
        info = pltpu.get_tpu_info()
        cap = int(getattr(info, "vmem_capacity_bytes", vmem))
        if cap > 0:
            vmem = cap
    except Exception:
        pass
    vmem_limit = max(32 * 1024 * 1024, min(vmem // 2, 96 * 1024 * 1024))
    max_tile = 2048 if vmem >= 100 * 1024 * 1024 else 1024
    return vmem_limit, max_tile


_VMEM_LIMIT, _MAX_TILE = _hw_budget()


# ---------------------------------------------------------------------------
# Kernel 1 (fused, both branches): per-point 3->128->128->128 MLP (zero-padded
# from 3->64->64->64) + 128->128->1024 MLP with masked average-pool.
# Grid: (branch, batch, point_tile); the point-tile axis is the "arbitrary"
# accumulation axis for the pooled global feature.
# ---------------------------------------------------------------------------
def _branches_kernel(x_ref, w1, b1, w2, b2, w3, b3, w4, b4, w5, b5,
                     loc_ref, glob_ref, acc_ref, *, n_a, n_b, compute_dtype):
    br = pl.program_id(0)
    i = pl.program_id(2)
    tile = x_ref.shape[0]

    @pl.when(i == 0)
    def _():
        acc_ref[...] = jnp.zeros_like(acc_ref)

    def mm(a, w_ref):
        # bf16 (or f32) operands on the MXU, f32 accumulation.
        return jnp.dot(a.astype(compute_dtype), w_ref[...],
                       preferred_element_type=jnp.float32)

    x = x_ref[...]                                                    # (tile, 3) f32
    h = jnp.maximum(mm(x, w1) + b1[...], 0.0)                         # (tile, 128)
    h = jnp.maximum(mm(h, w2) + b2[...], 0.0)                         # (tile, 128)
    loc = jnp.maximum(mm(h, w3) + b3[...], 0.0)                       # (tile, 128)
    loc_ref[...] = loc.astype(loc_ref.dtype)                          # lane-dense store

    g = jnp.maximum(mm(loc, w4) + b4[...], 0.0)                       # (tile, 128)
    g = jnp.maximum(mm(g, w5) + b5[...], 0.0)                         # (tile, 1024)

    # Per-branch valid-point count (the two branches may have different n).
    n_tot = jnp.where(br == 0, n_a, n_b)

    if jnp.dtype(compute_dtype) == jnp.dtype(jnp.float32):
        # Exact f32 path (used for the strict correctness check): VALU sum.
        rows = jax.lax.broadcasted_iota(jnp.int32, (tile, 1), 0) + i * tile
        gm = jnp.where(rows < n_tot, g, 0.0)
        acc_ref[...] += jnp.sum(gm, axis=0, keepdims=True)
    else:
        # Default perf path: masked column-sum as an MXU reduce
        # ((1, tile) @ (tile, 1024)) instead of ~tile-deep VALU adds.
        cols = jax.lax.broadcasted_iota(jnp.int32, (1, tile), 1) + i * tile
        mask_row = (cols < n_tot).astype(jnp.float32)
        acc_ref[...] += jnp.dot(mask_row, g, preferred_element_type=jnp.float32)

    @pl.when(i == pl.num_programs(2) - 1)
    def _():
        inv_n = jnp.where(br == 0, 1.0 / n_a, 1.0 / n_b).astype(jnp.float32)
        glob_ref[...] = (acc_ref[...] * inv_n).astype(glob_ref.dtype)


def _br_spec(arr):
    """Branch-stacked weight/bias: block = one branch's full (padded) array."""
    shape = arr.shape
    nrest = len(shape) - 1
    return pl.BlockSpec((None,) + shape[1:],
                        lambda br, b, i, _n=nrest: (br,) + (0,) * _n)


def branches_fused(x_all, w1, b1, w2, b2, w3, b3, w4, b4, w5, b5, *,
                   tile, n_a, n_b, compute_dtype):
    nbr, bs, n_pad, cin = x_all.shape
    c_loc = w3.shape[-1]          # 128
    c_glob = w5.shape[-1]         # 1024
    kern = functools.partial(_branches_kernel, n_a=n_a, n_b=n_b,
                             compute_dtype=compute_dtype)
    return pl.pallas_call(
        kern,
        out_shape=(jax.ShapeDtypeStruct((nbr, bs, n_pad, c_loc), compute_dtype),
                   jax.ShapeDtypeStruct((nbr, bs, 1, c_glob), jnp.float32)),
        grid_spec=pltpu.PrefetchScalarGridSpec(
            num_scalar_prefetch=0,
            grid=(nbr, bs, n_pad // tile),
            in_specs=[
                pl.BlockSpec((None, None, tile, cin), lambda br, b, i: (br, b, i, 0)),
                _br_spec(w1), _br_spec(b1),
                _br_spec(w2), _br_spec(b2),
                _br_spec(w3), _br_spec(b3),
                _br_spec(w4), _br_spec(b4),
                _br_spec(w5), _br_spec(b5),
            ],
            out_specs=(
                pl.BlockSpec((None, None, tile, c_loc), lambda br, b, i: (br, b, i, 0)),
                pl.BlockSpec((None, None, 1, c_glob), lambda br, b, i: (br, b, 0, 0)),
            ),
            scratch_shapes=[pltpu.VMEM((1, c_glob), jnp.float32)],
        ),
        compiler_params=pltpu.CompilerParams(
            dimension_semantics=("parallel", "parallel", "arbitrary"),
            vmem_limit_bytes=_VMEM_LIMIT),
    )(x_all, w1, b1, w2, b2, w3, b3, w4, b4, w5, b5)


# ---------------------------------------------------------------------------
# Kernels 2/3: head MLP (assignment / deformation) with the global-feature
# contribution pre-folded into a per-batch bias:
#   out = relu(relu(loc @ W1l + h1_bias) @ W2 + b2) @ W3 + b3
# The head reads its branch's local features directly out of the stacked
# (2, bs, n_pad, 128) tensor via a constant branch index in the index_map.
# ---------------------------------------------------------------------------
def _head_kernel(loc_ref, h1b_ref, w1l, w2, b2, w3, b3, o_ref, *, compute_dtype):
    def mm(a, w_ref):
        return jnp.dot(a.astype(compute_dtype), w_ref[...],
                       preferred_element_type=jnp.float32)

    x = loc_ref[...]                                                  # (tile, 128)
    h1 = jnp.maximum(mm(x, w1l) + h1b_ref[...], 0.0)                  # (tile, 512)
    h2 = jnp.maximum(mm(h1, w2) + b2[...], 0.0)                       # (tile, 256)
    o_ref[...] = (mm(h2, w3) + b3[...]).astype(o_ref.dtype)           # (tile, cout_pad)


def _const_spec(arr):
    shape = arr.shape
    nd = len(shape)
    return pl.BlockSpec(shape, lambda b, i, _n=nd: (0,) * _n)


def head_mlp(loc_all, branch, h1_bias, w1l, w2, b2, w3, b3, *,
             tile, n_tiles, compute_dtype):
    nbr, bs, n_pad, c_loc = loc_all.shape
    ch = h1_bias.shape[-1]
    cout = w3.shape[-1]
    kern = functools.partial(_head_kernel, compute_dtype=compute_dtype)
    return pl.pallas_call(
        kern,
        out_shape=jax.ShapeDtypeStruct((bs, n_tiles * tile, cout), jnp.float32),
        grid_spec=pltpu.PrefetchScalarGridSpec(
            num_scalar_prefetch=0,
            grid=(bs, n_tiles),
            in_specs=[
                pl.BlockSpec((None, None, tile, c_loc),
                             lambda b, i, _br=branch: (_br, b, i, 0)),
                pl.BlockSpec((None, 1, ch), lambda b, i: (b, 0, 0)),
                _const_spec(w1l), _const_spec(w2), _const_spec(b2),
                _const_spec(w3), _const_spec(b3),
            ],
            out_specs=pl.BlockSpec((None, tile, cout), lambda b, i: (b, i, 0)),
        ),
        compiler_params=pltpu.CompilerParams(
            dimension_semantics=("parallel", "parallel"),
            vmem_limit_bytes=_VMEM_LIMIT),
    )(loc_all, h1_bias, w1l, w2, b2, w3, b3)


# ---------------------------------------------------------------------------
# Parameter init (deterministic, mimics Conv1d default init; weights stored
# pre-transposed as (C_in, C_out), biases as (1, C_out)).
# ---------------------------------------------------------------------------
def _lin(key, cin, cout, w_std=None):
    kw, kb = jax.random.split(key)
    bound = 1.0 / (cin ** 0.5)
    if w_std is None:
        w = jax.random.uniform(kw, (cin, cout), jnp.float32, -bound, bound)
    else:
        w = w_std * jax.random.normal(kw, (cin, cout), jnp.float32)
    b = jax.random.uniform(kb, (1, cout), jnp.float32, -bound, bound)
    return w, b


def init_params(key, n_cat=6, nv_prior=128):
    ks = jax.random.split(key, 20)
    p = {}
    # instance_geometry / category_local : 3 -> 64 -> 64 -> 64
    p["inst_geo"] = sum((_lin(ks[i], c_in, 64) for i, c_in in enumerate([3, 64, 64])), ())
    p["cat_geo"] = sum((_lin(ks[3 + i], c_in, 64) for i, c_in in enumerate([3, 64, 64])), ())
    # instance_global / category_global : 64 -> 128 -> 1024 (+ avg pool)
    p["inst_glob"] = _lin(ks[6], 64, 128) + _lin(ks[7], 128, 1024)
    p["cat_glob"] = _lin(ks[8], 64, 128) + _lin(ks[9], 128, 1024)
    # assignment : 2112 -> 512 -> 256 -> nv_prior (first layer split 64/1024/1024)
    w1l, b1 = _lin(ks[10], 64, 512)
    w1a, _ = _lin(ks[11], 1024, 512)
    w1b, _ = _lin(ks[12], 1024, 512)
    p["assign"] = (w1l, w1a, w1b, b1) + _lin(ks[13], 512, 256) + _lin(ks[14], 256, nv_prior)
    # deformation : 2112 -> 512 -> 256 -> 3, last weight ~ N(0, 1e-4)
    w1l, b1 = _lin(ks[15], 64, 512)
    w1a, _ = _lin(ks[16], 1024, 512)
    w1b, _ = _lin(ks[17], 1024, 512)
    p["deform"] = (w1l, w1a, w1b, b1) + _lin(ks[18], 512, 256) + _lin(ks[19], 256, 3, w_std=1e-4)
    return p


# ---------------------------------------------------------------------------
# Full forward
# ---------------------------------------------------------------------------
def deformnet_forward(points, prior, params, *, compute_dtype=jnp.bfloat16,
                      max_tile=None):
    """points: (bs, n_pts, 3), prior: (bs, nv, 3) -> (assign_mat, deltas)."""
    bs, n_pts, _ = points.shape
    nv = prior.shape[1]
    cd = compute_dtype
    if max_tile is None:
        max_tile = _MAX_TILE

    n_max = max(n_pts, nv)
    tile = min(max_tile, _round_up(n_max, 128))      # whole row in one block if small
    n_pad = _round_up(n_max, tile)

    # Stack + zero-pad the two point clouds to a common (2, bs, n_pad, 3).
    def pad_pts(x):
        return jnp.pad(x, ((0, 0), (0, n_pad - x.shape[1]), (0, 0)))
    x_all = jnp.stack([pad_pts(points), pad_pts(prior)], axis=0)

    # Zero-pad weights to lane-dense widths (exact: extra rows/cols are zero)
    # and cast weights to the compute dtype once; biases stay f32.
    def pad_w(w, rows, cols):
        return jnp.pad(w, ((0, rows - w.shape[0]), (0, cols - w.shape[1])))

    def pad_b(b, cols):
        return jnp.pad(b, ((0, 0), (0, cols - b.shape[1])))

    def prep_branch(geo, glob):
        w1, b1, w2, b2, w3, b3 = geo
        w4, b4, w5, b5 = glob
        return (pad_w(w1, 3, 128).astype(cd),    pad_b(b1, 128),
                pad_w(w2, 128, 128).astype(cd),  pad_b(b2, 128),
                pad_w(w3, 128, 128).astype(cd),  pad_b(b3, 128),
                pad_w(w4, 128, 128).astype(cd),  pad_b(b4, 128),
                pad_w(w5, 128, 1024).astype(cd), b5)

    inst = prep_branch(params["inst_geo"], params["inst_glob"])
    cat = prep_branch(params["cat_geo"], params["cat_glob"])
    stacked = [jnp.stack(ab, axis=0) for ab in zip(inst, cat)]

    loc_all, glob_all = branches_fused(
        x_all, *stacked, tile=tile, n_a=n_pts, n_b=nv, compute_dtype=cd)
    inst_glob, cat_glob = glob_all[0], glob_all[1]   # (bs, 1, 1024) f32 each

    # Hoisted per-batch first-layer bias of the heads (tiny matmuls, plain XLA):
    #   h1_bias = glob_a @ W1a + glob_b @ W1b + b1   -> (bs, 1, 512)
    def h1_bias(ga, gb, w1a, w1b, b1):
        return (jnp.einsum("bij,jk->bik", ga.astype(cd), w1a.astype(cd),
                           preferred_element_type=jnp.float32)
                + jnp.einsum("bij,jk->bik", gb.astype(cd), w1b.astype(cd),
                             preferred_element_type=jnp.float32)
                + b1)

    aw, dw = params["assign"], params["deform"]
    nv_pad = _round_up(nv, 128)

    def prep_head(p, cout_pad):
        w1l, _, _, _, w2, b2, w3, b3 = p
        return (pad_w(w1l, 128, 512).astype(cd),   # rows padded to match 128-wide loc
                w2.astype(cd), b2,
                pad_w(w3, 256, cout_pad).astype(cd), pad_b(b3, cout_pad))

    a_w = prep_head(aw, nv_pad)
    d_w = prep_head(dw, 128)                         # deform cout 3 -> 128 (lane-dense)
    assign_bias = h1_bias(inst_glob, cat_glob, aw[1], aw[2], aw[3])
    deform_bias = h1_bias(cat_glob, inst_glob, dw[1], dw[2], dw[3])

    n_pts_tiles = _round_up(n_pts, tile) // tile
    nv_tiles = _round_up(nv, tile) // tile

    assign_mat = head_mlp(loc_all, 0, assign_bias, *a_w, tile=tile,
                          n_tiles=n_pts_tiles,
                          compute_dtype=cd)[:, :n_pts, :nv]           # (bs, n_pts, nv)
    deltas = head_mlp(loc_all, 1, deform_bias, *d_w, tile=tile,
                      n_tiles=nv_tiles,
                      compute_dtype=cd)[:, :nv, :3]                   # (bs, nv, 3)
    return assign_mat, deltas


# ---------------------------------------------------------------------------
# Pure-JAX reference (same math; compute_dtype controls the matmul-operand
# casts so the bf16 kernel path can be checked against a matched reference).
# ---------------------------------------------------------------------------
def ref_forward(points, prior, params, compute_dtype=jnp.float32):
    relu = jax.nn.relu
    cd = compute_dtype

    def mm(a, w):
        return jnp.einsum("...ij,jk->...ik", a.astype(cd), w.astype(cd),
                          preferred_element_type=jnp.float32)

    def mlp3(x, p):
        w1, b1, w2, b2, w3, b3 = p
        h = relu(mm(x, w1) + b1)
        h = relu(mm(h, w2) + b2)
        return relu(mm(h, w3) + b3)

    def glob(x, p):
        w4, b4, w5, b5 = p
        g = relu(mm(relu(mm(x, w4) + b4), w5) + b5)
        return jnp.mean(g, axis=1, keepdims=True)

    def head(loc, ga, gb, p):
        w1l, w1a, w1b, b1, w2, b2, w3, b3 = p
        h1 = relu(mm(loc, w1l) + mm(ga, w1a) + mm(gb, w1b) + b1)
        h2 = relu(mm(h1, w2) + b2)
        return mm(h2, w3) + b3

    il = mlp3(points, params["inst_geo"])
    ig = glob(il, params["inst_glob"])
    cl = mlp3(prior, params["cat_geo"])
    cg = glob(cl, params["cat_glob"])
    return head(il, ig, cg, params["assign"]), head(cl, cg, ig, params["deform"])


if __name__ == "__main__":
    bs, n_pts, nv = 2, 256, 128
    key = jax.random.PRNGKey(0)
    k_pts, k_pri, k_par = jax.random.split(key, 3)

    points = jax.random.normal(k_pts, (bs, n_pts, 3), jnp.float32)
    prior = jax.random.normal(k_pri, (bs, nv, 3), jnp.float32)
    params = init_params(k_par, nv_prior=nv)

    # Strict f32 path: exact check against the plain-JAX f32 reference.
    fwd_f32 = jax.jit(functools.partial(deformnet_forward, compute_dtype=jnp.float32))
    a32, d32 = jax.block_until_ready(fwd_f32(points, prior, params))
    assert a32.shape == (bs, n_pts, nv)
    assert d32.shape == (bs, nv, 3)
    ra32, rd32 = ref_forward(points, prior, params, compute_dtype=jnp.float32)
    assert jnp.allclose(a32, ra32, rtol=1e-4, atol=1e-4)
    assert jnp.allclose(d32, rd32, rtol=1e-4, atol=1e-4)

    # Default bf16 MXU path: check against a reference using the same casts.
    fwd_bf16 = jax.jit(functools.partial(deformnet_forward, compute_dtype=jnp.bfloat16))
    a16, d16 = jax.block_until_ready(fwd_bf16(points, prior, params))
    assert a16.shape == (bs, n_pts, nv)
    assert d16.shape == (bs, nv, 3)
    ra16, rd16 = ref_forward(points, prior, params, compute_dtype=jnp.bfloat16)
    assert jnp.allclose(a16, ra16, rtol=1e-2, atol=1e-2)
    assert jnp.allclose(d16, rd16, rtol=1e-2, atol=1e-2)

    print("KERNEL_OK")
</pallas_src>

<mosaic_0001>
module attributes {stable_mosaic.version = 11 : i64} {
  func.func @_branches_kernel(%arg0: i32, %arg1: i32, %arg2: i32, %arg3: memref<1x1x256x3xf32, #tpu.memory_space<vmem>>, %arg4: memref<1x3x128xf32, #tpu.memory_space<vmem>>, %arg5: memref<1x1x128xf32, #tpu.memory_space<vmem>>, %arg6: memref<1x128x128xf32, #tpu.memory_space<vmem>>, %arg7: memref<1x1x128xf32, #tpu.memory_space<vmem>>, %arg8: memref<1x128x128xf32, #tpu.memory_space<vmem>>, %arg9: memref<1x1x128xf32, #tpu.memory_space<vmem>>, %arg10: memref<1x128x128xf32, #tpu.memory_space<vmem>>, %arg11: memref<1x1x128xf32, #tpu.memory_space<vmem>>, %arg12: memref<1x128x1024xf32, #tpu.memory_space<vmem>>, %arg13: memref<1x1x1024xf32, #tpu.memory_space<vmem>>, %arg14: memref<1x1x256x128xf32, #tpu.memory_space<vmem>>, %arg15: memref<1x1x1x1024xf32, #tpu.memory_space<vmem>>, %arg16: memref<1x1024xf32, #tpu.memory_space<vmem>>) attributes {dimension_semantics = [#tpu.dimension_semantics<parallel>, #tpu.dimension_semantics<parallel>, #tpu.dimension_semantics<arbitrary>], iteration_bounds = array<i64: 2, 2, 1>, scalar_prefetch = 0 : i64, scratch_operands = 1 : i64, tpu.core_type = #tpu.core_type<tc>, window_params = [{transform_indices = @transform_0, window_bounds = array<i64: 1, 1, 256, 3>}, {transform_indices = @transform_1, window_bounds = array<i64: 1, 3, 128>}, {transform_indices = @transform_2, window_bounds = array<i64: 1, 1, 128>}, {transform_indices = @transform_3, window_bounds = array<i64: 1, 128, 128>}, {transform_indices = @transform_4, window_bounds = array<i64: 1, 1, 128>}, {transform_indices = @transform_5, window_bounds = array<i64: 1, 128, 128>}, {transform_indices = @transform_6, window_bounds = array<i64: 1, 1, 128>}, {transform_indices = @transform_7, window_bounds = array<i64: 1, 128, 128>}, {transform_indices = @transform_8, window_bounds = array<i64: 1, 1, 128>}, {transform_indices = @transform_9, window_bounds = array<i64: 1, 128, 1024>}, {transform_indices = @transform_10, window_bounds = array<i64: 1, 1, 1024>}, {transform_indices = @transform_11, window_bounds = array<i64: 1, 1, 256, 128>}, {transform_indices = @transform_12, window_bounds = array<i64: 1, 1, 1, 1024>}]} {
    %c0_i32 = arith.constant 0 : i32
    %0 = arith.cmpi eq, %arg2, %c0_i32 : i32
    %1 = arith.extui %0 : i1 to i32
    %c0_i32_0 = arith.constant 0 : i32
    %2 = arith.cmpi ne, %1, %c0_i32_0 : i32
    scf.if %2 {
      %cst_57 = arith.constant 0.000000e+00 : f32
      %73 = vector.broadcast %cst_57 : f32 to vector<1x1024xf32>
      %c0_58 = arith.constant 0 : index
      %c0_59 = arith.constant 0 : index
      %74 = vector.load %arg16[%c0_58, %c0_59] : memref<1x1024xf32, #tpu.memory_space<vmem>>, vector<1x1024xf32>
      tpu.vector_store %arg16[%c0_58, %c0_59], %73 {strides = array<i32>} : memref<1x1024xf32, #tpu.memory_space<vmem>>, vector<1x1024xf32>,
    } else {
    }
    %c0 = arith.constant 0 : index
    %c0_1 = arith.constant 0 : index
    %c0_2 = arith.constant 0 : index
    %c0_3 = arith.constant 0 : index
    %3 = vector.load %arg3[%c0, %c0_1, %c0_2, %c0_3] : memref<1x1x256x3xf32, #tpu.memory_space<vmem>>, vector<1x1x256x3xf32>
    %4 = vector.shape_cast %3 : vector<1x1x256x3xf32> to vector<256x3xf32>
    %c0_4 = arith.constant 0 : index
    %c0_5 = arith.constant 0 : index
    %c0_6 = arith.constant 0 : index
    %5 = vector.load %arg4[%c0_4, %c0_5, %c0_6] : memref<1x3x128xf32, #tpu.memory_space<vmem>>, vector<1x3x128xf32>
    %6 = vector.shape_cast %5 : vector<1x3x128xf32> to vector<3x128xf32>
    %cst = arith.constant dense<0.000000e+00> : vector<256x128xf32>
    %7 = tpu.matmul %4, %6, %cst {dimension_numbers = #tpu.dot_dimension_numbers<[1], [0], [0], [1], [0, 0, 1, 1], [], []>} : vector<256x3xf32>, vector<3x128xf32>, vector<256x128xf32> -> vector<256x128xf32>
    %c0_7 = arith.constant 0 : index
    %c0_8 = arith.constant 0 : index
    %c0_9 = arith.constant 0 : index
    %8 = vector.load %arg5[%c0_7, %c0_8, %c0_9] : memref<1x1x128xf32, #tpu.memory_space<vmem>>, vector<1x1x128xf32>
    %9 = vector.shape_cast %8 : vector<1x1x128xf32> to vector<1x128xf32>
    %10 = vector.broadcast %9 : vector<1x128xf32> to vector<256x128xf32>
    %11 = arith.addf %7, %10 : vector<256x128xf32>
    %cst_10 = arith.constant 0.000000e+00 : f32
    %12 = vector.broadcast %cst_10 : f32 to vector<256x128xf32>
    %13 = arith.maximumf %11, %12 : vector<256x128xf32>
    %c0_11 = arith.constant 0 : index
    %c0_12 = arith.constant 0 : index
    %c0_13 = arith.constant 0 : index
    %14 = vector.load %arg6[%c0_11, %c0_12, %c0_13] : memref<1x128x128xf32, #tpu.memory_space<vmem>>, vector<1x128x128xf32>
    %15 = vector.shape_cast %14 : vector<1x128x128xf32> to vector<128x128xf32>
    %cst_14 = arith.constant dense<0.000000e+00> : vector<256x128xf32>
    %16 = tpu.matmul %13, %15, %cst_14 {dimension_numbers = #tpu.dot_dimension_numbers<[1], [0], [0], [1], [0, 0, 1, 1], [], []>} : vector<256x128xf32>, vector<128x128xf32>, vector<256x128xf32> -> vector<256x128xf32>
    %c0_15 = arith.constant 0 : index
    %c0_16 = arith.constant 0 : index
    %c0_17 = arith.constant 0 : index
    %17 = vector.load %arg7[%c0_15, %c0_16, %c0_17] : memref<1x1x128xf32, #tpu.memory_space<vmem>>, vector<1x1x128xf32>
    %18 = vector.shape_cast %17 : vector<1x1x128xf32> to vector<1x128xf32>
    %19 = vector.broadcast %18 : vector<1x128xf32> to vector<256x128xf32>
    %20 = arith.addf %16, %19 : vector<256x128xf32>
    %cst_18 = arith.constant 0.000000e+00 : f32
    %21 = vector.broadcast %cst_18 : f32 to vector<256x128xf32>
    %22 = arith.maximumf %20, %21 : vector<256x128xf32>
    %c0_19 = arith.constant 0 : index
    %c0_20 = arith.constant 0 : index
    %c0_21 = arith.constant 0 : index
    %23 = vector.load %arg8[%c0_19, %c0_20, %c0_21] : memref<1x128x128xf32, #tpu.memory_space<vmem>>, vector<1x128x128xf32>
    %24 = vector.shape_cast %23 : vector<1x128x128xf32> to vector<128x128xf32>
    %cst_22 = arith.constant dense<0.000000e+00> : vector<256x128xf32>
    %25 = tpu.matmul %22, %24, %cst_22 {dimension_numbers = #tpu.dot_dimension_numbers<[1], [0], [0], [1], [0, 0, 1, 1], [], []>} : vector<256x128xf32>, vector<128x128xf32>, vector<256x128xf32> -> vector<256x128xf32>
    %c0_23 = arith.constant 0 : index
    %c0_24 = arith.constant 0 : index
    %c0_25 = arith.constant 0 : index
    %26 = vector.load %arg9[%c0_23, %c0_24, %c0_25] : memref<1x1x128xf32, #tpu.memory_space<vmem>>, vector<1x1x128xf32>
    %27 = vector.shape_cast %26 : vector<1x1x128xf32> to vector<1x128xf32>
    %28 = vector.broadcast %27 : vector<1x128xf32> to vector<256x128xf32>
    %29 = arith.addf %25, %28 : vector<256x128xf32>
    %cst_26 = arith.constant 0.000000e+00 : f32
    %30 = vector.broadcast %cst_26 : f32 to vector<256x128xf32>
    %31 = arith.maximumf %29, %30 : vector<256x128xf32>
    %c0_27 = arith.constant 0 : index
    %c0_28 = arith.constant 0 : index
    %c0_29 = arith.constant 0 : index
    %c0_30 = arith.constant 0 : index
    %32 = vector.load %arg14[%c0_27, %c0_28, %c0_29, %c0_30] : memref<1x1x256x128xf32, #tpu.memory_space<vmem>>, vector<1x1x256x128xf32>
    %33 = vector.shape_cast %32 : vector<1x1x256x128xf32> to vector<256x128xf32>
    %34 = vector.shape_cast %31 : vector<256x128xf32> to vector<1x1x256x128xf32>
    tpu.vector_store %arg14[%c0_27, %c0_28, %c0_29, %c0_30], %34 {strides = array<i32>} : memref<1x1x256x128xf32, #tpu.memory_space<vmem>>, vector<1x1x256x128xf32>,
    %c0_31 = arith.constant 0 : index
    %c0_32 = arith.constant 0 : index
    %c0_33 = arith.constant 0 : index
    %35 = vector.load %arg10[%c0_31, %c0_32, %c0_33] : memref<1x128x128xf32, #tpu.memory_space<vmem>>, vector<1x128x128xf32>
    %36 = vector.shape_cast %35 : vector<1x128x128xf32> to vector<128x128xf32>
    %cst_34 = arith.constant dense<0.000000e+00> : vector<256x128xf32>
    %37 = tpu.matmul %31, %36, %cst_34 {dimension_numbers = #tpu.dot_dimension_numbers<[1], [0], [0], [1], [0, 0, 1, 1], [], []>} : vector<256x128xf32>, vector<128x128xf32>, vector<256x128xf32> -> vector<256x128xf32>
    %c0_35 = arith.constant 0 : index
    %c0_36 = arith.constant 0 : index
    %c0_37 = arith.constant 0 : index
    %38 = vector.load %arg11[%c0_35, %c0_36, %c0_37] : memref<1x1x128xf32, #tpu.memory_space<vmem>>, vector<1x1x128xf32>
    %39 = vector.shape_cast %38 : vector<1x1x128xf32> to vector<1x128xf32>
    %40 = vector.broadcast %39 : vector<1x128xf32> to vector<256x128xf32>
    %41 = arith.addf %37, %40 : vector<256x128xf32>
    %cst_38 = arith.constant 0.000000e+00 : f32
    %42 = vector.broadcast %cst_38 : f32 to vector<256x128xf32>
    %43 = arith.maximumf %41, %42 : vector<256x128xf32>
    %c0_39 = arith.constant 0 : index
    %c0_40 = arith.constant 0 : index
    %c0_41 = arith.constant 0 : index
    %44 = vector.load %arg12[%c0_39, %c0_40, %c0_41] : memref<1x128x1024xf32, #tpu.memory_space<vmem>>, vector<1x128x1024xf32>
    %45 = vector.shape_cast %44 : vector<1x128x1024xf32> to vector<128x1024xf32>
    %cst_42 = arith.constant dense<0.000000e+00> : vector<256x1024xf32>
    %46 = tpu.matmul %43, %45, %cst_42 {dimension_numbers = #tpu.dot_dimension_numbers<[1], [0], [0], [1], [0, 0, 1, 1], [], []>} : vector<256x128xf32>, vector<128x1024xf32>, vector<256x1024xf32> -> vector<256x1024xf32>
    %c0_43 = arith.constant 0 : index
    %c0_44 = arith.constant 0 : index
    %c0_45 = arith.constant 0 : index
    %47 = vector.load %arg13[%c0_43, %c0_44, %c0_45] : memref<1x1x1024xf32, #tpu.memory_space<vmem>>, vector<1x1x1024xf32>
    %48 = vector.shape_cast %47 : vector<1x1x1024xf32> to vector<1x1024xf32>
    %49 = vector.broadcast %48 : vector<1x1024xf32> to vector<256x1024xf32>
    %50 = arith.addf %46, %49 : vector<256x1024xf32>
    %cst_46 = arith.constant 0.000000e+00 : f32
    %51 = vector.broadcast %cst_46 : f32 to vector<256x1024xf32>
    %52 = arith.maximumf %50, %51 : vector<256x1024xf32>
    %c0_i32_47 = arith.constant 0 : i32
    %53 = arith.cmpi eq, %arg0, %c0_i32_47 : i32
    %c256_i32 = arith.constant 256 : i32
    %c128_i32 = arith.constant 128 : i32
    %54 = arith.select %53, %c256_i32, %c128_i32 : i32
    %55 = tpu.iota {dimensions = array<i32: 0>} : vector<256x1xi32>
    %c256_i32_48 = arith.constant 256 : i32
    %56 = arith.muli %arg2, %c256_i32_48 : i32
    %57 = vector.broadcast %56 : i32 to vector<256x1xi32>
    %58 = arith.addi %55, %57 : vector<256x1xi32>
    %59 = vector.broadcast %54 : i32 to vector<256x1xi32>
    %60 = arith.cmpi slt, %58, %59 : vector<256x1xi32>
    %cst_49 = arith.constant 0.000000e+00 : f32
    %61 = vector.shape_cast %60 : vector<256x1xi1> to vector<256x1xi1>
    %62 = vector.broadcast %61 : vector<256x1xi1> to vector<256x1024xi1>
    %63 = vector.broadcast %cst_49 : f32 to vector<256x1024xf32>
    %64 = arith.select %62, %52, %63 : vector<256x1024xi1>, vector<256x1024xf32>
    %c0_50 = arith.constant 0 : index
    %c0_51 = arith.constant 0 : index
    %65 = vector.load %arg16[%c0_50, %c0_51] : memref<1x1024xf32, #tpu.memory_space<vmem>>, vector<1x1024xf32>
    %cst_52 = arith.constant dense<0.000000e+00> : vector<1024xf32>
    %66 = vector.multi_reduction <add>, %64, %cst_52 [0] : vector<256x1024xf32> to vector<1024xf32>
    %67 = vector.shape_cast %66 : vector<1024xf32> to vector<1x1024xf32>
    %68 = arith.addf %65, %67 : vector<1x1024xf32>
    %c0_53 = arith.constant 0 : index
    %c0_54 = arith.constant 0 : index
    %69 = vector.load %arg16[%c0_53, %c0_54] : memref<1x1024xf32, #tpu.memory_space<vmem>>, vector<1x1024xf32>
    tpu.vector_store %arg16[%c0_53, %c0_54], %68 {strides = array<i32>} : memref<1x1024xf32, #tpu.memory_space<vmem>>, vector<1x1024xf32>,
    %c0_i32_55 = arith.constant 0 : i32
    %70 = arith.cmpi eq, %arg2, %c0_i32_55 : i32
    %71 = arith.extui %70 : i1 to i32
    %c0_i32_56 = arith.constant 0 : i32
    %72 = arith.cmpi ne, %71, %c0_i32_56 : i32
    scf.if %72 {
      %c0_i32_57 = arith.constant 0 : i32
      %73 = arith.cmpi eq, %arg0, %c0_i32_57 : i32
      %cst_58 = arith.constant 3.906250e-03 : f32
      %cst_59 = arith.constant 7.812500e-03 : f32
      %74 = arith.select %73, %cst_58, %cst_59 : f32
      %c0_60 = arith.constant 0 : index
      %c0_61 = arith.constant 0 : index
      %75 = vector.load %arg16[%c0_60, %c0_61] : memref<1x1024xf32, #tpu.memory_space<vmem>>, vector<1x1024xf32>
      %76 = vector.broadcast %74 : f32 to vector<1x1024xf32>
      %77 = arith.mulf %75, %76 : vector<1x1024xf32>
      %c0_62 = arith.constant 0 : index
      %c0_63 = arith.constant 0 : index
      %c0_64 = arith.constant 0 : index
      %c0_65 = arith.constant 0 : index
      %78 = vector.load %arg15[%c0_62, %c0_63, %c0_64, %c0_65] : memref<1x1x1x1024xf32, #tpu.memory_space<vmem>>, vector<1x1x1x1024xf32>
      %79 = vector.shape_cast %78 : vector<1x1x1x1024xf32> to vector<1x1024xf32>
      %80 = vector.shape_cast %77 : vector<1x1024xf32> to vector<1x1x1x1024xf32>
      tpu.vector_store %arg15[%c0_62, %c0_63, %c0_64, %c0_65], %80 {strides = array<i32>} : memref<1x1x1x1024xf32, #tpu.memory_space<vmem>>, vector<1x1x1x1024xf32>,
    } else {
    }
    return
  }
  func.func @transform_0(%arg0: i32, %arg1: i32, %arg2: i32) -> (i32, i32, i32, i32) {
    %c0_i32 = arith.constant 0 : i32
    %c0_i32_0 = arith.constant 0 : i32
    return %arg0, %arg1, %arg2, %c0_i32 : i32, i32, i32, i32
  }
  func.func @transform_1(%arg0: i32, %arg1: i32, %arg2: i32) -> (i32, i32, i32) {
    %c0_i32 = arith.constant 0 : i32
    %c0_i32_0 = arith.constant 0 : i32
    %c0_i32_1 = arith.constant 0 : i32
    return %arg0, %c0_i32, %c0_i32_0 : i32, i32, i32
  }
  func.func @transform_2(%arg0: i32, %arg1: i32, %arg2: i32) -> (i32, i32, i32) {
    %c0_i32 = arith.constant 0 : i32
    %c0_i32_0 = arith.constant 0 : i32
    %c0_i32_1 = arith.constant 0 : i32
    return %arg0, %c0_i32, %c0_i32_0 : i32, i32, i32
  }
  func.func @transform_3(%arg0: i32, %arg1: i32, %arg2: i32) -> (i32, i32, i32) {
    %c0_i32 = arith.constant 0 : i32
    %c0_i32_0 = arith.constant 0 : i32
    %c0_i32_1 = arith.constant 0 : i32
    return %arg0, %c0_i32, %c0_i32_0 : i32, i32, i32
  }
  func.func @transform_4(%arg0: i32, %arg1: i32, %arg2: i32) -> (i32, i32, i32) {
    %c0_i32 = arith.constant 0 : i32
    %c0_i32_0 = arith.constant 0 : i32
    %c0_i32_1 = arith.constant 0 : i32
    return %arg0, %c0_i32, %c0_i32_0 : i32, i32, i32
  }
  func.func @transform_5(%arg0: i32, %arg1: i32, %arg2: i32) -> (i32, i32, i32) {
    %c0_i32 = arith.constant 0 : i32
    %c0_i32_0 = arith.constant 0 : i32
    %c0_i32_1 = arith.constant 0 : i32
    return %arg0, %c0_i32, %c0_i32_0 : i32, i32, i32
  }
  func.func @transform_6(%arg0: i32, %arg1: i32, %arg2: i32) -> (i32, i32, i32) {
    %c0_i32 = arith.constant 0 : i32
    %c0_i32_0 = arith.constant 0 : i32
    %c0_i32_1 = arith.constant 0 : i32
    return %arg0, %c0_i32, %c0_i32_0 : i32, i32, i32
  }
  func.func @transform_7(%arg0: i32, %arg1: i32, %arg2: i32) -> (i32, i32, i32) {
    %c0_i32 = arith.constant 0 : i32
    %c0_i32_0 = arith.constant 0 : i32
    %c0_i32_1 = arith.constant 0 : i32
    return %arg0, %c0_i32, %c0_i32_0 : i32, i32, i32
  }
  func.func @transform_8(%arg0: i32, %arg1: i32, %arg2: i32) -> (i32, i32, i32) {
    %c0_i32 = arith.constant 0 : i32
    %c0_i32_0 = arith.constant 0 : i32
    %c0_i32_1 = arith.constant 0 : i32
    return %arg0, %c0_i32, %c0_i32_0 : i32, i32, i32
  }
  func.func @transform_9(%arg0: i32, %arg1: i32, %arg2: i32) -> (i32, i32, i32) {
    %c0_i32 = arith.constant 0 : i32
    %c0_i32_0 = arith.constant 0 : i32
    %c0_i32_1 = arith.constant 0 : i32
    return %arg0, %c0_i32, %c0_i32_0 : i32, i32, i32
  }
  func.func @transform_10(%arg0: i32, %arg1: i32, %arg2: i32) -> (i32, i32, i32) {
    %c0_i32 = arith.constant 0 : i32
    %c0_i32_0 = arith.constant 0 : i32
    %c0_i32_1 = arith.constant 0 : i32
    return %arg0, %c0_i32, %c0_i32_0 : i32, i32, i32
  }
  func.func @transform_11(%arg0: i32, %arg1: i32, %arg2: i32) -> (i32, i32, i32, i32) {
    %c0_i32 = arith.constant 0 : i32
    %c0_i32_0 = arith.constant 0 : i32
    return %arg0, %arg1, %arg2, %c0_i32 : i32, i32, i32, i32
  }
  func.func @transform_12(%arg0: i32, %arg1: i32, %arg2: i32) -> (i32, i32, i32, i32) {
    %c0_i32 = arith.constant 0 : i32
    %c0_i32_0 = arith.constant 0 : i32
    %c0_i32_1 = arith.constant 0 : i32
    return %arg0, %arg1, %c0_i32, %c0_i32_0 : i32, i32, i32, i32
  }
}

module attributes {stable_mosaic.version = 11 : i64} {
  func.func @_head_kernel(%arg0: i32, %arg1: i32, %arg2: memref<1x1x256x128xf32, #tpu.memory_space<vmem>>, %arg3: memref<1x1x512xf32, #tpu.memory_space<vmem>>, %arg4: memref<128x512xf32, #tpu.memory_space<vmem>>, %arg5: memref<512x256xf32, #tpu.memory_space<vmem>>, %arg6: memref<1x256xf32, #tpu.memory_space<vmem>>, %arg7: memref<256x128xf32, #tpu.memory_space<vmem>>, %arg8: memref<1x128xf32, #tpu.memory_space<vmem>>, %arg9: memref<1x256x128xf32, #tpu.memory_space<vmem>>) attributes {dimension_semantics = [#tpu.dimension_semantics<parallel>, #tpu.dimension_semantics<parallel>], iteration_bounds = array<i64: 2, 1>, scalar_prefetch = 0 : i64, scratch_operands = 0 : i64, tpu.core_type = #tpu.core_type<tc>, window_params = [{transform_indices = @transform_0, window_bounds = array<i64: 1, 1, 256, 128>}, {transform_indices = @transform_1, window_bounds = array<i64: 1, 1, 512>}, {pipeline_mode = #tpu.pipeline_mode<synchronous>, transform_indices = @transform_2, window_bounds = array<i64: 128, 512>}, {pipeline_mode = #tpu.pipeline_mode<synchronous>, transform_indices = @transform_3, window_bounds = array<i64: 512, 256>}, {pipeline_mode = #tpu.pipeline_mode<synchronous>, transform_indices = @transform_4, window_bounds = array<i64: 1, 256>}, {pipeline_mode = #tpu.pipeline_mode<synchronous>, transform_indices = @transform_5, window_bounds = array<i64: 256, 128>}, {pipeline_mode = #tpu.pipeline_mode<synchronous>, transform_indices = @transform_6, window_bounds = array<i64: 1, 128>}, {transform_indices = @transform_7, window_bounds = array<i64: 1, 256, 128>}]} {
    %c0 = arith.constant 0 : index
    %c0_0 = arith.constant 0 : index
    %c0_1 = arith.constant 0 : index
    %c0_2 = arith.constant 0 : index
    %0 = vector.load %arg2[%c0, %c0_0, %c0_1, %c0_2] : memref<1x1x256x128xf32, #tpu.memory_space<vmem>>, vector<1x1x256x128xf32>
    %1 = vector.shape_cast %0 : vector<1x1x256x128xf32> to vector<256x128xf32>
    %c0_3 = arith.constant 0 : index
    %c0_4 = arith.constant 0 : index
    %2 = vector.load %arg4[%c0_3, %c0_4] : memref<128x512xf32, #tpu.memory_space<vmem>>, vector<128x512xf32>
    %cst = arith.constant dense<0.000000e+00> : vector<256x512xf32>
    %3 = tpu.matmul %1, %2, %cst {dimension_numbers = #tpu.dot_dimension_numbers<[1], [0], [0], [1], [0, 0, 1, 1], [], []>} : vector<256x128xf32>, vector<128x512xf32>, vector<256x512xf32> -> vector<256x512xf32>
    %c0_5 = arith.constant 0 : index
    %c0_6 = arith.constant 0 : index
    %c0_7 = arith.constant 0 : index
    %4 = vector.load %arg3[%c0_5, %c0_6, %c0_7] : memref<1x1x512xf32, #tpu.memory_space<vmem>>, vector<1x1x512xf32>
    %5 = vector.shape_cast %4 : vector<1x1x512xf32> to vector<1x512xf32>
    %6 = vector.broadcast %5 : vector<1x512xf32> to vector<256x512xf32>
    %7 = arith.addf %3, %6 : vector<256x512xf32>
    %cst_8 = arith.constant 0.000000e+00 : f32
    %8 = vector.broadcast %cst_8 : f32 to vector<256x512xf32>
    %9 = arith.maximumf %7, %8 : vector<256x512xf32>
    %c0_9 = arith.constant 0 : index
    %c0_10 = arith.constant 0 : index
    %10 = vector.load %arg5[%c0_9, %c0_10] : memref<512x256xf32, #tpu.memory_space<vmem>>, vector<512x256xf32>
    %cst_11 = arith.constant dense<0.000000e+00> : vector<256x256xf32>
    %11 = tpu.matmul %9, %10, %cst_11 {dimension_numbers = #tpu.dot_dimension_numbers<[1], [0], [0], [1], [0, 0, 1, 1], [], []>} : vector<256x512xf32>, vector<512x256xf32>, vector<256x256xf32> -> vector<256x256xf32>
    %c0_12 = arith.constant 0 : index
    %c0_13 = arith.constant 0 : index
    %12 = vector.load %arg6[%c0_12, %c0_13] : memref<1x256xf32, #tpu.memory_space<vmem>>, vector<1x256xf32>
    %13 = vector.broadcast %12 : vector<1x256xf32> to vector<256x256xf32>
    %14 = arith.addf %11, %13 : vector<256x256xf32>
    %cst_14 = arith.constant 0.000000e+00 : f32
    %15 = vector.broadcast %cst_14 : f32 to vector<256x256xf32>
    %16 = arith.maximumf %14, %15 : vector<256x256xf32>
    %c0_15 = arith.constant 0 : index
    %c0_16 = arith.constant 0 : index
    %17 = vector.load %arg7[%c0_15, %c0_16] : memref<256x128xf32, #tpu.memory_space<vmem>>, vector<256x128xf32>
    %cst_17 = arith.constant dense<0.000000e+00> : vector<256x128xf32>
    %18 = tpu.matmul %16, %17, %cst_17 {dimension_numbers = #tpu.dot_dimension_numbers<[1], [0], [0], [1], [0, 0, 1, 1], [], []>} : vector<256x256xf32>, vector<256x128xf32>, vector<256x128xf32> -> vector<256x128xf32>
    %c0_18 = arith.constant 0 : index
    %c0_19 = arith.constant 0 : index
    %19 = vector.load %arg8[%c0_18, %c0_19] : memref<1x128xf32, #tpu.memory_space<vmem>>, vector<1x128xf32>
    %20 = vector.broadcast %19 : vector<1x128xf32> to vector<256x128xf32>
    %21 = arith.addf %18, %20 : vector<256x128xf32>
    %c0_20 = arith.constant 0 : index
    %c0_21 = arith.constant 0 : index
    %c0_22 = arith.constant 0 : index
    %22 = vector.load %arg9[%c0_20, %c0_21, %c0_22] : memref<1x256x128xf32, #tpu.memory_space<vmem>>, vector<1x256x128xf32>
    %23 = vector.shape_cast %22 : vector<1x256x128xf32> to vector<256x128xf32>
    %24 = vector.shape_cast %21 : vector<256x128xf32> to vector<1x256x128xf32>
    tpu.vector_store %arg9[%c0_20, %c0_21, %c0_22], %24 {strides = array<i32>} : memref<1x256x128xf32, #tpu.memory_space<vmem>>, vector<1x256x128xf32>,
    return
  }
  func.func @transform_0(%arg0: i32, %arg1: i32) -> (i32, i32, i32, i32) {
    %c1_i32 = arith.constant 1 : i32
    %c0_i32 = arith.constant 0 : i32
    %c0_i32_0 = arith.constant 0 : i32
    return %c1_i32, %arg0, %arg1, %c0_i32 : i32, i32, i32, i32
  }
  func.func @transform_1(%arg0: i32, %arg1: i32) -> (i32, i32, i32) {
    %c0_i32 = arith.constant 0 : i32
    %c0_i32_0 = arith.constant 0 : i32
    %c0_i32_1 = arith.constant 0 : i32
    return %arg0, %c0_i32, %c0_i32_0 : i32, i32, i32
  }
  func.func @transform_2(%arg0: i32, %arg1: i32) -> (i32, i32) {
    %c0_i32 = arith.constant 0 : i32
    %c0_i32_0 = arith.constant 0 : i32
    %c0_i32_1 = arith.constant 0 : i32
    return %c0_i32, %c0_i32_0 : i32, i32
  }
  func.func @transform_3(%arg0: i32, %arg1: i32) -> (i32, i32) {
    %c0_i32 = arith.constant 0 : i32
    %c0_i32_0 = arith.constant 0 : i32
    %c0_i32_1 = arith.constant 0 : i32
    return %c0_i32, %c0_i32_0 : i32, i32
  }
  func.func @transform_4(%arg0: i32, %arg1: i32) -> (i32, i32) {
    %c0_i32 = arith.constant 0 : i32
    %c0_i32_0 = arith.constant 0 : i32
    %c0_i32_1 = arith.constant 0 : i32
    return %c0_i32, %c0_i32_0 : i32, i32
  }
  func.func @transform_5(%arg0: i32, %arg1: i32) -> (i32, i32) {
    %c0_i32 = arith.constant 0 : i32
    %c0_i32_0 = arith.constant 0 : i32
    %c0_i32_1 = arith.constant 0 : i32
    return %c0_i32, %c0_i32_0 : i32, i32
  }
  func.func @transform_6(%arg0: i32, %arg1: i32) -> (i32, i32) {
    %c0_i32 = arith.constant 0 : i32
    %c0_i32_0 = arith.constant 0 : i32
    %c0_i32_1 = arith.constant 0 : i32
    return %c0_i32, %c0_i32_0 : i32, i32
  }
  func.func @transform_7(%arg0: i32, %arg1: i32) -> (i32, i32, i32) {
    %c0_i32 = arith.constant 0 : i32
    %c0_i32_0 = arith.constant 0 : i32
    return %arg0, %arg1, %c0_i32 : i32, i32, i32
  }
}

module attributes {stable_mosaic.version = 11 : i64} {
  func.func @_head_kernel(%arg0: i32, %arg1: i32, %arg2: memref<1x1x256x128xf32, #tpu.memory_space<vmem>>, %arg3: memref<1x1x512xf32, #tpu.memory_space<vmem>>, %arg4: memref<128x512xf32, #tpu.memory_space<vmem>>, %arg5: memref<512x256xf32, #tpu.memory_space<vmem>>, %arg6: memref<1x256xf32, #tpu.memory_space<vmem>>, %arg7: memref<256x128xf32, #tpu.memory_space<vmem>>, %arg8: memref<1x128xf32, #tpu.memory_space<vmem>>, %arg9: memref<1x256x128xf32, #tpu.memory_space<vmem>>) attributes {dimension_semantics = [#tpu.dimension_semantics<parallel>, #tpu.dimension_semantics<parallel>], iteration_bounds = array<i64: 2, 1>, scalar_prefetch = 0 : i64, scratch_operands = 0 : i64, tpu.core_type = #tpu.core_type<tc>, window_params = [{transform_indices = @transform_0, window_bounds = array<i64: 1, 1, 256, 128>}, {transform_indices = @transform_1, window_bounds = array<i64: 1, 1, 512>}, {pipeline_mode = #tpu.pipeline_mode<synchronous>, transform_indices = @transform_2, window_bounds = array<i64: 128, 512>}, {pipeline_mode = #tpu.pipeline_mode<synchronous>, transform_indices = @transform_3, window_bounds = array<i64: 512, 256>}, {pipeline_mode = #tpu.pipeline_mode<synchronous>, transform_indices = @transform_4, window_bounds = array<i64: 1, 256>}, {pipeline_mode = #tpu.pipeline_mode<synchronous>, transform_indices = @transform_5, window_bounds = array<i64: 256, 128>}, {pipeline_mode = #tpu.pipeline_mode<synchronous>, transform_indices = @transform_6, window_bounds = array<i64: 1, 128>}, {transform_indices = @transform_7, window_bounds = array<i64: 1, 256, 128>}]} {
    %c0 = arith.constant 0 : index
    %c0_0 = arith.constant 0 : index
    %c0_1 = arith.constant 0 : index
    %c0_2 = arith.constant 0 : index
    %0 = vector.load %arg2[%c0, %c0_0, %c0_1, %c0_2] : memref<1x1x256x128xf32, #tpu.memory_space<vmem>>, vector<1x1x256x128xf32>
    %1 = vector.shape_cast %0 : vector<1x1x256x128xf32> to vector<256x128xf32>
    %c0_3 = arith.constant 0 : index
    %c0_4 = arith.constant 0 : index
    %2 = vector.load %arg4[%c0_3, %c0_4] : memref<128x512xf32, #tpu.memory_space<vmem>>, vector<128x512xf32>
    %cst = arith.constant dense<0.000000e+00> : vector<256x512xf32>
    %3 = tpu.matmul %1, %2, %cst {dimension_numbers = #tpu.dot_dimension_numbers<[1], [0], [0], [1], [0, 0, 1, 1], [], []>} : vector<256x128xf32>, vector<128x512xf32>, vector<256x512xf32> -> vector<256x512xf32>
    %c0_5 = arith.constant 0 : index
    %c0_6 = arith.constant 0 : index
    %c0_7 = arith.constant 0 : index
    %4 = vector.load %arg3[%c0_5, %c0_6, %c0_7] : memref<1x1x512xf32, #tpu.memory_space<vmem>>, vector<1x1x512xf32>
    %5 = vector.shape_cast %4 : vector<1x1x512xf32> to vector<1x512xf32>
    %6 = vector.broadcast %5 : vector<1x512xf32> to vector<256x512xf32>
    %7 = arith.addf %3, %6 : vector<256x512xf32>
    %cst_8 = arith.constant 0.000000e+00 : f32
    %8 = vector.broadcast %cst_8 : f32 to vector<256x512xf32>
    %9 = arith.maximumf %7, %8 : vector<256x512xf32>
    %c0_9 = arith.constant 0 : index
    %c0_10 = arith.constant 0 : index
    %10 = vector.load %arg5[%c0_9, %c0_10] : memref<512x256xf32, #tpu.memory_space<vmem>>, vector<512x256xf32>
    %cst_11 = arith.constant dense<0.000000e+00> : vector<256x256xf32>
    %11 = tpu.matmul %9, %10, %cst_11 {dimension_numbers = #tpu.dot_dimension_numbers<[1], [0], [0], [1], [0, 0, 1, 1], [], []>} : vector<256x512xf32>, vector<512x256xf32>, vector<256x256xf32> -> vector<256x256xf32>
    %c0_12 = arith.constant 0 : index
    %c0_13 = arith.constant 0 : index
    %12 = vector.load %arg6[%c0_12, %c0_13] : memref<1x256xf32, #tpu.memory_space<vmem>>, vector<1x256xf32>
    %13 = vector.broadcast %12 : vector<1x256xf32> to vector<256x256xf32>
    %14 = arith.addf %11, %13 : vector<256x256xf32>
    %cst_14 = arith.constant 0.000000e+00 : f32
    %15 = vector.broadcast %cst_14 : f32 to vector<256x256xf32>
    %16 = arith.maximumf %14, %15 : vector<256x256xf32>
    %c0_15 = arith.constant 0 : index
    %c0_16 = arith.constant 0 : index
    %17 = vector.load %arg7[%c0_15, %c0_16] : memref<256x128xf32, #tpu.memory_space<vmem>>, vector<256x128xf32>
    %cst_17 = arith.constant dense<0.000000e+00> : vector<256x128xf32>
    %18 = tpu.matmul %16, %17, %cst_17 {dimension_numbers = #tpu.dot_dimension_numbers<[1], [0], [0], [1], [0, 0, 1, 1], [], []>} : vector<256x256xf32>, vector<256x128xf32>, vector<256x128xf32> -> vector<256x128xf32>
    %c0_18 = arith.constant 0 : index
    %c0_19 = arith.constant 0 : index
    %19 = vector.load %arg8[%c0_18, %c0_19] : memref<1x128xf32, #tpu.memory_space<vmem>>, vector<1x128xf32>
    %20 = vector.broadcast %19 : vector<1x128xf32> to vector<256x128xf32>
    %21 = arith.addf %18, %20 : vector<256x128xf32>
    %c0_20 = arith.constant 0 : index
    %c0_21 = arith.constant 0 : index
    %c0_22 = arith.constant 0 : index
    %22 = vector.load %arg9[%c0_20, %c0_21, %c0_22] : memref<1x256x128xf32, #tpu.memory_space<vmem>>, vector<1x256x128xf32>
    %23 = vector.shape_cast %22 : vector<1x256x128xf32> to vector<256x128xf32>
    %24 = vector.shape_cast %21 : vector<256x128xf32> to vector<1x256x128xf32>
    tpu.vector_store %arg9[%c0_20, %c0_21, %c0_22], %24 {strides = array<i32>} : memref<1x256x128xf32, #tpu.memory_space<vmem>>, vector<1x256x128xf32>,
    return
  }
  func.func @transform_0(%arg0: i32, %arg1: i32) -> (i32, i32, i32, i32) {
    %c0_i32 = arith.constant 0 : i32
    %c0_i32_0 = arith.constant 0 : i32
    %c0_i32_1 = arith.constant 0 : i32
    return %c0_i32, %arg0, %arg1, %c0_i32_0 : i32, i32, i32, i32
  }
  func.func @transform_1(%arg0: i32, %arg1: i32) -> (i32, i32, i32) {
    %c0_i32 = arith.constant 0 : i32
    %c0_i32_0 = arith.constant 0 : i32
    %c0_i32_1 = arith.constant 0 : i32
    return %arg0, %c0_i32, %c0_i32_0 : i32, i32, i32
  }
  func.func @transform_2(%arg0: i32, %arg1: i32) -> (i32, i32) {
    %c0_i32 = arith.constant 0 : i32
    %c0_i32_0 = arith.constant 0 : i32
    %c0_i32_1 = arith.constant 0 : i32
    return %c0_i32, %c0_i32_0 : i32, i32
  }
  func.func @transform_3(%arg0: i32, %arg1: i32) -> (i32, i32) {
    %c0_i32 = arith.constant 0 : i32
    %c0_i32_0 = arith.constant 0 : i32
    %c0_i32_1 = arith.constant 0 : i32
    return %c0_i32, %c0_i32_0 : i32, i32
  }
  func.func @transform_4(%arg0: i32, %arg1: i32) -> (i32, i32) {
    %c0_i32 = arith.constant 0 : i32
    %c0_i32_0 = arith.constant 0 : i32
    %c0_i32_1 = arith.constant 0 : i32
    return %c0_i32, %c0_i32_0 : i32, i32
  }
  func.func @transform_5(%arg0: i32, %arg1: i32) -> (i32, i32) {
    %c0_i32 = arith.constant 0 : i32
    %c0_i32_0 = arith.constant 0 : i32
    %c0_i32_1 = arith.constant 0 : i32
    return %c0_i32, %c0_i32_0 : i32, i32
  }
  func.func @transform_6(%arg0: i32, %arg1: i32) -> (i32, i32) {
    %c0_i32 = arith.constant 0 : i32
    %c0_i32_0 = arith.constant 0 : i32
    %c0_i32_1 = arith.constant 0 : i32
    return %c0_i32, %c0_i32_0 : i32, i32
  }
  func.func @transform_7(%arg0: i32, %arg1: i32) -> (i32, i32, i32) {
    %c0_i32 = arith.constant 0 : i32
    %c0_i32_0 = arith.constant 0 : i32
    return %arg0, %arg1, %c0_i32 : i32, i32, i32
  }
}

</mosaic_0001>

<bundles_post_ra>
// kernel: deformnet_forward.5
= control target key start
LH: loop header
LB: loop body
LE: loop exit
PB: predicated region body
PF: predicated region fallthrough
CT: control target
= control target key end

     0   :  { %s2737_s24 = smov 0   ;;  %s2739_s25 = smov 0   ;;  %s4274_s0 = inlined_call_operand.vmem [shape: f32[2,2,256,128], index: 0, kind: input, shape index: {}]   ;;  %s4275_s1 = inlined_call_operand.vmem [shape: f32[2,1,512], index: 1, kind: input, shape index: {}]   ;;  %s4276_s2 = inlined_call_operand.vmem [shape: f32[128,512], index: 2, kind: input, shape index: {}]   ;;  %s4277_s3 = inlined_call_operand.vmem [shape: f32[512,256], index: 3, kind: input, shape index: {}]   ;;  %s4278_s4 = inlined_call_operand.vmem [shape: f32[1,256], index: 4, kind: input, shape index: {}]   ;;  %s4279_s5 = inlined_call_operand.vmem [shape: f32[256,128], index: 5, kind: input, shape index: {}]   ;;  %s4280_s6 = inlined_call_operand.vmem [shape: f32[1,128], index: 6, kind: input, shape index: {}]   ;;  %s4281_s7 = inlined_call_operand.vmem [shape: f32[2,256,128], index: 7, kind: output, shape index: {}]  }
   0x1   :  { %s2741_s26 = smov 0  }
   0x2 LB: > { %s29_s27 = sadd.s32 1, %s2689_s25  ;;  %p2218_p0 = scmp.ge.s32.totalorder %s2693_s26, 1  ;;  %s2693_s26 = sphi %s2741_s26, %s17_s26   ;;  %s2689_s25 = sphi %s2739_s25, %s4283_s25   ;;  %s2685_s24 = sphi %s2737_s24, %s4282_s24  }
   0x3   : > { %p31_p1 = scmp.ge.s32.totalorder %s29_s27, 2  ;;  %p268_p2 = scmp.lt.s32.totalorder %s2693_s26, 3 }
   0x5   : > { %s4285_s27 = smov (%p31_p1, %s29_s27), 0  ;;  %p269_p3 = pnand %p2218_p0, %p268_p2 }
   0x6   : > { %v371_v0 = vld [vmem:[%s4276_s2 + $0x8] sm:$0xff] (!%p269_p3)  ;;  %v370_v2 = vld [vmem:[%s4276_s2] sm:$0xff] (!%p269_p3)  ;;  %p314_p4 = scmp.lt.s32.totalorder (!%p269_p3), %s2685_s24, 1  ;;  %v2695_v7 = vmov (!%p269_p3), 0.0   ;;  %v436_v13 = vlaneseq (!%p269_p3)  ;;  %v373_v55 = vld [vmem:[%s4276_s2 + $0x18] sm:$0xff] (!%p269_p3) }
   0x7   : > { %272 = sbr.rel (%p269_p3) target bundleno = 945 (0x3b1), region = 48  ;;  %v375_v1 = vld [vmem:[%s4276_s2 + $0x28] sm:$0xff] (!%p269_p3)  ;;  %v374_v4 = vld [vmem:[%s4276_s2 + $0x20] sm:$0xff] (!%p269_p3)  ;;  %520 = vmatprep.mubr.f32.mxu0 (!%p269_p3), %v2695_v7  ;;  %616 = vmatprep.mubr.f32.mxu1 (!%p269_p3), %v2695_v7  ;;  %v377_v56 = vld [vmem:[%s4276_s2 + $0x38] sm:$0xff] (!%p269_p3) }
   0x8   : > { %v2261_v3 = vpack.c.bf16 (!%p269_p3), %v375_v1, %v371_v0  ;;  %v379_v5 = vld [vmem:[%s4276_s2 + $0x48] sm:$0xff] (!%p269_p3)  ;;  %v2263_v8 = vpack.c.bf16 (!%p269_p3), %v374_v4, %v370_v2  ;;  %v378_v10 = vld [vmem:[%s4276_s2 + $0x40] sm:$0xff] (!%p269_p3)  ;;  %v2803_v21 = vshrl.u32 (!%p269_p3), %v436_v13, 7  ;;  %v2293_v59 = vpack.c.bf16 (!%p269_p3), %v377_v56, %v373_v55  ;;  %v372_v60 = vld [vmem:[%s4276_s2 + $0x10] sm:$0xff] (!%p269_p3) }
   0x9   : > { %v383_v6 = vld [vmem:[%s4276_s2 + $0x68] sm:$0xff] (!%p269_p3)  ;;  %v382_v11 = vld [vmem:[%s4276_s2 + $0x60] sm:$0xff] (!%p269_p3)  ;;  %v376_v61 = vld [vmem:[%s4276_s2 + $0x30] sm:$0xff] (!%p269_p3) }
   0xa   : > { %v2265_v9 = vpack.c.bf16 (!%p269_p3), %v383_v6, %v379_v5  ;;  %v387_v12 = vld [vmem:[%s4276_s2 + $0x88] sm:$0xff] (!%p269_p3)  ;;  %2262 = vmatprep.subr.bf16.mxu0 (!%p269_p3), %v2261_v3  ;;  %2501 = vmatprep.subr.bf16.mxu1 (!%p269_p3), %v2261_v3  ;;  %v2267_v15 = vpack.c.bf16 (!%p269_p3), %v382_v11, %v378_v10  ;;  %v386_v17 = vld [vmem:[%s4276_s2 + $0x80] sm:$0xff] (!%p269_p3)  ;;  %v446_v23 = vsub.s32 (!%p269_p3), 2, %v2803_v21  ;;  %v450_v24 = vsub.s32 (!%p269_p3), 3, %v2803_v21  ;;  %v381_v63 = vld [vmem:[%s4276_s2 + $0x58] sm:$0xff] (!%p269_p3) }
   0xb   : > { %v391_v14 = vld [vmem:[%s4276_s2 + $0xa8] sm:$0xff] (!%p269_p3)  ;;  %2264 = vmatpush1.bf16.msra.mxu0 (!%p269_p3), %v2263_v8  ;;  %2509 = vmatpush1.bf16.msra.mxu1 (!%p269_p3), %v2263_v8  ;;  %v390_v18 = vld [vmem:[%s4276_s2 + $0xa0] sm:$0xff] (!%p269_p3)  ;;  %v385_v0 = vld [vmem:[%s4276_s2 + $0x78] sm:$0xff] (!%p269_p3)  ;;  %v2295_v4 = vpack.c.bf16 (!%p269_p3), %v376_v61, %v372_v60 }
   0xc   : > { %2266 = vmatprep.subr.bf16.mxu0 (!%p269_p3), %v2265_v9  ;;  %v2269_v16 = vpack.c.bf16 (!%p269_p3), %v391_v14, %v387_v12  ;;  %2502 = vmatprep.subr.bf16.mxu1 (!%p269_p3), %v2265_v9  ;;  %v395_v19 = vld [vmem:[%s4276_s2 + $0xc8] sm:$0xff] (!%p269_p3)  ;;  %v2271_v22 = vpack.c.bf16 (!%p269_p3), %v390_v18, %v386_v17  ;;  %v394_v26 = vld [vmem:[%s4276_s2 + $0xc0] sm:$0xff] (!%p269_p3)  ;;  %v380_v1 = vld [vmem:[%s4276_s2 + $0x50] sm:$0xff] (!%p269_p3)  ;;  %v2297_v10 = vpack.c.bf16 (!%p269_p3), %v385_v0, %v381_v63 }
   0xd   : > { %v399_v20 = vld [vmem:[%s4276_s2 + $0xe8] sm:$0xff] (!%p269_p3)  ;;  %v398_v27 = vld [vmem:[%s4276_s2 + $0xe0] sm:$0xff] (!%p269_p3)  ;;  %v1101_v3 = vld [vmem:[%s4277_s3 + $0x18] sm:$0xff] (!%p269_p3) }
   0xe   : > { %s4287_s24 = smov (!%p314_p4, %s2685_s24), 1  ;;  %v2273_v25 = vpack.c.bf16 %v399_v20, %v395_v19  ;;  %v403_v28 = vld [vmem:[%s4276_s2 + $0x108] sm:$0xff]  ;;  %v2275_v31 = vpack.c.bf16 %v398_v27, %v394_v26  ;;  %v402_v35 = vld [vmem:[%s4276_s2 + $0x100] sm:$0xff]  ;;  %v1100_v8 = vld [vmem:[%s4277_s3 + $0x10] sm:$0xff] }
   0xf   : > { %s2221_s10 = sshll.u32 %s4287_s24, 2  ;;  %2268 = vmatpush1.bf16.msra.mxu0 %v2267_v15  ;;  %2510 = vmatpush1.bf16.msra.mxu1 %v2267_v15  ;;  %v407_v29 = vld [vmem:[%s4276_s2 + $0x128] sm:$0xff]  ;;  %v406_v36 = vld [vmem:[%s4276_s2 + $0x120] sm:$0xff]  ;;  %s2259_s12 = sshll.u32 %s4287_s24, 8  ;;  %v384_v11 = vld [vmem:[%s4276_s2 + $0x70] sm:$0xff] }
  0x10   : > { %s327_s17 = scalar_lea.vmem %s4275_s1, %s2221_s10  ;;  %2270 = vmatprep.subr.bf16.mxu0 %v2269_v16  ;;  %2503 = vmatprep.subr.bf16.mxu1 %v2269_v16  ;;  %v2277_v34 = vpack.c.bf16 %v407_v29, %v403_v28  ;;  %v411_v37 = vld [vmem:[%s4276_s2 + $0x148] sm:$0xff]  ;;  %v2279_v39 = vpack.c.bf16 %v406_v36, %v402_v35  ;;  %v410_v41 = vld [vmem:[%s4276_s2 + $0x140] sm:$0xff]  ;;  %s2878_s19 = scalar_lea.vmem %s4274_s0, %s2259_s12  ;;  %v389_v12 = vld [vmem:[%s4276_s2 + $0x98] sm:$0xff] }
  0x11   : > { %v2822_v30 = vld [vmem:[%s327_s17] sm:$0xf]  ;;  %v415_v38 = vld [vmem:[%s4276_s2 + $0x168] sm:$0xff]  ;;  %v1105_v14 = vld [vmem:[%s4277_s3 + $0x38] sm:$0xff]  ;;  %s4199_s28 = scalar_lea.vmem %s4281_s7, %s2259_s12 }
  0x12   : > { %v2825_v32 = vrot.slane %v2822_v30, %v446_v23  ;;  %v2828_v33 = vrot.slane %v2822_v30, %v450_v24  ;;  %v2281_v40 = vpack.c.bf16 %v415_v38, %v411_v37  ;;  %v414_v42 = vld [vmem:[%s4276_s2 + $0x160] sm:$0xff]  ;;  %v419_v43 = vld [vmem:[%s4276_s2 + $0x188] sm:$0xff]  ;;  %v393_v15 = vld [vmem:[%s4276_s2 + $0xb8] sm:$0xff]  ;;  %v2299_v24 = vpack.c.bf16 %v384_v11, %v380_v1 }
  0x13   : > { %2272 = vmatpush1.bf16.msra.mxu0 %v2271_v22  ;;  %2511 = vmatpush1.bf16.msra.mxu1 %v2271_v22  ;;  %v423_v44 = vld [vmem:[%s4276_s2 + $0x1a8] sm:$0xff]  ;;  %v2283_v45 = vpack.c.bf16 %v414_v42, %v410_v41  ;;  %v418_v47 = vld [vmem:[%s4276_s2 + $0x180] sm:$0xff]  ;;  %v1104_v18 = vld [vmem:[%s4277_s3 + $0x30] sm:$0xff] }
  0x14   : > { %2274 = vmatprep.subr.bf16.mxu0 %v2273_v25  ;;  %2504 = vmatprep.subr.bf16.mxu1 %v2273_v25  ;;  %v2285_v46 = vpack.c.bf16 %v423_v44, %v419_v43  ;;  %v422_v48 = vld [vmem:[%s4276_s2 + $0x1a0] sm:$0xff]  ;;  %v427_v49 = vld [vmem:[%s4276_s2 + $0x1c8] sm:$0xff]  ;;  %v1109_v22 = vld [vmem:[%s4277_s3 + $0x58] sm:$0xff]  ;;  %v2301_v25 = vpack.c.bf16 %v393_v15, %v389_v12 }
  0x15   : > { %v431_v50 = vld [vmem:[%s4276_s2 + $0x1e8] sm:$0xff]  ;;  %v2287_v51 = vpack.c.bf16 %v422_v48, %v418_v47  ;;  %v426_v53 = vld [vmem:[%s4276_s2 + $0x1c0] sm:$0xff]  ;;  %v388_v26 = vld [vmem:[%s4276_s2 + $0x90] sm:$0xff] }
  0x16   : > { %v2289_v52 = vpack.c.bf16 %v431_v50, %v427_v49  ;;  %v430_v54 = vld [vmem:[%s4276_s2 + $0x1e0] sm:$0xff]  ;;  %v1099_v2 = vld [vmem:[%s4277_s3 + $0x8] sm:$0xff]  ;;  %v392_v27 = vld [vmem:[%s4276_s2 + $0xb0] sm:$0xff] }
  0x17   : > { %2276 = vmatpush1.bf16.msra.mxu0 %v2275_v31  ;;  %2512 = vmatpush1.bf16.msra.mxu1 %v2275_v31  ;;  %v2291_v57 = vpack.c.bf16 %v430_v54, %v426_v53  ;;  %v2887_v58 = vld [vmem:[%s2878_s19 + $0x200] sm:$0xff]  ;;  %v2325_v5 = vpack.c.bf16 %v1101_v3, %v1099_v2  ;;  %v1103_v9 = vld [vmem:[%s4277_s3 + $0x28] sm:$0xff]  ;;  %v397_v28 = vld [vmem:[%s4276_s2 + $0xd8] sm:$0xff]  ;;  %v2303_v41 = vpack.c.bf16 %v392_v27, %v388_v26 }
  0x18   : > { %2278 = vmatprep.subr.bf16.mxu0 %v2277_v34  ;;  %2505 = vmatprep.subr.bf16.mxu1 %v2277_v34  ;;  %v2896_v62 = vld [vmem:[%s2878_s19 + $0x280] sm:$0xff]  ;;  %v2329_v16 = vpack.c.bf16 %v1105_v14, %v1103_v9  ;;  %v2943_v19 = vld [vmem:[%s2878_s19 + $0x208] sm:$0xff]  ;;  %v401_v31 = vld [vmem:[%s4276_s2 + $0xf8] sm:$0xff] }
  0x19   : > { %v1098_v6 = vld [vmem:[%s4277_s3] sm:$0xff]  ;;  %v1107_v20 = vld [vmem:[%s4277_s3 + $0x48] sm:$0xff]  ;;  %v1108_v36 = vld [vmem:[%s4277_s3 + $0x50] sm:$0xff]  ;;  %v2305_v42 = vpack.c.bf16 %v401_v31, %v397_v28 }
  0x1a   : > { %v2327_v13 = vpack.c.bf16 %v1100_v8, %v1098_v6  ;;  %v1102_v17 = vld [vmem:[%s4277_s3 + $0x20] sm:$0xff]  ;;  %v2954_v23 = vld [vmem:[%s2878_s19 + $0x288] sm:$0xff]  ;;  %v2333_v34 = vpack.c.bf16 %v1109_v22, %v1107_v20  ;;  %v2977_v37 = vld [vmem:[%s2878_s19 + $0x210] sm:$0xff] }
  0x1b   : > { %2280 = vmatpush1.bf16.msra.mxu0 %v2279_v39  ;;  %2513 = vmatpush1.bf16.msra.mxu1 %v2279_v39  ;;  %v2331_v29 = vpack.c.bf16 %v1104_v18, %v1102_v17  ;;  %v1106_v35 = vld [vmem:[%s4277_s3 + $0x40] sm:$0xff]  ;;  %v1111_v38 = vld [vmem:[%s4277_s3 + $0x68] sm:$0xff]  ;;  %v1113_v39 = vld [vmem:[%s4277_s3 + $0x78] sm:$0xff] }
  0x1c   : > { %2282 = vmatprep.subr.bf16.mxu0 %v2281_v40  ;;  %2506 = vmatprep.subr.bf16.mxu1 %v2281_v40  ;;  %v2988_v40 = vld [vmem:[%s2878_s19 + $0x290] sm:$0xff]  ;;  %v409_v47 = vld [vmem:[%s4276_s2 + $0x138] sm:$0xff]  ;;  %v2337_v48 = vpack.c.bf16 %v1113_v39, %v1111_v38  ;;  %v1110_v49 = vld [vmem:[%s4277_s3 + $0x60] sm:$0xff] }
  0x1d   : > { %v396_v43 = vld [vmem:[%s4276_s2 + $0xd0] sm:$0xff]  ;;  %v1117_v53 = vld [vmem:[%s4277_s3 + $0x98] sm:$0xff]  ;;  %v1114_v1 = vld [vmem:[%s4277_s3 + $0x80] sm:$0xff] }
  0x1e   : > { %v400_v44 = vld [vmem:[%s4276_s2 + $0xf0] sm:$0xff]  ;;  %v3022_v54 = vld [vmem:[%s2878_s19 + $0x298] sm:$0xff]  ;;  %v3045_v3 = vld [vmem:[%s2878_s19 + $0x220] sm:$0xff] }
  0x1f   : > { %2284 = vmatpush1.bf16.msra.mxu0 %v2283_v45  ;;  %2514 = vmatpush1.bf16.msra.mxu1 %v2283_v45  ;;  %v405_v45 = vld [vmem:[%s4276_s2 + $0x118] sm:$0xff]  ;;  %v1112_v50 = vld [vmem:[%s4277_s3 + $0x70] sm:$0xff]  ;;  %v2307_v55 = vpack.c.bf16 %v400_v44, %v396_v43  ;;  %v3056_v6 = vld [vmem:[%s2878_s19 + $0x2a0] sm:$0xff] }
  0x20   : > { %2286 = vmatprep.subr.bf16.mxu0 %v2285_v46  ;;  %2507 = vmatprep.subr.bf16.mxu1 %v2285_v46  ;;  %v2335_v46 = vpack.c.bf16 %v1108_v36, %v1106_v35  ;;  %v2309_v56 = vpack.c.bf16 %v409_v47, %v405_v45  ;;  %v413_v60 = vld [vmem:[%s4276_s2 + $0x158] sm:$0xff]  ;;  %v2339_v61 = vpack.c.bf16 %v1112_v50, %v1110_v49  ;;  %v1116_v2 = vld [vmem:[%s4277_s3 + $0x90] sm:$0xff]  ;;  %v3079_v18 = vld [vmem:[%s2878_s19 + $0x228] sm:$0xff] }
  0x21   : > { %v417_v63 = vld [vmem:[%s4276_s2 + $0x178] sm:$0xff]  ;;  %v416_v11 = vld [vmem:[%s4276_s2 + $0x170] sm:$0xff]  ;;  %v1123_v20 = vld [vmem:[%s4277_s3 + $0xc8] sm:$0xff] }
  0x22   : > { %v2313_v9 = vpack.c.bf16 %v417_v63, %v413_v60  ;;  %v421_v12 = vld [vmem:[%s4276_s2 + $0x198] sm:$0xff]  ;;  %v1120_v17 = vld [vmem:[%s4277_s3 + $0xb0] sm:$0xff]  ;;  %v1122_v36 = vld [vmem:[%s4277_s3 + $0xc0] sm:$0xff] }
  0x23   : > { %2288 = vmatpush1.bf16.msra.mxu0 %v2287_v51  ;;  %2515 = vmatpush1.bf16.msra.mxu1 %v2287_v51  ;;  %v3011_v51 = vld [vmem:[%s2878_s19 + $0x218] sm:$0xff]  ;;  %v420_v27 = vld [vmem:[%s4276_s2 + $0x190] sm:$0xff]  ;;  %v1126_v50 = vld [vmem:[%s4277_s3 + $0xe0] sm:$0xff] }
  0x24   : > { %2290 = vmatprep.subr.bf16.mxu0 %v2289_v52  ;;  %2508 = vmatprep.subr.bf16.mxu1 %v2289_v52  ;;  %v1115_v52 = vld [vmem:[%s4277_s3 + $0x88] sm:$0xff]  ;;  %v425_v14 = vld [vmem:[%s4276_s2 + $0x1b8] sm:$0xff]  ;;  %v424_v28 = vld [vmem:[%s4276_s2 + $0x1b0] sm:$0xff] }
  0x25   : > { %v2341_v0 = vpack.c.bf16 %v1117_v53, %v1115_v52  ;;  %v1125_v22 = vld [vmem:[%s4277_s3 + $0xd8] sm:$0xff]  ;;  %v2317_v26 = vpack.c.bf16 %v425_v14, %v421_v12  ;;  %v1124_v38 = vld [vmem:[%s4277_s3 + $0xd0] sm:$0xff]  ;;  %v2319_v44 = vpack.c.bf16 %v424_v28, %v420_v27  ;;  %v1130_v63 = vld [vmem:[%s4277_s3 + $0x100] sm:$0xff] }
  0x26   : > { %v2349_v35 = vpack.c.bf16 %v1125_v22, %v1123_v20  ;;  %v3113_v39 = vld [vmem:[%s2878_s19 + $0x230] sm:$0xff]  ;;  %v3141_v53 = vld [vmem:[%s2878_s19 + $0x238] sm:$0xff]  ;;  %v3185_v12 = vld [vmem:[%s2878_s19 + $0x248] sm:$0xff] }
  0x27   : > { %2292 = vmatpush1.bf16.msra.mxu0 %v2291_v57  ;;  %2516 = vmatpush1.bf16.msra.mxu1 %v2291_v57  ;;  %v404_v57 = vld [vmem:[%s4276_s2 + $0x110] sm:$0xff]  ;;  %v1141_v14 = vld [vmem:[%s4277_s3 + $0x158] sm:$0xff]  ;;  %v1138_v20 = vld [vmem:[%s4277_s3 + $0x140] sm:$0xff] }
  0x28   : > { %2294 = vmatprep.subr.bf16.mxu1 %v2293_v59  ;;  %2326 = vmatprep.subr.bf16.mxu0 %v2325_v5  ;;  %v408_v59 = vld [vmem:[%s4276_s2 + $0x130] sm:$0xff]  ;;  %v1121_v5 = vld [vmem:[%s4277_s3 + $0xb8] sm:$0xff] }
  0x29   : > { %v2311_v8 = vpack.c.bf16 %v408_v59, %v404_v57  ;;  %v3124_v43 = vld [vmem:[%s2878_s19 + $0x2b0] sm:$0xff]  ;;  %v3152_v57 = vld [vmem:[%s2878_s19 + $0x2b8] sm:$0xff] }
  0x2a   : > { %521 = vmatmul.mubr.f32.vlgmr.msra.gmra.mrb[0].mxu0 %v2887_v58  ;;  %617 = vmatmul.mubr.f32.vlgmr.msra.gmra.mrb[0].mxu1 %v2896_v62  ;;  %v432_v47 = vld [vmem:[%s4276_s2 + $0x1f0] sm:$0xff]  ;;  %v1145_v27 = vld [vmem:[%s4277_s3 + $0x178] sm:$0xff] }
  0x2b   : > { %526 = vmatprep.mubr.f32.mxu0 %v2695_v7  ;;  %2296 = vmatpush1.bf16.msra.mxu1 %v2295_v4  ;;  %v1119_v4 = vld [vmem:[%s4277_s3 + $0xa8] sm:$0xff]  ;;  %v1128_v52 = vld [vmem:[%s4277_s3 + $0xf0] sm:$0xff] }
  0x2c   : > { %622 = vmatprep.mubr.f32.mxu1 %v2695_v7  ;;  %2298 = vmatprep.subr.bf16.mxu1 %v2297_v10  ;;  %v412_v10 = vld [vmem:[%s4276_s2 + $0x150] sm:$0xff]  ;;  %v2345_v15 = vpack.c.bf16 %v1121_v5, %v1119_v4  ;;  %v2355_v60 = vpack.c.bf16 %v1128_v52, %v1126_v50  ;;  %v1137_v4 = vld [vmem:[%s4277_s3 + $0x138] sm:$0xff]  ;;  %v3174_v5 = vld [vmem:[%s2878_s19 + $0x2c0] sm:$0xff] }
  0x2d   : > { %2328 = vmatpush1.bf16.msra.mxu0 %v2327_v13  ;;  %v2343_v13 = vpack.c.bf16 %v1116_v2, %v1114_v1  ;;  %v3163_v1 = vld [vmem:[%s2878_s19 + $0x240] sm:$0xff]  ;;  %v1135_v2 = vld [vmem:[%s4277_s3 + $0x128] sm:$0xff]  ;;  %v1140_v22 = vld [vmem:[%s4277_s3 + $0x150] sm:$0xff] }
  0x2e   : > { %527 = vmatmul.mubr.f32.gmra.mrb[2].mxu0 %v2943_v19  ;;  %2330 = vmatprep.subr.bf16.mxu0 %v2329_v16  ;;  %v1118_v16 = vld [vmem:[%s4277_s3 + $0xa0] sm:$0xff]  ;;  %v3218_v28 = vld [vmem:[%s2878_s19 + $0x2d0] sm:$0xff]  ;;  %v1153_v50 = vld [vmem:[%s4277_s3 + $0x1b8] sm:$0xff] }
  0x2f   : > { %532 = vmatprep.mubr.f32.mxu0 %v2695_v7  ;;  %623 = vmatmul.mubr.f32.gmra.mrb[2].mxu1 %v2954_v23  ;;  %v2347_v31 = vpack.c.bf16 %v1120_v17, %v1118_v16  ;;  %v3262_v52 = vld [vmem:[%s2878_s19 + $0x2e0] sm:$0xff] }
  0x30   : > { %628 = vmatprep.mubr.f32.mxu1 %v2695_v7  ;;  %2300 = vmatpush1.bf16.msra.mxu1 %v2299_v24  ;;  %v3090_v24 = vld [vmem:[%s2878_s19 + $0x2a8] sm:$0xff] }
  0x31   : > { %2302 = vmatprep.subr.bf16.mxu1 %v2301_v25  ;;  %2332 = vmatpush1.bf16.msra.mxu0 %v2331_v29  ;;  %v2315_v25 = vpack.c.bf16 %v416_v11, %v412_v10  ;;  %v429_v29 = vld [vmem:[%s4276_s2 + $0x1d8] sm:$0xff]  ;;  %v1134_v10 = vld [vmem:[%s4277_s3 + $0x120] sm:$0xff]  ;;  %v1136_v11 = vld [vmem:[%s4277_s3 + $0x130] sm:$0xff] }
  0x32   : > { %533 = vmatmul.mubr.f32.gmra.mrb[4].mxu0 %v2977_v37  ;;  %2334 = vmatprep.subr.bf16.mxu0 %v2333_v34  ;;  %v433_v34 = vld [vmem:[%s4276_s2 + $0x1f8] sm:$0xff]  ;;  %v2363_v16 = vpack.c.bf16 %v1136_v11, %v1134_v10  ;;  %v1156_v10 = vld [vmem:[%s4277_s3 + $0x1d0] sm:$0xff] }
  0x33   : > { %538 = vmatprep.mubr.f32.mxu0 %v2695_v7  ;;  %629 = vmatmul.mubr.f32.gmra.mrb[4].mxu1 %v2988_v40  ;;  %v2321_v45 = vpack.c.bf16 %v433_v34, %v429_v29  ;;  %v2367_v29 = vpack.c.bf16 %v1140_v22, %v1138_v20  ;;  %v1142_v34 = vld [vmem:[%s4277_s3 + $0x160] sm:$0xff]  ;;  %v2238_v11 = vld [vmem:[%s2878_s19 + $0x270] sm:$0xff]  ;;  %v1163_v22 = vld [vmem:[%s4277_s3 + $0x208] sm:$0xff] }
  0x34   : > { %634 = vmatprep.mubr.f32.mxu1 %v2695_v7  ;;  %2304 = vmatpush1.bf16.msra.mxu1 %v2303_v41  ;;  %v1127_v41 = vld [vmem:[%s4277_s3 + $0xe8] sm:$0xff] }
  0x35   : > { %2306 = vmatprep.subr.bf16.mxu1 %v2305_v42  ;;  %2336 = vmatpush1.bf16.msra.mxu0 %v2335_v46  ;;  %v1129_v42 = vld [vmem:[%s4277_s3 + $0xf8] sm:$0xff]  ;;  %v428_v46 = vld [vmem:[%s4276_s2 + $0x1d0] sm:$0xff] }
  0x36   : > { %539 = vmatmul.mubr.f32.gmra.mrb[6].mxu0 %v3011_v51  ;;  %2338 = vmatprep.subr.bf16.mxu0 %v2337_v48  ;;  %v2351_v48 = vpack.c.bf16 %v1124_v38, %v1122_v36  ;;  %v2353_v49 = vpack.c.bf16 %v1129_v42, %v1127_v41  ;;  %v2323_v59 = vpack.c.bf16 %v432_v47, %v428_v46  ;;  %v3229_v36 = vld [vmem:[%s2878_s19 + $0x258] sm:$0xff]  ;;  %v1147_v38 = vld [vmem:[%s4277_s3 + $0x188] sm:$0xff]  ;;  %v1146_v46 = vld [vmem:[%s4277_s3 + $0x180] sm:$0xff] }
  0x37   : > { %544 = vmatprep.mubr.f32.mxu0 %v2695_v7  ;;  %635 = vmatmul.mubr.f32.gmra.mrb[6].mxu1 %v3022_v54  ;;  %v1149_v41 = vld [vmem:[%s4277_s3 + $0x198] sm:$0xff]  ;;  %v1148_v47 = vld [vmem:[%s4277_s3 + $0x190] sm:$0xff] }
  0x38   : > { %640 = vmatprep.mubr.f32.mxu1 %v2695_v7  ;;  %2308 = vmatpush1.bf16.msra.mxu1 %v2307_v55  ;;  %v1131_v55 = vld [vmem:[%s4277_s3 + $0x108] sm:$0xff]  ;;  %v3240_v42 = vld [vmem:[%s2878_s19 + $0x2d8] sm:$0xff] }
  0x39   : > { %2310 = vmatprep.subr.bf16.mxu1 %v2309_v56  ;;  %2340 = vmatpush1.bf16.msra.mxu0 %v2339_v61  ;;  %v1133_v56 = vld [vmem:[%s4277_s3 + $0x118] sm:$0xff] }
  0x3a   : > { %545 = vmatmul.mubr.f32.gmra.mrb[8].mxu0 %v3045_v3  ;;  %2342 = vmatprep.subr.bf16.mxu0 %v2341_v0  ;;  %v2357_v61 = vpack.c.bf16 %v1133_v56, %v1131_v55  ;;  %v1132_v0 = vld [vmem:[%s4277_s3 + $0x110] sm:$0xff]  ;;  %v2375_v55 = vpack.c.bf16 %v1148_v47, %v1146_v46 }
  0x3b   : > { %550 = vmatprep.mubr.f32.mxu0 %v2695_v7  ;;  %641 = vmatmul.mubr.f32.gmra.mrb[8].mxu1 %v3056_v6 }
  0x3c   : > { %646 = vmatprep.mubr.f32.mxu1 %v2695_v7  ;;  %2312 = vmatpush1.bf16.msra.mxu1 %v2311_v8  ;;  %v2359_v8 = vpack.c.bf16 %v1132_v0, %v1130_v63  ;;  %v1155_v63 = vld [vmem:[%s4277_s3 + $0x1c8] sm:$0xff]  ;;  %v1157_v0 = vld [vmem:[%s4277_s3 + $0x1d8] sm:$0xff] }
  0x3d   : > { %2314 = vmatprep.subr.bf16.mxu1 %v2313_v9  ;;  %2344 = vmatpush1.bf16.msra.mxu0 %v2343_v13  ;;  %v2361_v9 = vpack.c.bf16 %v1137_v4, %v1135_v2  ;;  %v1139_v13 = vld [vmem:[%s4277_s3 + $0x148] sm:$0xff] }
  0x3e   : > { %551 = vmatmul.mubr.f32.gmra.mrb[10].mxu0 %v3079_v18  ;;  %2346 = vmatprep.subr.bf16.mxu0 %v2345_v15  ;;  %v3196_v15 = vld [vmem:[%s2878_s19 + $0x2c8] sm:$0xff]  ;;  %v2365_v17 = vpack.c.bf16 %v1141_v14, %v1139_v13  ;;  %v3298_v13 = vld [vmem:[%s2878_s19 + $0x2f0] sm:$0xff] }
  0x3f   : > { %556 = vmatprep.mubr.f32.mxu0 %v2695_v7  ;;  %647 = vmatmul.mubr.f32.gmra.mrb[10].mxu1 %v3090_v24  ;;  %v3284_v2 = vld [vmem:[%s2878_s19 + $0x2e8] sm:$0xff] }
  0x40   : > { %652 = vmatprep.mubr.f32.mxu1 %v2695_v7  ;;  %2316 = vmatpush1.bf16.msra.mxu1 %v2315_v25  ;;  %v3207_v25 = vld [vmem:[%s2878_s19 + $0x250] sm:$0xff] }
  0x41   : > { %2318 = vmatprep.subr.bf16.mxu1 %v2317_v26  ;;  %2348 = vmatpush1.bf16.msra.mxu0 %v2347_v31  ;;  %v1143_v26 = vld [vmem:[%s4277_s3 + $0x168] sm:$0xff] }
  0x42   : > { %557 = vmatmul.mubr.f32.gmra.mrb[12].mxu0 %v3113_v39  ;;  %2350 = vmatprep.subr.bf16.mxu0 %v2349_v35  ;;  %v2369_v31 = vpack.c.bf16 %v1145_v27, %v1143_v26  ;;  %v1144_v35 = vld [vmem:[%s4277_s3 + $0x170] sm:$0xff]  ;;  %v1165_v26 = vld [vmem:[%s4277_s3 + $0x218] sm:$0xff] }
  0x43   : > { %562 = vmatprep.mubr.f32.mxu0 %v2695_v7  ;;  %653 = vmatmul.mubr.f32.gmra.mrb[12].mxu1 %v3124_v43  ;;  %v2389_v27 = vpack.c.bf16 %v1165_v26, %v1163_v22  ;;  %v1179_v26 = vld [vmem:[%s4277_s3 + $0x288] sm:$0xff] }
  0x44   : > { %658 = vmatprep.mubr.f32.mxu1 %v2695_v7  ;;  %2320 = vmatpush1.bf16.msra.mxu1 %v2319_v44  ;;  %v2371_v44 = vpack.c.bf16 %v1144_v35, %v1142_v34 }
  0x45   : > { %2322 = vmatprep.subr.bf16.mxu1 %v2321_v45  ;;  %2352 = vmatpush1.bf16.msra.mxu0 %v2351_v48  ;;  %v2373_v45 = vpack.c.bf16 %v1149_v41, %v1147_v38  ;;  %v3251_v48 = vld [vmem:[%s2878_s19 + $0x260] sm:$0xff]  ;;  %v1168_v38 = vld [vmem:[%s4277_s3 + $0x230] sm:$0xff] }
  0x46   : > { %563 = vmatmul.mubr.f32.gmra.mrb[14].mxu0 %v3141_v53  ;;  %2354 = vmatprep.subr.bf16.mxu0 %v2353_v49  ;;  %v1151_v49 = vld [vmem:[%s4277_s3 + $0x1a8] sm:$0xff] }
  0x47   : > { %568 = vmatprep.mubr.f32.mxu0 %v2695_v7  ;;  %659 = vmatmul.mubr.f32.gmra.mrb[14].mxu1 %v3152_v57  ;;  %v2377_v56 = vpack.c.bf16 %v1153_v50, %v1151_v49 }
  0x48   : > { %664 = vmatprep.mubr.f32.mxu1 %v2695_v7  ;;  %2324 = vmatpush1.bf16.msra.mxu1 %v2323_v59  ;;  %v1150_v59 = vld [vmem:[%s4277_s3 + $0x1a0] sm:$0xff] }
  0x49   : > { %2356 = vmatpush1.bf16.msra.mxu0 %v2355_v60  ;;  %v1152_v60 = vld [vmem:[%s4277_s3 + $0x1b0] sm:$0xff] }
  0x4a   : > { %569 = vmatmul.mubr.f32.gmra.mrb[16].mxu0 %v3163_v1  ;;  %2358 = vmatprep.subr.bf16.mxu0 %v2357_v61  ;;  %v3273_v61 = vld [vmem:[%s2878_s19 + $0x268] sm:$0xff]  ;;  %v2379_v4 = vpack.c.bf16 %v1152_v60, %v1150_v59 }
  0x4b   : > { %574 = vmatprep.mubr.f32.mxu0 %v2695_v7  ;;  %665 = vmatmul.mubr.f32.gmra.mrb[16].mxu1 %v3174_v5 }
  0x4c   : > { %670 = vmatprep.mubr.f32.mxu1 %v2695_v7 }
  0x4d   : > { %2360 = vmatpush1.bf16.msra.mxu0 %v2359_v8  ;;  %v2381_v8 = vpack.c.bf16 %v1157_v0, %v1155_v63  ;;  %v1172_v63 = vld [vmem:[%s4277_s3 + $0x250] sm:$0xff] }
  0x4e   : > { %575 = vmatmul.mubr.f32.gmra.mrb[18].mxu0 %v3185_v12  ;;  %2362 = vmatprep.subr.bf16.mxu0 %v2361_v9  ;;  %v1154_v9 = vld [vmem:[%s4277_s3 + $0x1c0] sm:$0xff] }
  0x4f   : > { %580 = vmatprep.mubr.f32.mxu0 %v2695_v7  ;;  %671 = vmatmul.mubr.f32.gmra.mrb[18].mxu1 %v3196_v15  ;;  %v2383_v14 = vpack.c.bf16 %v1156_v10, %v1154_v9 }
  0x50   : > { %676 = vmatprep.mubr.f32.mxu1 %v2695_v7 }
  0x51   : > { %2364 = vmatpush1.bf16.msra.mxu0 %v2363_v16  ;;  %v2239_v16 = vld [vmem:[%s2878_s19 + $0x278] sm:$0xff] }
  0x52   : > { %581 = vmatmul.mubr.f32.gmra.mrb[20].mxu0 %v3207_v25  ;;  %2366 = vmatprep.subr.bf16.mxu0 %v2365_v17  ;;  %v3305_v17 = vld [vmem:[%s2878_s19 + $0x2f8] sm:$0xff] }
  0x53   : > { %586 = vmatprep.mubr.f32.mxu0 %v2695_v7  ;;  %677 = vmatmul.mubr.f32.gmra.mrb[20].mxu1 %v3218_v28 }
  0x54   : > { %682 = vmatprep.mubr.f32.mxu1 %v2695_v7 }
  0x55   : > { %2368 = vmatpush1.bf16.msra.mxu0 %v2367_v29 }
  0x56   : > { %587 = vmatmul.mubr.f32.gmra.mrb[22].mxu0 %v3229_v36  ;;  %2370 = vmatprep.subr.bf16.mxu0 %v2369_v31 }
  0x57   : > { %592 = vmatprep.mubr.f32.mxu0 %v2695_v7  ;;  %683 = vmatmul.mubr.f32.gmra.mrb[22].mxu1 %v3240_v42 }
  0x58   : > { %688 = vmatprep.mubr.f32.mxu1 %v2695_v7 }
  0x59   : > { %2372 = vmatpush1.bf16.msra.mxu0 %v2371_v44  ;;  %v1171_v44 = vld [vmem:[%s4277_s3 + $0x248] sm:$0xff] }
  0x5a   : > { %593 = vmatmul.mubr.f32.gmra.mrb[24].mxu0 %v3251_v48  ;;  %2374 = vmatprep.subr.bf16.mxu0 %v2373_v45  ;;  %v1173_v45 = vld [vmem:[%s4277_s3 + $0x258] sm:$0xff] }
  0x5b   : > { %598 = vmatprep.mubr.f32.mxu0 %v2695_v7  ;;  %689 = vmatmul.mubr.f32.gmra.mrb[24].mxu1 %v3262_v52  ;;  %v2397_v60 = vpack.c.bf16 %v1173_v45, %v1171_v44 }
  0x5c   : > { %694 = vmatprep.mubr.f32.mxu1 %v2695_v7 }
  0x5d   : > { %2376 = vmatpush1.bf16.msra.mxu0 %v2375_v55 }
  0x5e   : > { %599 = vmatmul.mubr.f32.gmra.mrb[26].mxu0 %v3273_v61  ;;  %2378 = vmatprep.subr.bf16.mxu0 %v2377_v56 }
  0x5f   : > { %604 = vmatprep.mubr.f32.mxu0 %v2695_v7  ;;  %695 = vmatmul.mubr.f32.gmra.mrb[26].mxu1 %v3284_v2 }
  0x60   : > { %700 = vmatprep.mubr.f32.mxu1 %v2695_v7 }
  0x61   : > { %2380 = vmatpush1.bf16.msra.mxu0 %v2379_v4  ;;  %v1175_v4 = vld [vmem:[%s4277_s3 + $0x268] sm:$0xff] }
  0x62   : > { %605 = vmatmul.mubr.f32.gmra.mrb[28].mxu0 %v2238_v11  ;;  %2382 = vmatprep.subr.bf16.mxu0 %v2381_v8  ;;  %v1177_v8 = vld [vmem:[%s4277_s3 + $0x278] sm:$0xff] }
  0x63   : > { %610 = vmatprep.mubr.f32.mxu0 %v2695_v7  ;;  %701 = vmatmul.mubr.f32.gmra.mrb[28].mxu1 %v3298_v13 }
  0x64   : > { %706 = vmatprep.mubr.f32.mxu1 %v2695_v7 }
  0x65   : > { %2384 = vmatpush1.bf16.msra.mxu0 %v2383_v14 }
  0x66   : > { %611 = vmatmul.mubr.f32.gmra.mrb[30].mxu0 %v2239_v16 }
  0x67   : > { %707 = vmatmul.mubr.f32.gmra.mrb[30].mxu1 %v3305_v17 }
  0x68   : > { %777 = vmatprep.mubr.f32.mxu1 %v2695_v7 }
  0x6b   : > { %778 = vmatmul.mubr.f32.vlgmr.msra.gmra.mrb[32].mxu1 %v2887_v58  ;;  %v1159_v58 = vld [vmem:[%s4277_s3 + $0x1e8] sm:$0xff] }
  0x6c   : > { %783 = vmatprep.mubr.f32.mxu1 %v2695_v7 }
  0x6f   : > { %784 = vmatmul.mubr.f32.gmra.mrb[34].mxu1 %v2943_v19  ;;  %v1161_v19 = vld [vmem:[%s4277_s3 + $0x1f8] sm:$0xff] }
  0x70   : > { %789 = vmatprep.mubr.f32.mxu1 %v2695_v7  ;;  %v2385_v20 = vpack.c.bf16 %v1161_v19, %v1159_v58 }
  0x72   : > { %2386 = vmatprep.subr.bf16.mxu0 %v2385_v20  ;;  %v2401_v20 = vpack.c.bf16 %v1177_v8, %v1175_v4 }
  0x73   : > { %790 = vmatmul.mubr.f32.gmra.mrb[36].mxu1 %v2977_v37  ;;  %v1158_v37 = vld [vmem:[%s4277_s3 + $0x1e0] sm:$0xff] }
  0x74   : > { %795 = vmatprep.mubr.f32.mxu1 %v2695_v7 }
  0x77   : > { %796 = vmatmul.mubr.f32.gmra.mrb[38].mxu1 %v3011_v51  ;;  %v1160_v51 = vld [vmem:[%s4277_s3 + $0x1f0] sm:$0xff] }
  0x78   : > { %801 = vmatprep.mubr.f32.mxu1 %v2695_v7 }
  0x7b   : > { %802 = vmatmul.mubr.f32.gmra.mrb[40].mxu1 %v3045_v3  ;;  %v2387_v3 = vpack.c.bf16 %v1160_v51, %v1158_v37  ;;  %v1174_v37 = vld [vmem:[%s4277_s3 + $0x260] sm:$0xff]  ;;  %v1176_v51 = vld [vmem:[%s4277_s3 + $0x270] sm:$0xff] }
  0x7c   : > { %807 = vmatprep.mubr.f32.mxu1 %v2695_v7 }
  0x7d   : > { %2388 = vmatpush1.bf16.msra.mxu0 %v2387_v3 }
  0x7e   : > { %2390 = vmatprep.subr.bf16.mxu0 %v2389_v27  ;;  %v1181_v27 = vld [vmem:[%s4277_s3 + $0x298] sm:$0xff] }
  0x7f   : > { %808 = vmatmul.mubr.f32.gmra.mrb[42].mxu1 %v3079_v18 }
  0x80   : > { %813 = vmatprep.mubr.f32.mxu1 %v2695_v7 }
  0x83   : > { %814 = vmatmul.mubr.f32.gmra.mrb[44].mxu1 %v3113_v39  ;;  %v1164_v39 = vld [vmem:[%s4277_s3 + $0x210] sm:$0xff] }
  0x84   : > { %819 = vmatprep.mubr.f32.mxu1 %v2695_v7 }
  0x87   : > { %820 = vmatmul.mubr.f32.gmra.mrb[46].mxu1 %v3141_v53 }
  0x88   : > { %825 = vmatprep.mubr.f32.mxu1 %v2695_v7 }
  0x8b   : > { %826 = vmatmul.mubr.f32.gmra.mrb[48].mxu1 %v3163_v1 }
  0x8c   : > { %831 = vmatprep.mubr.f32.mxu1 %v2695_v7 }
  0x8f   : > { %832 = vmatmul.mubr.f32.gmra.mrb[50].mxu1 %v3185_v12 }
  0x90   : > { %837 = vmatprep.mubr.f32.mxu1 %v2695_v7 }
  0x93   : > { %838 = vmatmul.mubr.f32.gmra.mrb[52].mxu1 %v3207_v25 }
  0x94   : > { %843 = vmatprep.mubr.f32.mxu1 %v2695_v7 }
  0x97   : > { %844 = vmatmul.mubr.f32.gmra.mrb[54].mxu1 %v3229_v36  ;;  %v1166_v36 = vld [vmem:[%s4277_s3 + $0x220] sm:$0xff] }
  0x98   : > { %849 = vmatprep.mubr.f32.mxu1 %v2695_v7 }
  0x9b   : > { %850 = vmatmul.mubr.f32.gmra.mrb[56].mxu1 %v3251_v48 }
  0x9c   : > { %855 = vmatprep.mubr.f32.mxu1 %v2695_v7 }
  0x9f   : > { %856 = vmatmul.mubr.f32.gmra.mrb[58].mxu1 %v3273_v61  ;;  %v1170_v61 = vld [vmem:[%s4277_s3 + $0x240] sm:$0xff] }
  0xa0   : > { %861 = vmatprep.mubr.f32.mxu1 %v2695_v7 }
  0xa3   : > { %862 = vmatmul.mubr.f32.gmra.mrb[60].mxu1 %v2238_v11 }
  0xa4   : > { %867 = vmatprep.mubr.f32.mxu1 %v2695_v7 }
  0xa7   : > { %868 = vmatmul.mubr.f32.gmra.mrb[62].mxu1 %v2239_v16  ;;  %v2399_v16 = vpack.c.bf16 %v1172_v63, %v1170_v61  ;;  %v1189_v61 = vld [vmem:[%s4277_s3 + $0x2d8] sm:$0xff] }
  0xa8   : > { %873 = vmatprep.mubr.f32.mxu1 %v2695_v7 }
  0xab   : > { %874 = vmatmul.mubr.f32.gmra.mrb[64].mxu1 %v2896_v62  ;;  %v438_v62 = vsub.s32 0, %v2803_v21 }
  0xac   : > { %879 = vmatprep.mubr.f32.mxu1 %v2695_v7 }
  0xaf   : > { %880 = vmatmul.mubr.f32.gmra.mrb[66].mxu1 %v2954_v23  ;;  %v442_v23 = vsub.s32 1, %v2803_v21 }
  0xb0   : > { %885 = vmatprep.mubr.f32.mxu1 %v2695_v7 }
  0xb3   : > { %886 = vmatmul.mubr.f32.gmra.mrb[68].mxu1 %v2988_v40  ;;  %v3393_v40 = vrot.slane %v2822_v30, %v438_v62 }
  0xb4   : > { %891 = vmatprep.mubr.f32.mxu1 %v2695_v7 }
  0xb7   : > { %892 = vmatmul.mubr.f32.gmra.mrb[70].mxu1 %v3022_v54  ;;  %v3398_v54 = vrot.slane %v2822_v30, %v442_v23  ;;  %v1167_v30 = vld [vmem:[%s4277_s3 + $0x228] sm:$0xff] }
  0xb8   : > { %897 = vmatprep.mubr.f32.mxu1 %v2695_v7 }
  0xbb   : > { %898 = vmatmul.mubr.f32.gmra.mrb[72].mxu1 %v3056_v6 }
  0xbc   : > { %903 = vmatprep.mubr.f32.mxu1 %v2695_v7 }
  0xbf   : > { %904 = vmatmul.mubr.f32.gmra.mrb[74].mxu1 %v3090_v24  ;;  %v1162_v24 = vld [vmem:[%s4277_s3 + $0x200] sm:$0xff] }
  0xc0   : > { %909 = vmatprep.mubr.f32.mxu1 %v2695_v7 }
  0xc3   : > { %910 = vmatmul.mubr.f32.gmra.mrb[76].mxu1 %v3124_v43 }
  0xc4   : > { %915 = vmatprep.mubr.f32.mxu1 %v2695_v7 }
  0xc7   : > { %916 = vmatmul.mubr.f32.gmra.mrb[78].mxu1 %v3152_v57  ;;  %v1169_v57 = vld [vmem:[%s4277_s3 + $0x238] sm:$0xff] }
  0xc8   : > { %921 = vmatprep.mubr.f32.mxu1 %v2695_v7  ;;  %v2393_v35 = vpack.c.bf16 %v1169_v57, %v1167_v30 }
  0xcb   : > { %922 = vmatmul.mubr.f32.gmra.mrb[80].mxu1 %v3174_v5 }
  0xcc   : > { %927 = vmatprep.mubr.f32.mxu1 %v2695_v7 }
  0xcf   : > { %928 = vmatmul.mubr.f32.gmra.mrb[82].mxu1 %v3196_v15 }
  0xd0   : > { %933 = vmatprep.mubr.f32.mxu1 %v2695_v7 }
  0xd3   : > { %934 = vmatmul.mubr.f32.gmra.mrb[84].mxu1 %v3218_v28  ;;  %v2391_v28 = vpack.c.bf16 %v1164_v39, %v1162_v24 }
  0xd4   : > { %939 = vmatprep.mubr.f32.mxu1 %v2695_v7 }
  0xd7   : > { %940 = vmatmul.mubr.f32.gmra.mrb[86].mxu1 %v3240_v42 }
  0xd8   : > { %945 = vmatprep.mubr.f32.mxu1 %v2695_v7 }
  0xdb   : > { %946 = vmatmul.mubr.f32.gmra.mrb[88].mxu1 %v3262_v52  ;;  %v2395_v52 = vpack.c.bf16 %v1168_v38, %v1166_v36 }
  0xdc   : > { %951 = vmatprep.mubr.f32.mxu1 %v2695_v7 }
  0xdf   : > { %952 = vmatmul.mubr.f32.gmra.mrb[90].mxu1 %v3284_v2 }
  0xe0   : > { %957 = vmatprep.mubr.f32.mxu1 %v2695_v7 }
  0xe3   : > { %958 = vmatmul.mubr.f32.gmra.mrb[92].mxu1 %v3298_v13 }
  0xe4   : > { %963 = vmatprep.mubr.f32.mxu1 %v2695_v7 }
  0xe7   : > { %964 = vmatmul.mubr.f32.gmra.mrb[94].mxu1 %v3305_v17 }
  0xfd   : > { %v522_v6 = vpop.f32.mrb[0].mxu0  ;;  %v618_v43 = vpop.f32.mrb[0].mxu1 }
  0xfe   : > { %v523_v18 = vadd.f32 %v522_v6, %v3393_v40  ;;  %v524_v7 = vpop.f32.mrb[1].mxu0  ;;  %v3415_v1 = vadd.f32 %v618_v43, %v3393_v40  ;;  %v620_v5 = vpop.f32.mrb[1].mxu1  ;;  %v2403_v43 = vpack.c.bf16 %v1176_v51, %v1174_v37  ;;  %v1191_v51 = vld [vmem:[%s4277_s3 + $0x2e8] sm:$0xff] }
  0xff   : > { %v525_v53 = vadd.f32 %v524_v7, %v3398_v54  ;;  %v3418_v12 = vadd.f32 %v620_v5, %v3398_v54  ;;  %v2405_v5 = vpack.c.bf16 %v1181_v27, %v1179_v26 }
 0x100   : > { %v970_v29 = vmax.f32 %v523_v18, 0.0 }
 0x101   : > { %v971_v15 = vmax.f32 %v525_v53, 0.0  ;;  %v528_v25 = vpop.f32.mrb[2].mxu0 }
 0x102   : > { %v529_v31 = vadd.f32 %v528_v25, %v3393_v40  ;;  %v530_v34 = vpop.f32.mrb[3].mxu0  ;;  %v624_v41 = vpop.f32.mrb[2].mxu1  ;;  %v1180_v25 = vld [vmem:[%s4277_s3 + $0x290] sm:$0xff] }
 0x103   : > { %v531_v42 = vadd.f32 %v530_v34, %v3398_v54  ;;  %1302 = vmatprep.mubr.f32.mxu0 %v971_v15  ;;  %v3435_v46 = vadd.f32 %v624_v41, %v3393_v40  ;;  %v626_v47 = vpop.f32.mrb[3].mxu1  ;;  %v1178_v15 = vld [vmem:[%s4277_s3 + $0x280] sm:$0xff]  ;;  %v1185_v34 = vld [vmem:[%s4277_s3 + $0x2b8] sm:$0xff] }
 0x104   : > { %1303 = vmatmul.mubr.f32.vlgmr.msra.gmra.mrb[32].mxu0 %v970_v29  ;;  %v3438_v48 = vadd.f32 %v626_v47, %v3398_v54  ;;  %v974_v55 = vmax.f32 %v529_v31, 0.0  ;;  %v1183_v31 = vld [vmem:[%s4277_s3 + $0x2a8] sm:$0xff]  ;;  %v2407_v44 = vpack.c.bf16 %v1180_v25, %v1178_v15  ;;  %v1192_v15 = vld [vmem:[%s4277_s3 + $0x2f0] sm:$0xff] }
 0x105   : > { %v975_v49 = vmax.f32 %v531_v42, 0.0  ;;  %2392 = vmatpush1.bf16.msra.mxu0 %v2391_v28  ;;  %v534_v50 = vpop.f32.mrb[4].mxu0 }
 0x106   : > { %v535_v56 = vadd.f32 %v534_v50, %v3393_v40  ;;  %v536_v59 = vpop.f32.mrb[5].mxu0  ;;  %2394 = vmatprep.subr.bf16.mxu0 %v2393_v35  ;;  %v630_v0 = vpop.f32.mrb[4].mxu1  ;;  %v2409_v50 = vpack.c.bf16 %v1185_v34, %v1183_v31  ;;  %v1197_v31 = vld [vmem:[%s4277_s3 + $0x318] sm:$0xff] }
 0x107   : > { %v537_v2 = vadd.f32 %v536_v59, %v3398_v54  ;;  %1308 = vmatprep.mubr.f32.mxu0 %v975_v49  ;;  %v3455_v9 = vadd.f32 %v630_v0, %v3393_v40  ;;  %v632_v10 = vpop.f32.mrb[5].mxu1 }
 0x108   : > { %1309 = vmatmul.mubr.f32.gmra.mrb[34].mxu0 %v974_v55  ;;  %v3458_v11 = vadd.f32 %v632_v10, %v3398_v54  ;;  %v978_v17 = vmax.f32 %v535_v56, 0.0  ;;  %v1184_v55 = vld [vmem:[%s4277_s3 + $0x2b0] sm:$0xff] }
 0x109   : > { %v979_v13 = vmax.f32 %v537_v2, 0.0  ;;  %v540_v14 = vpop.f32.mrb[6].mxu0  ;;  %2396 = vmatpush1.bf16.msra.mxu0 %v2395_v52  ;;  %v1182_v52 = vld [vmem:[%s4277_s3 + $0x2a0] sm:$0xff] }
 0x10a   : > { %v541_v58 = vadd.f32 %v540_v14, %v3393_v40  ;;  %v542_v19 = vpop.f32.mrb[7].mxu0  ;;  %2398 = vmatprep.subr.bf16.mxu0 %v2397_v60  ;;  %v636_v3 = vpop.f32.mrb[6].mxu1  ;;  %v1187_v60 = vld [vmem:[%s4277_s3 + $0x2c8] sm:$0xff]  ;;  %v2411_v10 = vpack.c.bf16 %v1184_v55, %v1182_v52  ;;  %v1194_v55 = vld [vmem:[%s4277_s3 + $0x300] sm:$0xff] }
 0x10b   : > { %v543_v22 = vadd.f32 %v542_v19, %v3398_v54  ;;  %1314 = vmatprep.mubr.f32.mxu0 %v979_v13  ;;  %v3475_v6 = vadd.f32 %v636_v3, %v3393_v40  ;;  %v638_v18 = vpop.f32.mrb[7].mxu1  ;;  %v1188_v19 = vld [vmem:[%s4277_s3 + $0x2d0] sm:$0xff]  ;;  %v1193_v3 = vld [vmem:[%s4277_s3 + $0x2f8] sm:$0xff] }
 0x10c   : > { %1315 = vmatmul.mubr.f32.gmra.mrb[36].mxu0 %v978_v17  ;;  %v3478_v7 = vadd.f32 %v638_v18, %v3398_v54  ;;  %v982_v53 = vmax.f32 %v541_v58, 0.0  ;;  %v2413_v17 = vpack.c.bf16 %v1189_v61, %v1187_v60  ;;  %v1186_v58 = vld [vmem:[%s4277_s3 + $0x2c0] sm:$0xff]  ;;  %v1199_v61 = vld [vmem:[%s4277_s3 + $0x328] sm:$0xff] }
 0x10d   : > { %v983_v24 = vmax.f32 %v543_v22, 0.0  ;;  %v546_v39 = vpop.f32.mrb[8].mxu0  ;;  %2400 = vmatpush1.bf16.msra.mxu0 %v2399_v16 }
 0x10e   : > { %v547_v30 = vadd.f32 %v546_v39, %v3393_v40  ;;  %v548_v57 = vpop.f32.mrb[9].mxu0  ;;  %2402 = vmatprep.subr.bf16.mxu0 %v2401_v20  ;;  %v642_v28 = vpop.f32.mrb[8].mxu1  ;;  %v2415_v39 = vpack.c.bf16 %v1188_v19, %v1186_v58 }
 0x10f   : > { %v549_v29 = vadd.f32 %v548_v57, %v3398_v54  ;;  %1320 = vmatprep.mubr.f32.mxu0 %v983_v24  ;;  %v3495_v35 = vadd.f32 %v642_v28, %v3393_v40  ;;  %v644_v36 = vpop.f32.mrb[9].mxu1  ;;  %v2417_v57 = vpack.c.bf16 %v1193_v3, %v1191_v51  ;;  %v1200_v51 = vld [vmem:[%s4277_s3 + $0x330] sm:$0xff] }
 0x110   : > { %1321 = vmatmul.mubr.f32.gmra.mrb[38].mxu0 %v982_v53  ;;  %v3498_v38 = vadd.f32 %v644_v36, %v3398_v54  ;;  %v986_v45 = vmax.f32 %v547_v30, 0.0 }
 0x111   : > { %v987_v41 = vmax.f32 %v549_v29, 0.0  ;;  %v552_v42 = vpop.f32.mrb[10].mxu0  ;;  %2404 = vmatpush1.bf16.msra.mxu0 %v2403_v43  ;;  %v1195_v29 = vld [vmem:[%s4277_s3 + $0x308] sm:$0xff] }
 0x112   : > { %v553_v47 = vadd.f32 %v552_v42, %v3393_v40  ;;  %v554_v49 = vpop.f32.mrb[11].mxu0  ;;  %2406 = vmatprep.subr.bf16.mxu0 %v2405_v5  ;;  %v648_v56 = vpop.f32.mrb[10].mxu1  ;;  %v1190_v5 = vld [vmem:[%s4277_s3 + $0x2e0] sm:$0xff]  ;;  %v2421_v52 = vpack.c.bf16 %v1197_v31, %v1195_v29 }
 0x113   : > { %v555_v59 = vadd.f32 %v554_v49, %v3398_v54  ;;  %1326 = vmatprep.mubr.f32.mxu0 %v987_v41  ;;  %v3515_v63 = vadd.f32 %v648_v56, %v3393_v40  ;;  %v650_v0 = vpop.f32.mrb[11].mxu1  ;;  %v1196_v56 = vld [vmem:[%s4277_s3 + $0x310] sm:$0xff]  ;;  %v1202_v31 = vld [vmem:[%s4277_s3 + $0x340] sm:$0xff] }
 0x114   : > { %1327 = vmatmul.mubr.f32.gmra.mrb[40].mxu0 %v986_v45  ;;  %v3518_v2 = vadd.f32 %v650_v0, %v3398_v54  ;;  %v990_v13 = vmax.f32 %v553_v47, 0.0  ;;  %v2419_v45 = vpack.c.bf16 %v1192_v15, %v1190_v5  ;;  %v1201_v0 = vld [vmem:[%s4277_s3 + $0x338] sm:$0xff] }
 0x115   : > { %v991_v4 = vmax.f32 %v555_v59, 0.0  ;;  %v558_v8 = vpop.f32.mrb[12].mxu0  ;;  %2408 = vmatpush1.bf16.msra.mxu0 %v2407_v44 }
 0x116   : > { %v559_v14 = vadd.f32 %v558_v8, %v3393_v40  ;;  %v560_v16 = vpop.f32.mrb[13].mxu0  ;;  %2410 = vmatprep.subr.bf16.mxu0 %v2409_v50  ;;  %v654_v20 = vpop.f32.mrb[12].mxu1 }
 0x117   : > { %v561_v37 = vadd.f32 %v560_v16, %v3398_v54  ;;  %1332 = vmatprep.mubr.f32.mxu0 %v991_v4  ;;  %v3535_v22 = vadd.f32 %v654_v20, %v3393_v40  ;;  %v656_v26 = vpop.f32.mrb[13].mxu1  ;;  %v2423_v16 = vpack.c.bf16 %v1196_v56, %v1194_v55  ;;  %v2425_v20 = vpack.c.bf16 %v1201_v0, %v1199_v61 }
 0x118   : > { %1333 = vmatmul.mubr.f32.gmra.mrb[42].mxu0 %v990_v13  ;;  %v3538_v27 = vadd.f32 %v656_v26, %v3398_v54  ;;  %v994_v43 = vmax.f32 %v559_v14, 0.0 }
 0x119   : > { %v995_v18 = vmax.f32 %v561_v37, 0.0  ;;  %v564_v24 = vpop.f32.mrb[14].mxu0  ;;  %2412 = vmatpush1.bf16.msra.mxu0 %v2411_v10  ;;  %v1198_v37 = vld [vmem:[%s4277_s3 + $0x320] sm:$0xff] }
 0x11a   : > { %v565_v53 = vadd.f32 %v564_v24, %v3393_v40  ;;  %v566_v30 = vpop.f32.mrb[15].mxu0  ;;  %2414 = vmatprep.subr.bf16.mxu0 %v2413_v17  ;;  %v660_v25 = vpop.f32.mrb[14].mxu1  ;;  %v1205_v24 = vld [vmem:[%s4277_s3 + $0x358] sm:$0xff]  ;;  %v2427_v5 = vpack.c.bf16 %v1200_v51, %v1198_v37 }
 0x11b   : > { %v567_v28 = vadd.f32 %v566_v30, %v3398_v54  ;;  %1338 = vmatprep.mubr.f32.mxu0 %v995_v18  ;;  %v3555_v34 = vadd.f32 %v660_v25, %v3393_v40  ;;  %v662_v36 = vpop.f32.mrb[15].mxu1  ;;  %v1203_v18 = vld [vmem:[%s4277_s3 + $0x348] sm:$0xff] }
 0x11c   : > { %1339 = vmatmul.mubr.f32.gmra.mrb[44].mxu0 %v994_v43  ;;  %v3558_v41 = vadd.f32 %v662_v36, %v3398_v54  ;;  %v998_v47 = vmax.f32 %v565_v53, 0.0  ;;  %v2429_v29 = vpack.c.bf16 %v1205_v24, %v1203_v18  ;;  %v1204_v36 = vld [vmem:[%s4277_s3 + $0x350] sm:$0xff] }
 0x11d   : > { %v999_v42 = vmax.f32 %v567_v28, 0.0  ;;  %v570_v44 = vpop.f32.mrb[16].mxu0  ;;  %2416 = vmatpush1.bf16.msra.mxu0 %v2415_v39 }
 0x11e   : > { %v571_v49 = vadd.f32 %v570_v44, %v3393_v40  ;;  %v572_v50 = vpop.f32.mrb[17].mxu0  ;;  %2418 = vmatprep.subr.bf16.mxu0 %v2417_v57  ;;  %v666_v59 = vpop.f32.mrb[16].mxu1 }
 0x11f   : > { %v573_v60 = vadd.f32 %v572_v50, %v3398_v54  ;;  %1344 = vmatprep.mubr.f32.mxu0 %v999_v42  ;;  %v3575_v4 = vadd.f32 %v666_v59, %v3393_v40  ;;  %v668_v8 = vpop.f32.mrb[17].mxu1  ;;  %v2431_v59 = vpack.c.bf16 %v1204_v36, %v1202_v31  ;;  %v1217_v31 = vld [vmem:[%s4277_s3 + $0x3b8] sm:$0xff] }
 0x120   : > { %1345 = vmatmul.mubr.f32.gmra.mrb[46].mxu0 %v998_v47  ;;  %v3578_v10 = vadd.f32 %v668_v8, %v3398_v54  ;;  %v1002_v17 = vmax.f32 %v571_v49, 0.0  ;;  %v1209_v47 = vld [vmem:[%s4277_s3 + $0x378] sm:$0xff] }
 0x121   : > { %v1003_v13 = vmax.f32 %v573_v60, 0.0  ;;  %v576_v14 = vpop.f32.mrb[18].mxu0  ;;  %2420 = vmatpush1.bf16.msra.mxu0 %v2419_v45  ;;  %v1207_v45 = vld [vmem:[%s4277_s3 + $0x368] sm:$0xff] }
 0x122   : > { %v577_v58 = vadd.f32 %v576_v14, %v3393_v40  ;;  %v578_v19 = vpop.f32.mrb[19].mxu0  ;;  %2422 = vmatprep.subr.bf16.mxu0 %v2421_v52  ;;  %v672_v3 = vpop.f32.mrb[18].mxu1  ;;  %v2433_v8 = vpack.c.bf16 %v1209_v47, %v1207_v45  ;;  %v1208_v14 = vld [vmem:[%s4277_s3 + $0x370] sm:$0xff] }
 0x123   : > { %v579_v26 = vadd.f32 %v578_v19, %v3398_v54  ;;  %1350 = vmatprep.mubr.f32.mxu0 %v1003_v13  ;;  %v3595_v39 = vadd.f32 %v672_v3, %v3393_v40  ;;  %v674_v43 = vpop.f32.mrb[19].mxu1  ;;  %v1206_v13 = vld [vmem:[%s4277_s3 + $0x360] sm:$0xff]  ;;  %v1213_v19 = vld [vmem:[%s4277_s3 + $0x398] sm:$0xff] }
 0x124   : > { %1351 = vmatmul.mubr.f32.gmra.mrb[48].mxu0 %v1002_v17  ;;  %v3598_v53 = vadd.f32 %v674_v43, %v3398_v54  ;;  %v1006_v15 = vmax.f32 %v577_v58, 0.0  ;;  %v1211_v58 = vld [vmem:[%s4277_s3 + $0x388] sm:$0xff]  ;;  %v2435_v18 = vpack.c.bf16 %v1208_v14, %v1206_v13 }
 0x125   : > { %v1007_v30 = vmax.f32 %v579_v26, 0.0  ;;  %v582_v57 = vpop.f32.mrb[20].mxu0  ;;  %2424 = vmatpush1.bf16.msra.mxu0 %v2423_v16 }
 0x126   : > { %v583_v25 = vadd.f32 %v582_v57, %v3393_v40  ;;  %v584_v28 = vpop.f32.mrb[21].mxu0  ;;  %2426 = vmatprep.subr.bf16.mxu0 %v2425_v20  ;;  %v678_v42 = vpop.f32.mrb[20].mxu1  ;;  %v2437_v57 = vpack.c.bf16 %v1213_v19, %v1211_v58  ;;  %v1221_v58 = vld [vmem:[%s4277_s3 + $0x3d8] sm:$0xff] }
 0x127   : > { %v585_v44 = vadd.f32 %v584_v28, %v3398_v54  ;;  %1356 = vmatprep.mubr.f32.mxu0 %v1007_v30  ;;  %v3615_v49 = vadd.f32 %v678_v42, %v3393_v40  ;;  %v680_v50 = vpop.f32.mrb[21].mxu1 }
 0x128   : > { %1357 = vmatmul.mubr.f32.gmra.mrb[50].mxu0 %v1006_v15  ;;  %v3618_v52 = vadd.f32 %v680_v50, %v3398_v54  ;;  %v1010_v60 = vmax.f32 %v583_v25, 0.0  ;;  %v1212_v15 = vld [vmem:[%s4277_s3 + $0x390] sm:$0xff] }
 0x129   : > { %v1011_v55 = vmax.f32 %v585_v44, 0.0  ;;  %v588_v56 = vpop.f32.mrb[22].mxu0  ;;  %2428 = vmatpush1.bf16.msra.mxu0 %v2427_v5  ;;  %v1210_v5 = vld [vmem:[%s4277_s3 + $0x380] sm:$0xff] }
 0x12a   : > { %v589_v61 = vadd.f32 %v588_v56, %v3393_v40  ;;  %v590_v0 = vpop.f32.mrb[23].mxu0  ;;  %2430 = vmatprep.subr.bf16.mxu0 %v2429_v29  ;;  %v684_v16 = vpop.f32.mrb[22].mxu1  ;;  %v1215_v29 = vld [vmem:[%s4277_s3 + $0x3a8] sm:$0xff]  ;;  %v2439_v50 = vpack.c.bf16 %v1212_v15, %v1210_v5  ;;  %v1218_v5 = vld [vmem:[%s4277_s3 + $0x3c0] sm:$0xff]  ;;  %v1220_v15 = vld [vmem:[%s4277_s3 + $0x3d0] sm:$0xff] }
 0x12b   : > { %v591_v17 = vadd.f32 %v590_v0, %v3398_v54  ;;  %1362 = vmatprep.mubr.f32.mxu0 %v1011_v55  ;;  %v3635_v20 = vadd.f32 %v684_v16, %v3393_v40  ;;  %v686_v37 = vpop.f32.mrb[23].mxu1  ;;  %v1216_v0 = vld [vmem:[%s4277_s3 + $0x3b0] sm:$0xff] }
 0x12c   : > { %1363 = vmatmul.mubr.f32.gmra.mrb[52].mxu0 %v1010_v60  ;;  %v3638_v51 = vadd.f32 %v686_v37, %v3398_v54  ;;  %v1014_v24 = vmax.f32 %v589_v61, 0.0  ;;  %v2441_v60 = vpack.c.bf16 %v1217_v31, %v1215_v29  ;;  %v1214_v61 = vld [vmem:[%s4277_s3 + $0x3a0] sm:$0xff]  ;;  %v1223_v31 = vld [vmem:[%s4277_s3 + $0x3e8] sm:$0xff] }
 0x12d   : > { %v1015_v3 = vmax.f32 %v591_v17, 0.0  ;;  %v594_v26 = vpop.f32.mrb[24].mxu0  ;;  %2432 = vmatpush1.bf16.msra.mxu0 %v2431_v59  ;;  %v1219_v17 = vld [vmem:[%s4277_s3 + $0x3c8] sm:$0xff] }
 0x12e   : > { %v595_v43 = vadd.f32 %v594_v26, %v3393_v40  ;;  %v596_v30 = vpop.f32.mrb[25].mxu0  ;;  %2434 = vmatprep.subr.bf16.mxu0 %v2433_v8  ;;  %v690_v25 = vpop.f32.mrb[24].mxu1  ;;  %v2443_v26 = vpack.c.bf16 %v1216_v0, %v1214_v61 }
 0x12f   : > { %v597_v28 = vadd.f32 %v596_v30, %v3398_v54  ;;  %1368 = vmatprep.mubr.f32.mxu0 %v1015_v3  ;;  %v3655_v36 = vadd.f32 %v690_v25, %v3393_v40  ;;  %v692_v42 = vpop.f32.mrb[25].mxu1  ;;  %v2445_v30 = vpack.c.bf16 %v1221_v58, %v1219_v17 }
 0x130   : > { %1369 = vmatmul.mubr.f32.gmra.mrb[54].mxu0 %v1014_v24  ;;  %v3658_v44 = vadd.f32 %v692_v42, %v3398_v54  ;;  %v1018_v55 = vmax.f32 %v595_v43, 0.0  ;;  %v1225_v42 = vld [vmem:[%s4277_s3 + $0x3f8] sm:$0xff] }
 0x131   : > { %v1019_v45 = vmax.f32 %v597_v28, 0.0  ;;  %v600_v47 = vpop.f32.mrb[26].mxu0  ;;  %2436 = vmatpush1.bf16.msra.mxu0 %v2435_v18  ;;  %v2449_v0 = vpack.c.bf16 %v1225_v42, %v1223_v31 }
 0x132   : > { %v601_v56 = vadd.f32 %v600_v47, %v3393_v40  ;;  %v602_v59 = vpop.f32.mrb[27].mxu0  ;;  %2438 = vmatprep.subr.bf16.mxu0 %v2437_v57  ;;  %v696_v8 = vpop.f32.mrb[26].mxu1 }
 0x133   : > { %v603_v13 = vadd.f32 %v602_v59, %v3398_v54  ;;  %1374 = vmatprep.mubr.f32.mxu0 %v1019_v45  ;;  %v3669_v14 = vadd.f32 %v696_v8, %v3393_v40  ;;  %v698_v16 = vpop.f32.mrb[27].mxu1  ;;  %v1222_v8 = vld [vmem:[%s4277_s3 + $0x3e0] sm:$0xff] }
 0x134   : > { %1375 = vmatmul.mubr.f32.gmra.mrb[56].mxu0 %v1018_v55  ;;  %v3678_v19 = vadd.f32 %v698_v16, %v3398_v54  ;;  %v1022_v18 = vmax.f32 %v601_v56, 0.0  ;;  %v2447_v55 = vpack.c.bf16 %v1220_v15, %v1218_v5  ;;  %v1038_v15 = vmax.f32 %v3435_v46, 0.0 }
 0x135   : > { %v1023_v37 = vmax.f32 %v603_v13, 0.0  ;;  %v606_v3 = vpop.f32.mrb[28].mxu0  ;;  %2440 = vmatpush1.bf16.msra.mxu0 %v2439_v50  ;;  %v1224_v13 = vld [vmem:[%s4277_s3 + $0x3f0] sm:$0xff]  ;;  %v1046_v46 = vmax.f32 %v3475_v6, 0.0  ;;  %v1054_v6 = vmax.f32 %v3515_v63, 0.0  ;;  %v1816_v63 = vld [vmem:[%s4279_s5] sm:$0xff] }
 0x136   : > { %v607_v24 = vadd.f32 %v606_v3, %v3393_v40  ;;  %v608_v43 = vpop.f32.mrb[29].mxu0  ;;  %2442 = vmatprep.subr.bf16.mxu0 %v2441_v60  ;;  %v702_v57 = vpop.f32.mrb[28].mxu1 }
 0x137   : > { %v609_v25 = vadd.f32 %v608_v43, %v3398_v54  ;;  %1380 = vmatprep.mubr.f32.mxu0 %v1023_v37  ;;  %v3689_v28 = vadd.f32 %v702_v57, %v3393_v40  ;;  %v704_v29 = vpop.f32.mrb[29].mxu1 }
 0x138   : > { %1381 = vmatmul.mubr.f32.gmra.mrb[58].mxu0 %v1022_v18  ;;  %v3698_v45 = vadd.f32 %v704_v29, %v3398_v54  ;;  %v1026_v56 = vmax.f32 %v607_v24, 0.0  ;;  %v2451_v18 = vpack.c.bf16 %v1224_v13, %v1222_v8  ;;  %v2696_v8 = vmov 0.0|0.0  }
 0x139   : > { %v1027_v47 = vmax.f32 %v609_v25, 0.0  ;;  %v612_v50 = vpop.f32.mrb[30].mxu0  ;;  %2444 = vmatpush1.bf16.msra.mxu0 %v2443_v26  ;;  %v1035_v26 = vmax.f32 %v3418_v12, 0.0  ;;  %v1043_v12 = vmax.f32 %v3458_v11, 0.0  ;;  %v1051_v11 = vmax.f32 %v3498_v38, 0.0  ;;  %2453 = vmatprep.subr.bf16.mxu1 %v2696_v8 }
 0x13a   : > { %v613_v59 = vadd.f32 %v612_v50, %v3393_v40  ;;  %v614_v60 = vpop.f32.mrb[31].mxu0  ;;  %2446 = vmatprep.subr.bf16.mxu0 %v2445_v30  ;;  %v708_v61 = vpop.f32.mrb[30].mxu1  ;;  %v1059_v38 = vmax.f32 %v3538_v27, 0.0  ;;  %v1067_v27 = vmax.f32 %v3578_v10, 0.0  ;;  %v1071_v10 = vmax.f32 %v3598_v53, 0.0  ;;  %v1819_v53 = vld [vmem:[%s4279_s5 + $0x18] sm:$0xff] }
 0x13b   : > { %v615_v16 = vadd.f32 %v614_v60, %v3398_v54  ;;  %1386 = vmatprep.mubr.f32.mxu0 %v1027_v47  ;;  %v3709_v17 = vadd.f32 %v708_v61, %v3393_v40  ;;  %v710_v58 = vpop.f32.mrb[31].mxu1  ;;  %v1039_v40 = vmax.f32 %v3438_v48, 0.0  ;;  %v1047_v48 = vmax.f32 %v3478_v7, 0.0 }
 0x13c   : > { %1387 = vmatmul.mubr.f32.gmra.mrb[60].mxu0 %v1026_v56  ;;  %v3712_v37 = vadd.f32 %v710_v58, %v3398_v54  ;;  %v1030_v24 = vmax.f32 %v613_v59, 0.0  ;;  %v1034_v54 = vmax.f32 %v3415_v1, 0.0  ;;  %v1042_v1 = vmax.f32 %v3455_v9, 0.0 }
 0x13d   : > { %v1031_v3 = vmax.f32 %v615_v16, 0.0  ;;  %2448 = vmatpush1.bf16.msra.mxu0 %v2447_v55  ;;  %v1055_v7 = vmax.f32 %v3518_v2, 0.0  ;;  %v1050_v9 = vmax.f32 %v3495_v35, 0.0  ;;  %v1063_v2 = vmax.f32 %v3558_v41, 0.0  ;;  %v1817_v41 = vld [vmem:[%s4279_s5 + $0x8] sm:$0xff] }
 0x13e   : > { %2450 = vmatprep.subr.bf16.mxu0 %v2449_v0  ;;  %v3715_v43 = vpop.f32.mrb[32].mxu1  ;;  %v1058_v35 = vmax.f32 %v3535_v22, 0.0  ;;  %v1062_v22 = vmax.f32 %v3555_v34, 0.0  ;;  %v2454_v16 = vpack.c.bf16 %v1817_v41, %v1816_v63  ;;  %v1075_v34 = vmax.f32 %v3618_v52, 0.0 }
 0x13f   : > { %1392 = vmatprep.mubr.f32.mxu0 %v1031_v3  ;;  %v3717_v30 = vpop.f32.mrb[33].mxu1  ;;  %v1066_v3 = vmax.f32 %v3575_v4, 0.0  ;;  %v1079_v52 = vmax.f32 %v3638_v51, 0.0  ;;  %v1821_v51 = vld [vmem:[%s4279_s5 + $0x28] sm:$0xff] }
 0x140   : > { %1393 = vmatmul.mubr.f32.gmra.mrb[62].mxu0 %v1030_v24  ;;  %2455 = vmatpush1.bf16.msra.mxu1 %v2454_v16  ;;  %v1818_v24 = vld [vmem:[%s4279_s5 + $0x10] sm:$0xff]  ;;  %v1090_v16 = vmax.f32 %v3689_v28, 0.0  ;;  %v1094_v28 = vmax.f32 %v3709_v17, 0.0 }
 0x141   : > { %1398 = vmatprep.mubr.f32.mxu0 %v1035_v26  ;;  %2452 = vmatpush1.bf16.msra.mxu0 %v2451_v18  ;;  %v2457_v4 = vpack.c.bf16 %v1819_v53, %v1818_v24  ;;  %v780_v24 = vadd.f32 %v3715_v43, %v2825_v32 }
 0x142   : > { %v3721_v57 = vpop.f32.mrb[34].mxu1  ;;  %2456 = vmatprep.subr.bf16.mxu1 %v2696_v8 }
 0x143   : > { %v3723_v5 = vpop.f32.mrb[35].mxu1 }
 0x144   : > { %1399 = vmatmul.mubr.f32.gmra.mrb[64].mxu0 %v1034_v54  ;;  %2458 = vmatpush1.bf16.msra.mxu1 %v2457_v4 }
 0x145   : > { %1404 = vmatprep.mubr.f32.mxu0 %v1039_v40  ;;  %v1070_v40 = vmax.f32 %v3595_v39, 0.0  ;;  %2459 = vmatprep.subr.bf16.mxu1 %v2696_v8  ;;  %v1083_v39 = vmax.f32 %v3658_v44, 0.0  ;;  %v1087_v44 = vmax.f32 %v3678_v19, 0.0  ;;  %v1823_v19 = vld [vmem:[%s4279_s5 + $0x38] sm:$0xff] }
 0x146   : > { %v3727_v25 = vpop.f32.mrb[36].mxu1 }
 0x147   : > { %v3729_v29 = vpop.f32.mrb[37].mxu1 }
 0x148   : > { %1405 = vmatmul.mubr.f32.gmra.mrb[66].mxu0 %v1038_v15  ;;  %v1074_v15 = vmax.f32 %v3615_v49, 0.0  ;;  %v794_v17 = vadd.f32 %v3729_v29, %v2828_v33 }
 0x149   : > { %1410 = vmatprep.mubr.f32.mxu0 %v1043_v12 }
 0x14a   : > { %v3733_v31 = vpop.f32.mrb[38].mxu1 }
 0x14b   : > { %v3735_v42 = vpop.f32.mrb[39].mxu1 }
 0x14c   : > { %1411 = vmatmul.mubr.f32.gmra.mrb[68].mxu0 %v1042_v1 }
 0x14d   : > { %1416 = vmatprep.mubr.f32.mxu0 %v1047_v48 }
 0x14e   : > { %v3739_v47 = vpop.f32.mrb[40].mxu1 }
 0x14f   : > { %v3741_v50 = vpop.f32.mrb[41].mxu1 }
 0x150   : > { %1417 = vmatmul.mubr.f32.gmra.mrb[70].mxu0 %v1046_v46  ;;  %v1078_v46 = vmax.f32 %v3635_v20, 0.0  ;;  %v1091_v20 = vmax.f32 %v3698_v45, 0.0  ;;  %v1095_v45 = vmax.f32 %v3712_v37, 0.0  ;;  %v1824_v37 = vld [vmem:[%s4279_s5 + $0x40] sm:$0xff] }
 0x151   : > { %1422 = vmatprep.mubr.f32.mxu0 %v1051_v11  ;;  %v1820_v11 = vld [vmem:[%s4279_s5 + $0x20] sm:$0xff] }
 0x152   : > { %v3745_v55 = vpop.f32.mrb[42].mxu1  ;;  %v2460_v49 = vpack.c.bf16 %v1821_v51, %v1820_v11  ;;  %v1829_v11 = vld [vmem:[%s4279_s5 + $0x68] sm:$0xff]  ;;  %v972_v51 = vmax.f32 %v780_v24, 0.0 }
 0x153   : > { %v3747_v56 = vpop.f32.mrb[43].mxu1 }
 0x154   : > { %1423 = vmatmul.mubr.f32.gmra.mrb[72].mxu0 %v1050_v9  ;;  %2461 = vmatpush1.bf16.msra.mxu1 %v2460_v49 }
 0x155   : > { %1428 = vmatprep.mubr.f32.mxu0 %v1055_v7  ;;  %2462 = vmatprep.subr.bf16.mxu1 %v2696_v8 }
 0x156   : > { %v3751_v59 = vpop.f32.mrb[44].mxu1 }
 0x157   : > { %v3753_v60 = vpop.f32.mrb[45].mxu1 }
 0x158   : > { %1429 = vmatmul.mubr.f32.gmra.mrb[74].mxu0 %v1054_v6 }
 0x159   : > { %1434 = vmatprep.mubr.f32.mxu0 %v1059_v38  ;;  %v1082_v38 = vmax.f32 %v3655_v36, 0.0 }
 0x15a   : > { %v3757_v61 = vpop.f32.mrb[46].mxu1 }
 0x15b   : > { %v3759_v0 = vpop.f32.mrb[47].mxu1 }
 0x15c   : > { %1435 = vmatmul.mubr.f32.gmra.mrb[76].mxu0 %v1058_v35  ;;  %v1822_v35 = vld [vmem:[%s4279_s5 + $0x30] sm:$0xff] }
 0x15d   : > { %1440 = vmatprep.mubr.f32.mxu0 %v1063_v2  ;;  %v2463_v36 = vpack.c.bf16 %v1823_v19, %v1822_v35  ;;  %v1830_v35 = vld [vmem:[%s4279_s5 + $0x70] sm:$0xff] }
 0x15e   : > { %v3770_v13 = vpop.f32.mrb[48].mxu1 }
 0x15f   : > { %v3772_v58 = vpop.f32.mrb[49].mxu1  ;;  %2464 = vmatpush1.bf16.msra.mxu1 %v2463_v36 }
 0x160   : > { %1441 = vmatmul.mubr.f32.gmra.mrb[78].mxu0 %v1062_v22  ;;  %v782_v22 = vadd.f32 %v3717_v30, %v2828_v33  ;;  %2465 = vmatprep.subr.bf16.mxu1 %v2696_v8  ;;  %v1825_v30 = vld [vmem:[%s4279_s5 + $0x48] sm:$0xff] }
 0x161   : > { %1446 = vmatprep.mubr.f32.mxu0 %v1067_v27  ;;  %v1086_v27 = vmax.f32 %v3669_v14, 0.0 }
 0x162   : > { %v3777_v26 = vpop.f32.mrb[50].mxu1 }
 0x163   : > { %v3779_v18 = vpop.f32.mrb[51].mxu1 }
 0x164   : > { %1447 = vmatmul.mubr.f32.gmra.mrb[80].mxu0 %v1066_v3  ;;  %v973_v3 = vmax.f32 %v782_v22, 0.0 }
 0x165   : > { %1452 = vmatprep.mubr.f32.mxu0 %v1071_v10 }
 0x166   : > { %v3789_v54 = vpop.f32.mrb[52].mxu1 }
 0x167   : > { %v3791_v12 = vpop.f32.mrb[53].mxu1 }
 0x168   : > { %1453 = vmatmul.mubr.f32.gmra.mrb[82].mxu0 %v1070_v40  ;;  %v2466_v40 = vpack.c.bf16 %v1825_v30, %v1824_v37  ;;  %v798_v37 = vadd.f32 %v3733_v31, %v2825_v32  ;;  %v1835_v31 = vld [vmem:[%s4279_s5 + $0x98] sm:$0xff] }
 0x169   : > { %1458 = vmatprep.mubr.f32.mxu0 %v1075_v34  ;;  %v788_v34 = vadd.f32 %v3723_v5, %v2828_v33  ;;  %v1826_v5 = vld [vmem:[%s4279_s5 + $0x50] sm:$0xff] }
 0x16a   : > { %v3796_v48 = vpop.f32.mrb[54].mxu1  ;;  %2467 = vmatpush1.bf16.msra.mxu1 %v2466_v40  ;;  %v812_v40 = vadd.f32 %v3747_v56, %v2828_v33 }
 0x16b   : > { %v3798_v1 = vpop.f32.mrb[55].mxu1  ;;  %2468 = vmatprep.subr.bf16.mxu1 %v2696_v8 }
 0x16c   : > { %1459 = vmatmul.mubr.f32.gmra.mrb[84].mxu0 %v1074_v15  ;;  %v977_v15 = vmax.f32 %v788_v34, 0.0 }
 0x16d   : > { %1464 = vmatprep.mubr.f32.mxu0 %v1079_v52  ;;  %v1827_v52 = vld [vmem:[%s4279_s5 + $0x58] sm:$0xff] }
 0x16e   : > { %v3808_v7 = vpop.f32.mrb[56].mxu1  ;;  %v2469_v43 = vpack.c.bf16 %v1827_v52, %v1826_v5  ;;  %v1834_v5 = vld [vmem:[%s4279_s5 + $0x90] sm:$0xff]  ;;  %v984_v52 = vmax.f32 %v798_v37, 0.0 }
 0x16f   : > { %v3810_v9 = vpop.f32.mrb[57].mxu1  ;;  %v2481_v56 = vpack.c.bf16 %v1835_v31, %v1834_v5  ;;  %v836_v31 = vadd.f32 %v3779_v18, %v2828_v33 }
 0x170   : > { %1465 = vmatmul.mubr.f32.gmra.mrb[86].mxu0 %v1078_v46  ;;  %v786_v46 = vadd.f32 %v3721_v57, %v2825_v32  ;;  %2470 = vmatpush1.bf16.msra.mxu1 %v2469_v43  ;;  %v1831_v57 = vld [vmem:[%s4279_s5 + $0x78] sm:$0xff] }
 0x171   : > { %1470 = vmatprep.mubr.f32.mxu0 %v1083_v39  ;;  %v1828_v39 = vld [vmem:[%s4279_s5 + $0x60] sm:$0xff]  ;;  %2471 = vmatprep.subr.bf16.mxu1 %v2696_v8 }
 0x172   : > { %v3815_v6 = vpop.f32.mrb[58].mxu1  ;;  %v2472_v29 = vpack.c.bf16 %v1829_v11, %v1828_v39  ;;  %v976_v19 = vmax.f32 %v786_v46, 0.0  ;;  %v993_v39 = vmax.f32 %v812_v40, 0.0  ;;  %v818_v11 = vadd.f32 %v3753_v60, %v2828_v33 }
 0x173   : > { %v3817_v2 = vpop.f32.mrb[59].mxu1 }
 0x174   : > { %1471 = vmatmul.mubr.f32.gmra.mrb[88].mxu0 %v1082_v38  ;;  %v981_v38 = vmax.f32 %v794_v17, 0.0  ;;  %2473 = vmatpush1.bf16.msra.mxu1 %v2472_v29  ;;  %v810_v29 = vadd.f32 %v3745_v55, %v2825_v32  ;;  %v1839_v55 = vld [vmem:[%s4279_s5 + $0xb8] sm:$0xff] }
 0x175   : > { %1476 = vmatprep.mubr.f32.mxu0 %v1087_v44  ;;  %2474 = vmatprep.subr.bf16.mxu1 %v2696_v8 }
 0x176   : > { %v3827_v63 = vpop.f32.mrb[60].mxu1 }
 0x177   : > { %v3829_v41 = vpop.f32.mrb[61].mxu1 }
 0x178   : > { %1477 = vmatmul.mubr.f32.gmra.mrb[90].mxu0 %v1086_v27  ;;  %v792_v27 = vadd.f32 %v3727_v25, %v2825_v32  ;;  %v1833_v25 = vld [vmem:[%s4279_s5 + $0x88] sm:$0xff] }
 0x179   : > { %1482 = vmatprep.mubr.f32.mxu0 %v1091_v20  ;;  %v800_v20 = vadd.f32 %v3735_v42, %v2828_v33  ;;  %v2475_v42 = vpack.c.bf16 %v1831_v57, %v1830_v35  ;;  %v997_v35 = vmax.f32 %v818_v11, 0.0  ;;  %v824_v57 = vadd.f32 %v3759_v0, %v2828_v33 }
 0x17a   : > { %v3836_v10 = vpop.f32.mrb[62].mxu1  ;;  %v980_v34 = vmax.f32 %v792_v27, 0.0  ;;  %v992_v27 = vmax.f32 %v810_v29, 0.0 }
 0x17b   : > { %v3838_v14 = vpop.f32.mrb[63].mxu1  ;;  %v985_v22 = vmax.f32 %v800_v20, 0.0  ;;  %2476 = vmatpush1.bf16.msra.mxu1 %v2475_v42  ;;  %v816_v42 = vadd.f32 %v3751_v59, %v2825_v32  ;;  %v1841_v59 = vld [vmem:[%s4279_s5 + $0xc8] sm:$0xff] }
 0x17c   : > { %1483 = vmatmul.mubr.f32.gmra.mrb[92].mxu0 %v1090_v16  ;;  %v806_v16 = vadd.f32 %v3741_v50, %v2828_v33  ;;  %2477 = vmatprep.subr.bf16.mxu1 %v2696_v8 }
 0x17d   : > { %1488 = vmatprep.mubr.f32.mxu0 %v1095_v45  ;;  %v996_v37 = vmax.f32 %v816_v42, 0.0 }
 0x17e   : > { %v3851_v53 = vpop.f32.mrb[64].mxu1  ;;  %v989_v24 = vmax.f32 %v806_v16, 0.0 }
 0x17f   : > { %v3853_v4 = vpop.f32.mrb[65].mxu1 }
 0x180   : > { %1489 = vmatmul.mubr.f32.gmra.mrb[94].mxu0 %v1094_v28 }
 0x181   : > { %1559 = vmatprep.mubr.f32.mxu0 %v973_v3  ;;  %v1832_v3 = vld [vmem:[%s4279_s5 + $0x80] sm:$0xff] }
 0x182   : > { %v3872_v49 = vpop.f32.mrb[66].mxu1  ;;  %v2478_v50 = vpack.c.bf16 %v1833_v25, %v1832_v3  ;;  %v1001_v3 = vmax.f32 %v824_v57, 0.0  ;;  %v830_v25 = vadd.f32 %v3772_v58, %v2828_v33 }
 0x183   : > { %v3874_v44 = vpop.f32.mrb[67].mxu1 }
 0x184   : > { %1560 = vmatmul.mubr.f32.vlgmr.msra.gmra.mrb[32].mxu0 %v972_v51  ;;  %2479 = vmatpush1.bf16.msra.mxu1 %v2478_v50  ;;  %v1836_v51 = vld [vmem:[%s4279_s5 + $0xa0] sm:$0xff]  ;;  %v822_v50 = vadd.f32 %v3757_v61, %v2825_v32  ;;  %v1005_v5 = vmax.f32 %v830_v25, 0.0  ;;  %v1843_v61 = vld [vmem:[%s4279_s5 + $0xd8] sm:$0xff] }
 0x185   : > { %1565 = vmatprep.mubr.f32.mxu0 %v977_v15  ;;  %v804_v15 = vadd.f32 %v3739_v47, %v2825_v32  ;;  %2480 = vmatprep.subr.bf16.mxu1 %v2696_v8  ;;  %v1837_v47 = vld [vmem:[%s4279_s5 + $0xa8] sm:$0xff] }
 0x186   : > { %v3887_v36 = vpop.f32.mrb[68].mxu1  ;;  %v2484_v60 = vpack.c.bf16 %v1837_v47, %v1836_v51  ;;  %v1009_v51 = vmax.f32 %v836_v31, 0.0  ;;  %v842_v47 = vadd.f32 %v3791_v12, %v2828_v33  ;;  %v860_v31 = vadd.f32 %v3817_v2, %v2828_v33 }
 0x187   : > { %v3889_v45 = vpop.f32.mrb[69].mxu1  ;;  %v988_v46 = vmax.f32 %v804_v15, 0.0  ;;  %v1000_v15 = vmax.f32 %v822_v50, 0.0  ;;  %v846_v50 = vadd.f32 %v3796_v48, %v2825_v32 }
 0x188   : > { %1566 = vmatmul.mubr.f32.gmra.mrb[34].mxu0 %v976_v19  ;;  %2482 = vmatpush1.bf16.msra.mxu1 %v2481_v56  ;;  %v1838_v19 = vld [vmem:[%s4279_s5 + $0xb0] sm:$0xff]  ;;  %v828_v56 = vadd.f32 %v3770_v13, %v2825_v32  ;;  %v1845_v13 = vld [vmem:[%s4279_s5 + $0xe8] sm:$0xff]  ;;  %v1025_v48 = vmax.f32 %v860_v31, 0.0 }
 0x189   : > { %1571 = vmatprep.mubr.f32.mxu0 %v981_v38  ;;  %2483 = vmatprep.subr.bf16.mxu1 %v2696_v8  ;;  %v2487_v0 = vpack.c.bf16 %v1839_v55, %v1838_v19  ;;  %v1013_v19 = vmax.f32 %v842_v47, 0.0  ;;  %v848_v55 = vadd.f32 %v3798_v1, %v2828_v33  ;;  %v872_v47 = vadd.f32 %v3838_v14, %v2828_v33 }
 0x18a   : > { %v3902_v30 = vpop.f32.mrb[70].mxu1  ;;  %v1004_v29 = vmax.f32 %v828_v56, 0.0 }
 0x18b   : > { %v3904_v28 = vpop.f32.mrb[71].mxu1 }
 0x18c   : > { %1572 = vmatmul.mubr.f32.gmra.mrb[36].mxu0 %v980_v34  ;;  %2485 = vmatpush1.bf16.msra.mxu1 %v2484_v60  ;;  %v1840_v34 = vld [vmem:[%s4279_s5 + $0xc0] sm:$0xff]  ;;  %v834_v60 = vadd.f32 %v3777_v26, %v2825_v32  ;;  %v1847_v26 = vld [vmem:[%s4279_s5 + $0xf8] sm:$0xff] }
 0x18d   : > { %1577 = vmatprep.mubr.f32.mxu0 %v985_v22  ;;  %2486 = vmatprep.subr.bf16.mxu1 %v2696_v8  ;;  %v2490_v58 = vpack.c.bf16 %v1841_v59, %v1840_v34  ;;  %v1017_v34 = vmax.f32 %v848_v55, 0.0  ;;  %v854_v59 = vadd.f32 %v3810_v9, %v2828_v33  ;;  %v852_v9 = vadd.f32 %v3808_v7, %v2825_v32 }
 0x18e   : > { %v3917_v17 = vpop.f32.mrb[72].mxu1  ;;  %v1008_v42 = vmax.f32 %v834_v60, 0.0  ;;  %v878_v60 = vadd.f32 %v3853_v4, %v2828_v33 }
 0x18f   : > { %v3919_v43 = vpop.f32.mrb[73].mxu1  ;;  %v1020_v56 = vmax.f32 %v852_v9, 0.0 }
 0x190   : > { %1578 = vmatmul.mubr.f32.gmra.mrb[38].mxu0 %v984_v52  ;;  %2488 = vmatpush1.bf16.msra.mxu1 %v2487_v0  ;;  %v1842_v52 = vld [vmem:[%s4279_s5 + $0xd0] sm:$0xff]  ;;  %v840_v0 = vadd.f32 %v3789_v54, %v2825_v32 }
 0x191   : > { %1583 = vmatprep.mubr.f32.mxu0 %v989_v24  ;;  %2489 = vmatprep.subr.bf16.mxu1 %v2696_v8  ;;  %v2493_v18 = vpack.c.bf16 %v1843_v61, %v1842_v52  ;;  %v1016_v52 = vmax.f32 %v846_v50, 0.0 }
 0x192   : > { %v3932_v38 = vpop.f32.mrb[74].mxu1 }
 0x193   : > { %v3934_v20 = vpop.f32.mrb[75].mxu1 }
 0x194   : > { %1584 = vmatmul.mubr.f32.gmra.mrb[40].mxu0 %v988_v46  ;;  %2491 = vmatpush1.bf16.msra.mxu1 %v2490_v58  ;;  %v1844_v46 = vld [vmem:[%s4279_s5 + $0xe0] sm:$0xff] }
 0x195   : > { %1589 = vmatprep.mubr.f32.mxu0 %v993_v39  ;;  %2492 = vmatprep.subr.bf16.mxu1 %v2696_v8  ;;  %v2496_v12 = vpack.c.bf16 %v1845_v13, %v1844_v46  ;;  %v864_v13 = vadd.f32 %v3827_v63, %v2825_v32  ;;  %v1037_v63 = vmax.f32 %v878_v60, 0.0 }
 0x196   : > { %v3947_v22 = vpop.f32.mrb[76].mxu1 }
 0x197   : > { %v3949_v16 = vpop.f32.mrb[77].mxu1 }
 0x198   : > { %1590 = vmatmul.mubr.f32.gmra.mrb[42].mxu0 %v992_v27  ;;  %2494 = vmatpush1.bf16.msra.mxu1 %v2493_v18  ;;  %v1846_v27 = vld [vmem:[%s4279_s5 + $0xf0] sm:$0xff]  ;;  %v858_v18 = vadd.f32 %v3815_v6, %v2825_v32  ;;  %v1033_v6 = vmax.f32 %v872_v47, 0.0 }
 0x199   : > { %1595 = vmatprep.mubr.f32.mxu0 %v997_v35  ;;  %2495 = vmatprep.subr.bf16.mxu1 %v2696_v8  ;;  %v2499_v1 = vpack.c.bf16 %v1847_v26, %v1846_v27  ;;  %v884_v27 = vadd.f32 %v3874_v44, %v2828_v33  ;;  %v896_v44 = vadd.f32 %v3904_v28, %v2828_v33 }
 0x19a   : > { %v3962_v24 = vpop.f32.mrb[78].mxu1  ;;  %v1024_v46 = vmax.f32 %v858_v18, 0.0  ;;  %v908_v28 = vadd.f32 %v3934_v20, %v2828_v33 }
 0x19b   : > { %v3964_v40 = vpop.f32.mrb[79].mxu1  ;;  %v1041_v4 = vmax.f32 %v884_v27, 0.0 }
 0x19c   : > { %1596 = vmatmul.mubr.f32.gmra.mrb[44].mxu0 %v996_v37  ;;  %2497 = vmatpush1.bf16.msra.mxu1 %v2496_v12  ;;  %v1012_v37 = vmax.f32 %v840_v0, 0.0  ;;  %v1028_v12 = vmax.f32 %v864_v13, 0.0  ;;  %v920_v20 = vadd.f32 %v3964_v40, %v2828_v33 }
 0x19d   : > { %1601 = vmatprep.mubr.f32.mxu0 %v1001_v3  ;;  %2498 = vmatprep.subr.bf16.mxu1 %v2696_v8 }
 0x19e   : > { %v3977_v39 = vpop.f32.mrb[80].mxu1 }
 0x19f   : > { %v3979_v11 = vpop.f32.mrb[81].mxu1 }
 0x1a0   : > { %1602 = vmatmul.mubr.f32.gmra.mrb[46].mxu0 %v1000_v15  ;;  %2500 = vmatpush1.bf16.msra.mxu1 %v2499_v1  ;;  %v866_v15 = vadd.f32 %v3829_v41, %v2828_v33  ;;  %v882_v1 = vadd.f32 %v3872_v49, %v2825_v32  ;;  %v894_v49 = vadd.f32 %v3902_v30, %v2825_v32 }
 0x1a1   : > { %1607 = vmatprep.mubr.f32.mxu0 %v1005_v5  ;;  %v1021_v5 = vmax.f32 %v854_v59, 0.0  ;;  %v906_v30 = vadd.f32 %v3932_v38, %v2825_v32  ;;  %v918_v38 = vadd.f32 %v3962_v24, %v2825_v32 }
 0x1a2   : > { %v3992_v35 = vpop.f32.mrb[82].mxu1  ;;  %v1029_v7 = vmax.f32 %v866_v15, 0.0  ;;  %v1040_v59 = vmax.f32 %v882_v1, 0.0  ;;  %v1048_v31 = vmax.f32 %v894_v49, 0.0 }
 0x1a3   : > { %v3994_v57 = vpop.f32.mrb[83].mxu1  ;;  %v1056_v15 = vmax.f32 %v906_v30, 0.0  ;;  %v1064_v47 = vmax.f32 %v918_v38, 0.0  ;;  %v930_v24 = vadd.f32 %v3992_v35, %v2825_v32 }
 0x1a4   : > { %1608 = vmatmul.mubr.f32.gmra.mrb[48].mxu0 %v1004_v29  ;;  %v932_v40 = vadd.f32 %v3994_v57, %v2828_v33 }
 0x1a5   : > { %1613 = vmatprep.mubr.f32.mxu0 %v1009_v51  ;;  %v1072_v60 = vmax.f32 %v930_v24, 0.0 }
 0x1a6   : > { %v4007_v3 = vpop.f32.mrb[84].mxu1 }
 0x1a7   : > { %v4009_v25 = vpop.f32.mrb[85].mxu1 }
 0x1a8   : > { %1614 = vmatmul.mubr.f32.gmra.mrb[50].mxu0 %v1008_v42  ;;  %v876_v42 = vadd.f32 %v3851_v53, %v2825_v32  ;;  %v888_v53 = vadd.f32 %v3887_v36, %v2825_v32  ;;  %v900_v36 = vadd.f32 %v3917_v17, %v2825_v32  ;;  %v912_v17 = vadd.f32 %v3947_v22, %v2825_v32 }
 0x1a9   : > { %1619 = vmatprep.mubr.f32.mxu0 %v1013_v19  ;;  %v870_v19 = vadd.f32 %v3836_v10, %v2825_v32  ;;  %v890_v10 = vadd.f32 %v3889_v45, %v2828_v33  ;;  %v902_v45 = vadd.f32 %v3919_v43, %v2828_v33  ;;  %v914_v43 = vadd.f32 %v3949_v16, %v2828_v33 }
 0x1aa   : > { %v4016_v58 = vpop.f32.mrb[86].mxu1  ;;  %v1036_v0 = vmax.f32 %v876_v42, 0.0  ;;  %v1044_v50 = vmax.f32 %v888_v53, 0.0  ;;  %v1052_v9 = vmax.f32 %v900_v36, 0.0  ;;  %v926_v16 = vadd.f32 %v3979_v11, %v2828_v33 }
 0x1ab   : > { %v4018_v54 = vpop.f32.mrb[87].mxu1  ;;  %v1032_v26 = vmax.f32 %v870_v19, 0.0  ;;  %v1060_v18 = vmax.f32 %v912_v17, 0.0  ;;  %v924_v22 = vadd.f32 %v3977_v39, %v2825_v32  ;;  %v938_v11 = vadd.f32 %v4009_v25, %v2828_v33 }
 0x1ac   : > { %1620 = vmatmul.mubr.f32.gmra.mrb[52].mxu0 %v1012_v37  ;;  %v1049_v37 = vmax.f32 %v896_v44, 0.0  ;;  %v944_v57 = vadd.f32 %v4018_v54, %v2828_v33  ;;  %v936_v39 = vadd.f32 %v4007_v3, %v2825_v32  ;;  %v942_v35 = vadd.f32 %v4016_v58, %v2825_v32 }
 0x1ad   : > { %1625 = vmatprep.mubr.f32.mxu0 %v1017_v34  ;;  %v1045_v34 = vmax.f32 %v890_v10, 0.0  ;;  %v1068_v13 = vmax.f32 %v924_v22, 0.0 }
 0x1ae   : > { %v4024_v8 = vpop.f32.mrb[88].mxu1  ;;  %v1076_v19 = vmax.f32 %v936_v39, 0.0  ;;  %v1080_v27 = vmax.f32 %v942_v35, 0.0 }
 0x1af   : > { %v4026_v61 = vpop.f32.mrb[89].mxu1  ;;  %v948_v3 = vadd.f32 %v4024_v8, %v2825_v32 }
 0x1b0   : > { %1626 = vmatmul.mubr.f32.gmra.mrb[54].mxu0 %v1016_v52  ;;  %v1057_v52 = vmax.f32 %v908_v28, 0.0  ;;  %v950_v25 = vadd.f32 %v4026_v61, %v2828_v33 }
 0x1b1   : > { %1631 = vmatprep.mubr.f32.mxu0 %v1021_v5  ;;  %v1053_v5 = vmax.f32 %v902_v45, 0.0  ;;  %v1084_v42 = vmax.f32 %v948_v3, 0.0 }
 0x1b2   : > { %v4032_v51 = vpop.f32.mrb[90].mxu1 }
 0x1b3   : > { %v4034_v2 = vpop.f32.mrb[91].mxu1  ;;  %v954_v58 = vadd.f32 %v4032_v51, %v2825_v32 }
 0x1b4   : > { %1632 = vmatmul.mubr.f32.gmra.mrb[56].mxu0 %v1020_v56  ;;  %v1065_v56 = vmax.f32 %v920_v20, 0.0  ;;  %v956_v54 = vadd.f32 %v4034_v2, %v2828_v33 }
 0x1b5   : > { %1637 = vmatprep.mubr.f32.mxu0 %v1025_v48  ;;  %v1061_v48 = vmax.f32 %v914_v43, 0.0  ;;  %v1088_v10 = vmax.f32 %v954_v58, 0.0 }
 0x1b6   : > { %v4040_v29 = vpop.f32.mrb[92].mxu1 }
 0x1b7   : > { %v4042_v41 = vpop.f32.mrb[93].mxu1  ;;  %v960_v8 = vadd.f32 %v4040_v29, %v2825_v32 }
 0x1b8   : > { %1638 = vmatmul.mubr.f32.gmra.mrb[58].mxu0 %v1024_v46  ;;  %v1073_v46 = vmax.f32 %v932_v40, 0.0  ;;  %v962_v61 = vadd.f32 %v4042_v41, %v2828_v33 }
 0x1b9   : > { %1643 = vmatprep.mubr.f32.mxu0 %v1029_v7  ;;  %v1069_v7 = vmax.f32 %v926_v16, 0.0  ;;  %v1092_v1 = vmax.f32 %v960_v8, 0.0 }
 0x1ba   : > { %v4048_v55 = vpop.f32.mrb[94].mxu1 }
 0x1bb   : > { %v4050_v14 = vpop.f32.mrb[95].mxu1  ;;  %v966_v41 = vadd.f32 %v4048_v55, %v2825_v32 }
 0x1bc   : > { %1644 = vmatmul.mubr.f32.gmra.mrb[60].mxu0 %v1028_v12  ;;  %v1081_v12 = vmax.f32 %v944_v57, 0.0  ;;  %v968_v2 = vadd.f32 %v4050_v14, %v2828_v33 }
 0x1bd   : > { %1649 = vmatprep.mubr.f32.mxu0 %v1033_v6  ;;  %v1077_v6 = vmax.f32 %v938_v11, 0.0  ;;  %v1096_v51 = vmax.f32 %v966_v41, 0.0 }
 0x1c0   : > { %1650 = vmatmul.mubr.f32.gmra.mrb[62].mxu0 %v1032_v26  ;;  %v1089_v26 = vmax.f32 %v956_v54, 0.0 }
 0x1c1   : > { %1655 = vmatprep.mubr.f32.mxu0 %v1037_v63  ;;  %v1085_v63 = vmax.f32 %v950_v25, 0.0 }
 0x1c4   : > { %1656 = vmatmul.mubr.f32.gmra.mrb[64].mxu0 %v1036_v0  ;;  %v1097_v0 = vmax.f32 %v968_v2, 0.0 }
 0x1c5   : > { %1661 = vmatprep.mubr.f32.mxu0 %v1041_v4  ;;  %v1093_v4 = vmax.f32 %v962_v61, 0.0 }
 0x1c8   : > { %1662 = vmatmul.mubr.f32.gmra.mrb[66].mxu0 %v1040_v59 }
 0x1c9   : > { %1667 = vmatprep.mubr.f32.mxu0 %v1045_v34  ;;  %v1226_v34 = vld [vmem:[%s4278_s4] sm:$0x3] }
 0x1ca   : > { %v4119_v33 = vrot.slane %v1226_v34, %v438_v62  ;;  %v4123_v29 = vrot.slane %v1226_v34, %v442_v23 }
 0x1cc   : > { %1668 = vmatmul.mubr.f32.gmra.mrb[68].mxu0 %v1044_v50 }
 0x1cd   : > { %1673 = vmatprep.mubr.f32.mxu0 %v1049_v37 }
 0x1d0   : > { %1674 = vmatmul.mubr.f32.gmra.mrb[70].mxu0 %v1048_v31 }
 0x1d1   : > { %1679 = vmatprep.mubr.f32.mxu0 %v1053_v5 }
 0x1d4   : > { %1680 = vmatmul.mubr.f32.gmra.mrb[72].mxu0 %v1052_v9 }
 0x1d5   : > { %1685 = vmatprep.mubr.f32.mxu0 %v1057_v52 }
 0x1d8   : > { %1686 = vmatmul.mubr.f32.gmra.mrb[74].mxu0 %v1056_v15 }
 0x1d9   : > { %1691 = vmatprep.mubr.f32.mxu0 %v1061_v48 }
 0x1dc   : > { %1692 = vmatmul.mubr.f32.gmra.mrb[76].mxu0 %v1060_v18 }
 0x1dd   : > { %1697 = vmatprep.mubr.f32.mxu0 %v1065_v56 }
 0x1e0   : > { %1698 = vmatmul.mubr.f32.gmra.mrb[78].mxu0 %v1064_v47 }
 0x1e1   : > { %1703 = vmatprep.mubr.f32.mxu0 %v1069_v7 }
 0x1e4   : > { %1704 = vmatmul.mubr.f32.gmra.mrb[80].mxu0 %v1068_v13 }
 0x1e5   : > { %1709 = vmatprep.mubr.f32.mxu0 %v1073_v46 }
 0x1e8   : > { %1710 = vmatmul.mubr.f32.gmra.mrb[82].mxu0 %v1072_v60 }
 0x1e9   : > { %1715 = vmatprep.mubr.f32.mxu0 %v1077_v6 }
 0x1ec   : > { %1716 = vmatmul.mubr.f32.gmra.mrb[84].mxu0 %v1076_v19 }
 0x1ed   : > { %1721 = vmatprep.mubr.f32.mxu0 %v1081_v12 }
 0x1f0   : > { %1722 = vmatmul.mubr.f32.gmra.mrb[86].mxu0 %v1080_v27 }
 0x1f1   : > { %1727 = vmatprep.mubr.f32.mxu0 %v1085_v63 }
 0x1f4   : > { %1728 = vmatmul.mubr.f32.gmra.mrb[88].mxu0 %v1084_v42 }
 0x1f5   : > { %1733 = vmatprep.mubr.f32.mxu0 %v1089_v26 }
 0x1f8   : > { %1734 = vmatmul.mubr.f32.gmra.mrb[90].mxu0 %v1088_v10 }
 0x1f9   : > { %1739 = vmatprep.mubr.f32.mxu0 %v1093_v4 }
 0x1fc   : > { %1740 = vmatmul.mubr.f32.gmra.mrb[92].mxu0 %v1092_v1 }
 0x1fd   : > { %1745 = vmatprep.mubr.f32.mxu0 %v1097_v0 }
 0x200   : > { %1746 = vmatmul.mubr.f32.gmra.mrb[94].mxu0 %v1096_v51 }
 0x257   : > { %v1561_v14 = vpop.f32.mrb[32].mxu0 }
 0x258   : > { %v2517_v44 = vadd.f32 %v1561_v14, %v4119_v33  ;;  %v1563_v32 = vpop.f32.mrb[33].mxu0 }
 0x259   : > { %v2518_v55 = vadd.f32 %v1563_v32, %v4123_v29 }
 0x25a   : > { %v1752_v37 = vmax.f32 %v2517_v44, 0.0 }
 0x25b   : > { %v1753_v59 = vmax.f32 %v2518_v55, 0.0  ;;  %v1567_v53 = vpop.f32.mrb[34].mxu0 }
 0x25c   : > { %v2519_v45 = vadd.f32 %v1567_v53, %v4119_v33  ;;  %v1569_v50 = vpop.f32.mrb[35].mxu0 }
 0x25d   : > { %v2520_v49 = vadd.f32 %v1569_v50, %v4123_v29  ;;  %1919 = vmatprep.mubr.f32.mxu1 %v1753_v59 }
 0x25e   : > { %1920 = vmatmul.mubr.f32.vlgmr.msra.gmra.mrb[96].mxu1 %v1752_v37  ;;  %v1754_v23 = vmax.f32 %v2519_v45, 0.0 }
 0x25f   : > { %v1755_v62 = vmax.f32 %v2520_v49, 0.0  ;;  %v1573_v21 = vpop.f32.mrb[36].mxu0 }
 0x260   : > { %v2521_v5 = vadd.f32 %v1573_v21, %v4119_v33  ;;  %v1575_v28 = vpop.f32.mrb[37].mxu0 }
 0x261   : > { %v2522_v31 = vadd.f32 %v1575_v28, %v4123_v29  ;;  %1924 = vmatprep.mubr.f32.mxu1 %v1755_v62 }
 0x262   : > { %1925 = vmatmul.mubr.f32.gmra.mrb[98].mxu1 %v1754_v23  ;;  %v1756_v43 = vmax.f32 %v2521_v5, 0.0 }
 0x263   : > { %v1757_v36 = vmax.f32 %v2522_v31, 0.0  ;;  %v1579_v52 = vpop.f32.mrb[38].mxu0 }
 0x264   : > { %v2523_v9 = vadd.f32 %v1579_v52, %v4119_v33  ;;  %v1581_v30 = vpop.f32.mrb[39].mxu0 }
 0x265   : > { %v2524_v48 = vadd.f32 %v1581_v30, %v4123_v29  ;;  %1929 = vmatprep.mubr.f32.mxu1 %v1757_v36 }
 0x266   : > { %1930 = vmatmul.mubr.f32.gmra.mrb[100].mxu1 %v1756_v43  ;;  %v1758_v17 = vmax.f32 %v2523_v9, 0.0 }
 0x267   : > { %v1759_v20 = vmax.f32 %v2524_v48, 0.0  ;;  %v1585_v15 = vpop.f32.mrb[40].mxu0 }
 0x268   : > { %v2525_v56 = vadd.f32 %v1585_v15, %v4119_v33  ;;  %v1587_v16 = vpop.f32.mrb[41].mxu0 }
 0x269   : > { %v2526_v18 = vadd.f32 %v1587_v16, %v4123_v29  ;;  %1934 = vmatprep.mubr.f32.mxu1 %v1759_v20 }
 0x26a   : > { %1935 = vmatmul.mubr.f32.gmra.mrb[102].mxu1 %v1758_v17  ;;  %v1760_v40 = vmax.f32 %v2525_v56, 0.0 }
 0x26b   : > { %v1761_v38 = vmax.f32 %v2526_v18, 0.0  ;;  %v1591_v7 = vpop.f32.mrb[42].mxu0 }
 0x26c   : > { %v2527_v47 = vadd.f32 %v1591_v7, %v4119_v33  ;;  %v1593_v22 = vpop.f32.mrb[43].mxu0 }
 0x26d   : > { %v2528_v46 = vadd.f32 %v1593_v22, %v4123_v29  ;;  %1939 = vmatprep.mubr.f32.mxu1 %v1761_v38 }
 0x26e   : > { %1940 = vmatmul.mubr.f32.gmra.mrb[104].mxu1 %v1760_v40  ;;  %v1762_v24 = vmax.f32 %v2527_v47, 0.0 }
 0x26f   : > { %v1763_v11 = vmax.f32 %v2528_v46, 0.0  ;;  %v1597_v13 = vpop.f32.mrb[44].mxu0 }
 0x270   : > { %v2529_v6 = vadd.f32 %v1597_v13, %v4119_v33  ;;  %v1599_v57 = vpop.f32.mrb[45].mxu0 }
 0x271   : > { %v2530_v60 = vadd.f32 %v1599_v57, %v4123_v29  ;;  %1944 = vmatprep.mubr.f32.mxu1 %v1763_v11 }
 0x272   : > { %1945 = vmatmul.mubr.f32.gmra.mrb[106].mxu1 %v1762_v24  ;;  %v1764_v25 = vmax.f32 %v2529_v6, 0.0 }
 0x273   : > { %v1765_v39 = vmax.f32 %v2530_v60, 0.0  ;;  %v1603_v12 = vpop.f32.mrb[46].mxu0 }
 0x274   : > { %v2531_v19 = vadd.f32 %v1603_v12, %v4119_v33  ;;  %v1605_v35 = vpop.f32.mrb[47].mxu0 }
 0x275   : > { %v2532_v63 = vadd.f32 %v1605_v35, %v4123_v29  ;;  %1949 = vmatprep.mubr.f32.mxu1 %v1765_v39 }
 0x276   : > { %1950 = vmatmul.mubr.f32.gmra.mrb[108].mxu1 %v1764_v25  ;;  %v1766_v3 = vmax.f32 %v2531_v19, 0.0 }
 0x277   : > { %v1767_v54 = vmax.f32 %v2532_v63, 0.0  ;;  %v1609_v27 = vpop.f32.mrb[48].mxu0 }
 0x278   : > { %v2533_v26 = vadd.f32 %v1609_v27, %v4119_v33  ;;  %v1611_v61 = vpop.f32.mrb[49].mxu0 }
 0x279   : > { %v2534_v42 = vadd.f32 %v1611_v61, %v4123_v29  ;;  %1954 = vmatprep.mubr.f32.mxu1 %v1767_v54 }
 0x27a   : > { %1955 = vmatmul.mubr.f32.gmra.mrb[110].mxu1 %v1766_v3  ;;  %v1768_v2 = vmax.f32 %v2533_v26, 0.0 }
 0x27b   : > { %v1769_v58 = vmax.f32 %v2534_v42, 0.0  ;;  %v1615_v4 = vpop.f32.mrb[50].mxu0 }
 0x27c   : > { %v2535_v10 = vadd.f32 %v1615_v4, %v4119_v33  ;;  %v1617_v8 = vpop.f32.mrb[51].mxu0 }
 0x27d   : > { %v2536_v0 = vadd.f32 %v1617_v8, %v4123_v29  ;;  %1959 = vmatprep.mubr.f32.mxu1 %v1769_v58 }
 0x27e   : > { %1960 = vmatmul.mubr.f32.gmra.mrb[112].mxu1 %v1768_v2  ;;  %v1770_v51 = vmax.f32 %v2535_v10, 0.0 }
 0x27f   : > { %v1771_v1 = vmax.f32 %v2536_v0, 0.0  ;;  %v1621_v41 = vpop.f32.mrb[52].mxu0 }
 0x280   : > { %v2537_v34 = vadd.f32 %v1621_v41, %v4119_v33  ;;  %v1623_v14 = vpop.f32.mrb[53].mxu0 }
 0x281   : > { %v2538_v44 = vadd.f32 %v1623_v14, %v4123_v29  ;;  %1964 = vmatprep.mubr.f32.mxu1 %v1771_v1 }
 0x282   : > { %1965 = vmatmul.mubr.f32.gmra.mrb[114].mxu1 %v1770_v51  ;;  %v1772_v59 = vmax.f32 %v2537_v34, 0.0 }
 0x283   : > { %v1773_v32 = vmax.f32 %v2538_v44, 0.0  ;;  %v1627_v55 = vpop.f32.mrb[54].mxu0 }
 0x284   : > { %v2539_v53 = vadd.f32 %v1627_v55, %v4119_v33  ;;  %v1629_v37 = vpop.f32.mrb[55].mxu0 }
 0x285   : > { %v2540_v45 = vadd.f32 %v1629_v37, %v4123_v29  ;;  %1969 = vmatprep.mubr.f32.mxu1 %v1773_v32 }
 0x286   : > { %1970 = vmatmul.mubr.f32.gmra.mrb[116].mxu1 %v1772_v59  ;;  %v1774_v62 = vmax.f32 %v2539_v53, 0.0 }
 0x287   : > { %v1775_v50 = vmax.f32 %v2540_v45, 0.0  ;;  %v1633_v49 = vpop.f32.mrb[56].mxu0 }
 0x288   : > { %v2541_v21 = vadd.f32 %v1633_v49, %v4119_v33  ;;  %v1635_v23 = vpop.f32.mrb[57].mxu0 }
 0x289   : > { %v2542_v5 = vadd.f32 %v1635_v23, %v4123_v29  ;;  %1974 = vmatprep.mubr.f32.mxu1 %v1775_v50 }
 0x28a   : > { %1975 = vmatmul.mubr.f32.gmra.mrb[118].mxu1 %v1774_v62  ;;  %v1776_v36 = vmax.f32 %v2541_v21, 0.0 }
 0x28b   : > { %v1777_v28 = vmax.f32 %v2542_v5, 0.0  ;;  %v1639_v31 = vpop.f32.mrb[58].mxu0 }
 0x28c   : > { %v2543_v52 = vadd.f32 %v1639_v31, %v4119_v33  ;;  %v1641_v43 = vpop.f32.mrb[59].mxu0 }
 0x28d   : > { %v2544_v9 = vadd.f32 %v1641_v43, %v4123_v29  ;;  %1979 = vmatprep.mubr.f32.mxu1 %v1777_v28 }
 0x28e   : > { %1980 = vmatmul.mubr.f32.gmra.mrb[120].mxu1 %v1776_v36  ;;  %v1778_v20 = vmax.f32 %v2543_v52, 0.0 }
 0x28f   : > { %v1779_v30 = vmax.f32 %v2544_v9, 0.0  ;;  %v1645_v48 = vpop.f32.mrb[60].mxu0 }
 0x290   : > { %v2545_v15 = vadd.f32 %v1645_v48, %v4119_v33  ;;  %v1647_v17 = vpop.f32.mrb[61].mxu0 }
 0x291   : > { %v2546_v56 = vadd.f32 %v1647_v17, %v4123_v29  ;;  %1984 = vmatprep.mubr.f32.mxu1 %v1779_v30 }
 0x292   : > { %1985 = vmatmul.mubr.f32.gmra.mrb[122].mxu1 %v1778_v20  ;;  %v1780_v38 = vmax.f32 %v2545_v15, 0.0 }
 0x293   : > { %v1781_v16 = vmax.f32 %v2546_v56, 0.0  ;;  %v1651_v18 = vpop.f32.mrb[62].mxu0 }
 0x294   : > { %v2547_v7 = vadd.f32 %v1651_v18, %v4119_v33  ;;  %v1653_v40 = vpop.f32.mrb[63].mxu0 }
 0x295   : > { %v2548_v47 = vadd.f32 %v1653_v40, %v4123_v29  ;;  %1989 = vmatprep.mubr.f32.mxu1 %v1781_v16 }
 0x296   : > { %1990 = vmatmul.mubr.f32.gmra.mrb[124].mxu1 %v1780_v38  ;;  %v1782_v11 = vmax.f32 %v2547_v7, 0.0 }
 0x297   : > { %v1783_v22 = vmax.f32 %v2548_v47, 0.0  ;;  %v1657_v46 = vpop.f32.mrb[64].mxu0 }
 0x298   : > { %v2549_v13 = vadd.f32 %v1657_v46, %v4119_v33  ;;  %v1659_v24 = vpop.f32.mrb[65].mxu0 }
 0x299   : > { %v2550_v6 = vadd.f32 %v1659_v24, %v4123_v29  ;;  %1994 = vmatprep.mubr.f32.mxu1 %v1783_v22 }
 0x29a   : > { %1995 = vmatmul.mubr.f32.gmra.mrb[126].mxu1 %v1782_v11  ;;  %v1784_v39 = vmax.f32 %v2549_v13, 0.0 }
 0x29b   : > { %v1785_v57 = vmax.f32 %v2550_v6, 0.0  ;;  %v1663_v60 = vpop.f32.mrb[66].mxu0 }
 0x29c   : > { %v2551_v12 = vadd.f32 %v1663_v60, %v4119_v33  ;;  %v1665_v25 = vpop.f32.mrb[67].mxu0 }
 0x29d   : > { %v2552_v19 = vadd.f32 %v1665_v25, %v4123_v29  ;;  %1999 = vmatprep.mubr.f32.mxu1 %v1785_v57 }
 0x29e   : > { %2000 = vmatmul.mubr.f32.gmra.mrb[128].mxu1 %v1784_v39  ;;  %v1786_v54 = vmax.f32 %v2551_v12, 0.0 }
 0x29f   : > { %v1787_v35 = vmax.f32 %v2552_v19, 0.0  ;;  %v1669_v63 = vpop.f32.mrb[68].mxu0 }
 0x2a0   : > { %v2553_v27 = vadd.f32 %v1669_v63, %v4119_v33  ;;  %v1671_v3 = vpop.f32.mrb[69].mxu0 }
 0x2a1   : > { %v2554_v26 = vadd.f32 %v1671_v3, %v4123_v29  ;;  %2004 = vmatprep.mubr.f32.mxu1 %v1787_v35 }
 0x2a2   : > { %2005 = vmatmul.mubr.f32.gmra.mrb[130].mxu1 %v1786_v54  ;;  %v1788_v58 = vmax.f32 %v2553_v27, 0.0 }
 0x2a3   : > { %v1789_v61 = vmax.f32 %v2554_v26, 0.0  ;;  %v1675_v42 = vpop.f32.mrb[70].mxu0 }
 0x2a4   : > { %v2555_v4 = vadd.f32 %v1675_v42, %v4119_v33  ;;  %v1677_v2 = vpop.f32.mrb[71].mxu0 }
 0x2a5   : > { %v2556_v10 = vadd.f32 %v1677_v2, %v4123_v29  ;;  %2009 = vmatprep.mubr.f32.mxu1 %v1789_v61 }
 0x2a6   : > { %2010 = vmatmul.mubr.f32.gmra.mrb[132].mxu1 %v1788_v58  ;;  %v1790_v1 = vmax.f32 %v2555_v4, 0.0 }
 0x2a7   : > { %v1791_v8 = vmax.f32 %v2556_v10, 0.0  ;;  %v1681_v0 = vpop.f32.mrb[72].mxu0 }
 0x2a8   : > { %v2557_v41 = vadd.f32 %v1681_v0, %v4119_v33  ;;  %v1683_v51 = vpop.f32.mrb[73].mxu0 }
 0x2a9   : > { %v2558_v34 = vadd.f32 %v1683_v51, %v4123_v29  ;;  %2014 = vmatprep.mubr.f32.mxu1 %v1791_v8 }
 0x2aa   : > { %2015 = vmatmul.mubr.f32.gmra.mrb[134].mxu1 %v1790_v1  ;;  %v1792_v32 = vmax.f32 %v2557_v41, 0.0 }
 0x2ab   : > { %v1793_v14 = vmax.f32 %v2558_v34, 0.0  ;;  %v1687_v44 = vpop.f32.mrb[74].mxu0 }
 0x2ac   : > { %v2559_v55 = vadd.f32 %v1687_v44, %v4119_v33  ;;  %v1689_v59 = vpop.f32.mrb[75].mxu0 }
 0x2ad   : > { %v2560_v53 = vadd.f32 %v1689_v59, %v4123_v29  ;;  %2019 = vmatprep.mubr.f32.mxu1 %v1793_v14 }
 0x2ae   : > { %2020 = vmatmul.mubr.f32.gmra.mrb[136].mxu1 %v1792_v32  ;;  %v1794_v50 = vmax.f32 %v2559_v55, 0.0 }
 0x2af   : > { %v1795_v37 = vmax.f32 %v2560_v53, 0.0  ;;  %v1693_v45 = vpop.f32.mrb[76].mxu0 }
 0x2b0   : > { %v2561_v49 = vadd.f32 %v1693_v45, %v4119_v33  ;;  %v1695_v62 = vpop.f32.mrb[77].mxu0 }
 0x2b1   : > { %v2562_v21 = vadd.f32 %v1695_v62, %v4123_v29  ;;  %2024 = vmatprep.mubr.f32.mxu1 %v1795_v37  ;;  %v4192_v37 = vld [vmem:[%s4280_s6] ss:$0 sm:$0xff] }
 0x2b2   : > { %2025 = vmatmul.mubr.f32.gmra.mrb[138].mxu1 %v1794_v50  ;;  %v1796_v28 = vmax.f32 %v2561_v49, 0.0 }
 0x2b3   : > { %v1797_v23 = vmax.f32 %v2562_v21, 0.0  ;;  %v1699_v5 = vpop.f32.mrb[78].mxu0 }
 0x2b4   : > { %v2563_v31 = vadd.f32 %v1699_v5, %v4119_v33  ;;  %v1701_v36 = vpop.f32.mrb[79].mxu0 }
 0x2b5   : > { %v2564_v52 = vadd.f32 %v1701_v36, %v4123_v29  ;;  %2029 = vmatprep.mubr.f32.mxu1 %v1797_v23 }
 0x2b6   : > { %2030 = vmatmul.mubr.f32.gmra.mrb[140].mxu1 %v1796_v28  ;;  %v1798_v30 = vmax.f32 %v2563_v31, 0.0 }
 0x2b7   : > { %v1799_v43 = vmax.f32 %v2564_v52, 0.0  ;;  %v1705_v9 = vpop.f32.mrb[80].mxu0 }
 0x2b8   : > { %v2565_v48 = vadd.f32 %v1705_v9, %v4119_v33  ;;  %v1707_v20 = vpop.f32.mrb[81].mxu0 }
 0x2b9   : > { %v2566_v15 = vadd.f32 %v1707_v20, %v4123_v29  ;;  %2034 = vmatprep.mubr.f32.mxu1 %v1799_v43 }
 0x2ba   : > { %2035 = vmatmul.mubr.f32.gmra.mrb[142].mxu1 %v1798_v30  ;;  %v1800_v16 = vmax.f32 %v2565_v48, 0.0 }
 0x2bb   : > { %v1801_v17 = vmax.f32 %v2566_v15, 0.0  ;;  %v1711_v56 = vpop.f32.mrb[82].mxu0 }
 0x2bc   : > { %v2567_v18 = vadd.f32 %v1711_v56, %v4119_v33  ;;  %v1713_v38 = vpop.f32.mrb[83].mxu0 }
 0x2bd   : > { %v2568_v7 = vadd.f32 %v1713_v38, %v4123_v29  ;;  %2039 = vmatprep.mubr.f32.mxu1 %v1801_v17 }
 0x2be   : > { %2040 = vmatmul.mubr.f32.gmra.mrb[144].mxu1 %v1800_v16  ;;  %v1802_v22 = vmax.f32 %v2567_v18, 0.0 }
 0x2bf   : > { %v1803_v40 = vmax.f32 %v2568_v7, 0.0  ;;  %v1717_v47 = vpop.f32.mrb[84].mxu0 }
 0x2c0   : > { %v2569_v46 = vadd.f32 %v1717_v47, %v4119_v33  ;;  %v1719_v11 = vpop.f32.mrb[85].mxu0 }
 0x2c1   : > { %v2570_v13 = vadd.f32 %v1719_v11, %v4123_v29  ;;  %2044 = vmatprep.mubr.f32.mxu1 %v1803_v40 }
 0x2c2   : > { %2045 = vmatmul.mubr.f32.gmra.mrb[146].mxu1 %v1802_v22  ;;  %v1804_v57 = vmax.f32 %v2569_v46, 0.0 }
 0x2c3   : > { %v1805_v24 = vmax.f32 %v2570_v13, 0.0  ;;  %v1723_v6 = vpop.f32.mrb[86].mxu0 }
 0x2c4   : > { %v2571_v60 = vadd.f32 %v1723_v6, %v4119_v33  ;;  %v1725_v39 = vpop.f32.mrb[87].mxu0 }
 0x2c5   : > { %v2572_v12 = vadd.f32 %v1725_v39, %v4123_v29  ;;  %2049 = vmatprep.mubr.f32.mxu1 %v1805_v24 }
 0x2c6   : > { %2050 = vmatmul.mubr.f32.gmra.mrb[148].mxu1 %v1804_v57  ;;  %v1806_v35 = vmax.f32 %v2571_v60, 0.0 }
 0x2c7   : > { %v1807_v25 = vmax.f32 %v2572_v12, 0.0  ;;  %v1729_v19 = vpop.f32.mrb[88].mxu0 }
 0x2c8   : > { %v2573_v63 = vadd.f32 %v1729_v19, %v4119_v33  ;;  %v1731_v54 = vpop.f32.mrb[89].mxu0 }
 0x2c9   : > { %v2574_v27 = vadd.f32 %v1731_v54, %v4123_v29  ;;  %2054 = vmatprep.mubr.f32.mxu1 %v1807_v25 }
 0x2ca   : > { %2055 = vmatmul.mubr.f32.gmra.mrb[150].mxu1 %v1806_v35  ;;  %v1808_v61 = vmax.f32 %v2573_v63, 0.0 }
 0x2cb   : > { %v1809_v3 = vmax.f32 %v2574_v27, 0.0  ;;  %v1735_v26 = vpop.f32.mrb[90].mxu0 }
 0x2cc   : > { %v2575_v42 = vadd.f32 %v1735_v26, %v4119_v33  ;;  %v1737_v58 = vpop.f32.mrb[91].mxu0 }
 0x2cd   : > { %v2576_v4 = vadd.f32 %v1737_v58, %v4123_v29  ;;  %2059 = vmatprep.mubr.f32.mxu1 %v1809_v3 }
 0x2ce   : > { %2060 = vmatmul.mubr.f32.gmra.mrb[152].mxu1 %v1808_v61  ;;  %v1810_v8 = vmax.f32 %v2575_v42, 0.0 }
 0x2cf   : > { %v1811_v2 = vmax.f32 %v2576_v4, 0.0  ;;  %v1741_v10 = vpop.f32.mrb[92].mxu0 }
 0x2d0   : > { %v2577_v0 = vadd.f32 %v1741_v10, %v4119_v33  ;;  %v1743_v1 = vpop.f32.mrb[93].mxu0 }
 0x2d1   : > { %v2578_v41 = vadd.f32 %v1743_v1, %v4123_v29  ;;  %2064 = vmatprep.mubr.f32.mxu1 %v1811_v2 }
 0x2d2   : > { %2065 = vmatmul.mubr.f32.gmra.mrb[154].mxu1 %v1810_v8  ;;  %v1812_v14 = vmax.f32 %v2577_v0, 0.0 }
 0x2d3   : > { %v1813_v51 = vmax.f32 %v2578_v41, 0.0  ;;  %v1747_v34 = vpop.f32.mrb[94].mxu0 }
 0x2d4   : > { %v2579_v44 = vadd.f32 %v1747_v34, %v4119_v33  ;;  %v1749_v32 = vpop.f32.mrb[95].mxu0 }
 0x2d5   : > { %v2580_v55 = vadd.f32 %v1749_v32, %v4123_v29  ;;  %2069 = vmatprep.mubr.f32.mxu1 %v1813_v51 }
 0x2d6   : > { %2070 = vmatmul.mubr.f32.gmra.mrb[156].mxu1 %v1812_v14  ;;  %v1814_v53 = vmax.f32 %v2579_v44, 0.0 }
 0x2d7   : > { %v1815_v59 = vmax.f32 %v2580_v55, 0.0 }
 0x2d9   : > { %2074 = vmatprep.mubr.f32.mxu1 %v1815_v59 }
 0x2da   : > { %2075 = vmatmul.mubr.f32.gmra.mrb[158].mxu1 %v1814_v53 }
 0x331   : > { %v1921_v33 = vpop.f32.mrb[96].mxu1 }
 0x332   : > { %v1922_v29 = vadd.f32 %v4192_v37, %v1921_v33  ;;  %v1923_v45 = vpop.f32.mrb[97].mxu1 }
 0x334   : > { %2080 = vst [vmem:[%s4199_s28] sm:$0xff] %v1922_v29 }
 0x335   : > { %v1926_v50 = vpop.f32.mrb[98].mxu1 }
 0x336   : > { %v1927_v49 = vadd.f32 %v4192_v37, %v1926_v50  ;;  %v1928_v62 = vpop.f32.mrb[99].mxu1 }
 0x338   : > { %2081 = vst [vmem:[%s4199_s28 + $0x8] sm:$0xff] %v1927_v49 }
 0x339   : > { %v1931_v21 = vpop.f32.mrb[100].mxu1 }
 0x33a   : > { %v1932_v23 = vadd.f32 %v4192_v37, %v1931_v21  ;;  %v1933_v5 = vpop.f32.mrb[101].mxu1 }
 0x33c   : > { %2082 = vst [vmem:[%s4199_s28 + $0x10] sm:$0xff] %v1932_v23 }
 0x33d   : > { %v1936_v28 = vpop.f32.mrb[102].mxu1 }
 0x33e   : > { %v1937_v31 = vadd.f32 %v4192_v37, %v1936_v28  ;;  %v1938_v36 = vpop.f32.mrb[103].mxu1 }
 0x340   : > { %2083 = vst [vmem:[%s4199_s28 + $0x18] sm:$0xff] %v1937_v31 }
 0x341   : > { %v1941_v52 = vpop.f32.mrb[104].mxu1 }
 0x342   : > { %v1942_v43 = vadd.f32 %v4192_v37, %v1941_v52  ;;  %v1943_v9 = vpop.f32.mrb[105].mxu1 }
 0x344   : > { %2084 = vst [vmem:[%s4199_s28 + $0x20] sm:$0xff] %v1942_v43 }
 0x345   : > { %v1946_v30 = vpop.f32.mrb[106].mxu1 }
 0x346   : > { %v1947_v48 = vadd.f32 %v4192_v37, %v1946_v30  ;;  %v1948_v20 = vpop.f32.mrb[107].mxu1 }
 0x348   : > { %2085 = vst [vmem:[%s4199_s28 + $0x28] sm:$0xff] %v1947_v48 }
 0x349   : > { %v1951_v15 = vpop.f32.mrb[108].mxu1 }
 0x34a   : > { %v1952_v17 = vadd.f32 %v4192_v37, %v1951_v15  ;;  %v1953_v56 = vpop.f32.mrb[109].mxu1 }
 0x34c   : > { %2086 = vst [vmem:[%s4199_s28 + $0x30] sm:$0xff] %v1952_v17 }
 0x34d   : > { %v1956_v16 = vpop.f32.mrb[110].mxu1 }
 0x34e   : > { %v1957_v18 = vadd.f32 %v4192_v37, %v1956_v16  ;;  %v1958_v38 = vpop.f32.mrb[111].mxu1 }
 0x350   : > { %2087 = vst [vmem:[%s4199_s28 + $0x38] sm:$0xff] %v1957_v18 }
 0x351   : > { %v1961_v7 = vpop.f32.mrb[112].mxu1 }
 0x352   : > { %v1962_v40 = vadd.f32 %v4192_v37, %v1961_v7  ;;  %v1963_v47 = vpop.f32.mrb[113].mxu1 }
 0x354   : > { %2088 = vst [vmem:[%s4199_s28 + $0x40] sm:$0xff] %v1962_v40 }
 0x355   : > { %v1966_v22 = vpop.f32.mrb[114].mxu1 }
 0x356   : > { %v1967_v46 = vadd.f32 %v4192_v37, %v1966_v22  ;;  %v1968_v11 = vpop.f32.mrb[115].mxu1 }
 0x358   : > { %2089 = vst [vmem:[%s4199_s28 + $0x48] sm:$0xff] %v1967_v46 }
 0x359   : > { %v1971_v13 = vpop.f32.mrb[116].mxu1 }
 0x35a   : > { %v1972_v24 = vadd.f32 %v4192_v37, %v1971_v13  ;;  %v1973_v6 = vpop.f32.mrb[117].mxu1 }
 0x35c   : > { %2090 = vst [vmem:[%s4199_s28 + $0x50] sm:$0xff] %v1972_v24 }
 0x35d   : > { %v1976_v57 = vpop.f32.mrb[118].mxu1 }
 0x35e   : > { %v1977_v60 = vadd.f32 %v4192_v37, %v1976_v57  ;;  %v1978_v39 = vpop.f32.mrb[119].mxu1 }
 0x360   : > { %2091 = vst [vmem:[%s4199_s28 + $0x58] sm:$0xff] %v1977_v60 }
 0x361   : > { %v1981_v12 = vpop.f32.mrb[120].mxu1 }
 0x362   : > { %v1982_v25 = vadd.f32 %v4192_v37, %v1981_v12  ;;  %v1983_v19 = vpop.f32.mrb[121].mxu1 }
 0x364   : > { %2092 = vst [vmem:[%s4199_s28 + $0x60] sm:$0xff] %v1982_v25 }
 0x365   : > { %v1986_v35 = vpop.f32.mrb[122].mxu1 }
 0x366   : > { %v1987_v63 = vadd.f32 %v4192_v37, %v1986_v35  ;;  %v1988_v54 = vpop.f32.mrb[123].mxu1 }
 0x368   : > { %2093 = vst [vmem:[%s4199_s28 + $0x68] sm:$0xff] %v1987_v63 }
 0x369   : > { %v1991_v27 = vpop.f32.mrb[124].mxu1 }
 0x36a   : > { %v1992_v3 = vadd.f32 %v4192_v37, %v1991_v27  ;;  %v1993_v26 = vpop.f32.mrb[125].mxu1 }
 0x36c   : > { %2094 = vst [vmem:[%s4199_s28 + $0x70] sm:$0xff] %v1992_v3 }
 0x36d   : > { %v1996_v61 = vpop.f32.mrb[126].mxu1 }
 0x36e   : > { %v1997_v42 = vadd.f32 %v4192_v37, %v1996_v61  ;;  %v1998_v58 = vpop.f32.mrb[127].mxu1 }
 0x370   : > { %2095 = vst [vmem:[%s4199_s28 + $0x78] sm:$0xff] %v1997_v42 }
 0x371   : > { %v2001_v4 = vpop.f32.mrb[128].mxu1 }
 0x372   : > { %v2002_v2 = vadd.f32 %v4192_v37, %v2001_v4  ;;  %v2003_v10 = vpop.f32.mrb[129].mxu1 }
 0x374   : > { %2096 = vst [vmem:[%s4199_s28 + $0x80] sm:$0xff] %v2002_v2 }
 0x375   : > { %v2006_v8 = vpop.f32.mrb[130].mxu1 }
 0x376   : > { %v2007_v0 = vadd.f32 %v4192_v37, %v2006_v8  ;;  %v2008_v1 = vpop.f32.mrb[131].mxu1 }
 0x378   : > { %2097 = vst [vmem:[%s4199_s28 + $0x88] sm:$0xff] %v2007_v0 }
 0x379   : > { %v2011_v41 = vpop.f32.mrb[132].mxu1 }
 0x37a   : > { %v2012_v51 = vadd.f32 %v4192_v37, %v2011_v41  ;;  %v2013_v34 = vpop.f32.mrb[133].mxu1 }
 0x37c   : > { %2098 = vst [vmem:[%s4199_s28 + $0x90] sm:$0xff] %v2012_v51 }
 0x37d   : > { %v2016_v14 = vpop.f32.mrb[134].mxu1 }
 0x37e   : > { %v2017_v44 = vadd.f32 %v4192_v37, %v2016_v14  ;;  %v2018_v32 = vpop.f32.mrb[135].mxu1 }
 0x380   : > { %2099 = vst [vmem:[%s4199_s28 + $0x98] sm:$0xff] %v2017_v44 }
 0x381   : > { %v2021_v55 = vpop.f32.mrb[136].mxu1 }
 0x382   : > { %v2022_v59 = vadd.f32 %v4192_v37, %v2021_v55  ;;  %v2023_v53 = vpop.f32.mrb[137].mxu1 }
 0x384   : > { %2100 = vst [vmem:[%s4199_s28 + $0xa0] sm:$0xff] %v2022_v59 }
 0x385   : > { %v2026_v33 = vpop.f32.mrb[138].mxu1 }
 0x386   : > { %v2027_v29 = vadd.f32 %v4192_v37, %v2026_v33  ;;  %v2028_v45 = vpop.f32.mrb[139].mxu1 }
 0x388   : > { %2101 = vst [vmem:[%s4199_s28 + $0xa8] sm:$0xff] %v2027_v29 }
 0x389   : > { %v2031_v50 = vpop.f32.mrb[140].mxu1 }
 0x38a   : > { %v2032_v49 = vadd.f32 %v4192_v37, %v2031_v50  ;;  %v2033_v62 = vpop.f32.mrb[141].mxu1 }
 0x38c   : > { %2102 = vst [vmem:[%s4199_s28 + $0xb0] sm:$0xff] %v2032_v49 }
 0x38d   : > { %v2036_v21 = vpop.f32.mrb[142].mxu1 }
 0x38e   : > { %v2037_v23 = vadd.f32 %v4192_v37, %v2036_v21  ;;  %v2038_v5 = vpop.f32.mrb[143].mxu1 }
 0x390   : > { %2103 = vst [vmem:[%s4199_s28 + $0xb8] sm:$0xff] %v2037_v23 }
 0x391   : > { %v2041_v28 = vpop.f32.mrb[144].mxu1 }
 0x392   : > { %v2042_v31 = vadd.f32 %v4192_v37, %v2041_v28  ;;  %v2043_v36 = vpop.f32.mrb[145].mxu1 }
 0x394   : > { %2104 = vst [vmem:[%s4199_s28 + $0xc0] sm:$0xff] %v2042_v31 }
 0x395   : > { %v2046_v52 = vpop.f32.mrb[146].mxu1 }
 0x396   : > { %v2047_v43 = vadd.f32 %v4192_v37, %v2046_v52  ;;  %v2048_v9 = vpop.f32.mrb[147].mxu1 }
 0x398   : > { %2105 = vst [vmem:[%s4199_s28 + $0xc8] sm:$0xff] %v2047_v43 }
 0x399   : > { %v2051_v30 = vpop.f32.mrb[148].mxu1 }
 0x39a   : > { %v2052_v48 = vadd.f32 %v4192_v37, %v2051_v30  ;;  %v2053_v20 = vpop.f32.mrb[149].mxu1 }
 0x39c   : > { %2106 = vst [vmem:[%s4199_s28 + $0xd0] sm:$0xff] %v2052_v48 }
 0x39d   : > { %v2056_v15 = vpop.f32.mrb[150].mxu1 }
 0x39e   : > { %v2057_v17 = vadd.f32 %v4192_v37, %v2056_v15  ;;  %v2058_v56 = vpop.f32.mrb[151].mxu1 }
 0x3a0   : > { %2107 = vst [vmem:[%s4199_s28 + $0xd8] sm:$0xff] %v2057_v17 }
 0x3a1   : > { %v2061_v16 = vpop.f32.mrb[152].mxu1 }
 0x3a2   : > { %v2062_v18 = vadd.f32 %v4192_v37, %v2061_v16  ;;  %v2063_v38 = vpop.f32.mrb[153].mxu1 }
 0x3a4   : > { %2108 = vst [vmem:[%s4199_s28 + $0xe0] sm:$0xff] %v2062_v18 }
 0x3a5   : > { %v2066_v7 = vpop.f32.mrb[154].mxu1 }
 0x3a6   : > { %v2067_v40 = vadd.f32 %v4192_v37, %v2066_v7  ;;  %v2068_v47 = vpop.f32.mrb[155].mxu1 }
 0x3a8   : > { %2109 = vst [vmem:[%s4199_s28 + $0xe8] sm:$0xff] %v2067_v40 }
 0x3a9   : > { %v2071_v22 = vpop.f32.mrb[156].mxu1 }
 0x3aa   : > { %v2072_v46 = vadd.f32 %v4192_v37, %v2071_v22  ;;  %v2073_v11 = vpop.f32.mrb[157].mxu1 }
 0x3ac   : > { %2110 = vst [vmem:[%s4199_s28 + $0xf0] sm:$0xff] %v2072_v46 }
 0x3ad   : > { %v2076_v13 = vpop.f32.mrb[158].mxu1 }
 0x3ae   : > { %v2077_v24 = vadd.f32 %v4192_v37, %v2076_v13  ;;  %v2078_v6 = vpop.f32.mrb[159].mxu1 }
 0x3b0   : > { %2111 = vst [vmem:[%s4199_s28 + $0xf8] sm:$0xff] %v2077_v24 }
 0x3b1 PF: > { %s17_s26 = sadd.s32 1, %s2693_s26   ;;  %s4282_s24 = smov %s2689_s25 }
 0x3b2   : > { %p14_p5 = scmp.ge.s32.totalorder %s17_s26, 4   ;;  %s4283_s25 = smov %s4285_s27 }
 0x3b4   :  { %16 = sbr.rel (!%p14_p5) target bundleno = 2 (0x2), region = 81 }

// kernel: deformnet_forward.4
= control target key start
LH: loop header
LB: loop body
LE: loop exit
PB: predicated region body
PF: predicated region fallthrough
CT: control target
= control target key end

     0   :  { %12 = vsyncpa [#allocation3], 0  ;;  %s4412_s0 = inlined_call_operand.vmem [shape: f32[2,2,256,128], index: 0, kind: input, shape index: {}]   ;;  %s4413_s1 = inlined_call_operand.vmem [shape: f32[2,1,512], index: 1, kind: input, shape index: {}]   ;;  %s4414_s2 = inlined_call_operand.vmem [shape: f32[128,512], index: 2, kind: input, shape index: {}]   ;;  %s4415_s3 = inlined_call_operand.vmem [shape: f32[512,256], index: 3, kind: input, shape index: {}]   ;;  %s4416_s4 = inlined_call_operand.vmem [shape: f32[1,256], index: 4, kind: input, shape index: {}]   ;;  %s4417_s5 = inlined_call_operand.vmem [shape: f32[256,128], index: 5, kind: input, shape index: {}]   ;;  %s4418_s6 = inlined_call_operand.vmem [shape: f32[1,128], index: 6, kind: input, shape index: {}]   ;;  %s4419_s7 = inlined_call_operand.hbm [shape: f32[2,256,128], index: 7, kind: output, shape index: {}]  }
   0x1   :  { %14 = vsyncpa [#allocation3 + $0x1], 0  ;;  %s2791_s24 = smov 0   ;;  %s2793_s25 = smov 0  }
   0x2   :  { %s2795_s26 = smov 0   ;;  %s2797_s27 = smov 0  }
   0x3   :  { %s2799_s28 = smov 0   ;;  %s2801_s29 = smov 0  }
   0x4 LB: > { %s2206_s30 = sadd.s32 4294967295, %s2744_s29   ;;  %s2207_s8 = sadd.s32 4294967294, %s2744_s29   ;;  %s2744_s29 = sphi %s2801_s29, %s20_s29   ;;  %s2740_s28 = sphi %s2799_s28, %s4426_s28   ;;  %s2736_s27 = sphi %s2797_s27, %s4425_s27   ;;  %s2732_s26 = sphi %s2795_s26, %s4424_s26   ;;  %s2728_s25 = sphi %s2793_s25, %s4423_s25   ;;  %s2724_s24 = sphi %s2791_s24, %s4422_s24  }
   0x5   : > { %s32_s9 = sadd.s32 1, %s2740_s28  ;;  %s200_s10 = sadd.s32 1, %s2732_s26 }
   0x6   : > { %p34_p0 = scmp.ge.s32.totalorder %s32_s9, 2  ;;  %p210_p1 = scmp.ne.s32.totalorder %s2732_s26, %s2728_s25 }
   0x7   : > { %p211_p2 = scmp.eq.s32.totalorder %s2206_s30, 1  ;;  %p216_p3 = scmp.ne.s32.totalorder %s2728_s25, %s2724_s24 }
   0x8   : > { %s4428_s9 = smov (%p34_p0, %s32_s9), 0  ;;  %p217_p5 = scmp.eq.s32.totalorder %s2207_s8, 1 }
   0x9   : > { %p2831_p4 = por %p211_p2, %p210_p1  ;;  %s195_s12 = ssub.s32 %s2740_s28, %s4428_s9 }
   0xa   : > { %p2210_p6 = scmp.ge.s32.totalorder %s2744_s29, 1  ;;  %p198_p7 = scmp.eq.s32.totalorder %s195_s12, 0 }
   0xb   : > { %p2838_p8 = por %p217_p5, %p216_p3  ;;  %p270_p9 = scmp.lt.s32.totalorder %s2744_s29, 3 }
   0xc   : > { %s2844_s14 = scalar_select %p198_p7, %s2732_s26, %s200_s10  }
   0xd   : > { %p271_p10 = pnand %p2210_p6, %p270_p9 }
   0xe   : > { %v358_v0 = vld [vmem:[%s4414_s2 + $0x8] sm:$0xff] (!%p271_p10)  ;;  %v357_v2 = vld [vmem:[%s4414_s2] sm:$0xff] (!%p271_p10)  ;;  %p311_p11 = scmp.lt.s32.totalorder (!%p271_p10), %s2736_s27, 1  ;;  %v2746_v7 = vmov (!%p271_p10), 0.0   ;;  %v423_v13 = vlaneseq (!%p271_p10)  ;;  %v360_v55 = vld [vmem:[%s4414_s2 + $0x18] sm:$0xff] (!%p271_p10)  ;;  %s307_s30 = sand.u32 (!%p271_p10), 1, %s2728_s25  }
   0xf   : > { %274 = sbr.rel (%p271_p10) target bundleno = 967 (0x3c7), region = 48  ;;  %v362_v1 = vld [vmem:[%s4414_s2 + $0x28] sm:$0xff] (!%p271_p10)  ;;  %v361_v4 = vld [vmem:[%s4414_s2 + $0x20] sm:$0xff] (!%p271_p10)  ;;  %507 = vmatprep.mubr.f32.mxu0 (!%p271_p10), %v2746_v7  ;;  %603 = vmatprep.mubr.f32.mxu1 (!%p271_p10), %v2746_v7  ;;  %v364_v56 = vld [vmem:[%s4414_s2 + $0x38] sm:$0xff] (!%p271_p10)  ;;  %s2211_s8 = sshll.u32 (!%p271_p10), %s307_s30, 8 }
  0x10   : > { %v2223_v3 = vpack.c.bf16 (!%p271_p10), %v362_v1, %v358_v0  ;;  %v366_v5 = vld [vmem:[%s4414_s2 + $0x48] sm:$0xff] (!%p271_p10)  ;;  %v2225_v8 = vpack.c.bf16 (!%p271_p10), %v361_v4, %v357_v2  ;;  %v365_v10 = vld [vmem:[%s4414_s2 + $0x40] sm:$0xff] (!%p271_p10)  ;;  %v2897_v21 = vshrl.u32 (!%p271_p10), %v423_v13, 7  ;;  %v2255_v59 = vpack.c.bf16 (!%p271_p10), %v364_v56, %v360_v55  ;;  %v359_v60 = vld [vmem:[%s4414_s2 + $0x10] sm:$0xff] (!%p271_p10)  ;;  %s4366_s20 = scalar_lea.sflag (!%p271_p10), [#allocation3], %s307_s30  ;;  %s2748_s23 = smov (!%p271_p10), [#allocation2]  }
  0x11   : > { %v370_v6 = vld [vmem:[%s4414_s2 + $0x68] sm:$0xff] (!%p271_p10)  ;;  %v369_v11 = vld [vmem:[%s4414_s2 + $0x60] sm:$0xff] (!%p271_p10)  ;;  %v363_v61 = vld [vmem:[%s4414_s2 + $0x30] sm:$0xff] (!%p271_p10) }
  0x12   : > { %v2227_v9 = vpack.c.bf16 (!%p271_p10), %v370_v6, %v366_v5  ;;  %v374_v12 = vld [vmem:[%s4414_s2 + $0x88] sm:$0xff] (!%p271_p10)  ;;  %2224 = vmatprep.subr.bf16.mxu0 (!%p271_p10), %v2223_v3  ;;  %2463 = vmatprep.subr.bf16.mxu1 (!%p271_p10), %v2223_v3  ;;  %v2229_v15 = vpack.c.bf16 (!%p271_p10), %v369_v11, %v365_v10  ;;  %v373_v17 = vld [vmem:[%s4414_s2 + $0x80] sm:$0xff] (!%p271_p10)  ;;  %v433_v23 = vsub.s32 (!%p271_p10), 2, %v2897_v21  ;;  %v437_v24 = vsub.s32 (!%p271_p10), 3, %v2897_v21  ;;  %v368_v63 = vld [vmem:[%s4414_s2 + $0x58] sm:$0xff] (!%p271_p10) }
  0x13   : > { %v378_v14 = vld [vmem:[%s4414_s2 + $0xa8] sm:$0xff] (!%p271_p10)  ;;  %2226 = vmatpush1.bf16.msra.mxu0 (!%p271_p10), %v2225_v8  ;;  %2471 = vmatpush1.bf16.msra.mxu1 (!%p271_p10), %v2225_v8  ;;  %v377_v18 = vld [vmem:[%s4414_s2 + $0xa0] sm:$0xff] (!%p271_p10)  ;;  %v372_v0 = vld [vmem:[%s4414_s2 + $0x78] sm:$0xff] (!%p271_p10)  ;;  %v2257_v4 = vpack.c.bf16 (!%p271_p10), %v363_v61, %v359_v60 }
  0x14   : > { %2228 = vmatprep.subr.bf16.mxu0 (!%p271_p10), %v2227_v9  ;;  %v2231_v16 = vpack.c.bf16 (!%p271_p10), %v378_v14, %v374_v12  ;;  %2464 = vmatprep.subr.bf16.mxu1 (!%p271_p10), %v2227_v9  ;;  %v382_v19 = vld [vmem:[%s4414_s2 + $0xc8] sm:$0xff] (!%p271_p10)  ;;  %v2233_v22 = vpack.c.bf16 (!%p271_p10), %v377_v18, %v373_v17  ;;  %v381_v26 = vld [vmem:[%s4414_s2 + $0xc0] sm:$0xff] (!%p271_p10)  ;;  %v367_v1 = vld [vmem:[%s4414_s2 + $0x50] sm:$0xff] (!%p271_p10)  ;;  %v2259_v10 = vpack.c.bf16 (!%p271_p10), %v372_v0, %v368_v63 }
  0x15   : > { %v386_v20 = vld [vmem:[%s4414_s2 + $0xe8] sm:$0xff] (!%p271_p10)  ;;  %v385_v27 = vld [vmem:[%s4414_s2 + $0xe0] sm:$0xff] (!%p271_p10)  ;;  %v1088_v3 = vld [vmem:[%s4415_s3 + $0x18] sm:$0xff] (!%p271_p10) }
  0x16   : > { %s2882_s22 = scalar_select %p311_p11, %s2736_s27, 1  ;;  %v2235_v25 = vpack.c.bf16 %v386_v20, %v382_v19  ;;  %v390_v28 = vld [vmem:[%s4414_s2 + $0x108] sm:$0xff]  ;;  %v2237_v31 = vpack.c.bf16 %v385_v27, %v381_v26  ;;  %v389_v35 = vld [vmem:[%s4414_s2 + $0x100] sm:$0xff]  ;;  %v1087_v8 = vld [vmem:[%s4415_s3 + $0x10] sm:$0xff] }
  0x17   : > { %2230 = vmatpush1.bf16.msra.mxu0 %v2229_v15  ;;  %2472 = vmatpush1.bf16.msra.mxu1 %v2229_v15  ;;  %v394_v29 = vld [vmem:[%s4414_s2 + $0x128] sm:$0xff]  ;;  %v393_v36 = vld [vmem:[%s4414_s2 + $0x120] sm:$0xff]  ;;  %v371_v11 = vld [vmem:[%s4414_s2 + $0x70] sm:$0xff] }
  0x18   : > { %s2214_s12 = sshll.u32 %s2882_s22, 2  ;;  %2232 = vmatprep.subr.bf16.mxu0 %v2231_v16  ;;  %2465 = vmatprep.subr.bf16.mxu1 %v2231_v16  ;;  %v2239_v34 = vpack.c.bf16 %v394_v29, %v390_v28  ;;  %v398_v37 = vld [vmem:[%s4414_s2 + $0x148] sm:$0xff]  ;;  %v2241_v39 = vpack.c.bf16 %v393_v36, %v389_v35  ;;  %v397_v41 = vld [vmem:[%s4414_s2 + $0x140] sm:$0xff]  ;;  %s2221_s18 = sshll.u32 %s2882_s22, 8  ;;  %v376_v12 = vld [vmem:[%s4414_s2 + $0x98] sm:$0xff] }
  0x19   : > { %s323_s21 = scalar_lea.vmem %s4413_s1, %s2214_s12  ;;  %v402_v38 = vld [vmem:[%s4414_s2 + $0x168] sm:$0xff]  ;;  %v401_v42 = vld [vmem:[%s4414_s2 + $0x160] sm:$0xff]  ;;  %s2970_s10 = scalar_lea.vmem %s4412_s0, %s2221_s18  ;;  %v1092_v14 = vld [vmem:[%s4415_s3 + $0x38] sm:$0xff] }
  0x1a   : > { %v2916_v30 = vld [vmem:[%s323_s21] sm:$0xf]  ;;  %v2243_v40 = vpack.c.bf16 %v402_v38, %v398_v37  ;;  %v406_v43 = vld [vmem:[%s4414_s2 + $0x188] sm:$0xff]  ;;  %v2245_v45 = vpack.c.bf16 %v401_v42, %v397_v41  ;;  %v380_v15 = vld [vmem:[%s4414_s2 + $0xb8] sm:$0xff]  ;;  %s4290_s22 = scalar_lea.vmem [#allocation2], %s2211_s8  ;;  %s2222_s12 = sshll.u32 %s2736_s27, 12 }
  0x1b   : > { %2234 = vmatpush1.bf16.msra.mxu0 %v2233_v22  ;;  %v2919_v32 = vrot.slane %v2916_v30, %v433_v23  ;;  %v2922_v33 = vrot.slane %v2916_v30, %v437_v24  ;;  %2473 = vmatpush1.bf16.msra.mxu1 %v2233_v22  ;;  %v410_v44 = vld [vmem:[%s4414_s2 + $0x1a8] sm:$0xff]  ;;  %v405_v47 = vld [vmem:[%s4414_s2 + $0x180] sm:$0xff]  ;;  %v1091_v18 = vld [vmem:[%s4415_s3 + $0x30] sm:$0xff]  ;;  %v2261_v24 = vpack.c.bf16 %v371_v11, %v367_v1  ;;  %s4358_s19 = scalar_lea.hbm %s4419_s7, %s2222_s12  ;;  %s2670_s21 = sshll.u32 %s2748_s23, 4  ;;  %s2671_s21 = int_to_ptr.vmem [resolvable:$false] %s2670_s21 }
  0x1c   : > { %2236 = vmatprep.subr.bf16.mxu0 %v2235_v25  ;;  %2466 = vmatprep.subr.bf16.mxu1 %v2235_v25  ;;  %v2247_v46 = vpack.c.bf16 %v410_v44, %v406_v43  ;;  %v409_v48 = vld [vmem:[%s4414_s2 + $0x1a0] sm:$0xff]  ;;  %v414_v49 = vld [vmem:[%s4414_s2 + $0x1c8] sm:$0xff]  ;;  %v1096_v22 = vld [vmem:[%s4415_s3 + $0x58] sm:$0xff]  ;;  %v2263_v25 = vpack.c.bf16 %v380_v15, %v376_v12  ;;  %s2672_s8 = scalar_lea.vmem %s2671_s21, 8192 }
  0x1d   : > { %v418_v50 = vld [vmem:[%s4414_s2 + $0x1e8] sm:$0xff]  ;;  %v2249_v51 = vpack.c.bf16 %v409_v48, %v405_v47  ;;  %v413_v53 = vld [vmem:[%s4414_s2 + $0x1c0] sm:$0xff]  ;;  %v375_v26 = vld [vmem:[%s4414_s2 + $0x90] sm:$0xff] }
  0x1e   : > { %v2251_v52 = vpack.c.bf16 %v418_v50, %v414_v49  ;;  %v417_v54 = vld [vmem:[%s4414_s2 + $0x1e0] sm:$0xff]  ;;  %v1086_v2 = vld [vmem:[%s4415_s3 + $0x8] sm:$0xff]  ;;  %v379_v27 = vld [vmem:[%s4414_s2 + $0xb0] sm:$0xff] }
  0x1f   : > { %2238 = vmatpush1.bf16.msra.mxu0 %v2237_v31  ;;  %2474 = vmatpush1.bf16.msra.mxu1 %v2237_v31  ;;  %v2253_v57 = vpack.c.bf16 %v417_v54, %v413_v53  ;;  %v2979_v58 = vld [vmem:[%s2970_s10] sm:$0xff]  ;;  %v2287_v5 = vpack.c.bf16 %v1088_v3, %v1086_v2  ;;  %v1090_v9 = vld [vmem:[%s4415_s3 + $0x28] sm:$0xff]  ;;  %v384_v28 = vld [vmem:[%s4414_s2 + $0xd8] sm:$0xff]  ;;  %v2265_v41 = vpack.c.bf16 %v379_v27, %v375_v26 }
  0x20   : > { %2240 = vmatprep.subr.bf16.mxu0 %v2239_v34  ;;  %2467 = vmatprep.subr.bf16.mxu1 %v2239_v34  ;;  %v2988_v62 = vld [vmem:[%s2970_s10 + $0x80] sm:$0xff]  ;;  %v2291_v16 = vpack.c.bf16 %v1092_v14, %v1090_v9  ;;  %v3035_v19 = vld [vmem:[%s2970_s10 + $0x8] sm:$0xff]  ;;  %v388_v31 = vld [vmem:[%s4414_s2 + $0xf8] sm:$0xff] }
  0x21   : > { %v1085_v6 = vld [vmem:[%s4415_s3] sm:$0xff]  ;;  %v1094_v20 = vld [vmem:[%s4415_s3 + $0x48] sm:$0xff]  ;;  %v1095_v36 = vld [vmem:[%s4415_s3 + $0x50] sm:$0xff]  ;;  %v2267_v42 = vpack.c.bf16 %v388_v31, %v384_v28 }
  0x22   : > { %v2289_v13 = vpack.c.bf16 %v1087_v8, %v1085_v6  ;;  %v1089_v17 = vld [vmem:[%s4415_s3 + $0x20] sm:$0xff]  ;;  %v3046_v23 = vld [vmem:[%s2970_s10 + $0x88] sm:$0xff]  ;;  %v2295_v34 = vpack.c.bf16 %v1096_v22, %v1094_v20  ;;  %v3069_v37 = vld [vmem:[%s2970_s10 + $0x10] sm:$0xff] }
  0x23   : > { %2242 = vmatpush1.bf16.msra.mxu0 %v2241_v39  ;;  %2475 = vmatpush1.bf16.msra.mxu1 %v2241_v39  ;;  %v2293_v29 = vpack.c.bf16 %v1091_v18, %v1089_v17  ;;  %v1093_v35 = vld [vmem:[%s4415_s3 + $0x40] sm:$0xff]  ;;  %v1098_v38 = vld [vmem:[%s4415_s3 + $0x68] sm:$0xff]  ;;  %v1100_v39 = vld [vmem:[%s4415_s3 + $0x78] sm:$0xff] }
  0x24   : > { %2244 = vmatprep.subr.bf16.mxu0 %v2243_v40  ;;  %2468 = vmatprep.subr.bf16.mxu1 %v2243_v40  ;;  %v3080_v40 = vld [vmem:[%s2970_s10 + $0x90] sm:$0xff]  ;;  %v396_v47 = vld [vmem:[%s4414_s2 + $0x138] sm:$0xff]  ;;  %v2299_v48 = vpack.c.bf16 %v1100_v39, %v1098_v38  ;;  %v1097_v49 = vld [vmem:[%s4415_s3 + $0x60] sm:$0xff] }
  0x25   : > { %v383_v43 = vld [vmem:[%s4414_s2 + $0xd0] sm:$0xff]  ;;  %v1104_v53 = vld [vmem:[%s4415_s3 + $0x98] sm:$0xff]  ;;  %v1101_v1 = vld [vmem:[%s4415_s3 + $0x80] sm:$0xff] }
  0x26   : > { %v387_v44 = vld [vmem:[%s4414_s2 + $0xf0] sm:$0xff]  ;;  %v3114_v54 = vld [vmem:[%s2970_s10 + $0x98] sm:$0xff]  ;;  %v3137_v3 = vld [vmem:[%s2970_s10 + $0x20] sm:$0xff] }
  0x27   : > { %2246 = vmatpush1.bf16.msra.mxu0 %v2245_v45  ;;  %2476 = vmatpush1.bf16.msra.mxu1 %v2245_v45  ;;  %v392_v45 = vld [vmem:[%s4414_s2 + $0x118] sm:$0xff]  ;;  %v1099_v50 = vld [vmem:[%s4415_s3 + $0x70] sm:$0xff]  ;;  %v2269_v55 = vpack.c.bf16 %v387_v44, %v383_v43  ;;  %v3148_v6 = vld [vmem:[%s2970_s10 + $0xa0] sm:$0xff] }
  0x28   : > { %2248 = vmatprep.subr.bf16.mxu0 %v2247_v46  ;;  %2469 = vmatprep.subr.bf16.mxu1 %v2247_v46  ;;  %v2297_v46 = vpack.c.bf16 %v1095_v36, %v1093_v35  ;;  %v2271_v56 = vpack.c.bf16 %v396_v47, %v392_v45  ;;  %v400_v60 = vld [vmem:[%s4414_s2 + $0x158] sm:$0xff]  ;;  %v2301_v61 = vpack.c.bf16 %v1099_v50, %v1097_v49  ;;  %v1103_v2 = vld [vmem:[%s4415_s3 + $0x90] sm:$0xff]  ;;  %v3171_v18 = vld [vmem:[%s2970_s10 + $0x28] sm:$0xff] }
  0x29   : > { %v404_v63 = vld [vmem:[%s4414_s2 + $0x178] sm:$0xff]  ;;  %v403_v11 = vld [vmem:[%s4414_s2 + $0x170] sm:$0xff]  ;;  %v1110_v20 = vld [vmem:[%s4415_s3 + $0xc8] sm:$0xff] }
  0x2a   : > { %v2275_v9 = vpack.c.bf16 %v404_v63, %v400_v60  ;;  %v408_v12 = vld [vmem:[%s4414_s2 + $0x198] sm:$0xff]  ;;  %v1107_v17 = vld [vmem:[%s4415_s3 + $0xb0] sm:$0xff]  ;;  %v1109_v36 = vld [vmem:[%s4415_s3 + $0xc0] sm:$0xff] }
  0x2b   : > { %2250 = vmatpush1.bf16.msra.mxu0 %v2249_v51  ;;  %2477 = vmatpush1.bf16.msra.mxu1 %v2249_v51  ;;  %v3103_v51 = vld [vmem:[%s2970_s10 + $0x18] sm:$0xff]  ;;  %v407_v27 = vld [vmem:[%s4414_s2 + $0x190] sm:$0xff]  ;;  %v1113_v50 = vld [vmem:[%s4415_s3 + $0xe0] sm:$0xff] }
  0x2c   : > { %2252 = vmatprep.subr.bf16.mxu0 %v2251_v52  ;;  %2470 = vmatprep.subr.bf16.mxu1 %v2251_v52  ;;  %v1102_v52 = vld [vmem:[%s4415_s3 + $0x88] sm:$0xff]  ;;  %v412_v14 = vld [vmem:[%s4414_s2 + $0x1b8] sm:$0xff]  ;;  %v411_v28 = vld [vmem:[%s4414_s2 + $0x1b0] sm:$0xff] }
  0x2d   : > { %v2303_v0 = vpack.c.bf16 %v1104_v53, %v1102_v52  ;;  %v1112_v22 = vld [vmem:[%s4415_s3 + $0xd8] sm:$0xff]  ;;  %v2279_v26 = vpack.c.bf16 %v412_v14, %v408_v12  ;;  %v1111_v38 = vld [vmem:[%s4415_s3 + $0xd0] sm:$0xff]  ;;  %v2281_v44 = vpack.c.bf16 %v411_v28, %v407_v27  ;;  %v1117_v63 = vld [vmem:[%s4415_s3 + $0x100] sm:$0xff] }
  0x2e   : > { %v2311_v35 = vpack.c.bf16 %v1112_v22, %v1110_v20  ;;  %v3205_v39 = vld [vmem:[%s2970_s10 + $0x30] sm:$0xff]  ;;  %v3233_v53 = vld [vmem:[%s2970_s10 + $0x38] sm:$0xff]  ;;  %v3277_v12 = vld [vmem:[%s2970_s10 + $0x48] sm:$0xff] }
  0x2f   : > { %2254 = vmatpush1.bf16.msra.mxu0 %v2253_v57  ;;  %2478 = vmatpush1.bf16.msra.mxu1 %v2253_v57  ;;  %v391_v57 = vld [vmem:[%s4414_s2 + $0x110] sm:$0xff]  ;;  %v1128_v14 = vld [vmem:[%s4415_s3 + $0x158] sm:$0xff]  ;;  %v1125_v20 = vld [vmem:[%s4415_s3 + $0x140] sm:$0xff] }
  0x30   : > { %2256 = vmatprep.subr.bf16.mxu1 %v2255_v59  ;;  %2288 = vmatprep.subr.bf16.mxu0 %v2287_v5  ;;  %v395_v59 = vld [vmem:[%s4414_s2 + $0x130] sm:$0xff]  ;;  %v1108_v5 = vld [vmem:[%s4415_s3 + $0xb8] sm:$0xff] }
  0x31   : > { %v2273_v8 = vpack.c.bf16 %v395_v59, %v391_v57  ;;  %v3216_v43 = vld [vmem:[%s2970_s10 + $0xb0] sm:$0xff]  ;;  %v3244_v57 = vld [vmem:[%s2970_s10 + $0xb8] sm:$0xff] }
  0x32   : > { %508 = vmatmul.mubr.f32.vlgmr.msra.gmra.mrb[0].mxu0 %v2979_v58  ;;  %604 = vmatmul.mubr.f32.vlgmr.msra.gmra.mrb[0].mxu1 %v2988_v62  ;;  %v419_v47 = vld [vmem:[%s4414_s2 + $0x1f0] sm:$0xff]  ;;  %v1132_v27 = vld [vmem:[%s4415_s3 + $0x178] sm:$0xff] }
  0x33   : > { %513 = vmatprep.mubr.f32.mxu0 %v2746_v7  ;;  %2258 = vmatpush1.bf16.msra.mxu1 %v2257_v4  ;;  %v1106_v4 = vld [vmem:[%s4415_s3 + $0xa8] sm:$0xff]  ;;  %v1115_v52 = vld [vmem:[%s4415_s3 + $0xf0] sm:$0xff] }
  0x34   : > { %609 = vmatprep.mubr.f32.mxu1 %v2746_v7  ;;  %2260 = vmatprep.subr.bf16.mxu1 %v2259_v10  ;;  %v399_v10 = vld [vmem:[%s4414_s2 + $0x150] sm:$0xff]  ;;  %v2307_v15 = vpack.c.bf16 %v1108_v5, %v1106_v4  ;;  %v2317_v60 = vpack.c.bf16 %v1115_v52, %v1113_v50  ;;  %v1124_v4 = vld [vmem:[%s4415_s3 + $0x138] sm:$0xff]  ;;  %v3266_v5 = vld [vmem:[%s2970_s10 + $0xc0] sm:$0xff] }
  0x35   : > { %2290 = vmatpush1.bf16.msra.mxu0 %v2289_v13  ;;  %v2305_v13 = vpack.c.bf16 %v1103_v2, %v1101_v1  ;;  %v3255_v1 = vld [vmem:[%s2970_s10 + $0x40] sm:$0xff]  ;;  %v1122_v2 = vld [vmem:[%s4415_s3 + $0x128] sm:$0xff]  ;;  %v1127_v22 = vld [vmem:[%s4415_s3 + $0x150] sm:$0xff] }
  0x36   : > { %514 = vmatmul.mubr.f32.gmra.mrb[2].mxu0 %v3035_v19  ;;  %2292 = vmatprep.subr.bf16.mxu0 %v2291_v16  ;;  %v1105_v16 = vld [vmem:[%s4415_s3 + $0xa0] sm:$0xff]  ;;  %v3310_v28 = vld [vmem:[%s2970_s10 + $0xd0] sm:$0xff]  ;;  %v1140_v50 = vld [vmem:[%s4415_s3 + $0x1b8] sm:$0xff] }
  0x37   : > { %519 = vmatprep.mubr.f32.mxu0 %v2746_v7  ;;  %610 = vmatmul.mubr.f32.gmra.mrb[2].mxu1 %v3046_v23  ;;  %v2309_v31 = vpack.c.bf16 %v1107_v17, %v1105_v16  ;;  %v3354_v52 = vld [vmem:[%s2970_s10 + $0xe0] sm:$0xff] }
  0x38   : > { %615 = vmatprep.mubr.f32.mxu1 %v2746_v7  ;;  %2262 = vmatpush1.bf16.msra.mxu1 %v2261_v24  ;;  %v3182_v24 = vld [vmem:[%s2970_s10 + $0xa8] sm:$0xff] }
  0x39   : > { %2264 = vmatprep.subr.bf16.mxu1 %v2263_v25  ;;  %2294 = vmatpush1.bf16.msra.mxu0 %v2293_v29  ;;  %v2277_v25 = vpack.c.bf16 %v403_v11, %v399_v10  ;;  %v416_v29 = vld [vmem:[%s4414_s2 + $0x1d8] sm:$0xff]  ;;  %v1121_v10 = vld [vmem:[%s4415_s3 + $0x120] sm:$0xff]  ;;  %v1123_v11 = vld [vmem:[%s4415_s3 + $0x130] sm:$0xff] }
  0x3a   : > { %520 = vmatmul.mubr.f32.gmra.mrb[4].mxu0 %v3069_v37  ;;  %2296 = vmatprep.subr.bf16.mxu0 %v2295_v34  ;;  %v420_v34 = vld [vmem:[%s4414_s2 + $0x1f8] sm:$0xff]  ;;  %v2325_v16 = vpack.c.bf16 %v1123_v11, %v1121_v10  ;;  %v1143_v10 = vld [vmem:[%s4415_s3 + $0x1d0] sm:$0xff] }
  0x3b   : > { %525 = vmatprep.mubr.f32.mxu0 %v2746_v7  ;;  %616 = vmatmul.mubr.f32.gmra.mrb[4].mxu1 %v3080_v40  ;;  %v2283_v45 = vpack.c.bf16 %v420_v34, %v416_v29  ;;  %v2329_v29 = vpack.c.bf16 %v1127_v22, %v1125_v20  ;;  %v1129_v34 = vld [vmem:[%s4415_s3 + $0x160] sm:$0xff]  ;;  %v339_v11 = vld [vmem:[%s2970_s10 + $0x70] sm:$0xff]  ;;  %v1150_v22 = vld [vmem:[%s4415_s3 + $0x208] sm:$0xff] }
  0x3c   : > { %621 = vmatprep.mubr.f32.mxu1 %v2746_v7  ;;  %2266 = vmatpush1.bf16.msra.mxu1 %v2265_v41  ;;  %v1114_v41 = vld [vmem:[%s4415_s3 + $0xe8] sm:$0xff] }
  0x3d   : > { %2268 = vmatprep.subr.bf16.mxu1 %v2267_v42  ;;  %2298 = vmatpush1.bf16.msra.mxu0 %v2297_v46  ;;  %v1116_v42 = vld [vmem:[%s4415_s3 + $0xf8] sm:$0xff]  ;;  %v415_v46 = vld [vmem:[%s4414_s2 + $0x1d0] sm:$0xff] }
  0x3e   : > { %526 = vmatmul.mubr.f32.gmra.mrb[6].mxu0 %v3103_v51  ;;  %2300 = vmatprep.subr.bf16.mxu0 %v2299_v48  ;;  %v2313_v48 = vpack.c.bf16 %v1111_v38, %v1109_v36  ;;  %v2315_v49 = vpack.c.bf16 %v1116_v42, %v1114_v41  ;;  %v2285_v59 = vpack.c.bf16 %v419_v47, %v415_v46  ;;  %v3321_v36 = vld [vmem:[%s2970_s10 + $0x58] sm:$0xff]  ;;  %v1134_v38 = vld [vmem:[%s4415_s3 + $0x188] sm:$0xff]  ;;  %v1133_v46 = vld [vmem:[%s4415_s3 + $0x180] sm:$0xff] }
  0x3f   : > { %531 = vmatprep.mubr.f32.mxu0 %v2746_v7  ;;  %622 = vmatmul.mubr.f32.gmra.mrb[6].mxu1 %v3114_v54  ;;  %v1136_v41 = vld [vmem:[%s4415_s3 + $0x198] sm:$0xff]  ;;  %v1135_v47 = vld [vmem:[%s4415_s3 + $0x190] sm:$0xff] }
  0x40   : > { %627 = vmatprep.mubr.f32.mxu1 %v2746_v7  ;;  %2270 = vmatpush1.bf16.msra.mxu1 %v2269_v55  ;;  %v1118_v55 = vld [vmem:[%s4415_s3 + $0x108] sm:$0xff]  ;;  %v3332_v42 = vld [vmem:[%s2970_s10 + $0xd8] sm:$0xff] }
  0x41   : > { %2272 = vmatprep.subr.bf16.mxu1 %v2271_v56  ;;  %2302 = vmatpush1.bf16.msra.mxu0 %v2301_v61  ;;  %v1120_v56 = vld [vmem:[%s4415_s3 + $0x118] sm:$0xff] }
  0x42   : > { %532 = vmatmul.mubr.f32.gmra.mrb[8].mxu0 %v3137_v3  ;;  %2304 = vmatprep.subr.bf16.mxu0 %v2303_v0  ;;  %v2319_v61 = vpack.c.bf16 %v1120_v56, %v1118_v55  ;;  %v1119_v0 = vld [vmem:[%s4415_s3 + $0x110] sm:$0xff]  ;;  %v2337_v55 = vpack.c.bf16 %v1135_v47, %v1133_v46 }
  0x43   : > { %537 = vmatprep.mubr.f32.mxu0 %v2746_v7  ;;  %628 = vmatmul.mubr.f32.gmra.mrb[8].mxu1 %v3148_v6 }
  0x44   : > { %633 = vmatprep.mubr.f32.mxu1 %v2746_v7  ;;  %2274 = vmatpush1.bf16.msra.mxu1 %v2273_v8  ;;  %v2321_v8 = vpack.c.bf16 %v1119_v0, %v1117_v63  ;;  %v1142_v63 = vld [vmem:[%s4415_s3 + $0x1c8] sm:$0xff]  ;;  %v1144_v0 = vld [vmem:[%s4415_s3 + $0x1d8] sm:$0xff] }
  0x45   : > { %2276 = vmatprep.subr.bf16.mxu1 %v2275_v9  ;;  %2306 = vmatpush1.bf16.msra.mxu0 %v2305_v13  ;;  %v2323_v9 = vpack.c.bf16 %v1124_v4, %v1122_v2  ;;  %v1126_v13 = vld [vmem:[%s4415_s3 + $0x148] sm:$0xff] }
  0x46   : > { %538 = vmatmul.mubr.f32.gmra.mrb[10].mxu0 %v3171_v18  ;;  %2308 = vmatprep.subr.bf16.mxu0 %v2307_v15  ;;  %v3288_v15 = vld [vmem:[%s2970_s10 + $0xc8] sm:$0xff]  ;;  %v2327_v17 = vpack.c.bf16 %v1128_v14, %v1126_v13  ;;  %v3390_v13 = vld [vmem:[%s2970_s10 + $0xf0] sm:$0xff] }
  0x47   : > { %543 = vmatprep.mubr.f32.mxu0 %v2746_v7  ;;  %634 = vmatmul.mubr.f32.gmra.mrb[10].mxu1 %v3182_v24  ;;  %v3376_v2 = vld [vmem:[%s2970_s10 + $0xe8] sm:$0xff] }
  0x48   : > { %639 = vmatprep.mubr.f32.mxu1 %v2746_v7  ;;  %2278 = vmatpush1.bf16.msra.mxu1 %v2277_v25  ;;  %v3299_v25 = vld [vmem:[%s2970_s10 + $0x50] sm:$0xff] }
  0x49   : > { %2280 = vmatprep.subr.bf16.mxu1 %v2279_v26  ;;  %2310 = vmatpush1.bf16.msra.mxu0 %v2309_v31  ;;  %v1130_v26 = vld [vmem:[%s4415_s3 + $0x168] sm:$0xff] }
  0x4a   : > { %544 = vmatmul.mubr.f32.gmra.mrb[12].mxu0 %v3205_v39  ;;  %2312 = vmatprep.subr.bf16.mxu0 %v2311_v35  ;;  %v2331_v31 = vpack.c.bf16 %v1132_v27, %v1130_v26  ;;  %v1131_v35 = vld [vmem:[%s4415_s3 + $0x170] sm:$0xff]  ;;  %v1152_v26 = vld [vmem:[%s4415_s3 + $0x218] sm:$0xff] }
  0x4b   : > { %549 = vmatprep.mubr.f32.mxu0 %v2746_v7  ;;  %640 = vmatmul.mubr.f32.gmra.mrb[12].mxu1 %v3216_v43  ;;  %v2351_v27 = vpack.c.bf16 %v1152_v26, %v1150_v22  ;;  %v1166_v26 = vld [vmem:[%s4415_s3 + $0x288] sm:$0xff] }
  0x4c   : > { %645 = vmatprep.mubr.f32.mxu1 %v2746_v7  ;;  %2282 = vmatpush1.bf16.msra.mxu1 %v2281_v44  ;;  %v2333_v44 = vpack.c.bf16 %v1131_v35, %v1129_v34 }
  0x4d   : > { %2284 = vmatprep.subr.bf16.mxu1 %v2283_v45  ;;  %2314 = vmatpush1.bf16.msra.mxu0 %v2313_v48  ;;  %v2335_v45 = vpack.c.bf16 %v1136_v41, %v1134_v38  ;;  %v3343_v48 = vld [vmem:[%s2970_s10 + $0x60] sm:$0xff]  ;;  %v1155_v38 = vld [vmem:[%s4415_s3 + $0x230] sm:$0xff] }
  0x4e   : > { %550 = vmatmul.mubr.f32.gmra.mrb[14].mxu0 %v3233_v53  ;;  %2316 = vmatprep.subr.bf16.mxu0 %v2315_v49  ;;  %v1138_v49 = vld [vmem:[%s4415_s3 + $0x1a8] sm:$0xff] }
  0x4f   : > { %555 = vmatprep.mubr.f32.mxu0 %v2746_v7  ;;  %646 = vmatmul.mubr.f32.gmra.mrb[14].mxu1 %v3244_v57  ;;  %v2339_v56 = vpack.c.bf16 %v1140_v50, %v1138_v49 }
  0x50   : > { %651 = vmatprep.mubr.f32.mxu1 %v2746_v7  ;;  %2286 = vmatpush1.bf16.msra.mxu1 %v2285_v59  ;;  %v1137_v59 = vld [vmem:[%s4415_s3 + $0x1a0] sm:$0xff] }
  0x51   : > { %2318 = vmatpush1.bf16.msra.mxu0 %v2317_v60  ;;  %v1139_v60 = vld [vmem:[%s4415_s3 + $0x1b0] sm:$0xff] }
  0x52   : > { %556 = vmatmul.mubr.f32.gmra.mrb[16].mxu0 %v3255_v1  ;;  %2320 = vmatprep.subr.bf16.mxu0 %v2319_v61  ;;  %v3365_v61 = vld [vmem:[%s2970_s10 + $0x68] sm:$0xff]  ;;  %v2341_v4 = vpack.c.bf16 %v1139_v60, %v1137_v59 }
  0x53   : > { %561 = vmatprep.mubr.f32.mxu0 %v2746_v7  ;;  %652 = vmatmul.mubr.f32.gmra.mrb[16].mxu1 %v3266_v5 }
  0x54   : > { %657 = vmatprep.mubr.f32.mxu1 %v2746_v7 }
  0x55   : > { %2322 = vmatpush1.bf16.msra.mxu0 %v2321_v8  ;;  %v2343_v8 = vpack.c.bf16 %v1144_v0, %v1142_v63  ;;  %v1159_v63 = vld [vmem:[%s4415_s3 + $0x250] sm:$0xff] }
  0x56   : > { %562 = vmatmul.mubr.f32.gmra.mrb[18].mxu0 %v3277_v12  ;;  %2324 = vmatprep.subr.bf16.mxu0 %v2323_v9  ;;  %v1141_v9 = vld [vmem:[%s4415_s3 + $0x1c0] sm:$0xff] }
  0x57   : > { %567 = vmatprep.mubr.f32.mxu0 %v2746_v7  ;;  %658 = vmatmul.mubr.f32.gmra.mrb[18].mxu1 %v3288_v15  ;;  %v2345_v14 = vpack.c.bf16 %v1143_v10, %v1141_v9 }
  0x58   : > { %663 = vmatprep.mubr.f32.mxu1 %v2746_v7 }
  0x59   : > { %2326 = vmatpush1.bf16.msra.mxu0 %v2325_v16  ;;  %v340_v16 = vld [vmem:[%s2970_s10 + $0x78] sm:$0xff] }
  0x5a   : > { %568 = vmatmul.mubr.f32.gmra.mrb[20].mxu0 %v3299_v25  ;;  %2328 = vmatprep.subr.bf16.mxu0 %v2327_v17  ;;  %v3397_v17 = vld [vmem:[%s2970_s10 + $0xf8] sm:$0xff]  ;;  %s2115_s10 = sshll.u32 %s4290_s22, 4  ;;  %s4360_s10 = int_to_ptr.vmem [resolvable:$true] %s2115_s10 }
  0x5b   : > { %573 = vmatprep.mubr.f32.mxu0 %v2746_v7  ;;  %664 = vmatmul.mubr.f32.gmra.mrb[20].mxu1 %v3310_v28  ;;  %s2666_s27 = scalar_lea.vmem %s4360_s10, 4096  ;;  %p2673_p1 = scmp.lt.s32.totalorder %s4360_s10, %s2671_s21 }
  0x5c   : > { %669 = vmatprep.mubr.f32.mxu1 %v2746_v7  ;;  %p2667_p12 = scmp.ne.s32.totalorder %s4360_s10, %s2666_s27  ;;  %p2674_p2 = scmp.lt.s32.totalorder %s2672_s8, %s2666_s27 }
  0x5d   : > { %2330 = vmatpush1.bf16.msra.mxu0 %v2329_v29 }
  0x5e   : > { %574 = vmatmul.mubr.f32.gmra.mrb[22].mxu0 %v3321_v36  ;;  %2332 = vmatprep.subr.bf16.mxu0 %v2331_v31  ;;  %p2668_p13 = pnand %p2667_p12, %p2831_p4  ;;  %p2675_p3 = por %p2674_p2, %p2673_p1 }
  0x5f   : > { %579 = vmatprep.mubr.f32.mxu0 %v2746_v7  ;;  %670 = vmatmul.mubr.f32.gmra.mrb[22].mxu1 %v3332_v42 }
  0x60   : > { %675 = vmatprep.mubr.f32.mxu1 %v2746_v7  ;;  %p2669_p0 = pneg %p2668_p13 }
  0x61   : > { %2334 = vmatpush1.bf16.msra.mxu0 %v2333_v44  ;;  %v1158_v44 = vld [vmem:[%s4415_s3 + $0x248] sm:$0xff] }
  0x62   : > { %580 = vmatmul.mubr.f32.gmra.mrb[24].mxu0 %v3343_v48  ;;  %2336 = vmatprep.subr.bf16.mxu0 %v2335_v45  ;;  %v1160_v45 = vld [vmem:[%s4415_s3 + $0x258] sm:$0xff]  ;;  %p2676_p5 = pnand %p2675_p3, %p2669_p0 }
  0x63   : > { %585 = vmatprep.mubr.f32.mxu0 %v2746_v7  ;;  %676 = vmatmul.mubr.f32.gmra.mrb[24].mxu1 %v3354_v52  ;;  %v2359_v60 = vpack.c.bf16 %v1160_v45, %v1158_v44 }
  0x64   : > { %681 = vmatprep.mubr.f32.mxu1 %v2746_v7 }
  0x65   : > { %2338 = vmatpush1.bf16.msra.mxu0 %v2337_v55 }
  0x66   : > { %586 = vmatmul.mubr.f32.gmra.mrb[26].mxu0 %v3365_v61  ;;  %2340 = vmatprep.subr.bf16.mxu0 %v2339_v56 }
  0x67   : > { %591 = vmatprep.mubr.f32.mxu0 %v2746_v7  ;;  %682 = vmatmul.mubr.f32.gmra.mrb[26].mxu1 %v3376_v2 }
  0x68   : > { %687 = vmatprep.mubr.f32.mxu1 %v2746_v7 }
  0x69   : > { %2342 = vmatpush1.bf16.msra.mxu0 %v2341_v4  ;;  %v1162_v4 = vld [vmem:[%s4415_s3 + $0x268] sm:$0xff] }
  0x6a   : > { %592 = vmatmul.mubr.f32.gmra.mrb[28].mxu0 %v339_v11  ;;  %2344 = vmatprep.subr.bf16.mxu0 %v2343_v8  ;;  %v1164_v8 = vld [vmem:[%s4415_s3 + $0x278] sm:$0xff] }
  0x6b   : > { %597 = vmatprep.mubr.f32.mxu0 %v2746_v7  ;;  %688 = vmatmul.mubr.f32.gmra.mrb[28].mxu1 %v3390_v13 }
  0x6c   : > { %693 = vmatprep.mubr.f32.mxu1 %v2746_v7 }
  0x6d   : > { %2346 = vmatpush1.bf16.msra.mxu0 %v2345_v14 }
  0x6e   : > { %598 = vmatmul.mubr.f32.gmra.mrb[30].mxu0 %v340_v16 }
  0x6f   : > { %694 = vmatmul.mubr.f32.gmra.mrb[30].mxu1 %v3397_v17 }
  0x70   : > { %764 = vmatprep.mubr.f32.mxu1 %v2746_v7 }
  0x73   : > { %765 = vmatmul.mubr.f32.vlgmr.msra.gmra.mrb[32].mxu1 %v2979_v58  ;;  %v1146_v58 = vld [vmem:[%s4415_s3 + $0x1e8] sm:$0xff] }
  0x74   : > { %770 = vmatprep.mubr.f32.mxu1 %v2746_v7 }
  0x77   : > { %771 = vmatmul.mubr.f32.gmra.mrb[34].mxu1 %v3035_v19  ;;  %v1148_v19 = vld [vmem:[%s4415_s3 + $0x1f8] sm:$0xff] }
  0x78   : > { %776 = vmatprep.mubr.f32.mxu1 %v2746_v7  ;;  %v2347_v20 = vpack.c.bf16 %v1148_v19, %v1146_v58 }
  0x7a   : > { %2348 = vmatprep.subr.bf16.mxu0 %v2347_v20  ;;  %v2363_v20 = vpack.c.bf16 %v1164_v8, %v1162_v4 }
  0x7b   : > { %777 = vmatmul.mubr.f32.gmra.mrb[36].mxu1 %v3069_v37  ;;  %v1145_v37 = vld [vmem:[%s4415_s3 + $0x1e0] sm:$0xff] }
  0x7c   : > { %782 = vmatprep.mubr.f32.mxu1 %v2746_v7 }
  0x7f   : > { %783 = vmatmul.mubr.f32.gmra.mrb[38].mxu1 %v3103_v51  ;;  %v1147_v51 = vld [vmem:[%s4415_s3 + $0x1f0] sm:$0xff] }
  0x80   : > { %788 = vmatprep.mubr.f32.mxu1 %v2746_v7 }
  0x83   : > { %789 = vmatmul.mubr.f32.gmra.mrb[40].mxu1 %v3137_v3  ;;  %v2349_v3 = vpack.c.bf16 %v1147_v51, %v1145_v37  ;;  %v1161_v37 = vld [vmem:[%s4415_s3 + $0x260] sm:$0xff]  ;;  %v1163_v51 = vld [vmem:[%s4415_s3 + $0x270] sm:$0xff] }
  0x84   : > { %794 = vmatprep.mubr.f32.mxu1 %v2746_v7 }
  0x85   : > { %2350 = vmatpush1.bf16.msra.mxu0 %v2349_v3 }
  0x86   : > { %2352 = vmatprep.subr.bf16.mxu0 %v2351_v27  ;;  %v1168_v27 = vld [vmem:[%s4415_s3 + $0x298] sm:$0xff] }
  0x87   : > { %795 = vmatmul.mubr.f32.gmra.mrb[42].mxu1 %v3171_v18 }
  0x88   : > { %800 = vmatprep.mubr.f32.mxu1 %v2746_v7 }
  0x8b   : > { %801 = vmatmul.mubr.f32.gmra.mrb[44].mxu1 %v3205_v39  ;;  %v1151_v39 = vld [vmem:[%s4415_s3 + $0x210] sm:$0xff] }
  0x8c   : > { %806 = vmatprep.mubr.f32.mxu1 %v2746_v7 }
  0x8f   : > { %807 = vmatmul.mubr.f32.gmra.mrb[46].mxu1 %v3233_v53 }
  0x90   : > { %812 = vmatprep.mubr.f32.mxu1 %v2746_v7 }
  0x93   : > { %813 = vmatmul.mubr.f32.gmra.mrb[48].mxu1 %v3255_v1 }
  0x94   : > { %818 = vmatprep.mubr.f32.mxu1 %v2746_v7 }
  0x97   : > { %819 = vmatmul.mubr.f32.gmra.mrb[50].mxu1 %v3277_v12 }
  0x98   : > { %824 = vmatprep.mubr.f32.mxu1 %v2746_v7 }
  0x9b   : > { %825 = vmatmul.mubr.f32.gmra.mrb[52].mxu1 %v3299_v25 }
  0x9c   : > { %830 = vmatprep.mubr.f32.mxu1 %v2746_v7 }
  0x9f   : > { %831 = vmatmul.mubr.f32.gmra.mrb[54].mxu1 %v3321_v36  ;;  %v1153_v36 = vld [vmem:[%s4415_s3 + $0x220] sm:$0xff] }
  0xa0   : > { %836 = vmatprep.mubr.f32.mxu1 %v2746_v7 }
  0xa3   : > { %837 = vmatmul.mubr.f32.gmra.mrb[56].mxu1 %v3343_v48 }
  0xa4   : > { %842 = vmatprep.mubr.f32.mxu1 %v2746_v7 }
  0xa7   : > { %843 = vmatmul.mubr.f32.gmra.mrb[58].mxu1 %v3365_v61  ;;  %v1157_v61 = vld [vmem:[%s4415_s3 + $0x240] sm:$0xff] }
  0xa8   : > { %848 = vmatprep.mubr.f32.mxu1 %v2746_v7 }
  0xab   : > { %849 = vmatmul.mubr.f32.gmra.mrb[60].mxu1 %v339_v11 }
  0xac   : > { %854 = vmatprep.mubr.f32.mxu1 %v2746_v7 }
  0xaf   : > { %855 = vmatmul.mubr.f32.gmra.mrb[62].mxu1 %v340_v16  ;;  %v2361_v16 = vpack.c.bf16 %v1159_v63, %v1157_v61  ;;  %v1176_v61 = vld [vmem:[%s4415_s3 + $0x2d8] sm:$0xff] }
  0xb0   : > { %860 = vmatprep.mubr.f32.mxu1 %v2746_v7 }
  0xb3   : > { %861 = vmatmul.mubr.f32.gmra.mrb[64].mxu1 %v2988_v62  ;;  %v425_v62 = vsub.s32 0, %v2897_v21 }
  0xb4   : > { %866 = vmatprep.mubr.f32.mxu1 %v2746_v7 }
  0xb7   : > { %867 = vmatmul.mubr.f32.gmra.mrb[66].mxu1 %v3046_v23  ;;  %v429_v23 = vsub.s32 1, %v2897_v21 }
  0xb8   : > { %872 = vmatprep.mubr.f32.mxu1 %v2746_v7 }
  0xbb   : > { %873 = vmatmul.mubr.f32.gmra.mrb[68].mxu1 %v3080_v40  ;;  %v3485_v40 = vrot.slane %v2916_v30, %v425_v62 }
  0xbc   : > { %878 = vmatprep.mubr.f32.mxu1 %v2746_v7 }
  0xbf   : > { %879 = vmatmul.mubr.f32.gmra.mrb[70].mxu1 %v3114_v54  ;;  %v3490_v54 = vrot.slane %v2916_v30, %v429_v23  ;;  %v1154_v30 = vld [vmem:[%s4415_s3 + $0x228] sm:$0xff] }
  0xc0   : > { %884 = vmatprep.mubr.f32.mxu1 %v2746_v7 }
  0xc3   : > { %885 = vmatmul.mubr.f32.gmra.mrb[72].mxu1 %v3148_v6 }
  0xc4   : > { %890 = vmatprep.mubr.f32.mxu1 %v2746_v7 }
  0xc7   : > { %891 = vmatmul.mubr.f32.gmra.mrb[74].mxu1 %v3182_v24  ;;  %v1149_v24 = vld [vmem:[%s4415_s3 + $0x200] sm:$0xff] }
  0xc8   : > { %896 = vmatprep.mubr.f32.mxu1 %v2746_v7 }
  0xcb   : > { %897 = vmatmul.mubr.f32.gmra.mrb[76].mxu1 %v3216_v43 }
  0xcc   : > { %902 = vmatprep.mubr.f32.mxu1 %v2746_v7 }
  0xcf   : > { %903 = vmatmul.mubr.f32.gmra.mrb[78].mxu1 %v3244_v57  ;;  %v1156_v57 = vld [vmem:[%s4415_s3 + $0x238] sm:$0xff] }
  0xd0   : > { %908 = vmatprep.mubr.f32.mxu1 %v2746_v7  ;;  %v2355_v35 = vpack.c.bf16 %v1156_v57, %v1154_v30 }
  0xd3   : > { %909 = vmatmul.mubr.f32.gmra.mrb[80].mxu1 %v3266_v5 }
  0xd4   : > { %914 = vmatprep.mubr.f32.mxu1 %v2746_v7 }
  0xd7   : > { %915 = vmatmul.mubr.f32.gmra.mrb[82].mxu1 %v3288_v15 }
  0xd8   : > { %920 = vmatprep.mubr.f32.mxu1 %v2746_v7 }
  0xdb   : > { %921 = vmatmul.mubr.f32.gmra.mrb[84].mxu1 %v3310_v28  ;;  %v2353_v28 = vpack.c.bf16 %v1151_v39, %v1149_v24 }
  0xdc   : > { %926 = vmatprep.mubr.f32.mxu1 %v2746_v7 }
  0xdf   : > { %927 = vmatmul.mubr.f32.gmra.mrb[86].mxu1 %v3332_v42 }
  0xe0   : > { %932 = vmatprep.mubr.f32.mxu1 %v2746_v7 }
  0xe3   : > { %933 = vmatmul.mubr.f32.gmra.mrb[88].mxu1 %v3354_v52  ;;  %v2357_v52 = vpack.c.bf16 %v1155_v38, %v1153_v36 }
  0xe4   : > { %938 = vmatprep.mubr.f32.mxu1 %v2746_v7 }
  0xe7   : > { %939 = vmatmul.mubr.f32.gmra.mrb[90].mxu1 %v3376_v2 }
  0xe8   : > { %944 = vmatprep.mubr.f32.mxu1 %v2746_v7 }
  0xeb   : > { %945 = vmatmul.mubr.f32.gmra.mrb[92].mxu1 %v3390_v13 }
  0xec   : > { %950 = vmatprep.mubr.f32.mxu1 %v2746_v7 }
  0xef   : > { %951 = vmatmul.mubr.f32.gmra.mrb[94].mxu1 %v3397_v17 }
 0x105   : > { %v509_v6 = vpop.f32.mrb[0].mxu0  ;;  %v605_v43 = vpop.f32.mrb[0].mxu1 }
 0x106   : > { %v510_v18 = vadd.f32 %v509_v6, %v3485_v40  ;;  %v511_v7 = vpop.f32.mrb[1].mxu0  ;;  %v3507_v1 = vadd.f32 %v605_v43, %v3485_v40  ;;  %v607_v5 = vpop.f32.mrb[1].mxu1  ;;  %v2365_v43 = vpack.c.bf16 %v1163_v51, %v1161_v37  ;;  %v1178_v51 = vld [vmem:[%s4415_s3 + $0x2e8] sm:$0xff] }
 0x107   : > { %v512_v53 = vadd.f32 %v511_v7, %v3490_v54  ;;  %v3510_v12 = vadd.f32 %v607_v5, %v3490_v54  ;;  %v2367_v5 = vpack.c.bf16 %v1168_v27, %v1166_v26 }
 0x108   : > { %v957_v29 = vmax.f32 %v510_v18, 0.0 }
 0x109   : > { %v958_v15 = vmax.f32 %v512_v53, 0.0  ;;  %v515_v25 = vpop.f32.mrb[2].mxu0 }
 0x10a   : > { %v516_v31 = vadd.f32 %v515_v25, %v3485_v40  ;;  %v517_v34 = vpop.f32.mrb[3].mxu0  ;;  %v611_v41 = vpop.f32.mrb[2].mxu1  ;;  %v1167_v25 = vld [vmem:[%s4415_s3 + $0x290] sm:$0xff] }
 0x10b   : > { %v518_v42 = vadd.f32 %v517_v34, %v3490_v54  ;;  %1289 = vmatprep.mubr.f32.mxu0 %v958_v15  ;;  %v3527_v46 = vadd.f32 %v611_v41, %v3485_v40  ;;  %v613_v47 = vpop.f32.mrb[3].mxu1  ;;  %v1165_v15 = vld [vmem:[%s4415_s3 + $0x280] sm:$0xff]  ;;  %v1172_v34 = vld [vmem:[%s4415_s3 + $0x2b8] sm:$0xff] }
 0x10c   : > { %1290 = vmatmul.mubr.f32.vlgmr.msra.gmra.mrb[32].mxu0 %v957_v29  ;;  %v3530_v48 = vadd.f32 %v613_v47, %v3490_v54  ;;  %v961_v55 = vmax.f32 %v516_v31, 0.0  ;;  %v1170_v31 = vld [vmem:[%s4415_s3 + $0x2a8] sm:$0xff]  ;;  %v2369_v44 = vpack.c.bf16 %v1167_v25, %v1165_v15  ;;  %v1179_v15 = vld [vmem:[%s4415_s3 + $0x2f0] sm:$0xff] }
 0x10d   : > { %v962_v49 = vmax.f32 %v518_v42, 0.0  ;;  %2354 = vmatpush1.bf16.msra.mxu0 %v2353_v28  ;;  %v521_v50 = vpop.f32.mrb[4].mxu0 }
 0x10e   : > { %v522_v56 = vadd.f32 %v521_v50, %v3485_v40  ;;  %v523_v59 = vpop.f32.mrb[5].mxu0  ;;  %2356 = vmatprep.subr.bf16.mxu0 %v2355_v35  ;;  %v617_v0 = vpop.f32.mrb[4].mxu1  ;;  %v2371_v50 = vpack.c.bf16 %v1172_v34, %v1170_v31  ;;  %v1184_v31 = vld [vmem:[%s4415_s3 + $0x318] sm:$0xff] }
 0x10f   : > { %v524_v2 = vadd.f32 %v523_v59, %v3490_v54  ;;  %1295 = vmatprep.mubr.f32.mxu0 %v962_v49  ;;  %v3547_v9 = vadd.f32 %v617_v0, %v3485_v40  ;;  %v619_v10 = vpop.f32.mrb[5].mxu1 }
 0x110   : > { %1296 = vmatmul.mubr.f32.gmra.mrb[34].mxu0 %v961_v55  ;;  %v3550_v11 = vadd.f32 %v619_v10, %v3490_v54  ;;  %v965_v17 = vmax.f32 %v522_v56, 0.0  ;;  %v1171_v55 = vld [vmem:[%s4415_s3 + $0x2b0] sm:$0xff] }
 0x111   : > { %v966_v13 = vmax.f32 %v524_v2, 0.0  ;;  %v527_v14 = vpop.f32.mrb[6].mxu0  ;;  %2358 = vmatpush1.bf16.msra.mxu0 %v2357_v52  ;;  %v1169_v52 = vld [vmem:[%s4415_s3 + $0x2a0] sm:$0xff] }
 0x112   : > { %v528_v58 = vadd.f32 %v527_v14, %v3485_v40  ;;  %v529_v19 = vpop.f32.mrb[7].mxu0  ;;  %2360 = vmatprep.subr.bf16.mxu0 %v2359_v60  ;;  %v623_v3 = vpop.f32.mrb[6].mxu1  ;;  %v1174_v60 = vld [vmem:[%s4415_s3 + $0x2c8] sm:$0xff]  ;;  %v2373_v10 = vpack.c.bf16 %v1171_v55, %v1169_v52  ;;  %v1181_v55 = vld [vmem:[%s4415_s3 + $0x300] sm:$0xff] }
 0x113   : > { %v530_v22 = vadd.f32 %v529_v19, %v3490_v54  ;;  %1301 = vmatprep.mubr.f32.mxu0 %v966_v13  ;;  %v3567_v6 = vadd.f32 %v623_v3, %v3485_v40  ;;  %v625_v18 = vpop.f32.mrb[7].mxu1  ;;  %v1175_v19 = vld [vmem:[%s4415_s3 + $0x2d0] sm:$0xff]  ;;  %v1180_v3 = vld [vmem:[%s4415_s3 + $0x2f8] sm:$0xff] }
 0x114   : > { %1302 = vmatmul.mubr.f32.gmra.mrb[36].mxu0 %v965_v17  ;;  %v3570_v7 = vadd.f32 %v625_v18, %v3490_v54  ;;  %v969_v53 = vmax.f32 %v528_v58, 0.0  ;;  %v2375_v17 = vpack.c.bf16 %v1176_v61, %v1174_v60  ;;  %v1173_v58 = vld [vmem:[%s4415_s3 + $0x2c0] sm:$0xff]  ;;  %v1186_v61 = vld [vmem:[%s4415_s3 + $0x328] sm:$0xff] }
 0x115   : > { %v970_v24 = vmax.f32 %v530_v22, 0.0  ;;  %v533_v39 = vpop.f32.mrb[8].mxu0  ;;  %2362 = vmatpush1.bf16.msra.mxu0 %v2361_v16 }
 0x116   : > { %v534_v30 = vadd.f32 %v533_v39, %v3485_v40  ;;  %v535_v57 = vpop.f32.mrb[9].mxu0  ;;  %2364 = vmatprep.subr.bf16.mxu0 %v2363_v20  ;;  %v629_v28 = vpop.f32.mrb[8].mxu1  ;;  %v2377_v39 = vpack.c.bf16 %v1175_v19, %v1173_v58 }
 0x117   : > { %v536_v29 = vadd.f32 %v535_v57, %v3490_v54  ;;  %1307 = vmatprep.mubr.f32.mxu0 %v970_v24  ;;  %v3587_v35 = vadd.f32 %v629_v28, %v3485_v40  ;;  %v631_v36 = vpop.f32.mrb[9].mxu1  ;;  %v2379_v57 = vpack.c.bf16 %v1180_v3, %v1178_v51  ;;  %v1187_v51 = vld [vmem:[%s4415_s3 + $0x330] sm:$0xff] }
 0x118   : > { %1308 = vmatmul.mubr.f32.gmra.mrb[38].mxu0 %v969_v53  ;;  %v3590_v38 = vadd.f32 %v631_v36, %v3490_v54  ;;  %v973_v45 = vmax.f32 %v534_v30, 0.0 }
 0x119   : > { %v974_v41 = vmax.f32 %v536_v29, 0.0  ;;  %v539_v42 = vpop.f32.mrb[10].mxu0  ;;  %2366 = vmatpush1.bf16.msra.mxu0 %v2365_v43  ;;  %v1182_v29 = vld [vmem:[%s4415_s3 + $0x308] sm:$0xff] }
 0x11a   : > { %v540_v47 = vadd.f32 %v539_v42, %v3485_v40  ;;  %v541_v49 = vpop.f32.mrb[11].mxu0  ;;  %2368 = vmatprep.subr.bf16.mxu0 %v2367_v5  ;;  %v635_v56 = vpop.f32.mrb[10].mxu1  ;;  %v1177_v5 = vld [vmem:[%s4415_s3 + $0x2e0] sm:$0xff]  ;;  %v2383_v52 = vpack.c.bf16 %v1184_v31, %v1182_v29 }
 0x11b   : > { %v542_v59 = vadd.f32 %v541_v49, %v3490_v54  ;;  %1313 = vmatprep.mubr.f32.mxu0 %v974_v41  ;;  %v3607_v63 = vadd.f32 %v635_v56, %v3485_v40  ;;  %v637_v0 = vpop.f32.mrb[11].mxu1  ;;  %v1183_v56 = vld [vmem:[%s4415_s3 + $0x310] sm:$0xff]  ;;  %v1189_v31 = vld [vmem:[%s4415_s3 + $0x340] sm:$0xff] }
 0x11c   : > { %1314 = vmatmul.mubr.f32.gmra.mrb[40].mxu0 %v973_v45  ;;  %v3610_v2 = vadd.f32 %v637_v0, %v3490_v54  ;;  %v977_v13 = vmax.f32 %v540_v47, 0.0  ;;  %v2381_v45 = vpack.c.bf16 %v1179_v15, %v1177_v5  ;;  %v1188_v0 = vld [vmem:[%s4415_s3 + $0x338] sm:$0xff] }
 0x11d   : > { %v978_v4 = vmax.f32 %v542_v59, 0.0  ;;  %v545_v8 = vpop.f32.mrb[12].mxu0  ;;  %2370 = vmatpush1.bf16.msra.mxu0 %v2369_v44 }
 0x11e   : > { %v546_v14 = vadd.f32 %v545_v8, %v3485_v40  ;;  %v547_v16 = vpop.f32.mrb[13].mxu0  ;;  %2372 = vmatprep.subr.bf16.mxu0 %v2371_v50  ;;  %v641_v20 = vpop.f32.mrb[12].mxu1 }
 0x11f   : > { %v548_v37 = vadd.f32 %v547_v16, %v3490_v54  ;;  %1319 = vmatprep.mubr.f32.mxu0 %v978_v4  ;;  %v3627_v22 = vadd.f32 %v641_v20, %v3485_v40  ;;  %v643_v26 = vpop.f32.mrb[13].mxu1  ;;  %v2385_v16 = vpack.c.bf16 %v1183_v56, %v1181_v55  ;;  %v2387_v20 = vpack.c.bf16 %v1188_v0, %v1186_v61 }
 0x120   : > { %1320 = vmatmul.mubr.f32.gmra.mrb[42].mxu0 %v977_v13  ;;  %v3630_v27 = vadd.f32 %v643_v26, %v3490_v54  ;;  %v981_v43 = vmax.f32 %v546_v14, 0.0 }
 0x121   : > { %v982_v18 = vmax.f32 %v548_v37, 0.0  ;;  %v551_v24 = vpop.f32.mrb[14].mxu0  ;;  %2374 = vmatpush1.bf16.msra.mxu0 %v2373_v10  ;;  %v1185_v37 = vld [vmem:[%s4415_s3 + $0x320] sm:$0xff] }
 0x122   : > { %v552_v53 = vadd.f32 %v551_v24, %v3485_v40  ;;  %v553_v30 = vpop.f32.mrb[15].mxu0  ;;  %2376 = vmatprep.subr.bf16.mxu0 %v2375_v17  ;;  %v647_v25 = vpop.f32.mrb[14].mxu1  ;;  %v1192_v24 = vld [vmem:[%s4415_s3 + $0x358] sm:$0xff]  ;;  %v2389_v5 = vpack.c.bf16 %v1187_v51, %v1185_v37 }
 0x123   : > { %v554_v28 = vadd.f32 %v553_v30, %v3490_v54  ;;  %1325 = vmatprep.mubr.f32.mxu0 %v982_v18  ;;  %v3647_v34 = vadd.f32 %v647_v25, %v3485_v40  ;;  %v649_v36 = vpop.f32.mrb[15].mxu1  ;;  %v1190_v18 = vld [vmem:[%s4415_s3 + $0x348] sm:$0xff] }
 0x124   : > { %1326 = vmatmul.mubr.f32.gmra.mrb[44].mxu0 %v981_v43  ;;  %v3650_v41 = vadd.f32 %v649_v36, %v3490_v54  ;;  %v985_v47 = vmax.f32 %v552_v53, 0.0  ;;  %v2391_v29 = vpack.c.bf16 %v1192_v24, %v1190_v18  ;;  %v1191_v36 = vld [vmem:[%s4415_s3 + $0x350] sm:$0xff] }
 0x125   : > { %v986_v42 = vmax.f32 %v554_v28, 0.0  ;;  %v557_v44 = vpop.f32.mrb[16].mxu0  ;;  %2378 = vmatpush1.bf16.msra.mxu0 %v2377_v39 }
 0x126   : > { %v558_v49 = vadd.f32 %v557_v44, %v3485_v40  ;;  %v559_v50 = vpop.f32.mrb[17].mxu0  ;;  %2380 = vmatprep.subr.bf16.mxu0 %v2379_v57  ;;  %v653_v59 = vpop.f32.mrb[16].mxu1 }
 0x127   : > { %v560_v60 = vadd.f32 %v559_v50, %v3490_v54  ;;  %1331 = vmatprep.mubr.f32.mxu0 %v986_v42  ;;  %v3667_v4 = vadd.f32 %v653_v59, %v3485_v40  ;;  %v655_v8 = vpop.f32.mrb[17].mxu1  ;;  %v2393_v59 = vpack.c.bf16 %v1191_v36, %v1189_v31  ;;  %v1204_v31 = vld [vmem:[%s4415_s3 + $0x3b8] sm:$0xff] }
 0x128   : > { %1332 = vmatmul.mubr.f32.gmra.mrb[46].mxu0 %v985_v47  ;;  %v3670_v10 = vadd.f32 %v655_v8, %v3490_v54  ;;  %v989_v17 = vmax.f32 %v558_v49, 0.0  ;;  %v1196_v47 = vld [vmem:[%s4415_s3 + $0x378] sm:$0xff] }
 0x129   : > { %v990_v13 = vmax.f32 %v560_v60, 0.0  ;;  %v563_v14 = vpop.f32.mrb[18].mxu0  ;;  %2382 = vmatpush1.bf16.msra.mxu0 %v2381_v45  ;;  %v1194_v45 = vld [vmem:[%s4415_s3 + $0x368] sm:$0xff] }
 0x12a   : > { %v564_v58 = vadd.f32 %v563_v14, %v3485_v40  ;;  %v565_v19 = vpop.f32.mrb[19].mxu0  ;;  %2384 = vmatprep.subr.bf16.mxu0 %v2383_v52  ;;  %v659_v3 = vpop.f32.mrb[18].mxu1  ;;  %v2395_v8 = vpack.c.bf16 %v1196_v47, %v1194_v45  ;;  %v1195_v14 = vld [vmem:[%s4415_s3 + $0x370] sm:$0xff] }
 0x12b   : > { %v566_v26 = vadd.f32 %v565_v19, %v3490_v54  ;;  %1337 = vmatprep.mubr.f32.mxu0 %v990_v13  ;;  %v3687_v39 = vadd.f32 %v659_v3, %v3485_v40  ;;  %v661_v43 = vpop.f32.mrb[19].mxu1  ;;  %v1193_v13 = vld [vmem:[%s4415_s3 + $0x360] sm:$0xff]  ;;  %v1200_v19 = vld [vmem:[%s4415_s3 + $0x398] sm:$0xff] }
 0x12c   : > { %1338 = vmatmul.mubr.f32.gmra.mrb[48].mxu0 %v989_v17  ;;  %v3690_v53 = vadd.f32 %v661_v43, %v3490_v54  ;;  %v993_v15 = vmax.f32 %v564_v58, 0.0  ;;  %v1198_v58 = vld [vmem:[%s4415_s3 + $0x388] sm:$0xff]  ;;  %v2397_v18 = vpack.c.bf16 %v1195_v14, %v1193_v13 }
 0x12d   : > { %v994_v30 = vmax.f32 %v566_v26, 0.0  ;;  %v569_v57 = vpop.f32.mrb[20].mxu0  ;;  %2386 = vmatpush1.bf16.msra.mxu0 %v2385_v16 }
 0x12e   : > { %v570_v25 = vadd.f32 %v569_v57, %v3485_v40  ;;  %v571_v28 = vpop.f32.mrb[21].mxu0  ;;  %2388 = vmatprep.subr.bf16.mxu0 %v2387_v20  ;;  %v665_v42 = vpop.f32.mrb[20].mxu1  ;;  %v2399_v57 = vpack.c.bf16 %v1200_v19, %v1198_v58  ;;  %v1208_v58 = vld [vmem:[%s4415_s3 + $0x3d8] sm:$0xff] }
 0x12f   : > { %v572_v44 = vadd.f32 %v571_v28, %v3490_v54  ;;  %1343 = vmatprep.mubr.f32.mxu0 %v994_v30  ;;  %v3707_v49 = vadd.f32 %v665_v42, %v3485_v40  ;;  %v667_v50 = vpop.f32.mrb[21].mxu1 }
 0x130   : > { %1344 = vmatmul.mubr.f32.gmra.mrb[50].mxu0 %v993_v15  ;;  %v3710_v52 = vadd.f32 %v667_v50, %v3490_v54  ;;  %v997_v60 = vmax.f32 %v570_v25, 0.0  ;;  %v1199_v15 = vld [vmem:[%s4415_s3 + $0x390] sm:$0xff] }
 0x131   : > { %v998_v55 = vmax.f32 %v572_v44, 0.0  ;;  %v575_v56 = vpop.f32.mrb[22].mxu0  ;;  %2390 = vmatpush1.bf16.msra.mxu0 %v2389_v5  ;;  %v1197_v5 = vld [vmem:[%s4415_s3 + $0x380] sm:$0xff] }
 0x132   : > { %v576_v61 = vadd.f32 %v575_v56, %v3485_v40  ;;  %v577_v0 = vpop.f32.mrb[23].mxu0  ;;  %2392 = vmatprep.subr.bf16.mxu0 %v2391_v29  ;;  %v671_v16 = vpop.f32.mrb[22].mxu1  ;;  %v1202_v29 = vld [vmem:[%s4415_s3 + $0x3a8] sm:$0xff]  ;;  %v2401_v50 = vpack.c.bf16 %v1199_v15, %v1197_v5  ;;  %v1205_v5 = vld [vmem:[%s4415_s3 + $0x3c0] sm:$0xff]  ;;  %v1207_v15 = vld [vmem:[%s4415_s3 + $0x3d0] sm:$0xff] }
 0x133   : > { %v578_v17 = vadd.f32 %v577_v0, %v3490_v54  ;;  %1349 = vmatprep.mubr.f32.mxu0 %v998_v55  ;;  %v3727_v20 = vadd.f32 %v671_v16, %v3485_v40  ;;  %v673_v37 = vpop.f32.mrb[23].mxu1  ;;  %v1203_v0 = vld [vmem:[%s4415_s3 + $0x3b0] sm:$0xff] }
 0x134   : > { %1350 = vmatmul.mubr.f32.gmra.mrb[52].mxu0 %v997_v60  ;;  %v3730_v51 = vadd.f32 %v673_v37, %v3490_v54  ;;  %v1001_v24 = vmax.f32 %v576_v61, 0.0  ;;  %v2403_v60 = vpack.c.bf16 %v1204_v31, %v1202_v29  ;;  %v1201_v61 = vld [vmem:[%s4415_s3 + $0x3a0] sm:$0xff]  ;;  %v1210_v31 = vld [vmem:[%s4415_s3 + $0x3e8] sm:$0xff] }
 0x135   : > { %v1002_v3 = vmax.f32 %v578_v17, 0.0  ;;  %v581_v26 = vpop.f32.mrb[24].mxu0  ;;  %2394 = vmatpush1.bf16.msra.mxu0 %v2393_v59  ;;  %v1206_v17 = vld [vmem:[%s4415_s3 + $0x3c8] sm:$0xff] }
 0x136   : > { %v582_v43 = vadd.f32 %v581_v26, %v3485_v40  ;;  %v583_v30 = vpop.f32.mrb[25].mxu0  ;;  %2396 = vmatprep.subr.bf16.mxu0 %v2395_v8  ;;  %v677_v25 = vpop.f32.mrb[24].mxu1  ;;  %v2405_v26 = vpack.c.bf16 %v1203_v0, %v1201_v61 }
 0x137   : > { %v584_v28 = vadd.f32 %v583_v30, %v3490_v54  ;;  %1355 = vmatprep.mubr.f32.mxu0 %v1002_v3  ;;  %v3747_v36 = vadd.f32 %v677_v25, %v3485_v40  ;;  %v679_v42 = vpop.f32.mrb[25].mxu1  ;;  %v2407_v30 = vpack.c.bf16 %v1208_v58, %v1206_v17 }
 0x138   : > { %1356 = vmatmul.mubr.f32.gmra.mrb[54].mxu0 %v1001_v24  ;;  %v3750_v44 = vadd.f32 %v679_v42, %v3490_v54  ;;  %v1005_v55 = vmax.f32 %v582_v43, 0.0  ;;  %v1212_v42 = vld [vmem:[%s4415_s3 + $0x3f8] sm:$0xff] }
 0x139   : > { %v1006_v45 = vmax.f32 %v584_v28, 0.0  ;;  %v587_v47 = vpop.f32.mrb[26].mxu0  ;;  %2398 = vmatpush1.bf16.msra.mxu0 %v2397_v18  ;;  %v2411_v0 = vpack.c.bf16 %v1212_v42, %v1210_v31 }
 0x13a   : > { %v588_v56 = vadd.f32 %v587_v47, %v3485_v40  ;;  %v589_v59 = vpop.f32.mrb[27].mxu0  ;;  %2400 = vmatprep.subr.bf16.mxu0 %v2399_v57  ;;  %v683_v8 = vpop.f32.mrb[26].mxu1 }
 0x13b   : > { %v590_v13 = vadd.f32 %v589_v59, %v3490_v54  ;;  %1361 = vmatprep.mubr.f32.mxu0 %v1006_v45  ;;  %v3761_v14 = vadd.f32 %v683_v8, %v3485_v40  ;;  %v685_v16 = vpop.f32.mrb[27].mxu1  ;;  %v1209_v8 = vld [vmem:[%s4415_s3 + $0x3e0] sm:$0xff] }
 0x13c   : > { %1362 = vmatmul.mubr.f32.gmra.mrb[56].mxu0 %v1005_v55  ;;  %v3770_v19 = vadd.f32 %v685_v16, %v3490_v54  ;;  %v1009_v18 = vmax.f32 %v588_v56, 0.0  ;;  %v2409_v55 = vpack.c.bf16 %v1207_v15, %v1205_v5  ;;  %v1025_v15 = vmax.f32 %v3527_v46, 0.0 }
 0x13d   : > { %v1010_v37 = vmax.f32 %v590_v13, 0.0  ;;  %v593_v3 = vpop.f32.mrb[28].mxu0  ;;  %2402 = vmatpush1.bf16.msra.mxu0 %v2401_v50  ;;  %v1211_v13 = vld [vmem:[%s4415_s3 + $0x3f0] sm:$0xff]  ;;  %v1033_v46 = vmax.f32 %v3567_v6, 0.0  ;;  %v1041_v6 = vmax.f32 %v3607_v63, 0.0  ;;  %v1803_v63 = vld [vmem:[%s4417_s5] sm:$0xff] }
 0x13e   : > { %v594_v24 = vadd.f32 %v593_v3, %v3485_v40  ;;  %v595_v43 = vpop.f32.mrb[29].mxu0  ;;  %2404 = vmatprep.subr.bf16.mxu0 %v2403_v60  ;;  %v689_v57 = vpop.f32.mrb[28].mxu1 }
 0x13f   : > { %v596_v25 = vadd.f32 %v595_v43, %v3490_v54  ;;  %1367 = vmatprep.mubr.f32.mxu0 %v1010_v37  ;;  %v3781_v28 = vadd.f32 %v689_v57, %v3485_v40  ;;  %v691_v29 = vpop.f32.mrb[29].mxu1 }
 0x140   : > { %1368 = vmatmul.mubr.f32.gmra.mrb[58].mxu0 %v1009_v18  ;;  %v3790_v45 = vadd.f32 %v691_v29, %v3490_v54  ;;  %v1013_v56 = vmax.f32 %v594_v24, 0.0  ;;  %v2413_v18 = vpack.c.bf16 %v1211_v13, %v1209_v8  ;;  %v2747_v8 = vmov 0.0|0.0  }
 0x141   : > { %v1014_v47 = vmax.f32 %v596_v25, 0.0  ;;  %v599_v50 = vpop.f32.mrb[30].mxu0  ;;  %2406 = vmatpush1.bf16.msra.mxu0 %v2405_v26  ;;  %v1022_v26 = vmax.f32 %v3510_v12, 0.0  ;;  %v1030_v12 = vmax.f32 %v3550_v11, 0.0  ;;  %v1038_v11 = vmax.f32 %v3590_v38, 0.0  ;;  %2415 = vmatprep.subr.bf16.mxu1 %v2747_v8 }
 0x142   : > { %v600_v59 = vadd.f32 %v599_v50, %v3485_v40  ;;  %v601_v60 = vpop.f32.mrb[31].mxu0  ;;  %2408 = vmatprep.subr.bf16.mxu0 %v2407_v30  ;;  %v695_v61 = vpop.f32.mrb[30].mxu1  ;;  %v1046_v38 = vmax.f32 %v3630_v27, 0.0  ;;  %v1054_v27 = vmax.f32 %v3670_v10, 0.0  ;;  %v1058_v10 = vmax.f32 %v3690_v53, 0.0  ;;  %v1806_v53 = vld [vmem:[%s4417_s5 + $0x18] sm:$0xff] }
 0x143   : > { %v602_v16 = vadd.f32 %v601_v60, %v3490_v54  ;;  %1373 = vmatprep.mubr.f32.mxu0 %v1014_v47  ;;  %v3801_v17 = vadd.f32 %v695_v61, %v3485_v40  ;;  %v697_v58 = vpop.f32.mrb[31].mxu1  ;;  %v1026_v40 = vmax.f32 %v3530_v48, 0.0  ;;  %v1034_v48 = vmax.f32 %v3570_v7, 0.0 }
 0x144   : > { %1374 = vmatmul.mubr.f32.gmra.mrb[60].mxu0 %v1013_v56  ;;  %v3804_v37 = vadd.f32 %v697_v58, %v3490_v54  ;;  %v1017_v24 = vmax.f32 %v600_v59, 0.0  ;;  %v1021_v54 = vmax.f32 %v3507_v1, 0.0  ;;  %v1029_v1 = vmax.f32 %v3547_v9, 0.0 }
 0x145   : > { %v1018_v3 = vmax.f32 %v602_v16, 0.0  ;;  %2410 = vmatpush1.bf16.msra.mxu0 %v2409_v55  ;;  %v1042_v7 = vmax.f32 %v3610_v2, 0.0  ;;  %v1037_v9 = vmax.f32 %v3587_v35, 0.0  ;;  %v1050_v2 = vmax.f32 %v3650_v41, 0.0  ;;  %v1804_v41 = vld [vmem:[%s4417_s5 + $0x8] sm:$0xff] }
 0x146   : > { %2412 = vmatprep.subr.bf16.mxu0 %v2411_v0  ;;  %v3807_v43 = vpop.f32.mrb[32].mxu1  ;;  %v1045_v35 = vmax.f32 %v3627_v22, 0.0  ;;  %v1049_v22 = vmax.f32 %v3647_v34, 0.0  ;;  %v2416_v16 = vpack.c.bf16 %v1804_v41, %v1803_v63  ;;  %v1062_v34 = vmax.f32 %v3710_v52, 0.0 }
 0x147   : > { %1379 = vmatprep.mubr.f32.mxu0 %v1018_v3  ;;  %v3809_v30 = vpop.f32.mrb[33].mxu1  ;;  %v1053_v3 = vmax.f32 %v3667_v4, 0.0  ;;  %v1066_v52 = vmax.f32 %v3730_v51, 0.0  ;;  %v1808_v51 = vld [vmem:[%s4417_s5 + $0x28] sm:$0xff] }
 0x148   : > { %1380 = vmatmul.mubr.f32.gmra.mrb[62].mxu0 %v1017_v24  ;;  %2417 = vmatpush1.bf16.msra.mxu1 %v2416_v16  ;;  %v1805_v24 = vld [vmem:[%s4417_s5 + $0x10] sm:$0xff]  ;;  %v1077_v16 = vmax.f32 %v3781_v28, 0.0  ;;  %v1081_v28 = vmax.f32 %v3801_v17, 0.0 }
 0x149   : > { %1385 = vmatprep.mubr.f32.mxu0 %v1022_v26  ;;  %2414 = vmatpush1.bf16.msra.mxu0 %v2413_v18  ;;  %v2419_v4 = vpack.c.bf16 %v1806_v53, %v1805_v24  ;;  %v767_v24 = vadd.f32 %v3807_v43, %v2919_v32 }
 0x14a   : > { %v3813_v57 = vpop.f32.mrb[34].mxu1  ;;  %2418 = vmatprep.subr.bf16.mxu1 %v2747_v8 }
 0x14b   : > { %v3815_v5 = vpop.f32.mrb[35].mxu1 }
 0x14c   : > { %1386 = vmatmul.mubr.f32.gmra.mrb[64].mxu0 %v1021_v54  ;;  %2420 = vmatpush1.bf16.msra.mxu1 %v2419_v4 }
 0x14d   : > { %1391 = vmatprep.mubr.f32.mxu0 %v1026_v40  ;;  %v1057_v40 = vmax.f32 %v3687_v39, 0.0  ;;  %2421 = vmatprep.subr.bf16.mxu1 %v2747_v8  ;;  %v1070_v39 = vmax.f32 %v3750_v44, 0.0  ;;  %v1074_v44 = vmax.f32 %v3770_v19, 0.0  ;;  %v1810_v19 = vld [vmem:[%s4417_s5 + $0x38] sm:$0xff] }
 0x14e   : > { %v3819_v25 = vpop.f32.mrb[36].mxu1 }
 0x14f   : > { %v3821_v29 = vpop.f32.mrb[37].mxu1 }
 0x150   : > { %1392 = vmatmul.mubr.f32.gmra.mrb[66].mxu0 %v1025_v15  ;;  %v1061_v15 = vmax.f32 %v3707_v49, 0.0  ;;  %v781_v17 = vadd.f32 %v3821_v29, %v2922_v33 }
 0x151   : > { %1397 = vmatprep.mubr.f32.mxu0 %v1030_v12 }
 0x152   : > { %v3825_v31 = vpop.f32.mrb[38].mxu1 }
 0x153   : > { %v3827_v42 = vpop.f32.mrb[39].mxu1 }
 0x154   : > { %1398 = vmatmul.mubr.f32.gmra.mrb[68].mxu0 %v1029_v1 }
 0x155   : > { %1403 = vmatprep.mubr.f32.mxu0 %v1034_v48 }
 0x156   : > { %v3831_v47 = vpop.f32.mrb[40].mxu1 }
 0x157   : > { %v3833_v50 = vpop.f32.mrb[41].mxu1 }
 0x158   : > { %1404 = vmatmul.mubr.f32.gmra.mrb[70].mxu0 %v1033_v46  ;;  %v1065_v46 = vmax.f32 %v3727_v20, 0.0  ;;  %v1078_v20 = vmax.f32 %v3790_v45, 0.0  ;;  %v1082_v45 = vmax.f32 %v3804_v37, 0.0  ;;  %v1811_v37 = vld [vmem:[%s4417_s5 + $0x40] sm:$0xff] }
 0x159   : > { %1409 = vmatprep.mubr.f32.mxu0 %v1038_v11  ;;  %v1807_v11 = vld [vmem:[%s4417_s5 + $0x20] sm:$0xff] }
 0x15a   : > { %v3837_v55 = vpop.f32.mrb[42].mxu1  ;;  %v2422_v49 = vpack.c.bf16 %v1808_v51, %v1807_v11  ;;  %v1816_v11 = vld [vmem:[%s4417_s5 + $0x68] sm:$0xff]  ;;  %v959_v51 = vmax.f32 %v767_v24, 0.0 }
 0x15b   : > { %v3839_v56 = vpop.f32.mrb[43].mxu1 }
 0x15c   : > { %1410 = vmatmul.mubr.f32.gmra.mrb[72].mxu0 %v1037_v9  ;;  %2423 = vmatpush1.bf16.msra.mxu1 %v2422_v49 }
 0x15d   : > { %1415 = vmatprep.mubr.f32.mxu0 %v1042_v7  ;;  %2424 = vmatprep.subr.bf16.mxu1 %v2747_v8 }
 0x15e   : > { %v3843_v59 = vpop.f32.mrb[44].mxu1 }
 0x15f   : > { %v3845_v60 = vpop.f32.mrb[45].mxu1 }
 0x160   : > { %1416 = vmatmul.mubr.f32.gmra.mrb[74].mxu0 %v1041_v6 }
 0x161   : > { %1421 = vmatprep.mubr.f32.mxu0 %v1046_v38  ;;  %v1069_v38 = vmax.f32 %v3747_v36, 0.0 }
 0x162   : > { %v3849_v61 = vpop.f32.mrb[46].mxu1 }
 0x163   : > { %v3851_v0 = vpop.f32.mrb[47].mxu1 }
 0x164   : > { %1422 = vmatmul.mubr.f32.gmra.mrb[76].mxu0 %v1045_v35  ;;  %v1809_v35 = vld [vmem:[%s4417_s5 + $0x30] sm:$0xff] }
 0x165   : > { %1427 = vmatprep.mubr.f32.mxu0 %v1050_v2  ;;  %v2425_v36 = vpack.c.bf16 %v1810_v19, %v1809_v35  ;;  %v1817_v35 = vld [vmem:[%s4417_s5 + $0x70] sm:$0xff] }
 0x166   : > { %v3862_v13 = vpop.f32.mrb[48].mxu1 }
 0x167   : > { %v3864_v58 = vpop.f32.mrb[49].mxu1  ;;  %2426 = vmatpush1.bf16.msra.mxu1 %v2425_v36 }
 0x168   : > { %1428 = vmatmul.mubr.f32.gmra.mrb[78].mxu0 %v1049_v22  ;;  %v769_v22 = vadd.f32 %v3809_v30, %v2922_v33  ;;  %2427 = vmatprep.subr.bf16.mxu1 %v2747_v8  ;;  %v1812_v30 = vld [vmem:[%s4417_s5 + $0x48] sm:$0xff] }
 0x169   : > { %1433 = vmatprep.mubr.f32.mxu0 %v1054_v27  ;;  %v1073_v27 = vmax.f32 %v3761_v14, 0.0 }
 0x16a   : > { %v3869_v26 = vpop.f32.mrb[50].mxu1 }
 0x16b   : > { %v3871_v18 = vpop.f32.mrb[51].mxu1 }
 0x16c   : > { %1434 = vmatmul.mubr.f32.gmra.mrb[80].mxu0 %v1053_v3  ;;  %v960_v3 = vmax.f32 %v769_v22, 0.0 }
 0x16d   : > { %1439 = vmatprep.mubr.f32.mxu0 %v1058_v10 }
 0x16e   : > { %v3881_v54 = vpop.f32.mrb[52].mxu1 }
 0x16f   : > { %v3883_v12 = vpop.f32.mrb[53].mxu1 }
 0x170   : > { %1440 = vmatmul.mubr.f32.gmra.mrb[82].mxu0 %v1057_v40  ;;  %v2428_v40 = vpack.c.bf16 %v1812_v30, %v1811_v37  ;;  %v785_v37 = vadd.f32 %v3825_v31, %v2919_v32  ;;  %v1822_v31 = vld [vmem:[%s4417_s5 + $0x98] sm:$0xff] }
 0x171   : > { %1445 = vmatprep.mubr.f32.mxu0 %v1062_v34  ;;  %v775_v34 = vadd.f32 %v3815_v5, %v2922_v33  ;;  %v1813_v5 = vld [vmem:[%s4417_s5 + $0x50] sm:$0xff] }
 0x172   : > { %v3888_v48 = vpop.f32.mrb[54].mxu1  ;;  %2429 = vmatpush1.bf16.msra.mxu1 %v2428_v40  ;;  %v799_v40 = vadd.f32 %v3839_v56, %v2922_v33 }
 0x173   : > { %v3890_v1 = vpop.f32.mrb[55].mxu1  ;;  %2430 = vmatprep.subr.bf16.mxu1 %v2747_v8 }
 0x174   : > { %1446 = vmatmul.mubr.f32.gmra.mrb[84].mxu0 %v1061_v15  ;;  %v964_v15 = vmax.f32 %v775_v34, 0.0 }
 0x175   : > { %1451 = vmatprep.mubr.f32.mxu0 %v1066_v52  ;;  %v1814_v52 = vld [vmem:[%s4417_s5 + $0x58] sm:$0xff] }
 0x176   : > { %v3900_v7 = vpop.f32.mrb[56].mxu1  ;;  %v2431_v43 = vpack.c.bf16 %v1814_v52, %v1813_v5  ;;  %v1821_v5 = vld [vmem:[%s4417_s5 + $0x90] sm:$0xff]  ;;  %v971_v52 = vmax.f32 %v785_v37, 0.0 }
 0x177   : > { %v3902_v9 = vpop.f32.mrb[57].mxu1  ;;  %v2443_v56 = vpack.c.bf16 %v1822_v31, %v1821_v5  ;;  %v823_v31 = vadd.f32 %v3871_v18, %v2922_v33 }
 0x178   : > { %1452 = vmatmul.mubr.f32.gmra.mrb[86].mxu0 %v1065_v46  ;;  %v773_v46 = vadd.f32 %v3813_v57, %v2919_v32  ;;  %2432 = vmatpush1.bf16.msra.mxu1 %v2431_v43  ;;  %v1818_v57 = vld [vmem:[%s4417_s5 + $0x78] sm:$0xff] }
 0x179   : > { %1457 = vmatprep.mubr.f32.mxu0 %v1070_v39  ;;  %v1815_v39 = vld [vmem:[%s4417_s5 + $0x60] sm:$0xff]  ;;  %2433 = vmatprep.subr.bf16.mxu1 %v2747_v8 }
 0x17a   : > { %v3907_v6 = vpop.f32.mrb[58].mxu1  ;;  %v2434_v29 = vpack.c.bf16 %v1816_v11, %v1815_v39  ;;  %v963_v19 = vmax.f32 %v773_v46, 0.0  ;;  %v980_v39 = vmax.f32 %v799_v40, 0.0  ;;  %v805_v11 = vadd.f32 %v3845_v60, %v2922_v33 }
 0x17b   : > { %v3909_v2 = vpop.f32.mrb[59].mxu1 }
 0x17c   : > { %1458 = vmatmul.mubr.f32.gmra.mrb[88].mxu0 %v1069_v38  ;;  %v968_v38 = vmax.f32 %v781_v17, 0.0  ;;  %2435 = vmatpush1.bf16.msra.mxu1 %v2434_v29  ;;  %v797_v29 = vadd.f32 %v3837_v55, %v2919_v32  ;;  %v1826_v55 = vld [vmem:[%s4417_s5 + $0xb8] sm:$0xff] }
 0x17d   : > { %1463 = vmatprep.mubr.f32.mxu0 %v1074_v44  ;;  %2436 = vmatprep.subr.bf16.mxu1 %v2747_v8 }
 0x17e   : > { %v3919_v63 = vpop.f32.mrb[60].mxu1 }
 0x17f   : > { %v3921_v41 = vpop.f32.mrb[61].mxu1 }
 0x180   : > { %1464 = vmatmul.mubr.f32.gmra.mrb[90].mxu0 %v1073_v27  ;;  %v779_v27 = vadd.f32 %v3819_v25, %v2919_v32  ;;  %v1820_v25 = vld [vmem:[%s4417_s5 + $0x88] sm:$0xff] }
 0x181   : > { %1469 = vmatprep.mubr.f32.mxu0 %v1078_v20  ;;  %v787_v20 = vadd.f32 %v3827_v42, %v2922_v33  ;;  %v2437_v42 = vpack.c.bf16 %v1818_v57, %v1817_v35  ;;  %v984_v35 = vmax.f32 %v805_v11, 0.0  ;;  %v811_v57 = vadd.f32 %v3851_v0, %v2922_v33 }
 0x182   : > { %v3928_v10 = vpop.f32.mrb[62].mxu1  ;;  %v967_v34 = vmax.f32 %v779_v27, 0.0  ;;  %v979_v27 = vmax.f32 %v797_v29, 0.0 }
 0x183   : > { %v3930_v14 = vpop.f32.mrb[63].mxu1  ;;  %v972_v22 = vmax.f32 %v787_v20, 0.0  ;;  %2438 = vmatpush1.bf16.msra.mxu1 %v2437_v42  ;;  %v803_v42 = vadd.f32 %v3843_v59, %v2919_v32  ;;  %v1828_v59 = vld [vmem:[%s4417_s5 + $0xc8] sm:$0xff] }
 0x184   : > { %1470 = vmatmul.mubr.f32.gmra.mrb[92].mxu0 %v1077_v16  ;;  %v793_v16 = vadd.f32 %v3833_v50, %v2922_v33  ;;  %2439 = vmatprep.subr.bf16.mxu1 %v2747_v8 }
 0x185   : > { %1475 = vmatprep.mubr.f32.mxu0 %v1082_v45  ;;  %v983_v37 = vmax.f32 %v803_v42, 0.0 }
 0x186   : > { %v3943_v53 = vpop.f32.mrb[64].mxu1  ;;  %v976_v24 = vmax.f32 %v793_v16, 0.0 }
 0x187   : > { %v3945_v4 = vpop.f32.mrb[65].mxu1 }
 0x188   : > { %1476 = vmatmul.mubr.f32.gmra.mrb[94].mxu0 %v1081_v28 }
 0x189   : > { %1546 = vmatprep.mubr.f32.mxu0 %v960_v3  ;;  %v1819_v3 = vld [vmem:[%s4417_s5 + $0x80] sm:$0xff] }
 0x18a   : > { %v3964_v49 = vpop.f32.mrb[66].mxu1  ;;  %v2440_v50 = vpack.c.bf16 %v1820_v25, %v1819_v3  ;;  %v988_v3 = vmax.f32 %v811_v57, 0.0  ;;  %v817_v25 = vadd.f32 %v3864_v58, %v2922_v33 }
 0x18b   : > { %v3966_v44 = vpop.f32.mrb[67].mxu1 }
 0x18c   : > { %1547 = vmatmul.mubr.f32.vlgmr.msra.gmra.mrb[32].mxu0 %v959_v51  ;;  %2441 = vmatpush1.bf16.msra.mxu1 %v2440_v50  ;;  %v1823_v51 = vld [vmem:[%s4417_s5 + $0xa0] sm:$0xff]  ;;  %v809_v50 = vadd.f32 %v3849_v61, %v2919_v32  ;;  %v992_v5 = vmax.f32 %v817_v25, 0.0  ;;  %v1830_v61 = vld [vmem:[%s4417_s5 + $0xd8] sm:$0xff] }
 0x18d   : > { %1552 = vmatprep.mubr.f32.mxu0 %v964_v15  ;;  %v791_v15 = vadd.f32 %v3831_v47, %v2919_v32  ;;  %2442 = vmatprep.subr.bf16.mxu1 %v2747_v8  ;;  %v1824_v47 = vld [vmem:[%s4417_s5 + $0xa8] sm:$0xff] }
 0x18e   : > { %v3979_v36 = vpop.f32.mrb[68].mxu1  ;;  %v2446_v60 = vpack.c.bf16 %v1824_v47, %v1823_v51  ;;  %v996_v51 = vmax.f32 %v823_v31, 0.0  ;;  %v829_v47 = vadd.f32 %v3883_v12, %v2922_v33  ;;  %v847_v31 = vadd.f32 %v3909_v2, %v2922_v33 }
 0x18f   : > { %v3981_v45 = vpop.f32.mrb[69].mxu1  ;;  %v975_v46 = vmax.f32 %v791_v15, 0.0  ;;  %v987_v15 = vmax.f32 %v809_v50, 0.0  ;;  %v833_v50 = vadd.f32 %v3888_v48, %v2919_v32 }
 0x190   : > { %1553 = vmatmul.mubr.f32.gmra.mrb[34].mxu0 %v963_v19  ;;  %2444 = vmatpush1.bf16.msra.mxu1 %v2443_v56  ;;  %v1825_v19 = vld [vmem:[%s4417_s5 + $0xb0] sm:$0xff]  ;;  %v815_v56 = vadd.f32 %v3862_v13, %v2919_v32  ;;  %v1832_v13 = vld [vmem:[%s4417_s5 + $0xe8] sm:$0xff]  ;;  %v1012_v48 = vmax.f32 %v847_v31, 0.0 }
 0x191   : > { %1558 = vmatprep.mubr.f32.mxu0 %v968_v38  ;;  %2445 = vmatprep.subr.bf16.mxu1 %v2747_v8  ;;  %v2449_v0 = vpack.c.bf16 %v1826_v55, %v1825_v19  ;;  %v1000_v19 = vmax.f32 %v829_v47, 0.0  ;;  %v835_v55 = vadd.f32 %v3890_v1, %v2922_v33  ;;  %v859_v47 = vadd.f32 %v3930_v14, %v2922_v33 }
 0x192   : > { %v3994_v30 = vpop.f32.mrb[70].mxu1  ;;  %v991_v29 = vmax.f32 %v815_v56, 0.0 }
 0x193   : > { %v3996_v28 = vpop.f32.mrb[71].mxu1 }
 0x194   : > { %1559 = vmatmul.mubr.f32.gmra.mrb[36].mxu0 %v967_v34  ;;  %2447 = vmatpush1.bf16.msra.mxu1 %v2446_v60  ;;  %v1827_v34 = vld [vmem:[%s4417_s5 + $0xc0] sm:$0xff]  ;;  %v821_v60 = vadd.f32 %v3869_v26, %v2919_v32  ;;  %v1834_v26 = vld [vmem:[%s4417_s5 + $0xf8] sm:$0xff] }
 0x195   : > { %1564 = vmatprep.mubr.f32.mxu0 %v972_v22  ;;  %2448 = vmatprep.subr.bf16.mxu1 %v2747_v8  ;;  %v2452_v58 = vpack.c.bf16 %v1828_v59, %v1827_v34  ;;  %v1004_v34 = vmax.f32 %v835_v55, 0.0  ;;  %v841_v59 = vadd.f32 %v3902_v9, %v2922_v33  ;;  %v839_v9 = vadd.f32 %v3900_v7, %v2919_v32 }
 0x196   : > { %v4009_v17 = vpop.f32.mrb[72].mxu1  ;;  %v995_v42 = vmax.f32 %v821_v60, 0.0  ;;  %v865_v60 = vadd.f32 %v3945_v4, %v2922_v33 }
 0x197   : > { %v4011_v43 = vpop.f32.mrb[73].mxu1  ;;  %v1007_v56 = vmax.f32 %v839_v9, 0.0 }
 0x198   : > { %1565 = vmatmul.mubr.f32.gmra.mrb[38].mxu0 %v971_v52  ;;  %2450 = vmatpush1.bf16.msra.mxu1 %v2449_v0  ;;  %v1829_v52 = vld [vmem:[%s4417_s5 + $0xd0] sm:$0xff]  ;;  %v827_v0 = vadd.f32 %v3881_v54, %v2919_v32 }
 0x199   : > { %1570 = vmatprep.mubr.f32.mxu0 %v976_v24  ;;  %2451 = vmatprep.subr.bf16.mxu1 %v2747_v8  ;;  %v2455_v18 = vpack.c.bf16 %v1830_v61, %v1829_v52  ;;  %v1003_v52 = vmax.f32 %v833_v50, 0.0 }
 0x19a   : > { %v4024_v38 = vpop.f32.mrb[74].mxu1 }
 0x19b   : > { %v4026_v20 = vpop.f32.mrb[75].mxu1 }
 0x19c   : > { %1571 = vmatmul.mubr.f32.gmra.mrb[40].mxu0 %v975_v46  ;;  %2453 = vmatpush1.bf16.msra.mxu1 %v2452_v58  ;;  %v1831_v46 = vld [vmem:[%s4417_s5 + $0xe0] sm:$0xff] }
 0x19d   : > { %1576 = vmatprep.mubr.f32.mxu0 %v980_v39  ;;  %2454 = vmatprep.subr.bf16.mxu1 %v2747_v8  ;;  %v2458_v12 = vpack.c.bf16 %v1832_v13, %v1831_v46  ;;  %v851_v13 = vadd.f32 %v3919_v63, %v2919_v32  ;;  %v1024_v63 = vmax.f32 %v865_v60, 0.0 }
 0x19e   : > { %v4039_v22 = vpop.f32.mrb[76].mxu1 }
 0x19f   : > { %v4041_v16 = vpop.f32.mrb[77].mxu1 }
 0x1a0   : > { %1577 = vmatmul.mubr.f32.gmra.mrb[42].mxu0 %v979_v27  ;;  %2456 = vmatpush1.bf16.msra.mxu1 %v2455_v18  ;;  %v1833_v27 = vld [vmem:[%s4417_s5 + $0xf0] sm:$0xff]  ;;  %v845_v18 = vadd.f32 %v3907_v6, %v2919_v32  ;;  %v1020_v6 = vmax.f32 %v859_v47, 0.0 }
 0x1a1   : > { %1582 = vmatprep.mubr.f32.mxu0 %v984_v35  ;;  %2457 = vmatprep.subr.bf16.mxu1 %v2747_v8  ;;  %v2461_v1 = vpack.c.bf16 %v1834_v26, %v1833_v27  ;;  %v871_v27 = vadd.f32 %v3966_v44, %v2922_v33  ;;  %v883_v44 = vadd.f32 %v3996_v28, %v2922_v33 }
 0x1a2   : > { %v4054_v24 = vpop.f32.mrb[78].mxu1  ;;  %v1011_v46 = vmax.f32 %v845_v18, 0.0  ;;  %v895_v28 = vadd.f32 %v4026_v20, %v2922_v33 }
 0x1a3   : > { %v4056_v40 = vpop.f32.mrb[79].mxu1  ;;  %v1028_v4 = vmax.f32 %v871_v27, 0.0 }
 0x1a4   : > { %1583 = vmatmul.mubr.f32.gmra.mrb[44].mxu0 %v983_v37  ;;  %2459 = vmatpush1.bf16.msra.mxu1 %v2458_v12  ;;  %v999_v37 = vmax.f32 %v827_v0, 0.0  ;;  %v1015_v12 = vmax.f32 %v851_v13, 0.0  ;;  %v907_v20 = vadd.f32 %v4056_v40, %v2922_v33 }
 0x1a5   : > { %1588 = vmatprep.mubr.f32.mxu0 %v988_v3  ;;  %2460 = vmatprep.subr.bf16.mxu1 %v2747_v8 }
 0x1a6   : > { %v4069_v39 = vpop.f32.mrb[80].mxu1 }
 0x1a7   : > { %v4071_v11 = vpop.f32.mrb[81].mxu1 }
 0x1a8   : > { %1589 = vmatmul.mubr.f32.gmra.mrb[46].mxu0 %v987_v15  ;;  %2462 = vmatpush1.bf16.msra.mxu1 %v2461_v1  ;;  %v853_v15 = vadd.f32 %v3921_v41, %v2922_v33  ;;  %v869_v1 = vadd.f32 %v3964_v49, %v2919_v32  ;;  %v881_v49 = vadd.f32 %v3994_v30, %v2919_v32 }
 0x1a9   : > { %1594 = vmatprep.mubr.f32.mxu0 %v992_v5  ;;  %v1008_v5 = vmax.f32 %v841_v59, 0.0  ;;  %v893_v30 = vadd.f32 %v4024_v38, %v2919_v32  ;;  %v905_v38 = vadd.f32 %v4054_v24, %v2919_v32 }
 0x1aa   : > { %v4084_v35 = vpop.f32.mrb[82].mxu1  ;;  %v1016_v7 = vmax.f32 %v853_v15, 0.0  ;;  %v1027_v59 = vmax.f32 %v869_v1, 0.0  ;;  %v1035_v31 = vmax.f32 %v881_v49, 0.0 }
 0x1ab   : > { %v4086_v57 = vpop.f32.mrb[83].mxu1  ;;  %v1043_v15 = vmax.f32 %v893_v30, 0.0  ;;  %v1051_v47 = vmax.f32 %v905_v38, 0.0  ;;  %v917_v24 = vadd.f32 %v4084_v35, %v2919_v32 }
 0x1ac   : > { %1595 = vmatmul.mubr.f32.gmra.mrb[48].mxu0 %v991_v29  ;;  %v919_v40 = vadd.f32 %v4086_v57, %v2922_v33 }
 0x1ad   : > { %1600 = vmatprep.mubr.f32.mxu0 %v996_v51  ;;  %v1059_v60 = vmax.f32 %v917_v24, 0.0 }
 0x1ae   : > { %v4099_v3 = vpop.f32.mrb[84].mxu1 }
 0x1af   : > { %v4101_v25 = vpop.f32.mrb[85].mxu1 }
 0x1b0   : > { %1601 = vmatmul.mubr.f32.gmra.mrb[50].mxu0 %v995_v42  ;;  %v863_v42 = vadd.f32 %v3943_v53, %v2919_v32  ;;  %v875_v53 = vadd.f32 %v3979_v36, %v2919_v32  ;;  %v887_v36 = vadd.f32 %v4009_v17, %v2919_v32  ;;  %v899_v17 = vadd.f32 %v4039_v22, %v2919_v32 }
 0x1b1   : > { %1606 = vmatprep.mubr.f32.mxu0 %v1000_v19  ;;  %v857_v19 = vadd.f32 %v3928_v10, %v2919_v32  ;;  %v877_v10 = vadd.f32 %v3981_v45, %v2922_v33  ;;  %v889_v45 = vadd.f32 %v4011_v43, %v2922_v33  ;;  %v901_v43 = vadd.f32 %v4041_v16, %v2922_v33 }
 0x1b2   : > { %v4108_v58 = vpop.f32.mrb[86].mxu1  ;;  %v1023_v0 = vmax.f32 %v863_v42, 0.0  ;;  %v1031_v50 = vmax.f32 %v875_v53, 0.0  ;;  %v1039_v9 = vmax.f32 %v887_v36, 0.0  ;;  %v913_v16 = vadd.f32 %v4071_v11, %v2922_v33 }
 0x1b3   : > { %v4110_v54 = vpop.f32.mrb[87].mxu1  ;;  %v1019_v26 = vmax.f32 %v857_v19, 0.0  ;;  %v1047_v18 = vmax.f32 %v899_v17, 0.0  ;;  %v911_v22 = vadd.f32 %v4069_v39, %v2919_v32  ;;  %v925_v11 = vadd.f32 %v4101_v25, %v2922_v33 }
 0x1b4   : > { %1607 = vmatmul.mubr.f32.gmra.mrb[52].mxu0 %v999_v37  ;;  %v1036_v37 = vmax.f32 %v883_v44, 0.0  ;;  %v931_v57 = vadd.f32 %v4110_v54, %v2922_v33  ;;  %v923_v39 = vadd.f32 %v4099_v3, %v2919_v32  ;;  %v929_v35 = vadd.f32 %v4108_v58, %v2919_v32 }
 0x1b5   : > { %1612 = vmatprep.mubr.f32.mxu0 %v1004_v34  ;;  %v1032_v34 = vmax.f32 %v877_v10, 0.0  ;;  %v1055_v13 = vmax.f32 %v911_v22, 0.0 }
 0x1b6   : > { %v4116_v8 = vpop.f32.mrb[88].mxu1  ;;  %v1063_v19 = vmax.f32 %v923_v39, 0.0  ;;  %v1067_v27 = vmax.f32 %v929_v35, 0.0 }
 0x1b7   : > { %v4118_v61 = vpop.f32.mrb[89].mxu1  ;;  %v935_v3 = vadd.f32 %v4116_v8, %v2919_v32 }
 0x1b8   : > { %1613 = vmatmul.mubr.f32.gmra.mrb[54].mxu0 %v1003_v52  ;;  %v1044_v52 = vmax.f32 %v895_v28, 0.0  ;;  %v937_v25 = vadd.f32 %v4118_v61, %v2922_v33 }
 0x1b9   : > { %1618 = vmatprep.mubr.f32.mxu0 %v1008_v5  ;;  %v1040_v5 = vmax.f32 %v889_v45, 0.0  ;;  %v1071_v42 = vmax.f32 %v935_v3, 0.0 }
 0x1ba   : > { %v4124_v51 = vpop.f32.mrb[90].mxu1 }
 0x1bb   : > { %v4126_v2 = vpop.f32.mrb[91].mxu1  ;;  %v941_v58 = vadd.f32 %v4124_v51, %v2919_v32 }
 0x1bc   : > { %1619 = vmatmul.mubr.f32.gmra.mrb[56].mxu0 %v1007_v56  ;;  %v1052_v56 = vmax.f32 %v907_v20, 0.0  ;;  %v943_v54 = vadd.f32 %v4126_v2, %v2922_v33 }
 0x1bd   : > { %1624 = vmatprep.mubr.f32.mxu0 %v1012_v48  ;;  %v1048_v48 = vmax.f32 %v901_v43, 0.0  ;;  %v1075_v10 = vmax.f32 %v941_v58, 0.0 }
 0x1be   : > { %v4132_v29 = vpop.f32.mrb[92].mxu1 }
 0x1bf   : > { %v4134_v41 = vpop.f32.mrb[93].mxu1  ;;  %v947_v8 = vadd.f32 %v4132_v29, %v2919_v32 }
 0x1c0   : > { %1625 = vmatmul.mubr.f32.gmra.mrb[58].mxu0 %v1011_v46  ;;  %v1060_v46 = vmax.f32 %v919_v40, 0.0  ;;  %v949_v61 = vadd.f32 %v4134_v41, %v2922_v33 }
 0x1c1   : > { %1630 = vmatprep.mubr.f32.mxu0 %v1016_v7  ;;  %v1056_v7 = vmax.f32 %v913_v16, 0.0  ;;  %v1079_v1 = vmax.f32 %v947_v8, 0.0 }
 0x1c2   : > { %v4140_v55 = vpop.f32.mrb[94].mxu1 }
 0x1c3   : > { %v4142_v14 = vpop.f32.mrb[95].mxu1  ;;  %v953_v41 = vadd.f32 %v4140_v55, %v2919_v32 }
 0x1c4   : > { %1631 = vmatmul.mubr.f32.gmra.mrb[60].mxu0 %v1015_v12  ;;  %v1068_v12 = vmax.f32 %v931_v57, 0.0  ;;  %v955_v2 = vadd.f32 %v4142_v14, %v2922_v33 }
 0x1c5   : > { %1636 = vmatprep.mubr.f32.mxu0 %v1020_v6  ;;  %v1064_v6 = vmax.f32 %v925_v11, 0.0  ;;  %v1083_v51 = vmax.f32 %v953_v41, 0.0 }
 0x1c8   : > { %1637 = vmatmul.mubr.f32.gmra.mrb[62].mxu0 %v1019_v26  ;;  %v1076_v26 = vmax.f32 %v943_v54, 0.0 }
 0x1c9   : > { %1642 = vmatprep.mubr.f32.mxu0 %v1024_v63  ;;  %v1072_v63 = vmax.f32 %v937_v25, 0.0 }
 0x1cc   : > { %1643 = vmatmul.mubr.f32.gmra.mrb[64].mxu0 %v1023_v0  ;;  %v1084_v0 = vmax.f32 %v955_v2, 0.0 }
 0x1cd   : > { %1648 = vmatprep.mubr.f32.mxu0 %v1028_v4  ;;  %v1080_v4 = vmax.f32 %v949_v61, 0.0 }
 0x1d0   : > { %1649 = vmatmul.mubr.f32.gmra.mrb[66].mxu0 %v1027_v59 }
 0x1d1   : > { %1654 = vmatprep.mubr.f32.mxu0 %v1032_v34  ;;  %v1213_v34 = vld [vmem:[%s4416_s4] sm:$0x3] }
 0x1d2   : > { %v4211_v33 = vrot.slane %v1213_v34, %v425_v62  ;;  %v4215_v29 = vrot.slane %v1213_v34, %v429_v23 }
 0x1d4   : > { %1655 = vmatmul.mubr.f32.gmra.mrb[68].mxu0 %v1031_v50 }
 0x1d5   : > { %1660 = vmatprep.mubr.f32.mxu0 %v1036_v37 }
 0x1d8   : > { %1661 = vmatmul.mubr.f32.gmra.mrb[70].mxu0 %v1035_v31 }
 0x1d9   : > { %1666 = vmatprep.mubr.f32.mxu0 %v1040_v5 }
 0x1dc   : > { %1667 = vmatmul.mubr.f32.gmra.mrb[72].mxu0 %v1039_v9 }
 0x1dd   : > { %1672 = vmatprep.mubr.f32.mxu0 %v1044_v52 }
 0x1e0   : > { %1673 = vmatmul.mubr.f32.gmra.mrb[74].mxu0 %v1043_v15 }
 0x1e1   : > { %1678 = vmatprep.mubr.f32.mxu0 %v1048_v48 }
 0x1e4   : > { %1679 = vmatmul.mubr.f32.gmra.mrb[76].mxu0 %v1047_v18 }
 0x1e5   : > { %1684 = vmatprep.mubr.f32.mxu0 %v1052_v56 }
 0x1e8   : > { %1685 = vmatmul.mubr.f32.gmra.mrb[78].mxu0 %v1051_v47 }
 0x1e9   : > { %1690 = vmatprep.mubr.f32.mxu0 %v1056_v7 }
 0x1ec   : > { %1691 = vmatmul.mubr.f32.gmra.mrb[80].mxu0 %v1055_v13 }
 0x1ed   : > { %1696 = vmatprep.mubr.f32.mxu0 %v1060_v46 }
 0x1f0   : > { %1697 = vmatmul.mubr.f32.gmra.mrb[82].mxu0 %v1059_v60 }
 0x1f1   : > { %1702 = vmatprep.mubr.f32.mxu0 %v1064_v6 }
 0x1f4   : > { %1703 = vmatmul.mubr.f32.gmra.mrb[84].mxu0 %v1063_v19 }
 0x1f5   : > { %1708 = vmatprep.mubr.f32.mxu0 %v1068_v12 }
 0x1f8   : > { %1709 = vmatmul.mubr.f32.gmra.mrb[86].mxu0 %v1067_v27 }
 0x1f9   : > { %1714 = vmatprep.mubr.f32.mxu0 %v1072_v63 }
 0x1fc   : > { %1715 = vmatmul.mubr.f32.gmra.mrb[88].mxu0 %v1071_v42 }
 0x1fd   : > { %1720 = vmatprep.mubr.f32.mxu0 %v1076_v26 }
 0x200   : > { %1721 = vmatmul.mubr.f32.gmra.mrb[90].mxu0 %v1075_v10 }
 0x201   : > { %1726 = vmatprep.mubr.f32.mxu0 %v1080_v4 }
 0x204   : > { %1727 = vmatmul.mubr.f32.gmra.mrb[92].mxu0 %v1079_v1 }
 0x205   : > { %1732 = vmatprep.mubr.f32.mxu0 %v1084_v0 }
 0x208   : > { %1733 = vmatmul.mubr.f32.gmra.mrb[94].mxu0 %v1083_v51 }
 0x25f   : > { %v1548_v14 = vpop.f32.mrb[32].mxu0 }
 0x260   : > { %v2479_v44 = vadd.f32 %v1548_v14, %v4211_v33  ;;  %v1550_v32 = vpop.f32.mrb[33].mxu0 }
 0x261   : > { %v2480_v55 = vadd.f32 %v1550_v32, %v4215_v29 }
 0x262   : > { %v1739_v37 = vmax.f32 %v2479_v44, 0.0 }
 0x263   : > { %v1740_v59 = vmax.f32 %v2480_v55, 0.0  ;;  %v1554_v53 = vpop.f32.mrb[34].mxu0 }
 0x264   : > { %v2481_v45 = vadd.f32 %v1554_v53, %v4211_v33  ;;  %v1556_v50 = vpop.f32.mrb[35].mxu0 }
 0x265   : > { %v2482_v49 = vadd.f32 %v1556_v50, %v4215_v29  ;;  %1906 = vmatprep.mubr.f32.mxu1 %v1740_v59 }
 0x266   : > { %1907 = vmatmul.mubr.f32.vlgmr.msra.gmra.mrb[96].mxu1 %v1739_v37  ;;  %v1741_v23 = vmax.f32 %v2481_v45, 0.0 }
 0x267   : > { %v1742_v62 = vmax.f32 %v2482_v49, 0.0  ;;  %v1560_v21 = vpop.f32.mrb[36].mxu0 }
 0x268   : > { %v2483_v5 = vadd.f32 %v1560_v21, %v4211_v33  ;;  %v1562_v28 = vpop.f32.mrb[37].mxu0 }
 0x269   : > { %v2484_v31 = vadd.f32 %v1562_v28, %v4215_v29  ;;  %1911 = vmatprep.mubr.f32.mxu1 %v1742_v62 }
 0x26a   : > { %1912 = vmatmul.mubr.f32.gmra.mrb[98].mxu1 %v1741_v23  ;;  %v1743_v43 = vmax.f32 %v2483_v5, 0.0 }
 0x26b   : > { %v1744_v36 = vmax.f32 %v2484_v31, 0.0  ;;  %v1566_v52 = vpop.f32.mrb[38].mxu0 }
 0x26c   : > { %v2485_v9 = vadd.f32 %v1566_v52, %v4211_v33  ;;  %v1568_v30 = vpop.f32.mrb[39].mxu0 }
 0x26d   : > { %v2486_v48 = vadd.f32 %v1568_v30, %v4215_v29  ;;  %1916 = vmatprep.mubr.f32.mxu1 %v1744_v36 }
 0x26e   : > { %1917 = vmatmul.mubr.f32.gmra.mrb[100].mxu1 %v1743_v43  ;;  %v1745_v17 = vmax.f32 %v2485_v9, 0.0 }
 0x26f   : > { %v1746_v20 = vmax.f32 %v2486_v48, 0.0  ;;  %v1572_v15 = vpop.f32.mrb[40].mxu0 }
 0x270   : > { %v2487_v56 = vadd.f32 %v1572_v15, %v4211_v33  ;;  %v1574_v16 = vpop.f32.mrb[41].mxu0 }
 0x271   : > { %v2488_v18 = vadd.f32 %v1574_v16, %v4215_v29  ;;  %1921 = vmatprep.mubr.f32.mxu1 %v1746_v20 }
 0x272   : > { %1922 = vmatmul.mubr.f32.gmra.mrb[102].mxu1 %v1745_v17  ;;  %v1747_v40 = vmax.f32 %v2487_v56, 0.0 }
 0x273   : > { %v1748_v38 = vmax.f32 %v2488_v18, 0.0  ;;  %v1578_v7 = vpop.f32.mrb[42].mxu0 }
 0x274   : > { %v2489_v47 = vadd.f32 %v1578_v7, %v4211_v33  ;;  %v1580_v22 = vpop.f32.mrb[43].mxu0 }
 0x275   : > { %v2490_v46 = vadd.f32 %v1580_v22, %v4215_v29  ;;  %1926 = vmatprep.mubr.f32.mxu1 %v1748_v38 }
 0x276   : > { %1927 = vmatmul.mubr.f32.gmra.mrb[104].mxu1 %v1747_v40  ;;  %v1749_v24 = vmax.f32 %v2489_v47, 0.0 }
 0x277   : > { %v1750_v11 = vmax.f32 %v2490_v46, 0.0  ;;  %v1584_v13 = vpop.f32.mrb[44].mxu0 }
 0x278   : > { %v2491_v6 = vadd.f32 %v1584_v13, %v4211_v33  ;;  %v1586_v57 = vpop.f32.mrb[45].mxu0 }
 0x279   : > { %v2492_v60 = vadd.f32 %v1586_v57, %v4215_v29  ;;  %1931 = vmatprep.mubr.f32.mxu1 %v1750_v11 }
 0x27a   : > { %1932 = vmatmul.mubr.f32.gmra.mrb[106].mxu1 %v1749_v24  ;;  %v1751_v25 = vmax.f32 %v2491_v6, 0.0 }
 0x27b   : > { %v1752_v39 = vmax.f32 %v2492_v60, 0.0  ;;  %v1590_v12 = vpop.f32.mrb[46].mxu0 }
 0x27c   : > { %v2493_v19 = vadd.f32 %v1590_v12, %v4211_v33  ;;  %v1592_v35 = vpop.f32.mrb[47].mxu0 }
 0x27d   : > { %v2494_v63 = vadd.f32 %v1592_v35, %v4215_v29  ;;  %1936 = vmatprep.mubr.f32.mxu1 %v1752_v39 }
 0x27e   : > { %1937 = vmatmul.mubr.f32.gmra.mrb[108].mxu1 %v1751_v25  ;;  %v1753_v3 = vmax.f32 %v2493_v19, 0.0 }
 0x27f   : > { %v1754_v54 = vmax.f32 %v2494_v63, 0.0  ;;  %v1596_v27 = vpop.f32.mrb[48].mxu0 }
 0x280   : > { %v2495_v26 = vadd.f32 %v1596_v27, %v4211_v33  ;;  %v1598_v61 = vpop.f32.mrb[49].mxu0 }
 0x281   : > { %v2496_v42 = vadd.f32 %v1598_v61, %v4215_v29  ;;  %1941 = vmatprep.mubr.f32.mxu1 %v1754_v54 }
 0x282   : > { %1942 = vmatmul.mubr.f32.gmra.mrb[110].mxu1 %v1753_v3  ;;  %v1755_v2 = vmax.f32 %v2495_v26, 0.0 }
 0x283   : > { %v1756_v58 = vmax.f32 %v2496_v42, 0.0  ;;  %v1602_v4 = vpop.f32.mrb[50].mxu0 }
 0x284   : > { %v2497_v10 = vadd.f32 %v1602_v4, %v4211_v33  ;;  %v1604_v8 = vpop.f32.mrb[51].mxu0 }
 0x285   : > { %v2498_v0 = vadd.f32 %v1604_v8, %v4215_v29  ;;  %1946 = vmatprep.mubr.f32.mxu1 %v1756_v58 }
 0x286   : > { %1947 = vmatmul.mubr.f32.gmra.mrb[112].mxu1 %v1755_v2  ;;  %v1757_v51 = vmax.f32 %v2497_v10, 0.0 }
 0x287   : > { %v1758_v1 = vmax.f32 %v2498_v0, 0.0  ;;  %v1608_v41 = vpop.f32.mrb[52].mxu0 }
 0x288   : > { %v2499_v34 = vadd.f32 %v1608_v41, %v4211_v33  ;;  %v1610_v14 = vpop.f32.mrb[53].mxu0 }
 0x289   : > { %v2500_v44 = vadd.f32 %v1610_v14, %v4215_v29  ;;  %1951 = vmatprep.mubr.f32.mxu1 %v1758_v1 }
 0x28a   : > { %1952 = vmatmul.mubr.f32.gmra.mrb[114].mxu1 %v1757_v51  ;;  %v1759_v59 = vmax.f32 %v2499_v34, 0.0 }
 0x28b   : > { %v1760_v32 = vmax.f32 %v2500_v44, 0.0  ;;  %v1614_v55 = vpop.f32.mrb[54].mxu0 }
 0x28c   : > { %v2501_v53 = vadd.f32 %v1614_v55, %v4211_v33  ;;  %v1616_v37 = vpop.f32.mrb[55].mxu0 }
 0x28d   : > { %v2502_v45 = vadd.f32 %v1616_v37, %v4215_v29  ;;  %1956 = vmatprep.mubr.f32.mxu1 %v1760_v32 }
 0x28e   : > { %1957 = vmatmul.mubr.f32.gmra.mrb[116].mxu1 %v1759_v59  ;;  %v1761_v62 = vmax.f32 %v2501_v53, 0.0 }
 0x28f   : > { %v1762_v50 = vmax.f32 %v2502_v45, 0.0  ;;  %v1620_v49 = vpop.f32.mrb[56].mxu0 }
 0x290   : > { %v2503_v21 = vadd.f32 %v1620_v49, %v4211_v33  ;;  %v1622_v23 = vpop.f32.mrb[57].mxu0 }
 0x291   : > { %v2504_v5 = vadd.f32 %v1622_v23, %v4215_v29  ;;  %1961 = vmatprep.mubr.f32.mxu1 %v1762_v50 }
 0x292   : > { %1962 = vmatmul.mubr.f32.gmra.mrb[118].mxu1 %v1761_v62  ;;  %v1763_v36 = vmax.f32 %v2503_v21, 0.0 }
 0x293   : > { %v1764_v28 = vmax.f32 %v2504_v5, 0.0  ;;  %v1626_v31 = vpop.f32.mrb[58].mxu0 }
 0x294   : > { %v2505_v52 = vadd.f32 %v1626_v31, %v4211_v33  ;;  %v1628_v43 = vpop.f32.mrb[59].mxu0 }
 0x295   : > { %v2506_v9 = vadd.f32 %v1628_v43, %v4215_v29  ;;  %1966 = vmatprep.mubr.f32.mxu1 %v1764_v28 }
 0x296   : > { %1967 = vmatmul.mubr.f32.gmra.mrb[120].mxu1 %v1763_v36  ;;  %v1765_v20 = vmax.f32 %v2505_v52, 0.0 }
 0x297   : > { %v1766_v30 = vmax.f32 %v2506_v9, 0.0  ;;  %v1632_v48 = vpop.f32.mrb[60].mxu0 }
 0x298   : > { %v2507_v15 = vadd.f32 %v1632_v48, %v4211_v33  ;;  %v1634_v17 = vpop.f32.mrb[61].mxu0 }
 0x299   : > { %v2508_v56 = vadd.f32 %v1634_v17, %v4215_v29  ;;  %1971 = vmatprep.mubr.f32.mxu1 %v1766_v30 }
 0x29a   : > { %1972 = vmatmul.mubr.f32.gmra.mrb[122].mxu1 %v1765_v20  ;;  %v1767_v38 = vmax.f32 %v2507_v15, 0.0 }
 0x29b   : > { %v1768_v16 = vmax.f32 %v2508_v56, 0.0  ;;  %v1638_v18 = vpop.f32.mrb[62].mxu0 }
 0x29c   : > { %v2509_v7 = vadd.f32 %v1638_v18, %v4211_v33  ;;  %v1640_v40 = vpop.f32.mrb[63].mxu0 }
 0x29d   : > { %v2510_v47 = vadd.f32 %v1640_v40, %v4215_v29  ;;  %1976 = vmatprep.mubr.f32.mxu1 %v1768_v16 }
 0x29e   : > { %1977 = vmatmul.mubr.f32.gmra.mrb[124].mxu1 %v1767_v38  ;;  %v1769_v11 = vmax.f32 %v2509_v7, 0.0 }
 0x29f   : > { %v1770_v22 = vmax.f32 %v2510_v47, 0.0  ;;  %v1644_v46 = vpop.f32.mrb[64].mxu0 }
 0x2a0   : > { %v2511_v13 = vadd.f32 %v1644_v46, %v4211_v33  ;;  %v1646_v24 = vpop.f32.mrb[65].mxu0 }
 0x2a1   : > { %v2512_v6 = vadd.f32 %v1646_v24, %v4215_v29  ;;  %1981 = vmatprep.mubr.f32.mxu1 %v1770_v22 }
 0x2a2   : > { %1982 = vmatmul.mubr.f32.gmra.mrb[126].mxu1 %v1769_v11  ;;  %v1771_v39 = vmax.f32 %v2511_v13, 0.0 }
 0x2a3   : > { %v1772_v57 = vmax.f32 %v2512_v6, 0.0  ;;  %v1650_v60 = vpop.f32.mrb[66].mxu0 }
 0x2a4   : > { %v2513_v12 = vadd.f32 %v1650_v60, %v4211_v33  ;;  %v1652_v25 = vpop.f32.mrb[67].mxu0 }
 0x2a5   : > { %v2514_v19 = vadd.f32 %v1652_v25, %v4215_v29  ;;  %1986 = vmatprep.mubr.f32.mxu1 %v1772_v57 }
 0x2a6   : > { %1987 = vmatmul.mubr.f32.gmra.mrb[128].mxu1 %v1771_v39  ;;  %v1773_v54 = vmax.f32 %v2513_v12, 0.0 }
 0x2a7   : > { %v1774_v35 = vmax.f32 %v2514_v19, 0.0  ;;  %v1656_v63 = vpop.f32.mrb[68].mxu0 }
 0x2a8   : > { %v2515_v27 = vadd.f32 %v1656_v63, %v4211_v33  ;;  %v1658_v3 = vpop.f32.mrb[69].mxu0 }
 0x2a9   : > { %v2516_v26 = vadd.f32 %v1658_v3, %v4215_v29  ;;  %1991 = vmatprep.mubr.f32.mxu1 %v1774_v35 }
 0x2aa   : > { %1992 = vmatmul.mubr.f32.gmra.mrb[130].mxu1 %v1773_v54  ;;  %v1775_v58 = vmax.f32 %v2515_v27, 0.0 }
 0x2ab   : > { %v1776_v61 = vmax.f32 %v2516_v26, 0.0  ;;  %v1662_v42 = vpop.f32.mrb[70].mxu0 }
 0x2ac   : > { %v2517_v4 = vadd.f32 %v1662_v42, %v4211_v33  ;;  %v1664_v2 = vpop.f32.mrb[71].mxu0 }
 0x2ad   : > { %v2518_v10 = vadd.f32 %v1664_v2, %v4215_v29  ;;  %1996 = vmatprep.mubr.f32.mxu1 %v1776_v61 }
 0x2ae   : > { %1997 = vmatmul.mubr.f32.gmra.mrb[132].mxu1 %v1775_v58  ;;  %v1777_v1 = vmax.f32 %v2517_v4, 0.0 }
 0x2af   : > { %v1778_v8 = vmax.f32 %v2518_v10, 0.0  ;;  %v1668_v0 = vpop.f32.mrb[72].mxu0 }
 0x2b0   : > { %v2519_v41 = vadd.f32 %v1668_v0, %v4211_v33  ;;  %v1670_v51 = vpop.f32.mrb[73].mxu0 }
 0x2b1   : > { %v2520_v34 = vadd.f32 %v1670_v51, %v4215_v29  ;;  %2001 = vmatprep.mubr.f32.mxu1 %v1778_v8 }
 0x2b2   : > { %2002 = vmatmul.mubr.f32.gmra.mrb[134].mxu1 %v1777_v1  ;;  %v1779_v32 = vmax.f32 %v2519_v41, 0.0 }
 0x2b3   : > { %v1780_v14 = vmax.f32 %v2520_v34, 0.0  ;;  %v1674_v44 = vpop.f32.mrb[74].mxu0 }
 0x2b4   : > { %v2521_v55 = vadd.f32 %v1674_v44, %v4211_v33  ;;  %v1676_v59 = vpop.f32.mrb[75].mxu0 }
 0x2b5   : > { %v2522_v53 = vadd.f32 %v1676_v59, %v4215_v29  ;;  %2006 = vmatprep.mubr.f32.mxu1 %v1780_v14 }
 0x2b6   : > { %2007 = vmatmul.mubr.f32.gmra.mrb[136].mxu1 %v1779_v32  ;;  %v1781_v50 = vmax.f32 %v2521_v55, 0.0 }
 0x2b7   : > { %v1782_v37 = vmax.f32 %v2522_v53, 0.0  ;;  %v1680_v45 = vpop.f32.mrb[76].mxu0 }
 0x2b8   : > { %v2523_v49 = vadd.f32 %v1680_v45, %v4211_v33  ;;  %v1682_v62 = vpop.f32.mrb[77].mxu0 }
 0x2b9   : > { %v2524_v21 = vadd.f32 %v1682_v62, %v4215_v29  ;;  %2011 = vmatprep.mubr.f32.mxu1 %v1782_v37  ;;  %v4287_v37 = vld [vmem:[%s4418_s6] ss:$0 sm:$0xff] }
 0x2ba   : > { %2012 = vmatmul.mubr.f32.gmra.mrb[138].mxu1 %v1781_v50  ;;  %v1783_v28 = vmax.f32 %v2523_v49, 0.0 }
 0x2bb   : > { %v1784_v23 = vmax.f32 %v2524_v21, 0.0  ;;  %v1686_v5 = vpop.f32.mrb[78].mxu0 }
 0x2bc   : > { %v2525_v31 = vadd.f32 %v1686_v5, %v4211_v33  ;;  %v1688_v36 = vpop.f32.mrb[79].mxu0 }
 0x2bd   : > { %v2526_v52 = vadd.f32 %v1688_v36, %v4215_v29  ;;  %2016 = vmatprep.mubr.f32.mxu1 %v1784_v23 }
 0x2be   : > { %2017 = vmatmul.mubr.f32.gmra.mrb[140].mxu1 %v1783_v28  ;;  %v1785_v30 = vmax.f32 %v2525_v31, 0.0 }
 0x2bf   : > { %v1786_v43 = vmax.f32 %v2526_v52, 0.0  ;;  %v1692_v9 = vpop.f32.mrb[80].mxu0 }
 0x2c0   : > { %v2527_v48 = vadd.f32 %v1692_v9, %v4211_v33  ;;  %v1694_v20 = vpop.f32.mrb[81].mxu0 }
 0x2c1   : > { %v2528_v15 = vadd.f32 %v1694_v20, %v4215_v29  ;;  %2021 = vmatprep.mubr.f32.mxu1 %v1786_v43 }
 0x2c2   : > { %2022 = vmatmul.mubr.f32.gmra.mrb[142].mxu1 %v1785_v30  ;;  %v1787_v16 = vmax.f32 %v2527_v48, 0.0 }
 0x2c3   : > { %v1788_v17 = vmax.f32 %v2528_v15, 0.0  ;;  %v1698_v56 = vpop.f32.mrb[82].mxu0 }
 0x2c4   : > { %v2529_v18 = vadd.f32 %v1698_v56, %v4211_v33  ;;  %v1700_v38 = vpop.f32.mrb[83].mxu0 }
 0x2c5   : > { %v2530_v7 = vadd.f32 %v1700_v38, %v4215_v29  ;;  %2026 = vmatprep.mubr.f32.mxu1 %v1788_v17 }
 0x2c6   : > { %2027 = vmatmul.mubr.f32.gmra.mrb[144].mxu1 %v1787_v16  ;;  %v1789_v22 = vmax.f32 %v2529_v18, 0.0 }
 0x2c7   : > { %v1790_v40 = vmax.f32 %v2530_v7, 0.0  ;;  %v1704_v47 = vpop.f32.mrb[84].mxu0 }
 0x2c8   : > { %v2531_v46 = vadd.f32 %v1704_v47, %v4211_v33  ;;  %v1706_v11 = vpop.f32.mrb[85].mxu0 }
 0x2c9   : > { %v2532_v13 = vadd.f32 %v1706_v11, %v4215_v29  ;;  %2031 = vmatprep.mubr.f32.mxu1 %v1790_v40 }
 0x2ca   : > { %2032 = vmatmul.mubr.f32.gmra.mrb[146].mxu1 %v1789_v22  ;;  %v1791_v57 = vmax.f32 %v2531_v46, 0.0 }
 0x2cb   : > { %v1792_v24 = vmax.f32 %v2532_v13, 0.0  ;;  %v1710_v6 = vpop.f32.mrb[86].mxu0 }
 0x2cc   : > { %v2533_v60 = vadd.f32 %v1710_v6, %v4211_v33  ;;  %v1712_v39 = vpop.f32.mrb[87].mxu0 }
 0x2cd   : > { %v2534_v12 = vadd.f32 %v1712_v39, %v4215_v29  ;;  %2036 = vmatprep.mubr.f32.mxu1 %v1792_v24 }
 0x2ce   : > { %2037 = vmatmul.mubr.f32.gmra.mrb[148].mxu1 %v1791_v57  ;;  %v1793_v35 = vmax.f32 %v2533_v60, 0.0 }
 0x2cf   : > { %v1794_v25 = vmax.f32 %v2534_v12, 0.0  ;;  %v1716_v19 = vpop.f32.mrb[88].mxu0 }
 0x2d0   : > { %v2535_v63 = vadd.f32 %v1716_v19, %v4211_v33  ;;  %v1718_v54 = vpop.f32.mrb[89].mxu0 }
 0x2d1   : > { %v2536_v27 = vadd.f32 %v1718_v54, %v4215_v29  ;;  %2041 = vmatprep.mubr.f32.mxu1 %v1794_v25 }
 0x2d2   : > { %2042 = vmatmul.mubr.f32.gmra.mrb[150].mxu1 %v1793_v35  ;;  %v1795_v61 = vmax.f32 %v2535_v63, 0.0 }
 0x2d3   : > { %v1796_v3 = vmax.f32 %v2536_v27, 0.0  ;;  %v1722_v26 = vpop.f32.mrb[90].mxu0 }
 0x2d4   : > { %v2537_v42 = vadd.f32 %v1722_v26, %v4211_v33  ;;  %v1724_v58 = vpop.f32.mrb[91].mxu0 }
 0x2d5   : > { %v2538_v4 = vadd.f32 %v1724_v58, %v4215_v29  ;;  %2046 = vmatprep.mubr.f32.mxu1 %v1796_v3 }
 0x2d6   : > { %2047 = vmatmul.mubr.f32.gmra.mrb[152].mxu1 %v1795_v61  ;;  %v1797_v8 = vmax.f32 %v2537_v42, 0.0 }
 0x2d7   : > { %v1798_v2 = vmax.f32 %v2538_v4, 0.0  ;;  %v1728_v10 = vpop.f32.mrb[92].mxu0 }
 0x2d8   : > { %v2539_v0 = vadd.f32 %v1728_v10, %v4211_v33  ;;  %v1730_v1 = vpop.f32.mrb[93].mxu0 }
 0x2d9   : > { %v2540_v41 = vadd.f32 %v1730_v1, %v4215_v29  ;;  %2051 = vmatprep.mubr.f32.mxu1 %v1798_v2 }
 0x2da   : > { %2052 = vmatmul.mubr.f32.gmra.mrb[154].mxu1 %v1797_v8  ;;  %v1799_v14 = vmax.f32 %v2539_v0, 0.0 }
 0x2db   : > { %v1800_v51 = vmax.f32 %v2540_v41, 0.0  ;;  %v1734_v34 = vpop.f32.mrb[94].mxu0 }
 0x2dc   : > { %v2541_v44 = vadd.f32 %v1734_v34, %v4211_v33  ;;  %v1736_v32 = vpop.f32.mrb[95].mxu0 }
 0x2dd   : > { %v2542_v55 = vadd.f32 %v1736_v32, %v4215_v29  ;;  %2056 = vmatprep.mubr.f32.mxu1 %v1800_v51 }
 0x2de   : > { %2057 = vmatmul.mubr.f32.gmra.mrb[156].mxu1 %v1799_v14  ;;  %v1801_v53 = vmax.f32 %v2541_v44, 0.0 }
 0x2df   : > { %v1802_v59 = vmax.f32 %v2542_v55, 0.0 }
 0x2e1   : > { %2061 = vmatprep.mubr.f32.mxu1 %v1802_v59 }
 0x2e2   : > { %2062 = vmatmul.mubr.f32.gmra.mrb[158].mxu1 %v1801_v53 }
 0x339   : > { %v1908_v45 = vpop.f32.mrb[96].mxu1 }
 0x33a   : > { %v1909_v33 = vadd.f32 %v4287_v37, %v1908_v45  ;;  %v1910_v50 = vpop.f32.mrb[97].mxu1 }
 0x33c   : > { %2067 = vst [vmem:[%s4290_s22] sm:$0xff] %v1909_v33 }
 0x33d   : > { %v1913_v29 = vpop.f32.mrb[98].mxu1 }
 0x33e   : > { %v1914_v49 = vadd.f32 %v4287_v37, %v1913_v29  ;;  %v1915_v62 = vpop.f32.mrb[99].mxu1 }
 0x340   : > { %2068 = vst [vmem:[%s4290_s22 + $0x8] sm:$0xff] %v1914_v49 }
 0x341   : > { %v1918_v21 = vpop.f32.mrb[100].mxu1 }
 0x342   : > { %v1919_v23 = vadd.f32 %v4287_v37, %v1918_v21  ;;  %v1920_v5 = vpop.f32.mrb[101].mxu1 }
 0x344   : > { %2069 = vst [vmem:[%s4290_s22 + $0x10] sm:$0xff] %v1919_v23 }
 0x345   : > { %v1923_v28 = vpop.f32.mrb[102].mxu1 }
 0x346   : > { %v1924_v31 = vadd.f32 %v4287_v37, %v1923_v28  ;;  %v1925_v36 = vpop.f32.mrb[103].mxu1 }
 0x348   : > { %2070 = vst [vmem:[%s4290_s22 + $0x18] sm:$0xff] %v1924_v31 }
 0x349   : > { %v1928_v52 = vpop.f32.mrb[104].mxu1 }
 0x34a   : > { %v1929_v43 = vadd.f32 %v4287_v37, %v1928_v52  ;;  %v1930_v9 = vpop.f32.mrb[105].mxu1 }
 0x34c   : > { %2071 = vst [vmem:[%s4290_s22 + $0x20] sm:$0xff] %v1929_v43 }
 0x34d   : > { %v1933_v30 = vpop.f32.mrb[106].mxu1 }
 0x34e   : > { %v1934_v48 = vadd.f32 %v4287_v37, %v1933_v30  ;;  %v1935_v20 = vpop.f32.mrb[107].mxu1 }
 0x350   : > { %2072 = vst [vmem:[%s4290_s22 + $0x28] sm:$0xff] %v1934_v48 }
 0x351   : > { %v1938_v15 = vpop.f32.mrb[108].mxu1 }
 0x352   : > { %v1939_v17 = vadd.f32 %v4287_v37, %v1938_v15  ;;  %v1940_v56 = vpop.f32.mrb[109].mxu1 }
 0x354   : > { %2073 = vst [vmem:[%s4290_s22 + $0x30] sm:$0xff] %v1939_v17 }
 0x355   : > { %v1943_v16 = vpop.f32.mrb[110].mxu1 }
 0x356   : > { %v1944_v18 = vadd.f32 %v4287_v37, %v1943_v16  ;;  %v1945_v38 = vpop.f32.mrb[111].mxu1 }
 0x358   : > { %2074 = vst [vmem:[%s4290_s22 + $0x38] sm:$0xff] %v1944_v18 }
 0x359   : > { %v1948_v7 = vpop.f32.mrb[112].mxu1 }
 0x35a   : > { %v1949_v40 = vadd.f32 %v4287_v37, %v1948_v7  ;;  %v1950_v47 = vpop.f32.mrb[113].mxu1 }
 0x35c   : > { %2075 = vst [vmem:[%s4290_s22 + $0x40] sm:$0xff] %v1949_v40 }
 0x35d   : > { %v1953_v22 = vpop.f32.mrb[114].mxu1 }
 0x35e   : > { %v1954_v46 = vadd.f32 %v4287_v37, %v1953_v22  ;;  %v1955_v11 = vpop.f32.mrb[115].mxu1 }
 0x360   : > { %2076 = vst [vmem:[%s4290_s22 + $0x48] sm:$0xff] %v1954_v46 }
 0x361   : > { %v1958_v13 = vpop.f32.mrb[116].mxu1 }
 0x362   : > { %v1959_v24 = vadd.f32 %v4287_v37, %v1958_v13  ;;  %v1960_v6 = vpop.f32.mrb[117].mxu1 }
 0x364   : > { %2077 = vst [vmem:[%s4290_s22 + $0x50] sm:$0xff] %v1959_v24 }
 0x365   : > { %v1963_v57 = vpop.f32.mrb[118].mxu1 }
 0x366   : > { %v1964_v60 = vadd.f32 %v4287_v37, %v1963_v57  ;;  %v1965_v39 = vpop.f32.mrb[119].mxu1 }
 0x368   : > { %2078 = vst [vmem:[%s4290_s22 + $0x58] sm:$0xff] %v1964_v60 }
 0x369   : > { %v1968_v12 = vpop.f32.mrb[120].mxu1 }
 0x36a   : > { %v1969_v25 = vadd.f32 %v4287_v37, %v1968_v12  ;;  %v1970_v19 = vpop.f32.mrb[121].mxu1 }
 0x36c   : > { %2079 = vst [vmem:[%s4290_s22 + $0x60] sm:$0xff] %v1969_v25 }
 0x36d   : > { %v1973_v35 = vpop.f32.mrb[122].mxu1 }
 0x36e   : > { %v1974_v63 = vadd.f32 %v4287_v37, %v1973_v35  ;;  %v1975_v54 = vpop.f32.mrb[123].mxu1 }
 0x370   : > { %2080 = vst [vmem:[%s4290_s22 + $0x68] sm:$0xff] %v1974_v63 }
 0x371   : > { %v1978_v27 = vpop.f32.mrb[124].mxu1 }
 0x372   : > { %v1979_v3 = vadd.f32 %v4287_v37, %v1978_v27  ;;  %v1980_v26 = vpop.f32.mrb[125].mxu1 }
 0x374   : > { %2081 = vst [vmem:[%s4290_s22 + $0x70] sm:$0xff] %v1979_v3 }
 0x375   : > { %v1983_v61 = vpop.f32.mrb[126].mxu1 }
 0x376   : > { %v1984_v42 = vadd.f32 %v4287_v37, %v1983_v61  ;;  %v1985_v58 = vpop.f32.mrb[127].mxu1 }
 0x378   : > { %2082 = vst [vmem:[%s4290_s22 + $0x78] sm:$0xff] %v1984_v42 }
 0x379   : > { %v1988_v4 = vpop.f32.mrb[128].mxu1 }
 0x37a   : > { %v1989_v2 = vadd.f32 %v4287_v37, %v1988_v4  ;;  %v1990_v10 = vpop.f32.mrb[129].mxu1 }
 0x37c   : > { %2083 = vst [vmem:[%s4290_s22 + $0x80] sm:$0xff] %v1989_v2 }
 0x37d   : > { %v1993_v8 = vpop.f32.mrb[130].mxu1 }
 0x37e   : > { %v1994_v0 = vadd.f32 %v4287_v37, %v1993_v8  ;;  %v1995_v1 = vpop.f32.mrb[131].mxu1 }
 0x380   : > { %2084 = vst [vmem:[%s4290_s22 + $0x88] sm:$0xff] %v1994_v0 }
 0x381   : > { %v1998_v41 = vpop.f32.mrb[132].mxu1 }
 0x382   : > { %v1999_v51 = vadd.f32 %v4287_v37, %v1998_v41  ;;  %v2000_v34 = vpop.f32.mrb[133].mxu1 }
 0x384   : > { %2085 = vst [vmem:[%s4290_s22 + $0x90] sm:$0xff] %v1999_v51 }
 0x385   : > { %v2003_v14 = vpop.f32.mrb[134].mxu1 }
 0x386   : > { %v2004_v44 = vadd.f32 %v4287_v37, %v2003_v14  ;;  %v2005_v32 = vpop.f32.mrb[135].mxu1 }
 0x388   : > { %2086 = vst [vmem:[%s4290_s22 + $0x98] sm:$0xff] %v2004_v44 }
 0x389   : > { %v2008_v55 = vpop.f32.mrb[136].mxu1 }
 0x38a   : > { %v2009_v59 = vadd.f32 %v4287_v37, %v2008_v55  ;;  %v2010_v53 = vpop.f32.mrb[137].mxu1 }
 0x38c   : > { %2087 = vst [vmem:[%s4290_s22 + $0xa0] sm:$0xff] %v2009_v59 }
 0x38d   : > { %v2013_v45 = vpop.f32.mrb[138].mxu1 }
 0x38e   : > { %v2014_v33 = vadd.f32 %v4287_v37, %v2013_v45  ;;  %v2015_v50 = vpop.f32.mrb[139].mxu1 }
 0x390   : > { %2088 = vst [vmem:[%s4290_s22 + $0xa8] sm:$0xff] %v2014_v33 }
 0x391   : > { %v2018_v29 = vpop.f32.mrb[140].mxu1 }
 0x392   : > { %v2019_v49 = vadd.f32 %v4287_v37, %v2018_v29  ;;  %v2020_v62 = vpop.f32.mrb[141].mxu1 }
 0x394   : > { %2089 = vst [vmem:[%s4290_s22 + $0xb0] sm:$0xff] %v2019_v49 }
 0x395   : > { %v2023_v21 = vpop.f32.mrb[142].mxu1 }
 0x396   : > { %v2024_v23 = vadd.f32 %v4287_v37, %v2023_v21  ;;  %v2025_v5 = vpop.f32.mrb[143].mxu1 }
 0x398   : > { %2090 = vst [vmem:[%s4290_s22 + $0xb8] sm:$0xff] %v2024_v23 }
 0x399   : > { %v2028_v28 = vpop.f32.mrb[144].mxu1 }
 0x39a   : > { %v2029_v31 = vadd.f32 %v4287_v37, %v2028_v28  ;;  %v2030_v36 = vpop.f32.mrb[145].mxu1 }
 0x39c   : > { %2091 = vst [vmem:[%s4290_s22 + $0xc0] sm:$0xff] %v2029_v31 }
 0x39d   : > { %v2033_v52 = vpop.f32.mrb[146].mxu1 }
 0x39e   : > { %v2034_v43 = vadd.f32 %v4287_v37, %v2033_v52  ;;  %v2035_v9 = vpop.f32.mrb[147].mxu1 }
 0x3a0   : > { %2092 = vst [vmem:[%s4290_s22 + $0xc8] sm:$0xff] %v2034_v43 }
 0x3a1   : > { %v2038_v30 = vpop.f32.mrb[148].mxu1 }
 0x3a2   : > { %v2039_v48 = vadd.f32 %v4287_v37, %v2038_v30  ;;  %v2040_v20 = vpop.f32.mrb[149].mxu1 }
 0x3a4   : > { %2093 = vst [vmem:[%s4290_s22 + $0xd0] sm:$0xff] %v2039_v48 }
 0x3a5   : > { %v2043_v15 = vpop.f32.mrb[150].mxu1 }
 0x3a6   : > { %v2044_v17 = vadd.f32 %v4287_v37, %v2043_v15  ;;  %v2045_v56 = vpop.f32.mrb[151].mxu1 }
 0x3a8   : > { %2094 = vst [vmem:[%s4290_s22 + $0xd8] sm:$0xff] %v2044_v17 }
 0x3a9   : > { %v2048_v16 = vpop.f32.mrb[152].mxu1 }
 0x3aa   : > { %v2049_v18 = vadd.f32 %v4287_v37, %v2048_v16  ;;  %v2050_v38 = vpop.f32.mrb[153].mxu1 }
 0x3ac   : > { %2095 = vst [vmem:[%s4290_s22 + $0xe0] sm:$0xff] %v2049_v18 }
 0x3ad   : > { %v2053_v7 = vpop.f32.mrb[154].mxu1 }
 0x3ae   : > { %v2054_v40 = vadd.f32 %v4287_v37, %v2053_v7  ;;  %v2055_v47 = vpop.f32.mrb[155].mxu1 }
 0x3b0   : > { %2096 = vst [vmem:[%s4290_s22 + $0xe8] sm:$0xff] %v2054_v40 }
 0x3b1   : > { %v2058_v22 = vpop.f32.mrb[156].mxu1 }
 0x3b2   : > { %v2059_v46 = vadd.f32 %v4287_v37, %v2058_v22  ;;  %v2060_v11 = vpop.f32.mrb[157].mxu1 }
 0x3b4   : > { %2097 = vst [vmem:[%s4290_s22 + $0xf0] sm:$0xff] %v2059_v46 }
 0x3b5   : > { %v2063_v13 = vpop.f32.mrb[158].mxu1 }
 0x3b6   : > { %v2064_v24 = vadd.f32 %v4287_v37, %v2063_v13  ;;  %v2065_v6 = vpop.f32.mrb[159].mxu1 }
 0x3b8   : > { %2098 = vst [vmem:[%s4290_s22 + $0xf8] sm:$0xff] %v2064_v24 }
 0x3b9   : > { %2679 = shalt.err (!%p2676_p5)
}
 0x3ba   : > { %s2680_s30 = scalar_lea.hbm %s4358_s19, 4096  ;;  %s2684_s22 = scalar_lea.hbm %s4419_s7, 8192 }
 0x3bb   : > { %p2681_p6 = scmp.ne.s32.totalorder %s4358_s19, %s2680_s30  ;;  %p2685_p10 = scmp.lt.u32.totalorder %s4358_s19, %s4419_s7 }
 0x3bc   : > { %p2686_p11 = scmp.lt.u32.totalorder %s2684_s22, %s2680_s30  ;;  %p2688_p13 = scmp.lt.u32.totalorder %s2680_s30, %s4358_s19 }
 0x3bd   : > { %p2682_p7 = pnand %p2681_p6, %p2831_p4 }
 0x3be   : > { %p2687_p12 = por %p2686_p11, %p2685_p10 }
 0x3bf   : > { %p2683_p9 = pneg %p2682_p7 }
 0x3c0   : > { %p2689_p0 = por %p2688_p13, %p2687_p12 }
 0x3c2   : > { %p2690_p1 = pnand %p2689_p0, %p2683_p9 }
 0x3c4   : > { %2693 = shalt.err (!%p2690_p1)
}
 0x3c5   : > { %s2749_s18 = smov 128   ;;  %s2750_s27 = smov 8  }
 0x3c6   : > { %2607 = dma.vmem_to_hbm [thread:$0]  (%p2831_p4), %s4360_s10, 4096, %s4358_s19, %s4366_s20, %s2749_s18, %s2749_s18, %s2750_s27  }
 0x3c7 PF: > { %p2613_p2 = scmp.ge.s32.totalorder %s2744_s29, 2  ;;  %s2130_s23 = sand.u32 1, %s2724_s24  }
 0x3c8   : > { %s2131_s21 = scalar_lea.sflag [#allocation3], %s2130_s23 }
 0x3c9   : > { %p2610_p3 = pnand %p2613_p2, %p2838_p8 }
 0x3cb   : > { %2719 = dma.done.wait (!%p2610_p3), %s2131_s21, 4096  }
 0x3cc   : > { %2721 = vsyncadd (!%p2610_p3), %s2131_s21, 4294963200  ;;  %s20_s29 = sadd.s32 1, %s2744_s29   ;;  %s4422_s24 = smov %s2728_s25 }
 0x3cd   : > { %p17_p5 = scmp.ge.s32.totalorder %s20_s29, 4   ;;  %s4423_s25 = smov %s2732_s26 }
 0x3ce   : > { %s4424_s26 = smov %s2844_s14  ;;  %s4425_s27 = smov %s2740_s28 }
 0x3cf   : > { %s4426_s28 = smov %s4428_s9  ;;  %19 = sbr.rel (!%p17_p5) target bundleno = 4 (0x4), region = 86 }
 0x3d6   :  { %2136 = vsyncpa [#allocation3], 1 }
 0x3d7   :  { %2138 = vsyncpa [#allocation3 + $0x1], 1 }

// kernel: deformnet_forward.3
= control target key start
LH: loop header
LB: loop body
LE: loop exit
PB: predicated region body
PF: predicated region fallthrough
CT: control target
= control target key end

     0   :  { %s5384_s21 = smov 0   ;;  %s5386_s22 = smov 0   ;;  %s7681_s0 = inlined_call_operand.vmem [shape: f32[2,2,256,3], index: 0, kind: input, shape index: {}]   ;;  %s7682_s1 = inlined_call_operand.vmem [shape: f32[2,3,128], index: 1, kind: input, shape index: {}]   ;;  %s7683_s2 = inlined_call_operand.vmem [shape: f32[2,1,128], index: 2, kind: input, shape index: {}]   ;;  %s7684_s3 = inlined_call_operand.vmem [shape: f32[2,128,128], index: 3, kind: input, shape index: {}]   ;;  %s7685_s4 = inlined_call_operand.vmem [shape: f32[2,1,128], index: 4, kind: input, shape index: {}]   ;;  %s7686_s5 = inlined_call_operand.vmem [shape: f32[2,128,128], index: 5, kind: input, shape index: {}]   ;;  %s7687_s6 = inlined_call_operand.vmem [shape: f32[2,1,128], index: 6, kind: input, shape index: {}]   ;;  %s7688_s7 = inlined_call_operand.vmem [shape: f32[2,128,128], index: 7, kind: input, shape index: {}]   ;;  %s7689_s8 = inlined_call_operand.vmem [shape: f32[2,1,128], index: 8, kind: input, shape index: {}]   ;;  %s7690_s9 = inlined_call_operand.vmem [shape: f32[2,128,1024], index: 9, kind: input, shape index: {}]   ;;  %s7691_s10 = inlined_call_operand.vmem [shape: f32[2,1,1024], index: 10, kind: input, shape index: {}]   ;;  %s7692_s11 = inlined_call_operand.vmem [shape: f32[2,2,256,128], index: 11, kind: output, shape index: {0}]   ;;  %s7693_s12 = inlined_call_operand.vmem [shape: f32[2,2,1,1024], index: 12, kind: output, shape index: {1}]  }
   0x1   :  { %s5388_s23 = smov 0   ;;  %s5390_s24 = smov 0  }
   0x2   :  { %s5392_s25 = smov 0  }
   0x3 LB: > { %s38_s26 = sadd.s32 1, %s5307_s23  ;;  %s42_s27 = sadd.s32 1, %s5311_s24  ;;  %s5315_s25 = sphi %s5392_s25, %s23_s25   ;;  %s5311_s24 = sphi %s5390_s24, %s8011_s24   ;;  %s5307_s23 = sphi %s5388_s23, %s8010_s23   ;;  %s5303_s22 = sphi %s5386_s22, %s8009_s22   ;;  %s5299_s21 = sphi %s5384_s21, %s8008_s21  }
   0x4   : > { %p40_p0 = scmp.ge.s32.totalorder %s38_s26, 2  ;;  %p4465_p1 = scmp.ge.s32.totalorder %s5315_s25, 1 }
   0x5   : > { %p493_p2 = scmp.lt.s32.totalorder %s5315_s25, 5 }
   0x6   : > { %s8013_s26 = smov (%p40_p0, %s38_s26), 0  ;;  %s8015_s27 = smov (!%p40_p0, %s42_s27), %s5311_s24 }
   0x7   : > { %7772 = sst [smem:[#allocation3_spill]] %s8013_s26  ;;  %p494_p3 = pnand %p4465_p1, %p493_p2 }
   0x8   : > { %p44_p4 = scmp.ge.s32.totalorder %s8015_s27, 2 }
   0x9   : > { %497 = sbr.rel (%p494_p3) target bundleno = 1466 (0x5ba), region = 64 }
   0xa   : > { %s8017_s27 = smov (%p44_p4, %s8015_s27), 0 }
   0xb   : > { %7773 = sst [smem:[#allocation4_spill]] %s8017_s27 }
  0x10   : > { %p600_p5 = scmp.lt.s32.totalorder %s5303_s22, 1  ;;  %p602_p6 = scmp.lt.s32.totalorder %s5299_s21, 1  ;;  %vm817_vm0 = vcmask 1042432   ;;  %vm720_vm1 = vcmask 23552  }
  0x11   : > { %p3404_p7 = scmp.eq.s32.totalorder %s5303_s22, 0 }
  0x12   : > { %s5418_s28 = scalar_select %p600_p5, %s5303_s22, 1 }
  0x13   : > { %s8019_s21 = smov (!%p602_p6, %s5299_s21), 1 }
  0x14   : > { %s4469_s29 = sshll.u32 %s5418_s28, 2  ;;  %s4467_s30 = sshll.u32 %s5418_s28, 6 }
  0x15   : > { %s616_s15 = scalar_lea.vmem %s7682_s1, %s4469_s29  ;;  %s4466_s16 = sshll.u32 %s8019_s21, 5 }
  0x16   : > { %v712_v0 = vld [vmem:[%s616_s15] sm:$0x7]  ;;  %s5428_s17 = sadd.s32 %s4467_s30, %s4466_s16  ;;  %s5431_s18 = sshll.u32 %s5418_s28, 7 }
  0x17   : > { %4704 = vmatprep.subr.msk.mxu0 %vm817_vm0, %v712_v0  ;;  %s4468_s19 = sshll.u32 %s5428_s17, 3  ;;  %s5438_s26 = scalar_lea.vmem %s7684_s3, %s5431_s18 }
  0x18   : > { %4705 = vmatpush3.msk.msra.mxu0 %vm817_vm0, %v712_v0  ;;  %s5445_s13 = scalar_lea.vmem %s7681_s0, %s4468_s19  ;;  %v1078_v1 = vld [vmem:[%s5438_s26] sm:$0xff]  ;;  %v1079_v2 = vld [vmem:[%s5438_s26 + $0x8] sm:$0xff]  ;;  %v1080_v11 = vld [vmem:[%s5438_s26 + $0x10] sm:$0xff]  ;;  %s5531_s15 = scalar_lea.vmem %s7686_s5, %s5431_s18 }
  0x19   : > { %v680_v3 = vld [vmem:[%s5445_s13] sm:$0xff]  ;;  %v681_v4 = vld [vmem:[%s5445_s13 + $0x8] sm:$0xff]  ;;  %v682_v5 = vld [vmem:[%s5445_s13 + $0x10] sm:$0xff]  ;;  %v4994_v6 = vpack.c.bf16 %v1079_v2, %v1078_v1  ;;  %s619_s20 = scalar_lea.vmem %s7683_s2, %s5418_s28  ;;  %s627_s14 = scalar_lea.vmem %s7685_s4, %s5418_s28 }
  0x1a   : > { %4706 = vmatprep.mubr.msk.f32.mxu0 %vm720_vm1, %v680_v3  ;;  %v683_v7 = vld [vmem:[%s5445_s13 + $0x18] sm:$0xff]  ;;  %v684_v8 = vld [vmem:[%s5445_s13 + $0x20] sm:$0xff]  ;;  %v685_v9 = vld [vmem:[%s5445_s13 + $0x28] sm:$0xff]  ;;  %s3405_s30 = scalar_select %p3404_p7, 256, 128 }
  0x1b   : > { %4707 = vmatmul.mubr.msk.f32.vlgmr.msra.gmra.mrb[0].mxu0 %vm720_vm1, %v681_v4  ;;  %4995 = vmatprep.subr.bf16.mxu1 %v4994_v6  ;;  %v686_v10 = vld [vmem:[%s5445_s13 + $0x30] sm:$0xff]  ;;  %v1081_v12 = vld [vmem:[%s5438_s26 + $0x18] sm:$0xff]  ;;  %v1082_v15 = vld [vmem:[%s5438_s26 + $0x20] sm:$0xff]  ;;  %s4186_s27 = scalar_select %p3404_p7, 0.00390625, 0.0078125 }
  0x1c   : > { %4709 = vmatprep.mubr.msk.f32.mxu0 %vm720_vm1, %v682_v5  ;;  %4997 = vmatpush3.bf16.msra.mxu1 %v4994_v6  ;;  %v687_v13 = vld [vmem:[%s5445_s13 + $0x38] sm:$0xff]  ;;  %v4998_v14 = vpack.c.bf16 %v1081_v12, %v1080_v11  ;;  %v1083_v16 = vld [vmem:[%s5438_s26 + $0x28] sm:$0xff]  ;;  %v688_v17 = vld [vmem:[%s5445_s13 + $0x40] sm:$0xff] }
  0x1d   : > { %v5002_v18 = vpack.c.bf16 %v1083_v16, %v1082_v15  ;;  %v1084_v19 = vld [vmem:[%s5438_s26 + $0x30] sm:$0xff]  ;;  %v1085_v20 = vld [vmem:[%s5438_s26 + $0x38] sm:$0xff]  ;;  %v689_v21 = vld [vmem:[%s5445_s13 + $0x48] sm:$0xff] }
  0x1e   : > { %4999 = vmatprep.subr.bf16.mxu1 %v4998_v14  ;;  %v5006_v22 = vpack.c.bf16 %v1085_v20, %v1084_v19  ;;  %v690_v23 = vld [vmem:[%s5445_s13 + $0x50] sm:$0xff]  ;;  %v1086_v24 = vld [vmem:[%s5438_s26 + $0x40] sm:$0xff]  ;;  %v1087_v25 = vld [vmem:[%s5438_s26 + $0x48] sm:$0xff] }
  0x1f   : > { %4710 = vmatmul.mubr.msk.f32.gmra.mrb[2].mxu0 %vm720_vm1, %v683_v7  ;;  %v691_v26 = vld [vmem:[%s5445_s13 + $0x58] sm:$0xff]  ;;  %v5010_v27 = vpack.c.bf16 %v1087_v25, %v1086_v24  ;;  %v692_v28 = vld [vmem:[%s5445_s13 + $0x60] sm:$0xff]  ;;  %v1088_v29 = vld [vmem:[%s5438_s26 + $0x50] sm:$0xff] }
  0x20   : > { %4712 = vmatprep.mubr.msk.f32.mxu0 %vm720_vm1, %v684_v8  ;;  %5001 = vmatpush3.bf16.msra.mxu1 %v4998_v14  ;;  %v1089_v30 = vld [vmem:[%s5438_s26 + $0x58] sm:$0xff]  ;;  %v693_v31 = vld [vmem:[%s5445_s13 + $0x68] sm:$0xff]  ;;  %v694_v33 = vld [vmem:[%s5445_s13 + $0x70] sm:$0xff] }
  0x21   : > { %5003 = vmatprep.subr.bf16.mxu1 %v5002_v18  ;;  %v5014_v32 = vpack.c.bf16 %v1089_v30, %v1088_v29  ;;  %v1090_v34 = vld [vmem:[%s5438_s26 + $0x60] sm:$0xff]  ;;  %v1091_v35 = vld [vmem:[%s5438_s26 + $0x68] sm:$0xff]  ;;  %v695_v36 = vld [vmem:[%s5445_s13 + $0x78] sm:$0xff] }
  0x22   : > { %v5018_v37 = vpack.c.bf16 %v1091_v35, %v1090_v34  ;;  %v696_v38 = vld [vmem:[%s5445_s13 + $0x80] sm:$0xff]  ;;  %v697_v39 = vld [vmem:[%s5445_s13 + $0x88] sm:$0xff]  ;;  %v698_v40 = vld [vmem:[%s5445_s13 + $0x90] sm:$0xff] }
  0x23   : > { %4713 = vmatmul.mubr.msk.f32.gmra.mrb[4].mxu0 %vm720_vm1, %v685_v9  ;;  %v699_v41 = vld [vmem:[%s5445_s13 + $0x98] sm:$0xff]  ;;  %v700_v42 = vld [vmem:[%s5445_s13 + $0xa0] sm:$0xff]  ;;  %v701_v43 = vld [vmem:[%s5445_s13 + $0xa8] sm:$0xff] }
  0x24   : > { %4715 = vmatprep.mubr.msk.f32.mxu0 %vm720_vm1, %v686_v10  ;;  %5005 = vmatpush3.bf16.msra.mxu1 %v5002_v18  ;;  %v702_v44 = vld [vmem:[%s5445_s13 + $0xb0] sm:$0xff]  ;;  %v703_v45 = vld [vmem:[%s5445_s13 + $0xb8] sm:$0xff]  ;;  %v704_v46 = vld [vmem:[%s5445_s13 + $0xc0] sm:$0xff] }
  0x25   : > { %5007 = vmatprep.subr.bf16.mxu1 %v5006_v22  ;;  %v705_v47 = vld [vmem:[%s5445_s13 + $0xc8] sm:$0xff]  ;;  %v706_v48 = vld [vmem:[%s5445_s13 + $0xd0] sm:$0xff]  ;;  %v707_v49 = vld [vmem:[%s5445_s13 + $0xd8] sm:$0xff] }
  0x26   : > { %v708_v50 = vld [vmem:[%s5445_s13 + $0xe0] sm:$0xff]  ;;  %v709_v51 = vld [vmem:[%s5445_s13 + $0xe8] sm:$0xff]  ;;  %v710_v52 = vld [vmem:[%s5445_s13 + $0xf0] sm:$0xff] }
  0x27   : > { %4716 = vmatmul.mubr.msk.f32.gmra.mrb[6].mxu0 %vm720_vm1, %v687_v13  ;;  %v711_v53 = vld [vmem:[%s5445_s13 + $0xf8] sm:$0xff]  ;;  %v1092_v54 = vld [vmem:[%s5438_s26 + $0x70] sm:$0xff]  ;;  %v1358_v57 = vld [vmem:[%s5531_s15] sm:$0xff]  ;;  %s5591_s13 = scalar_lea.vmem %s7688_s7, %s5431_s18  ;;  %s4483_s18 = sshll.u32 %s5418_s28, 4 }
  0x28   : > { %4718 = vmatprep.mubr.msk.f32.mxu0 %vm720_vm1, %v688_v17  ;;  %5009 = vmatpush3.bf16.msra.mxu1 %v5006_v22  ;;  %v1093_v55 = vld [vmem:[%s5438_s26 + $0x78] sm:$0xff]  ;;  %v1359_v58 = vld [vmem:[%s5531_s15 + $0x8] sm:$0xff]  ;;  %v1360_v59 = vld [vmem:[%s5531_s15 + $0x10] sm:$0xff]  ;;  %s4478_s26 = sshll.u32 %s5418_s28, 3 }
  0x29   : > { %5011 = vmatprep.subr.bf16.mxu1 %v5010_v27  ;;  %v5022_v56 = vpack.c.bf16 %v1093_v55, %v1092_v54  ;;  %v5026_v60 = vpack.c.bf16 %v1359_v58, %v1358_v57  ;;  %v1361_v61 = vld [vmem:[%s5531_s15 + $0x18] sm:$0xff]  ;;  %v1362_v63 = vld [vmem:[%s5531_s15 + $0x20] sm:$0xff]  ;;  %v1363_v0 = vld [vmem:[%s5531_s15 + $0x28] sm:$0xff]  ;;  %s6316_s29 = scalar_lea.vmem %s7691_s10, %s4478_s26 }
  0x2a   : > { %v5030_v62 = vpack.c.bf16 %v1361_v61, %v1360_v59  ;;  %v5034_v1 = vpack.c.bf16 %v1363_v0, %v1362_v63  ;;  %v1364_v2 = vld [vmem:[%s5531_s15 + $0x30] sm:$0xff]  ;;  %v1365_v3 = vld [vmem:[%s5531_s15 + $0x38] sm:$0xff]  ;;  %v1366_v5 = vld [vmem:[%s5531_s15 + $0x40] sm:$0xff] }
  0x2b   : > { %4719 = vmatmul.mubr.msk.f32.gmra.mrb[8].mxu0 %vm720_vm1, %v689_v21  ;;  %5027 = vmatprep.subr.bf16.mxu0 %v5026_v60  ;;  %v5038_v4 = vpack.c.bf16 %v1365_v3, %v1364_v2  ;;  %v1367_v6 = vld [vmem:[%s5531_s15 + $0x48] sm:$0xff]  ;;  %v1368_v8 = vld [vmem:[%s5531_s15 + $0x50] sm:$0xff]  ;;  %v1369_v9 = vld [vmem:[%s5531_s15 + $0x58] sm:$0xff] }
  0x2c   : > { %4721 = vmatprep.mubr.msk.f32.mxu0 %vm720_vm1, %v690_v23  ;;  %5013 = vmatpush3.bf16.msra.mxu1 %v5010_v27  ;;  %v5042_v7 = vpack.c.bf16 %v1367_v6, %v1366_v5  ;;  %v5046_v10 = vpack.c.bf16 %v1369_v9, %v1368_v8  ;;  %v1370_v11 = vld [vmem:[%s5531_s15 + $0x60] sm:$0xff]  ;;  %v1371_v12 = vld [vmem:[%s5531_s15 + $0x68] sm:$0xff]  ;;  %v1372_v14 = vld [vmem:[%s5531_s15 + $0x70] sm:$0xff] }
  0x2d   : > { %5015 = vmatprep.subr.bf16.mxu1 %v5014_v32  ;;  %5029 = vmatpush3.bf16.msra.mxu0 %v5026_v60  ;;  %v5050_v13 = vpack.c.bf16 %v1371_v12, %v1370_v11  ;;  %v1373_v15 = vld [vmem:[%s5531_s15 + $0x78] sm:$0xff]  ;;  %v5553_v17 = vld [vmem:[%s619_s20] ss:$0 sm:$0xff]  ;;  %s4526_s15 = sshll.u32 %s5418_s28, 10 }
  0x2e   : > { %5031 = vmatprep.subr.bf16.mxu0 %v5030_v62  ;;  %v5054_v16 = vpack.c.bf16 %v1373_v15, %v1372_v14  ;;  %s5651_s20 = scalar_lea.vmem %s7690_s9, %s4526_s15  ;;  %s643_s15 = scalar_lea.vmem %s7689_s8, %s5418_s28 }
  0x2f   : > { %4722 = vmatmul.mubr.msk.f32.gmra.mrb[10].mxu0 %vm720_vm1, %v691_v26 }
  0x30   : > { %4724 = vmatprep.mubr.msk.f32.mxu0 %vm720_vm1, %v692_v28  ;;  %5017 = vmatpush3.bf16.msra.mxu1 %v5014_v32 }
  0x31   : > { %5019 = vmatprep.subr.bf16.mxu1 %v5018_v37  ;;  %5033 = vmatpush3.bf16.msra.mxu0 %v5030_v62 }
  0x32   : > { %5035 = vmatprep.subr.bf16.mxu0 %v5034_v1 }
  0x33   : > { %4725 = vmatmul.mubr.msk.f32.gmra.mrb[12].mxu0 %vm720_vm1, %v693_v31 }
  0x34   : > { %4727 = vmatprep.mubr.msk.f32.mxu0 %vm720_vm1, %v694_v33  ;;  %5021 = vmatpush3.bf16.msra.mxu1 %v5018_v37 }
  0x35   : > { %5023 = vmatprep.subr.bf16.mxu1 %v5022_v56  ;;  %5037 = vmatpush3.bf16.msra.mxu0 %v5034_v1 }
  0x36   : > { %5039 = vmatprep.subr.bf16.mxu0 %v5038_v4 }
  0x37   : > { %4728 = vmatmul.mubr.msk.f32.gmra.mrb[14].mxu0 %vm720_vm1, %v695_v36 }
  0x38   : > { %4730 = vmatprep.mubr.msk.f32.mxu0 %vm720_vm1, %v696_v38  ;;  %5025 = vmatpush3.bf16.msra.mxu1 %v5022_v56 }
  0x39   : > { %5041 = vmatpush3.bf16.msra.mxu0 %v5038_v4 }
  0x3a   : > { %5043 = vmatprep.subr.bf16.mxu0 %v5042_v7 }
  0x3b   : > { %4731 = vmatmul.mubr.msk.f32.gmra.mrb[16].mxu0 %vm720_vm1, %v697_v39 }
  0x3c   : > { %4733 = vmatprep.mubr.msk.f32.mxu0 %vm720_vm1, %v698_v40 }
  0x3d   : > { %5045 = vmatpush3.bf16.msra.mxu0 %v5042_v7 }
  0x3e   : > { %5047 = vmatprep.subr.bf16.mxu0 %v5046_v10 }
  0x3f   : > { %4734 = vmatmul.mubr.msk.f32.gmra.mrb[18].mxu0 %vm720_vm1, %v699_v41 }
  0x40   : > { %4736 = vmatprep.mubr.msk.f32.mxu0 %vm720_vm1, %v700_v42 }
  0x41   : > { %5049 = vmatpush3.bf16.msra.mxu0 %v5046_v10 }
  0x42   : > { %5051 = vmatprep.subr.bf16.mxu0 %v5050_v13 }
  0x43   : > { %4737 = vmatmul.mubr.msk.f32.gmra.mrb[20].mxu0 %vm720_vm1, %v701_v43 }
  0x44   : > { %4739 = vmatprep.mubr.msk.f32.mxu0 %vm720_vm1, %v702_v44 }
  0x45   : > { %5053 = vmatpush3.bf16.msra.mxu0 %v5050_v13 }
  0x46   : > { %5055 = vmatprep.subr.bf16.mxu0 %v5054_v16 }
  0x47   : > { %4740 = vmatmul.mubr.msk.f32.gmra.mrb[22].mxu0 %vm720_vm1, %v703_v45 }
  0x48   : > { %4742 = vmatprep.mubr.msk.f32.mxu0 %vm720_vm1, %v704_v46 }
  0x49   : > { %5057 = vmatpush3.bf16.msra.mxu0 %v5054_v16 }
  0x4b   : > { %4743 = vmatmul.mubr.msk.f32.gmra.mrb[24].mxu0 %vm720_vm1, %v705_v47 }
  0x4c   : > { %4745 = vmatprep.mubr.msk.f32.mxu0 %vm720_vm1, %v706_v48 }
  0x4f   : > { %4746 = vmatmul.mubr.msk.f32.gmra.mrb[26].mxu0 %vm720_vm1, %v707_v49 }
  0x50   : > { %4748 = vmatprep.mubr.msk.f32.mxu0 %vm720_vm1, %v708_v50 }
  0x53   : > { %4749 = vmatmul.mubr.msk.f32.gmra.mrb[28].mxu0 %vm720_vm1, %v709_v51 }
  0x54   : > { %4751 = vmatprep.mubr.msk.f32.mxu0 %vm720_vm1, %v710_v52 }
  0x57   : > { %4752 = vmatmul.mubr.msk.f32.gmra.mrb[30].mxu0 %vm720_vm1, %v711_v53 }
  0xee   : > { %v4708_v18 = vpop.f32.mrb[0].mxu0 }
  0xef   : > { %v893_v19 = vadd.f32 %v4708_v18, %v5553_v17  ;;  %v887_v20 = vpop.f32.mrb[1].mxu0 }
  0xf0   : > { %v888_v21 = vadd.f32 %v5553_v17, %v887_v20 }
  0xf1   : > { %v1047_v24 = vmax.f32 %v893_v19, 0.0 }
  0xf2   : > { %v4711_v22 = vpop.f32.mrb[2].mxu0  ;;  %v1046_v23 = vmax.f32 %v888_v21, 0.0 }
  0xf3   : > { %v903_v25 = vadd.f32 %v4711_v22, %v5553_v17  ;;  %v897_v26 = vpop.f32.mrb[3].mxu0 }
  0xf4   : > { %v898_v27 = vadd.f32 %v5553_v17, %v897_v26  ;;  %4786 = vmatprep.mubr.f32.mxu1 %v1046_v23 }
  0xf5   : > { %v1049_v28 = vmax.f32 %v903_v25, 0.0  ;;  %4787 = vmatmul.mubr.f32.vlgmr.msra.gmra.mrb[0].mxu1 %v1047_v24 }
  0xf6   : > { %v1048_v29 = vmax.f32 %v898_v27, 0.0  ;;  %v4714_v30 = vpop.f32.mrb[4].mxu0 }
  0xf7   : > { %v913_v31 = vadd.f32 %v4714_v30, %v5553_v17  ;;  %v907_v32 = vpop.f32.mrb[5].mxu0 }
  0xf8   : > { %v908_v33 = vadd.f32 %v5553_v17, %v907_v32  ;;  %4789 = vmatprep.mubr.f32.mxu1 %v1048_v29 }
  0xf9   : > { %v1051_v34 = vmax.f32 %v913_v31, 0.0  ;;  %4790 = vmatmul.mubr.f32.gmra.mrb[2].mxu1 %v1049_v28 }
  0xfa   : > { %v1050_v35 = vmax.f32 %v908_v33, 0.0  ;;  %v4717_v36 = vpop.f32.mrb[6].mxu0 }
  0xfb   : > { %v923_v37 = vadd.f32 %v4717_v36, %v5553_v17  ;;  %v917_v38 = vpop.f32.mrb[7].mxu0 }
  0xfc   : > { %4792 = vmatprep.mubr.f32.mxu1 %v1050_v35  ;;  %v918_v39 = vadd.f32 %v5553_v17, %v917_v38 }
  0xfd   : > { %4793 = vmatmul.mubr.f32.gmra.mrb[4].mxu1 %v1051_v34  ;;  %v1053_v40 = vmax.f32 %v923_v37, 0.0 }
  0xfe   : > { %v1052_v41 = vmax.f32 %v918_v39, 0.0  ;;  %v4720_v42 = vpop.f32.mrb[8].mxu0 }
  0xff   : > { %v933_v43 = vadd.f32 %v4720_v42, %v5553_v17  ;;  %v927_v44 = vpop.f32.mrb[9].mxu0 }
 0x100   : > { %4795 = vmatprep.mubr.f32.mxu1 %v1052_v41  ;;  %v928_v45 = vadd.f32 %v5553_v17, %v927_v44 }
 0x101   : > { %4796 = vmatmul.mubr.f32.gmra.mrb[6].mxu1 %v1053_v40  ;;  %v1055_v46 = vmax.f32 %v933_v43, 0.0 }
 0x102   : > { %v1054_v47 = vmax.f32 %v928_v45, 0.0  ;;  %v4723_v48 = vpop.f32.mrb[10].mxu0 }
 0x103   : > { %v943_v49 = vadd.f32 %v4723_v48, %v5553_v17  ;;  %v937_v50 = vpop.f32.mrb[11].mxu0 }
 0x104   : > { %4798 = vmatprep.mubr.f32.mxu1 %v1054_v47  ;;  %v938_v51 = vadd.f32 %v5553_v17, %v937_v50 }
 0x105   : > { %4799 = vmatmul.mubr.f32.gmra.mrb[8].mxu1 %v1055_v46  ;;  %v1057_v52 = vmax.f32 %v943_v49, 0.0 }
 0x106   : > { %v1056_v53 = vmax.f32 %v938_v51, 0.0  ;;  %v4726_v54 = vpop.f32.mrb[12].mxu0  ;;  %v1670_v51 = vld [vmem:[%s5591_s13] sm:$0xff] }
 0x107   : > { %v953_v55 = vadd.f32 %v4726_v54, %v5553_v17  ;;  %v947_v56 = vpop.f32.mrb[13].mxu0  ;;  %v1673_v54 = vld [vmem:[%s5591_s13 + $0x18] sm:$0xff] }
 0x108   : > { %4801 = vmatprep.mubr.f32.mxu1 %v1056_v53  ;;  %v948_v57 = vadd.f32 %v5553_v17, %v947_v56  ;;  %v1674_v56 = vld [vmem:[%s5591_s13 + $0x20] sm:$0xff] }
 0x109   : > { %4802 = vmatmul.mubr.f32.gmra.mrb[10].mxu1 %v1057_v52  ;;  %v1059_v58 = vmax.f32 %v953_v55, 0.0  ;;  %v1672_v52 = vld [vmem:[%s5591_s13 + $0x10] sm:$0xff] }
 0x10a   : > { %v1058_v59 = vmax.f32 %v948_v57, 0.0  ;;  %v4729_v60 = vpop.f32.mrb[14].mxu0  ;;  %v5062_v55 = vpack.c.bf16 %v1673_v54, %v1672_v52  ;;  %v1675_v57 = vld [vmem:[%s5591_s13 + $0x28] sm:$0xff] }
 0x10b   : > { %v963_v61 = vadd.f32 %v4729_v60, %v5553_v17  ;;  %v957_v62 = vpop.f32.mrb[15].mxu0  ;;  %v1677_v60 = vld [vmem:[%s5591_s13 + $0x38] sm:$0xff] }
 0x10c   : > { %4804 = vmatprep.mubr.f32.mxu1 %v1058_v59  ;;  %v958_v63 = vadd.f32 %v5553_v17, %v957_v62  ;;  %v1676_v59 = vld [vmem:[%s5591_s13 + $0x30] sm:$0xff]  ;;  %v1678_v62 = vld [vmem:[%s5591_s13 + $0x40] sm:$0xff] }
 0x10d   : > { %4805 = vmatmul.mubr.f32.gmra.mrb[12].mxu1 %v1059_v58  ;;  %v1061_v0 = vmax.f32 %v963_v61, 0.0  ;;  %v5066_v58 = vpack.c.bf16 %v1675_v57, %v1674_v56  ;;  %v5070_v61 = vpack.c.bf16 %v1677_v60, %v1676_v59 }
 0x10e   : > { %v1060_v1 = vmax.f32 %v958_v63, 0.0  ;;  %v4732_v2 = vpop.f32.mrb[16].mxu0  ;;  %v1679_v63 = vld [vmem:[%s5591_s13 + $0x48] sm:$0xff] }
 0x10f   : > { %v973_v3 = vadd.f32 %v4732_v2, %v5553_v17  ;;  %v967_v4 = vpop.f32.mrb[17].mxu0  ;;  %v1681_v2 = vld [vmem:[%s5591_s13 + $0x58] sm:$0xff] }
 0x110   : > { %4807 = vmatprep.mubr.f32.mxu1 %v1060_v1  ;;  %v968_v5 = vadd.f32 %v5553_v17, %v967_v4  ;;  %v1680_v1 = vld [vmem:[%s5591_s13 + $0x50] sm:$0xff]  ;;  %v1682_v4 = vld [vmem:[%s5591_s13 + $0x60] sm:$0xff] }
 0x111   : > { %4808 = vmatmul.mubr.f32.gmra.mrb[14].mxu1 %v1061_v0  ;;  %v1063_v6 = vmax.f32 %v973_v3, 0.0  ;;  %v5074_v0 = vpack.c.bf16 %v1679_v63, %v1678_v62  ;;  %v5078_v3 = vpack.c.bf16 %v1681_v2, %v1680_v1 }
 0x112   : > { %v1062_v7 = vmax.f32 %v968_v5, 0.0  ;;  %v4735_v8 = vpop.f32.mrb[18].mxu0  ;;  %v1683_v5 = vld [vmem:[%s5591_s13 + $0x68] sm:$0xff] }
 0x113   : > { %v983_v9 = vadd.f32 %v4735_v8, %v5553_v17  ;;  %v977_v10 = vpop.f32.mrb[19].mxu0  ;;  %v1685_v8 = vld [vmem:[%s5591_s13 + $0x78] sm:$0xff] }
 0x114   : > { %4810 = vmatprep.mubr.f32.mxu1 %v1062_v7  ;;  %v978_v11 = vadd.f32 %v5553_v17, %v977_v10  ;;  %v1684_v7 = vld [vmem:[%s5591_s13 + $0x70] sm:$0xff]  ;;  %v5613_v10 = vld [vmem:[%s627_s14] ss:$0 sm:$0xff]  ;;  %s5701_s14 = scalar_lea.vmem %s7692_s11, %s4468_s19 }
 0x115   : > { %4811 = vmatmul.mubr.f32.gmra.mrb[16].mxu1 %v1063_v6  ;;  %v1065_v12 = vmax.f32 %v983_v9, 0.0  ;;  %v5082_v6 = vpack.c.bf16 %v1683_v5, %v1682_v4  ;;  %v5086_v9 = vpack.c.bf16 %v1685_v8, %v1684_v7 }
 0x116   : > { %v1064_v13 = vmax.f32 %v978_v11, 0.0  ;;  %v4738_v14 = vpop.f32.mrb[20].mxu0 }
 0x117   : > { %v993_v15 = vadd.f32 %v4738_v14, %v5553_v17  ;;  %v987_v16 = vpop.f32.mrb[21].mxu0 }
 0x118   : > { %4813 = vmatprep.mubr.f32.mxu1 %v1064_v13  ;;  %v988_v18 = vadd.f32 %v5553_v17, %v987_v16 }
 0x119   : > { %4814 = vmatmul.mubr.f32.gmra.mrb[18].mxu1 %v1065_v12  ;;  %v1067_v19 = vmax.f32 %v993_v15, 0.0 }
 0x11a   : > { %v1066_v20 = vmax.f32 %v988_v18, 0.0  ;;  %v4741_v21 = vpop.f32.mrb[22].mxu0 }
 0x11b   : > { %v1003_v22 = vadd.f32 %v4741_v21, %v5553_v17  ;;  %v997_v23 = vpop.f32.mrb[23].mxu0 }
 0x11c   : > { %4816 = vmatprep.mubr.f32.mxu1 %v1066_v20  ;;  %v998_v24 = vadd.f32 %v5553_v17, %v997_v23 }
 0x11d   : > { %4817 = vmatmul.mubr.f32.gmra.mrb[20].mxu1 %v1067_v19  ;;  %v1069_v25 = vmax.f32 %v1003_v22, 0.0 }
 0x11e   : > { %v1068_v26 = vmax.f32 %v998_v24, 0.0  ;;  %v4744_v27 = vpop.f32.mrb[24].mxu0 }
 0x11f   : > { %v1013_v28 = vadd.f32 %v4744_v27, %v5553_v17  ;;  %v1007_v29 = vpop.f32.mrb[25].mxu0 }
 0x120   : > { %4819 = vmatprep.mubr.f32.mxu1 %v1068_v26  ;;  %v1008_v30 = vadd.f32 %v5553_v17, %v1007_v29 }
 0x121   : > { %4820 = vmatmul.mubr.f32.gmra.mrb[22].mxu1 %v1069_v25  ;;  %v1071_v31 = vmax.f32 %v1013_v28, 0.0 }
 0x122   : > { %v1070_v32 = vmax.f32 %v1008_v30, 0.0  ;;  %v4747_v33 = vpop.f32.mrb[26].mxu0 }
 0x123   : > { %v1023_v34 = vadd.f32 %v4747_v33, %v5553_v17  ;;  %v1017_v35 = vpop.f32.mrb[27].mxu0 }
 0x124   : > { %4822 = vmatprep.mubr.f32.mxu1 %v1070_v32  ;;  %v1018_v36 = vadd.f32 %v5553_v17, %v1017_v35 }
 0x125   : > { %4823 = vmatmul.mubr.f32.gmra.mrb[24].mxu1 %v1071_v31  ;;  %v1073_v37 = vmax.f32 %v1023_v34, 0.0 }
 0x126   : > { %v1072_v38 = vmax.f32 %v1018_v36, 0.0  ;;  %v4750_v39 = vpop.f32.mrb[28].mxu0 }
 0x127   : > { %v1033_v40 = vadd.f32 %v4750_v39, %v5553_v17  ;;  %v1027_v41 = vpop.f32.mrb[29].mxu0 }
 0x128   : > { %4825 = vmatprep.mubr.f32.mxu1 %v1072_v38  ;;  %v1028_v42 = vadd.f32 %v5553_v17, %v1027_v41 }
 0x129   : > { %4826 = vmatmul.mubr.f32.gmra.mrb[26].mxu1 %v1073_v37  ;;  %v1075_v43 = vmax.f32 %v1033_v40, 0.0 }
 0x12a   : > { %v1074_v44 = vmax.f32 %v1028_v42, 0.0  ;;  %v4753_v45 = vpop.f32.mrb[30].mxu0 }
 0x12b   : > { %v1043_v46 = vadd.f32 %v4753_v45, %v5553_v17  ;;  %v1037_v47 = vpop.f32.mrb[31].mxu0 }
 0x12c   : > { %4828 = vmatprep.mubr.f32.mxu1 %v1074_v44  ;;  %v1038_v48 = vadd.f32 %v5553_v17, %v1037_v47  ;;  %v1671_v17 = vld [vmem:[%s5591_s13 + $0x8] sm:$0xff]  ;;  %s635_s13 = scalar_lea.vmem %s7687_s6, %s5418_s28 }
 0x12d   : > { %4829 = vmatmul.mubr.f32.gmra.mrb[28].mxu1 %v1075_v43  ;;  %v1077_v49 = vmax.f32 %v1043_v46, 0.0  ;;  %v5058_v53 = vpack.c.bf16 %v1671_v17, %v1670_v51 }
 0x12e   : > { %v1076_v50 = vmax.f32 %v1038_v48, 0.0 }
 0x12f   : > { %5059 = vmatprep.subr.bf16.mxu1 %v5058_v53 }
 0x130   : > { %4831 = vmatprep.mubr.f32.mxu1 %v1076_v50  ;;  %5061 = vmatpush3.bf16.msra.mxu1 %v5058_v53 }
 0x131   : > { %4832 = vmatmul.mubr.f32.gmra.mrb[30].mxu1 %v1077_v49  ;;  %5063 = vmatprep.subr.bf16.mxu1 %v5062_v55 }
 0x134   : > { %5065 = vmatpush3.bf16.msra.mxu1 %v5062_v55 }
 0x135   : > { %5067 = vmatprep.subr.bf16.mxu1 %v5066_v58 }
 0x138   : > { %5069 = vmatpush3.bf16.msra.mxu1 %v5066_v58 }
 0x139   : > { %5071 = vmatprep.subr.bf16.mxu1 %v5070_v61 }
 0x13c   : > { %5073 = vmatpush3.bf16.msra.mxu1 %v5070_v61 }
 0x13d   : > { %5075 = vmatprep.subr.bf16.mxu1 %v5074_v0 }
 0x140   : > { %5077 = vmatpush3.bf16.msra.mxu1 %v5074_v0 }
 0x141   : > { %5079 = vmatprep.subr.bf16.mxu1 %v5078_v3 }
 0x144   : > { %5081 = vmatpush3.bf16.msra.mxu1 %v5078_v3 }
 0x145   : > { %5083 = vmatprep.subr.bf16.mxu1 %v5082_v6 }
 0x148   : > { %5085 = vmatpush3.bf16.msra.mxu1 %v5082_v6 }
 0x149   : > { %5087 = vmatprep.subr.bf16.mxu1 %v5086_v9 }
 0x14c   : > { %5089 = vmatpush3.bf16.msra.mxu1 %v5086_v9 }
 0x1c8   : > { %v4788_v11 = vpop.f32.mrb[0].mxu1 }
 0x1c9   : > { %v1173_v12 = vadd.f32 %v4788_v11, %v5613_v10  ;;  %v1167_v13 = vpop.f32.mrb[1].mxu1 }
 0x1ca   : > { %v1168_v14 = vadd.f32 %v5613_v10, %v1167_v13 }
 0x1cb   : > { %v1327_v18 = vmax.f32 %v1173_v12, 0.0 }
 0x1cc   : > { %v1326_v15 = vmax.f32 %v1168_v14, 0.0  ;;  %v4791_v16 = vpop.f32.mrb[2].mxu1 }
 0x1cd   : > { %v1183_v19 = vadd.f32 %v4791_v16, %v5613_v10  ;;  %v1177_v20 = vpop.f32.mrb[3].mxu1 }
 0x1ce   : > { %v1178_v21 = vadd.f32 %v5613_v10, %v1177_v20  ;;  %4866 = vmatprep.mubr.f32.mxu0 %v1326_v15 }
 0x1cf   : > { %v1329_v22 = vmax.f32 %v1183_v19, 0.0  ;;  %4867 = vmatmul.mubr.f32.vlgmr.msra.gmra.mrb[32].mxu0 %v1327_v18 }
 0x1d0   : > { %v1328_v23 = vmax.f32 %v1178_v21, 0.0  ;;  %v4794_v24 = vpop.f32.mrb[4].mxu1 }
 0x1d1   : > { %v1193_v25 = vadd.f32 %v4794_v24, %v5613_v10  ;;  %v1187_v26 = vpop.f32.mrb[5].mxu1 }
 0x1d2   : > { %v1188_v27 = vadd.f32 %v5613_v10, %v1187_v26  ;;  %4869 = vmatprep.mubr.f32.mxu0 %v1328_v23 }
 0x1d3   : > { %v1331_v28 = vmax.f32 %v1193_v25, 0.0  ;;  %4870 = vmatmul.mubr.f32.gmra.mrb[34].mxu0 %v1329_v22 }
 0x1d4   : > { %v1330_v29 = vmax.f32 %v1188_v27, 0.0  ;;  %v4797_v30 = vpop.f32.mrb[6].mxu1 }
 0x1d5   : > { %v1203_v31 = vadd.f32 %v4797_v30, %v5613_v10  ;;  %v1197_v32 = vpop.f32.mrb[7].mxu1 }
 0x1d6   : > { %4872 = vmatprep.mubr.f32.mxu0 %v1330_v29  ;;  %v1198_v33 = vadd.f32 %v5613_v10, %v1197_v32 }
 0x1d7   : > { %4873 = vmatmul.mubr.f32.gmra.mrb[36].mxu0 %v1331_v28  ;;  %v1333_v34 = vmax.f32 %v1203_v31, 0.0 }
 0x1d8   : > { %v1332_v35 = vmax.f32 %v1198_v33, 0.0  ;;  %v4800_v36 = vpop.f32.mrb[8].mxu1 }
 0x1d9   : > { %v1213_v37 = vadd.f32 %v4800_v36, %v5613_v10  ;;  %v1207_v38 = vpop.f32.mrb[9].mxu1 }
 0x1da   : > { %4875 = vmatprep.mubr.f32.mxu0 %v1332_v35  ;;  %v1208_v39 = vadd.f32 %v5613_v10, %v1207_v38 }
 0x1db   : > { %4876 = vmatmul.mubr.f32.gmra.mrb[38].mxu0 %v1333_v34  ;;  %v1335_v40 = vmax.f32 %v1213_v37, 0.0 }
 0x1dc   : > { %v1334_v41 = vmax.f32 %v1208_v39, 0.0  ;;  %v4803_v42 = vpop.f32.mrb[10].mxu1 }
 0x1dd   : > { %v1223_v43 = vadd.f32 %v4803_v42, %v5613_v10  ;;  %v1217_v44 = vpop.f32.mrb[11].mxu1 }
 0x1de   : > { %4878 = vmatprep.mubr.f32.mxu0 %v1334_v41  ;;  %v1218_v45 = vadd.f32 %v5613_v10, %v1217_v44 }
 0x1df   : > { %4879 = vmatmul.mubr.f32.gmra.mrb[40].mxu0 %v1335_v40  ;;  %v1337_v46 = vmax.f32 %v1223_v43, 0.0 }
 0x1e0   : > { %v1336_v47 = vmax.f32 %v1218_v45, 0.0  ;;  %v4806_v48 = vpop.f32.mrb[12].mxu1  ;;  %v1959_v45 = vld [vmem:[%s5651_s20 + $0x48] sm:$0xff] }
 0x1e1   : > { %v1233_v49 = vadd.f32 %v4806_v48, %v5613_v10  ;;  %v1227_v50 = vpop.f32.mrb[13].mxu1  ;;  %v1958_v48 = vld [vmem:[%s5651_s20 + $0x40] sm:$0xff] }
 0x1e2   : > { %4881 = vmatprep.mubr.f32.mxu0 %v1336_v47  ;;  %v1228_v51 = vadd.f32 %v5613_v10, %v1227_v50  ;;  %v1975_v50 = vld [vmem:[%s5651_s20 + $0xc8] sm:$0xff] }
 0x1e3   : > { %4882 = vmatmul.mubr.f32.gmra.mrb[42].mxu0 %v1337_v46  ;;  %v1339_v17 = vmax.f32 %v1233_v49, 0.0  ;;  %v1950_v46 = vld [vmem:[%s5651_s20] sm:$0xff]  ;;  %v1967_v49 = vld [vmem:[%s5651_s20 + $0x88] sm:$0xff] }
 0x1e4   : > { %v1338_v52 = vmax.f32 %v1228_v51, 0.0  ;;  %v4809_v53 = vpop.f32.mrb[14].mxu1  ;;  %v5092_v51 = vpack.c.bf16 %v1958_v48, %v1950_v46  ;;  %v1976_v48 = vld [vmem:[%s5651_s20 + $0xd0] sm:$0xff] }
 0x1e5   : > { %v1243_v54 = vadd.f32 %v4809_v53, %v5613_v10  ;;  %v1237_v55 = vpop.f32.mrb[15].mxu1  ;;  %v1974_v53 = vld [vmem:[%s5651_s20 + $0xc0] sm:$0xff] }
 0x1e6   : > { %4884 = vmatprep.mubr.f32.mxu0 %v1338_v52  ;;  %v1238_v56 = vadd.f32 %v5613_v10, %v1237_v55  ;;  %v1966_v52 = vld [vmem:[%s5651_s20 + $0x80] sm:$0xff]  ;;  %v1991_v55 = vld [vmem:[%s5651_s20 + $0x148] sm:$0xff] }
 0x1e7   : > { %4885 = vmatmul.mubr.f32.gmra.mrb[44].mxu0 %v1339_v17  ;;  %v1341_v57 = vmax.f32 %v1243_v54, 0.0  ;;  %v5094_v17 = vpack.c.bf16 %v1975_v50, %v1967_v49  ;;  %v1983_v54 = vld [vmem:[%s5651_s20 + $0x108] sm:$0xff]  ;;  %v1985_v50 = vld [vmem:[%s5651_s20 + $0x118] sm:$0xff] }
 0x1e8   : > { %v1340_v58 = vmax.f32 %v1238_v56, 0.0  ;;  %v4812_v59 = vpop.f32.mrb[16].mxu1  ;;  %v5096_v56 = vpack.c.bf16 %v1974_v53, %v1966_v52 }
 0x1e9   : > { %v1253_v60 = vadd.f32 %v4812_v59, %v5613_v10  ;;  %v1247_v61 = vpop.f32.mrb[17].mxu1  ;;  %v1990_v59 = vld [vmem:[%s5651_s20 + $0x140] sm:$0xff] }
 0x1ea   : > { %4887 = vmatprep.mubr.f32.mxu0 %v1340_v58  ;;  %v1248_v62 = vadd.f32 %v5613_v10, %v1247_v61  ;;  %v1982_v58 = vld [vmem:[%s5651_s20 + $0x100] sm:$0xff]  ;;  %v2007_v61 = vld [vmem:[%s5651_s20 + $0x1c8] sm:$0xff] }
 0x1eb   : > { %4888 = vmatmul.mubr.f32.gmra.mrb[46].mxu0 %v1341_v57  ;;  %v1343_v63 = vmax.f32 %v1253_v60, 0.0  ;;  %v5098_v57 = vpack.c.bf16 %v1991_v55, %v1983_v54  ;;  %v1999_v60 = vld [vmem:[%s5651_s20 + $0x188] sm:$0xff] }
 0x1ec   : > { %v1342_v0 = vmax.f32 %v1248_v62, 0.0  ;;  %v4815_v1 = vpop.f32.mrb[18].mxu1  ;;  %v1953_v62 = vld [vmem:[%s5651_s20 + $0x18] sm:$0xff] }
 0x1ed   : > { %v1263_v2 = vadd.f32 %v4815_v1, %v5613_v10  ;;  %v1257_v3 = vpop.f32.mrb[19].mxu1 }
 0x1ee   : > { %4890 = vmatprep.mubr.f32.mxu0 %v1342_v0  ;;  %v1258_v4 = vadd.f32 %v5613_v10, %v1257_v3  ;;  %v5100_v0 = vpack.c.bf16 %v1990_v59, %v1982_v58  ;;  %v1998_v3 = vld [vmem:[%s5651_s20 + $0x180] sm:$0xff]  ;;  %v1984_v58 = vld [vmem:[%s5651_s20 + $0x110] sm:$0xff] }
 0x1ef   : > { %4891 = vmatmul.mubr.f32.gmra.mrb[48].mxu0 %v1343_v63  ;;  %v1345_v5 = vmax.f32 %v1263_v2, 0.0  ;;  %v1961_v63 = vld [vmem:[%s5651_s20 + $0x58] sm:$0xff]  ;;  %v5102_v2 = vpack.c.bf16 %v2007_v61, %v1999_v60  ;;  %v1992_v59 = vld [vmem:[%s5651_s20 + $0x150] sm:$0xff] }
 0x1f0   : > { %v1344_v6 = vmax.f32 %v1258_v4, 0.0  ;;  %v4818_v7 = vpop.f32.mrb[20].mxu1  ;;  %v5122_v1 = vpack.c.bf16 %v1961_v63, %v1953_v62  ;;  %v2006_v4 = vld [vmem:[%s5651_s20 + $0x1c0] sm:$0xff]  ;;  %v2001_v61 = vld [vmem:[%s5651_s20 + $0x198] sm:$0xff] }
 0x1f1   : > { %v1273_v8 = vadd.f32 %v4818_v7, %v5613_v10  ;;  %v1267_v9 = vpop.f32.mrb[21].mxu1  ;;  %v5104_v7 = vpack.c.bf16 %v2006_v4, %v1998_v3  ;;  %v2009_v62 = vld [vmem:[%s5651_s20 + $0x1d8] sm:$0xff] }
 0x1f2   : > { %4893 = vmatprep.mubr.f32.mxu0 %v1344_v6  ;;  %v1268_v11 = vadd.f32 %v5613_v10, %v1267_v9  ;;  %v2023_v6 = vld [vmem:[%s5651_s20 + $0x248] sm:$0xff]  ;;  %5123 = vmatprep.subr.bf16.mxu1 %v5122_v1  ;;  %v2014_v9 = vld [vmem:[%s5651_s20 + $0x200] sm:$0xff] }
 0x1f3   : > { %4894 = vmatmul.mubr.f32.gmra.mrb[50].mxu0 %v1345_v5  ;;  %v1347_v12 = vmax.f32 %v1273_v8, 0.0  ;;  %v2015_v5 = vld [vmem:[%s5651_s20 + $0x208] sm:$0xff] }
 0x1f4   : > { %v1346_v13 = vmax.f32 %v1268_v11, 0.0  ;;  %v4821_v14 = vpop.f32.mrb[22].mxu1  ;;  %v5106_v8 = vpack.c.bf16 %v2023_v6, %v2015_v5  ;;  %v2022_v11 = vld [vmem:[%s5651_s20 + $0x240] sm:$0xff]  ;;  %v5134_v5 = vpack.c.bf16 %v2009_v62, %v2001_v61  ;;  %v2000_v6 = vld [vmem:[%s5651_s20 + $0x190] sm:$0xff] }
 0x1f5   : > { %v1283_v15 = vadd.f32 %v4821_v14, %v5613_v10  ;;  %v1277_v16 = vpop.f32.mrb[23].mxu1  ;;  %v5108_v14 = vpack.c.bf16 %v2022_v11, %v2014_v9  ;;  %v2017_v9 = vld [vmem:[%s5651_s20 + $0x218] sm:$0xff] }
 0x1f6   : > { %4896 = vmatprep.mubr.f32.mxu0 %v1346_v13  ;;  %v1278_v18 = vadd.f32 %v5613_v10, %v1277_v16  ;;  %v2039_v13 = vld [vmem:[%s5651_s20 + $0x2c8] sm:$0xff]  ;;  %v2030_v16 = vld [vmem:[%s5651_s20 + $0x280] sm:$0xff]  ;;  %v2025_v11 = vld [vmem:[%s5651_s20 + $0x258] sm:$0xff] }
 0x1f7   : > { %4897 = vmatmul.mubr.f32.gmra.mrb[52].mxu0 %v1347_v12  ;;  %v1349_v19 = vmax.f32 %v1283_v15, 0.0  ;;  %v2031_v12 = vld [vmem:[%s5651_s20 + $0x288] sm:$0xff] }
 0x1f8   : > { %v1348_v20 = vmax.f32 %v1278_v18, 0.0  ;;  %v4824_v21 = vpop.f32.mrb[24].mxu1  ;;  %v5110_v15 = vpack.c.bf16 %v2039_v13, %v2031_v12  ;;  %v2038_v18 = vld [vmem:[%s5651_s20 + $0x2c0] sm:$0xff] }
 0x1f9   : > { %v1293_v22 = vadd.f32 %v4824_v21, %v5613_v10  ;;  %v1287_v23 = vpop.f32.mrb[25].mxu1  ;;  %v5112_v21 = vpack.c.bf16 %v2038_v18, %v2030_v16 }
 0x1fa   : > { %4899 = vmatprep.mubr.f32.mxu0 %v1348_v20  ;;  %v1288_v24 = vadd.f32 %v5613_v10, %v1287_v23  ;;  %v2055_v20 = vld [vmem:[%s5651_s20 + $0x348] sm:$0xff]  ;;  %v2046_v23 = vld [vmem:[%s5651_s20 + $0x300] sm:$0xff] }
 0x1fb   : > { %4900 = vmatmul.mubr.f32.gmra.mrb[54].mxu0 %v1349_v19  ;;  %v1351_v25 = vmax.f32 %v1293_v22, 0.0  ;;  %v2047_v19 = vld [vmem:[%s5651_s20 + $0x308] sm:$0xff] }
 0x1fc   : > { %v1350_v26 = vmax.f32 %v1288_v24, 0.0  ;;  %v4827_v27 = vpop.f32.mrb[26].mxu1  ;;  %v5114_v22 = vpack.c.bf16 %v2055_v20, %v2047_v19  ;;  %v2054_v24 = vld [vmem:[%s5651_s20 + $0x340] sm:$0xff]  ;;  %v5138_v19 = vpack.c.bf16 %v2025_v11, %v2017_v9  ;;  %v2016_v20 = vld [vmem:[%s5651_s20 + $0x210] sm:$0xff] }
 0x1fd   : > { %v1303_v28 = vadd.f32 %v4827_v27, %v5613_v10  ;;  %v1297_v29 = vpop.f32.mrb[27].mxu1  ;;  %v5116_v27 = vpack.c.bf16 %v2054_v24, %v2046_v23  ;;  %v2033_v23 = vld [vmem:[%s5651_s20 + $0x298] sm:$0xff] }
 0x1fe   : > { %4902 = vmatprep.mubr.f32.mxu0 %v1350_v26  ;;  %v1298_v30 = vadd.f32 %v5613_v10, %v1297_v29  ;;  %v2071_v26 = vld [vmem:[%s5651_s20 + $0x3c8] sm:$0xff]  ;;  %v2062_v29 = vld [vmem:[%s5651_s20 + $0x380] sm:$0xff]  ;;  %v2041_v24 = vld [vmem:[%s5651_s20 + $0x2d8] sm:$0xff] }
 0x1ff   : > { %4903 = vmatmul.mubr.f32.gmra.mrb[56].mxu0 %v1351_v25  ;;  %v1353_v31 = vmax.f32 %v1303_v28, 0.0  ;;  %v2063_v25 = vld [vmem:[%s5651_s20 + $0x388] sm:$0xff] }
 0x200   : > { %v1352_v32 = vmax.f32 %v1298_v30, 0.0  ;;  %v4830_v33 = vpop.f32.mrb[28].mxu1  ;;  %v5118_v28 = vpack.c.bf16 %v2071_v26, %v2063_v25  ;;  %v2070_v30 = vld [vmem:[%s5651_s20 + $0x3c0] sm:$0xff] }
 0x201   : > { %v1313_v34 = vadd.f32 %v4830_v33, %v5613_v10  ;;  %v1307_v35 = vpop.f32.mrb[29].mxu1 }
 0x202   : > { %4905 = vmatprep.mubr.f32.mxu0 %v1352_v32  ;;  %v1308_v36 = vadd.f32 %v5613_v10, %v1307_v35  ;;  %v5691_v32 = vld [vmem:[%s635_s13] ss:$0 sm:$0xff]  ;;  %s4482_s13 = sshll.u32 %s8019_s21, 3 }
 0x203   : > { %4906 = vmatmul.mubr.f32.gmra.mrb[58].mxu0 %v1353_v31  ;;  %v1355_v37 = vmax.f32 %v1313_v34, 0.0  ;;  %v5120_v31 = vpack.c.bf16 %v2070_v30, %v2062_v29 }
 0x204   : > { %v1354_v38 = vmax.f32 %v1308_v36, 0.0  ;;  %v4833_v39 = vpop.f32.mrb[30].mxu1  ;;  %v1952_v36 = vld [vmem:[%s5651_s20 + $0x10] sm:$0xff] }
 0x205   : > { %v1323_v40 = vadd.f32 %v4833_v39, %v5613_v10  ;;  %v1317_v41 = vpop.f32.mrb[31].mxu1  ;;  %v1969_v39 = vld [vmem:[%s5651_s20 + $0x98] sm:$0xff] }
 0x206   : > { %4908 = vmatprep.mubr.f32.mxu0 %v1354_v38  ;;  %v1318_v42 = vadd.f32 %v5613_v10, %v1317_v41  ;;  %v1951_v10 = vld [vmem:[%s5651_s20 + $0x8] sm:$0xff] }
 0x207   : > { %4909 = vmatmul.mubr.f32.gmra.mrb[60].mxu0 %v1355_v37  ;;  %v1357_v43 = vmax.f32 %v1323_v40, 0.0  ;;  %v5090_v47 = vpack.c.bf16 %v1959_v45, %v1951_v10  ;;  %v1960_v37 = vld [vmem:[%s5651_s20 + $0x50] sm:$0xff]  ;;  %v1977_v40 = vld [vmem:[%s5651_s20 + $0xd8] sm:$0xff] }
 0x208   : > { %v1356_v44 = vmax.f32 %v1318_v42, 0.0  ;;  %v5126_v46 = vpack.c.bf16 %v1977_v40, %v1969_v39 }
 0x209   : > { %5091 = vmatprep.subr.bf16.mxu0 %v5090_v47  ;;  %v1968_v47 = vld [vmem:[%s5651_s20 + $0x90] sm:$0xff] }
 0x20a   : > { %4911 = vmatprep.mubr.f32.mxu0 %v1356_v44  ;;  %5093 = vmatpush1.bf16.msra.mxu0 %v5092_v51  ;;  %v5124_v44 = vpack.c.bf16 %v1960_v37, %v1952_v36  ;;  %v1993_v51 = vld [vmem:[%s5651_s20 + $0x158] sm:$0xff]  ;;  %v5128_v54 = vpack.c.bf16 %v1976_v48, %v1968_v47 }
 0x20b   : > { %4912 = vmatmul.mubr.f32.gmra.mrb[62].mxu0 %v1357_v43  ;;  %5095 = vmatprep.subr.bf16.mxu0 %v5094_v17  ;;  %v2049_v36 = vld [vmem:[%s5651_s20 + $0x318] sm:$0xff] }
 0x20c   : > { %v2057_v37 = vld [vmem:[%s5651_s20 + $0x358] sm:$0xff] }
 0x20e   : > { %5097 = vmatpush1.bf16.msra.mxu0 %v5096_v56 }
 0x20f   : > { %5099 = vmatprep.subr.bf16.mxu0 %v5098_v57  ;;  %v5130_v57 = vpack.c.bf16 %v1993_v51, %v1985_v50 }
 0x212   : > { %5101 = vmatpush1.bf16.msra.mxu0 %v5100_v0 }
 0x213   : > { %5103 = vmatprep.subr.bf16.mxu0 %v5102_v2  ;;  %v5132_v2 = vpack.c.bf16 %v1992_v59, %v1984_v58 }
 0x216   : > { %5105 = vmatpush1.bf16.msra.mxu0 %v5104_v7  ;;  %v2008_v7 = vld [vmem:[%s5651_s20 + $0x1d0] sm:$0xff] }
 0x217   : > { %5107 = vmatprep.subr.bf16.mxu0 %v5106_v8 }
 0x21a   : > { %5109 = vmatpush1.bf16.msra.mxu0 %v5108_v14 }
 0x21b   : > { %5111 = vmatprep.subr.bf16.mxu0 %v5110_v15  ;;  %v5136_v15 = vpack.c.bf16 %v2008_v7, %v2000_v6 }
 0x21e   : > { %5113 = vmatpush1.bf16.msra.mxu0 %v5112_v21  ;;  %v2024_v21 = vld [vmem:[%s5651_s20 + $0x250] sm:$0xff] }
 0x21f   : > { %5115 = vmatprep.subr.bf16.mxu0 %v5114_v22 }
 0x222   : > { %5117 = vmatpush1.bf16.msra.mxu0 %v5116_v27 }
 0x223   : > { %5119 = vmatprep.subr.bf16.mxu0 %v5118_v28  ;;  %v5140_v28 = vpack.c.bf16 %v2024_v21, %v2016_v20 }
 0x226   : > { %5121 = vmatpush1.bf16.msra.mxu0 %v5120_v31  ;;  %v5142_v31 = vpack.c.bf16 %v2041_v24, %v2033_v23 }
 0x2a2   : > { %v4868_v33 = vpop.f32.mrb[32].mxu0 }
 0x2a3   : > { %v1453_v34 = vadd.f32 %v4868_v33, %v5691_v32  ;;  %v1447_v35 = vpop.f32.mrb[33].mxu0  ;;  %v2032_v33 = vld [vmem:[%s5651_s20 + $0x290] sm:$0xff] }
 0x2a4   : > { %v1448_v38 = vadd.f32 %v5691_v32, %v1447_v35 }
 0x2a5   : > { %v1607_v41 = vmax.f32 %v1453_v34, 0.0  ;;  %v2040_v34 = vld [vmem:[%s5651_s20 + $0x2d0] sm:$0xff] }
 0x2a6   : > { %v1606_v42 = vmax.f32 %v1448_v38, 0.0  ;;  %v4871_v43 = vpop.f32.mrb[34].mxu0 }
 0x2a7   : > { %1639 = vst [vmem:[%s5701_s14 + $0x8] sm:$0xff] %v1607_v41  ;;  %v1463_v10 = vadd.f32 %v4871_v43, %v5691_v32  ;;  %v1457_v45 = vpop.f32.mrb[35].mxu0 }
 0x2a8   : > { %1638 = vst [vmem:[%s5701_s14] sm:$0xff] %v1606_v42  ;;  %v1458_v49 = vadd.f32 %v5691_v32, %v1457_v45  ;;  %4946 = vmatprep.mubr.f32.mxu1 %v1606_v42  ;;  %v2056_v45 = vld [vmem:[%s5651_s20 + $0x350] sm:$0xff] }
 0x2a9   : > { %v1609_v17 = vmax.f32 %v1463_v10, 0.0  ;;  %4947 = vmatmul.mubr.f32.vlgmr.msra.gmra.mrb[32].mxu1 %v1607_v41  ;;  %v5144_v41 = vpack.c.bf16 %v2040_v34, %v2032_v33  ;;  %v2048_v10 = vld [vmem:[%s5651_s20 + $0x310] sm:$0xff] }
 0x2aa   : > { %v1608_v52 = vmax.f32 %v1458_v49, 0.0  ;;  %v4874_v53 = vpop.f32.mrb[36].mxu0  ;;  %5125 = vmatpush1.bf16.msra.mxu1 %v5124_v44  ;;  %v5146_v44 = vpack.c.bf16 %v2057_v37, %v2049_v36  ;;  %v5148_v50 = vpack.c.bf16 %v2056_v45, %v2048_v10  ;;  %v2064_v10 = vld [vmem:[%s5651_s20 + $0x390] sm:$0xff] }
 0x2ab   : > { %1641 = vst [vmem:[%s5701_s14 + $0x18] sm:$0xff] %v1609_v17  ;;  %v1473_v55 = vadd.f32 %v4874_v53, %v5691_v32  ;;  %v1467_v56 = vpop.f32.mrb[37].mxu0  ;;  %5127 = vmatprep.subr.bf16.mxu1 %v5126_v46  ;;  %v2072_v45 = vld [vmem:[%s5651_s20 + $0x3d0] sm:$0xff] }
 0x2ac   : > { %1640 = vst [vmem:[%s5701_s14 + $0x10] sm:$0xff] %v1608_v52  ;;  %v1468_v60 = vadd.f32 %v5691_v32, %v1467_v56  ;;  %4949 = vmatprep.mubr.f32.mxu1 %v1608_v52 }
 0x2ad   : > { %v1611_v63 = vmax.f32 %v1473_v55, 0.0  ;;  %4950 = vmatmul.mubr.f32.gmra.mrb[34].mxu1 %v1609_v17 }
 0x2ae   : > { %v1610_v0 = vmax.f32 %v1468_v60, 0.0  ;;  %v4877_v1 = vpop.f32.mrb[38].mxu0  ;;  %5129 = vmatpush1.bf16.msra.mxu1 %v5128_v54 }
 0x2af   : > { %1643 = vst [vmem:[%s5701_s14 + $0x28] sm:$0xff] %v1611_v63  ;;  %v1483_v3 = vadd.f32 %v4877_v1, %v5691_v32  ;;  %v1477_v4 = vpop.f32.mrb[39].mxu0  ;;  %5131 = vmatprep.subr.bf16.mxu1 %v5130_v57 }
 0x2b0   : > { %1642 = vst [vmem:[%s5701_s14 + $0x20] sm:$0xff] %v1610_v0  ;;  %4952 = vmatprep.mubr.f32.mxu1 %v1610_v0  ;;  %v1478_v8 = vadd.f32 %v5691_v32, %v1477_v4 }
 0x2b1   : > { %4953 = vmatmul.mubr.f32.gmra.mrb[36].mxu1 %v1611_v63  ;;  %v1613_v12 = vmax.f32 %v1483_v3, 0.0 }
 0x2b2   : > { %v1612_v13 = vmax.f32 %v1478_v8, 0.0  ;;  %v4880_v14 = vpop.f32.mrb[40].mxu0  ;;  %5133 = vmatpush1.bf16.msra.mxu1 %v5132_v2 }
 0x2b3   : > { %1645 = vst [vmem:[%s5701_s14 + $0x38] sm:$0xff] %v1613_v12  ;;  %v1493_v16 = vadd.f32 %v4880_v14, %v5691_v32  ;;  %v1487_v18 = vpop.f32.mrb[41].mxu0  ;;  %5135 = vmatprep.subr.bf16.mxu1 %v5134_v5 }
 0x2b4   : > { %1644 = vst [vmem:[%s5701_s14 + $0x30] sm:$0xff] %v1612_v13  ;;  %4955 = vmatprep.mubr.f32.mxu1 %v1612_v13  ;;  %v1488_v22 = vadd.f32 %v5691_v32, %v1487_v18 }
 0x2b5   : > { %4956 = vmatmul.mubr.f32.gmra.mrb[38].mxu1 %v1613_v12  ;;  %v1615_v25 = vmax.f32 %v1493_v16, 0.0 }
 0x2b6   : > { %v1614_v26 = vmax.f32 %v1488_v22, 0.0  ;;  %v4883_v27 = vpop.f32.mrb[42].mxu0  ;;  %5137 = vmatpush1.bf16.msra.mxu1 %v5136_v15 }
 0x2b7   : > { %1647 = vst [vmem:[%s5701_s14 + $0x48] sm:$0xff] %v1615_v25  ;;  %v1503_v29 = vadd.f32 %v4883_v27, %v5691_v32  ;;  %v1497_v30 = vpop.f32.mrb[43].mxu0  ;;  %5139 = vmatprep.subr.bf16.mxu1 %v5138_v19 }
 0x2b8   : > { %1646 = vst [vmem:[%s5701_s14 + $0x40] sm:$0xff] %v1614_v26  ;;  %4958 = vmatprep.mubr.f32.mxu1 %v1614_v26  ;;  %v1498_v35 = vadd.f32 %v5691_v32, %v1497_v30 }
 0x2b9   : > { %4959 = vmatmul.mubr.f32.gmra.mrb[40].mxu1 %v1615_v25  ;;  %v1617_v38 = vmax.f32 %v1503_v29, 0.0 }
 0x2ba   : > { %v1616_v39 = vmax.f32 %v1498_v35, 0.0  ;;  %v4886_v40 = vpop.f32.mrb[44].mxu0  ;;  %5141 = vmatpush1.bf16.msra.mxu1 %v5140_v28 }
 0x2bb   : > { %1649 = vst [vmem:[%s5701_s14 + $0x58] sm:$0xff] %v1617_v38  ;;  %v1513_v42 = vadd.f32 %v4886_v40, %v5691_v32  ;;  %v1507_v43 = vpop.f32.mrb[45].mxu0  ;;  %5143 = vmatprep.subr.bf16.mxu1 %v5142_v31 }
 0x2bc   : > { %1648 = vst [vmem:[%s5701_s14 + $0x50] sm:$0xff] %v1616_v39  ;;  %4961 = vmatprep.mubr.f32.mxu1 %v1616_v39  ;;  %v1508_v46 = vadd.f32 %v5691_v32, %v1507_v43  ;;  %v2073_v43 = vld [vmem:[%s5651_s20 + $0x3d8] sm:$0xff] }
 0x2bd   : > { %4962 = vmatmul.mubr.f32.gmra.mrb[42].mxu1 %v1617_v38  ;;  %v1619_v47 = vmax.f32 %v1513_v42, 0.0  ;;  %v2065_v42 = vld [vmem:[%s5651_s20 + $0x398] sm:$0xff] }
 0x2be   : > { %v1618_v48 = vmax.f32 %v1508_v46, 0.0  ;;  %v4889_v49 = vpop.f32.mrb[46].mxu0  ;;  %5145 = vmatpush1.bf16.msra.mxu1 %v5144_v41  ;;  %v5152_v46 = vpack.c.bf16 %v2072_v45, %v2064_v10  ;;  %v2027_v10 = vld [vmem:[%s5651_s20 + $0x268] sm:$0xff]  ;;  %v2004_v45 = vld [vmem:[%s5651_s20 + $0x1b0] sm:$0xff] }
 0x2bf   : > { %1651 = vst [vmem:[%s5701_s14 + $0x68] sm:$0xff] %v1619_v47  ;;  %v1523_v51 = vadd.f32 %v4889_v49, %v5691_v32  ;;  %v1517_v17 = vpop.f32.mrb[47].mxu0  ;;  %5147 = vmatprep.subr.bf16.mxu1 %v5146_v44  ;;  %v5150_v44 = vpack.c.bf16 %v2073_v43, %v2065_v42  ;;  %v2005_v43 = vld [vmem:[%s5651_s20 + $0x1b8] sm:$0xff] }
 0x2c0   : > { %1650 = vst [vmem:[%s5701_s14 + $0x60] sm:$0xff] %v1618_v48  ;;  %4964 = vmatprep.mubr.f32.mxu1 %v1618_v48  ;;  %v1518_v52 = vadd.f32 %v5691_v32, %v1517_v17  ;;  %v1963_v48 = vld [vmem:[%s5651_s20 + $0x68] sm:$0xff] }
 0x2c1   : > { %4965 = vmatmul.mubr.f32.gmra.mrb[44].mxu1 %v1619_v47  ;;  %v1621_v53 = vmax.f32 %v1523_v51, 0.0  ;;  %v1955_v47 = vld [vmem:[%s5651_s20 + $0x28] sm:$0xff]  ;;  %v1965_v51 = vld [vmem:[%s5651_s20 + $0x78] sm:$0xff] }
 0x2c2   : > { %v1620_v54 = vmax.f32 %v1518_v52, 0.0  ;;  %v4892_v55 = vpop.f32.mrb[48].mxu0  ;;  %5149 = vmatpush1.bf16.msra.mxu1 %v5148_v50  ;;  %v5154_v49 = vpack.c.bf16 %v1963_v48, %v1955_v47  ;;  %v1957_v50 = vld [vmem:[%s5651_s20 + $0x38] sm:$0xff]  ;;  %v5807_v52 = vld [vmem:[%s643_s15] ss:$0 sm:$0xff] }
 0x2c3   : > { %1653 = vst [vmem:[%s5701_s14 + $0x78] sm:$0xff] %v1621_v53  ;;  %v1533_v56 = vadd.f32 %v4892_v55, %v5691_v32  ;;  %v1527_v57 = vpop.f32.mrb[49].mxu0  ;;  %5151 = vmatprep.subr.bf16.mxu1 %v5150_v44  ;;  %v5800_v17 = vpack.c.bf16 %v1965_v51, %v1957_v50  ;;  %v1962_v55 = vld [vmem:[%s5651_s20 + $0x60] sm:$0xff]  ;;  %v2013_v44 = vld [vmem:[%s5651_s20 + $0x1f8] sm:$0xff] }
 0x2c4   : > { %1652 = vst [vmem:[%s5701_s14 + $0x70] sm:$0xff] %v1620_v54  ;;  %4967 = vmatprep.mubr.f32.mxu1 %v1620_v54  ;;  %v1528_v58 = vadd.f32 %v5691_v32, %v1527_v57  ;;  %5155 = vmatprep.subr.bf16.mxu0 %v5154_v49  ;;  %v1954_v54 = vld [vmem:[%s5651_s20 + $0x20] sm:$0xff]  ;;  %v1971_v57 = vld [vmem:[%s5651_s20 + $0xa8] sm:$0xff] }
 0x2c5   : > { %4968 = vmatmul.mubr.f32.gmra.mrb[46].mxu1 %v1621_v53  ;;  %v1623_v59 = vmax.f32 %v1533_v56, 0.0  ;;  %v2018_v51 = vld [vmem:[%s5651_s20 + $0x220] sm:$0xff] }
 0x2c6   : > { %v1622_v60 = vmax.f32 %v1528_v58, 0.0  ;;  %v4895_v61 = vpop.f32.mrb[50].mxu0  ;;  %5153 = vmatpush1.bf16.msra.mxu1 %v5152_v46  ;;  %v1979_v58 = vld [vmem:[%s5651_s20 + $0xe8] sm:$0xff]  ;;  %v2012_v46 = vld [vmem:[%s5651_s20 + $0x1f0] sm:$0xff] }
 0x2c7   : > { %1655 = vst [vmem:[%s5701_s14 + $0x88] sm:$0xff] %v1623_v59  ;;  %v1543_v62 = vadd.f32 %v4895_v61, %v5691_v32  ;;  %v1537_v63 = vpop.f32.mrb[51].mxu0  ;;  %5218 = vmatprep.subr.bf16.mxu1 %v5800_v17  ;;  %v1964_v61 = vld [vmem:[%s5651_s20 + $0x70] sm:$0xff] }
 0x2c8   : > { %1654 = vst [vmem:[%s5701_s14 + $0x80] sm:$0xff] %v1622_v60  ;;  %4970 = vmatprep.mubr.f32.mxu1 %v1622_v60  ;;  %v1538_v0 = vadd.f32 %v5691_v32, %v1537_v63  ;;  %v1956_v60 = vld [vmem:[%s5651_s20 + $0x30] sm:$0xff] }
 0x2c9   : > { %4971 = vmatmul.mubr.f32.gmra.mrb[48].mxu1 %v1623_v59  ;;  %v1625_v1 = vmax.f32 %v1543_v62, 0.0  ;;  %v5156_v62 = vpack.c.bf16 %v1962_v55, %v1954_v54  ;;  %v5888_v54 = vpack.c.bf16 %v2013_v44, %v2005_v43  ;;  %v2060_v43 = vld [vmem:[%s5651_s20 + $0x370] sm:$0xff] }
 0x2ca   : > { %v1624_v2 = vmax.f32 %v1538_v0, 0.0  ;;  %v4898_v3 = vpop.f32.mrb[52].mxu0 }
 0x2cb   : > { %1657 = vst [vmem:[%s5701_s14 + $0x98] sm:$0xff] %v1625_v1  ;;  %v1553_v4 = vadd.f32 %v4898_v3, %v5691_v32  ;;  %v1547_v5 = vpop.f32.mrb[53].mxu0  ;;  %v1970_v3 = vld [vmem:[%s5651_s20 + $0xa0] sm:$0xff] }
 0x2cc   : > { %1656 = vst [vmem:[%s5701_s14 + $0x90] sm:$0xff] %v1624_v2  ;;  %4973 = vmatprep.mubr.f32.mxu1 %v1624_v2  ;;  %v1548_v6 = vadd.f32 %v5691_v32, %v1547_v5  ;;  %v5158_v2 = vpack.c.bf16 %v1979_v58, %v1971_v57  ;;  %v2035_v57 = vld [vmem:[%s5651_s20 + $0x2a8] sm:$0xff]  ;;  %v5894_v58 = vpack.c.bf16 %v2012_v46, %v2004_v45 }
 0x2cd   : > { %4974 = vmatmul.mubr.f32.gmra.mrb[50].mxu1 %v1625_v1  ;;  %v1627_v7 = vmax.f32 %v1553_v4, 0.0  ;;  %v1978_v4 = vld [vmem:[%s5651_s20 + $0xe0] sm:$0xff] }
 0x2ce   : > { %v1626_v8 = vmax.f32 %v1548_v6, 0.0  ;;  %v4901_v9 = vpop.f32.mrb[54].mxu0  ;;  %v1987_v6 = vld [vmem:[%s5651_s20 + $0x128] sm:$0xff] }
 0x2cf   : > { %1659 = vst [vmem:[%s5701_s14 + $0xa8] sm:$0xff] %v1627_v7  ;;  %v1563_v11 = vadd.f32 %v4901_v9, %v5691_v32  ;;  %v1557_v12 = vpop.f32.mrb[55].mxu0  ;;  %v1981_v9 = vld [vmem:[%s5651_s20 + $0xf8] sm:$0xff] }
 0x2d0   : > { %1658 = vst [vmem:[%s5701_s14 + $0xa0] sm:$0xff] %v1626_v8  ;;  %4976 = vmatprep.mubr.f32.mxu1 %v1626_v8  ;;  %v1558_v13 = vadd.f32 %v5691_v32, %v1557_v12  ;;  %v1973_v8 = vld [vmem:[%s5651_s20 + $0xb8] sm:$0xff]  ;;  %v1972_v12 = vld [vmem:[%s5651_s20 + $0xb0] sm:$0xff] }
 0x2d1   : > { %4977 = vmatmul.mubr.f32.gmra.mrb[52].mxu1 %v1627_v7  ;;  %v1629_v14 = vmax.f32 %v1563_v11, 0.0  ;;  %v5822_v7 = vpack.c.bf16 %v1964_v61, %v1956_v60  ;;  %v1995_v11 = vld [vmem:[%s5651_s20 + $0x168] sm:$0xff]  ;;  %v2029_v60 = vld [vmem:[%s5651_s20 + $0x278] sm:$0xff] }
 0x2d2   : > { %v1628_v15 = vmax.f32 %v1558_v13, 0.0  ;;  %v4904_v16 = vpop.f32.mrb[56].mxu0  ;;  %v1980_v13 = vld [vmem:[%s5651_s20 + $0xf0] sm:$0xff]  ;;  %v2043_v61 = vld [vmem:[%s5651_s20 + $0x2e8] sm:$0xff] }
 0x2d3   : > { %1661 = vst [vmem:[%s5701_s14 + $0xb8] sm:$0xff] %v1629_v14  ;;  %v1573_v18 = vadd.f32 %v4904_v16, %v5691_v32  ;;  %v1567_v19 = vpop.f32.mrb[57].mxu0 }
 0x2d4   : > { %1660 = vst [vmem:[%s5701_s14 + $0xb0] sm:$0xff] %v1628_v15  ;;  %4979 = vmatprep.mubr.f32.mxu1 %v1628_v15  ;;  %v1568_v20 = vadd.f32 %v5691_v32, %v1567_v19  ;;  %v1986_v19 = vld [vmem:[%s5651_s20 + $0x120] sm:$0xff] }
 0x2d5   : > { %4980 = vmatmul.mubr.f32.gmra.mrb[54].mxu1 %v1629_v14  ;;  %v1631_v21 = vmax.f32 %v1573_v18, 0.0  ;;  %v5160_v18 = vpack.c.bf16 %v1978_v4, %v1970_v3 }
 0x2d6   : > { %v1630_v22 = vmax.f32 %v1568_v20, 0.0  ;;  %v4907_v23 = vpop.f32.mrb[58].mxu0  ;;  %v1994_v20 = vld [vmem:[%s5651_s20 + $0x160] sm:$0xff] }
 0x2d7   : > { %1663 = vst [vmem:[%s5701_s14 + $0xc8] sm:$0xff] %v1631_v21  ;;  %v1583_v24 = vadd.f32 %v4907_v23, %v5691_v32  ;;  %v1577_v25 = vpop.f32.mrb[59].mxu0  ;;  %v5162_v23 = vpack.c.bf16 %v1995_v11, %v1987_v6  ;;  %v2042_v6 = vld [vmem:[%s5651_s20 + $0x2e0] sm:$0xff]  ;;  %v5174_v11 = vpack.c.bf16 %v2043_v61, %v2035_v57  ;;  %v2069_v57 = vld [vmem:[%s5651_s20 + $0x3b8] sm:$0xff]  ;;  %v2076_v61 = vld [vmem:[%s5651_s20 + $0x3f0] sm:$0xff] }
 0x2d8   : > { %1662 = vst [vmem:[%s5701_s14 + $0xc0] sm:$0xff] %v1630_v22  ;;  %4982 = vmatprep.mubr.f32.mxu1 %v1630_v22  ;;  %v1578_v26 = vadd.f32 %v5691_v32, %v1577_v25  ;;  %v5844_v25 = vpack.c.bf16 %v1980_v13, %v1972_v12  ;;  %v2051_v12 = vld [vmem:[%s5651_s20 + $0x328] sm:$0xff] }
 0x2d9   : > { %4983 = vmatmul.mubr.f32.gmra.mrb[56].mxu1 %v1631_v21  ;;  %v1633_v27 = vmax.f32 %v1583_v24, 0.0  ;;  %v5840_v21 = vpack.c.bf16 %v1981_v9, %v1973_v8  ;;  %v2003_v24 = vld [vmem:[%s5651_s20 + $0x1a8] sm:$0xff] }
 0x2da   : > { %v1632_v28 = vmax.f32 %v1578_v26, 0.0  ;;  %v4910_v29 = vpop.f32.mrb[60].mxu0  ;;  %v1989_v26 = vld [vmem:[%s5651_s20 + $0x138] sm:$0xff] }
 0x2db   : > { %1665 = vst [vmem:[%s5701_s14 + $0xd8] sm:$0xff] %v1633_v27  ;;  %v1593_v30 = vadd.f32 %v4910_v29, %v5691_v32  ;;  %v1587_v31 = vpop.f32.mrb[61].mxu0  ;;  %v1988_v29 = vld [vmem:[%s5651_s20 + $0x130] sm:$0xff] }
 0x2dc   : > { %1664 = vst [vmem:[%s5701_s14 + $0xd0] sm:$0xff] %v1632_v28  ;;  %4985 = vmatprep.mubr.f32.mxu1 %v1632_v28  ;;  %v1588_v33 = vadd.f32 %v5691_v32, %v1587_v31  ;;  %v2011_v28 = vld [vmem:[%s5651_s20 + $0x1e8] sm:$0xff] }
 0x2dd   : > { %4986 = vmatmul.mubr.f32.gmra.mrb[58].mxu1 %v1633_v27  ;;  %v1635_v34 = vmax.f32 %v1593_v30, 0.0  ;;  %v1997_v27 = vld [vmem:[%s5651_s20 + $0x178] sm:$0xff]  ;;  %v1996_v30 = vld [vmem:[%s5651_s20 + $0x170] sm:$0xff] }
 0x2de   : > { %v1634_v35 = vmax.f32 %v1588_v33, 0.0  ;;  %v4913_v36 = vpop.f32.mrb[62].mxu0  ;;  %v5869_v42 = vpack.c.bf16 %v1996_v30, %v1988_v29 }
 0x2df   : > { %1667 = vst [vmem:[%s5701_s14 + $0xe8] sm:$0xff] %v1635_v34  ;;  %v1603_v37 = vadd.f32 %v4913_v36, %v5691_v32  ;;  %v1597_v38 = vpop.f32.mrb[63].mxu0  ;;  %v2002_v36 = vld [vmem:[%s5651_s20 + $0x1a0] sm:$0xff] }
 0x2e0   : > { %1666 = vst [vmem:[%s5701_s14 + $0xe0] sm:$0xff] %v1634_v35  ;;  %4988 = vmatprep.mubr.f32.mxu1 %v1634_v35  ;;  %v1598_v39 = vadd.f32 %v5691_v32, %v1597_v38  ;;  %v7694_v32 = vmov 0.0   ;;  %v5164_v35 = vpack.c.bf16 %v1994_v20, %v1986_v19  ;;  %v5863_v38 = vpack.c.bf16 %v1997_v27, %v1989_v26  ;;  %v2036_v19 = vld [vmem:[%s5651_s20 + $0x2b0] sm:$0xff]  ;;  %v2050_v27 = vld [vmem:[%s5651_s20 + $0x320] sm:$0xff] }
 0x2e1   : > { %4989 = vmatmul.mubr.f32.gmra.mrb[60].mxu1 %v1635_v34  ;;  %v1637_v40 = vmax.f32 %v1603_v37, 0.0  ;;  %2184 = vmatprep.mubr.f32.mxu0 %v7694_v32  ;;  %v2010_v37 = vld [vmem:[%s5651_s20 + $0x1e0] sm:$0xff]  ;;  %v2044_v20 = vld [vmem:[%s5651_s20 + $0x2f0] sm:$0xff] }
 0x2e2   : > { %v1636_v41 = vmax.f32 %v1598_v39, 0.0  ;;  %v5168_v50 = vpack.c.bf16 %v2010_v37, %v2002_v36  ;;  %v5946_v36 = vpack.c.bf16 %v2044_v20, %v2036_v19  ;;  %v2053_v37 = vld [vmem:[%s5651_s20 + $0x338] sm:$0xff] }
 0x2e3   : > { %1669 = vst [vmem:[%s5701_s14 + $0xf8] sm:$0xff] %v1637_v40 }
 0x2e4   : > { %1668 = vst [vmem:[%s5701_s14 + $0xf0] sm:$0xff] %v1636_v41  ;;  %4991 = vmatprep.mubr.f32.mxu1 %v1636_v41  ;;  %v2019_v41 = vld [vmem:[%s5651_s20 + $0x228] sm:$0xff]  ;;  %s673_s14 = sadd.s32 %s4483_s18, %s4482_s13 }
 0x2e5   : > { %4992 = vmatmul.mubr.f32.gmra.mrb[62].mxu1 %v1637_v40  ;;  %v5166_v40 = vpack.c.bf16 %v2011_v28, %v2003_v24  ;;  %v2058_v28 = vld [vmem:[%s5651_s20 + $0x360] sm:$0xff]  ;;  %s674_s21 = scalar_lea.vmem %s7693_s12, %s673_s14 }
 0x2e6   : > { %2441 = vmatprep.mubr.f32.mxu1 %v7694_v32  ;;  %v5180_v46 = vpack.c.bf16 %v2058_v28, %v2050_v27 }
 0x37c   : > { %v4948_v53 = vpop.f32.mrb[32].mxu1 }
 0x37d   : > { %v1759_v56 = vpop.f32.mrb[33].mxu1  ;;  %v1765_v63 = vadd.f32 %v4948_v53, %v5807_v52  ;;  %v2026_v53 = vld [vmem:[%s5651_s20 + $0x260] sm:$0xff] }
 0x37e   : > { %v1760_v59 = vadd.f32 %v5807_v52, %v1759_v56  ;;  %v5170_v56 = vpack.c.bf16 %v2027_v10, %v2019_v41  ;;  %v5172_v4 = vpack.c.bf16 %v2026_v53, %v2018_v51  ;;  %v2052_v41 = vld [vmem:[%s5651_s20 + $0x330] sm:$0xff] }
 0x37f   : > { %v5832_v14 = vmax.f32 %v1765_v63, 0.0  ;;  %v2028_v63 = vld [vmem:[%s5651_s20 + $0x270] sm:$0xff] }
 0x380   : > { %v5817_v0 = vmax.f32 %v1760_v59, 0.0  ;;  %v4951_v1 = vpop.f32.mrb[34].mxu1  ;;  %v2021_v59 = vld [vmem:[%s5651_s20 + $0x238] sm:$0xff] }
 0x381   : > { %v1769_v5 = vpop.f32.mrb[35].mxu1  ;;  %v1775_v31 = vadd.f32 %v4951_v1, %v5807_v52  ;;  %v5914_v8 = vpack.c.bf16 %v2029_v60, %v2021_v59  ;;  %v2077_v59 = vld [vmem:[%s5651_s20 + $0x3f8] sm:$0xff]  ;;  %v2068_v60 = vld [vmem:[%s5651_s20 + $0x3b0] sm:$0xff] }
 0x382   : > { %2185 = vmatmul.mubr.f32.vlgmr.msra.gmra.mrb[64].mxu0 %v5817_v0  ;;  %2442 = vmatmul.mubr.f32.vlgmr.msra.gmra.mrb[64].mxu1 %v5817_v0  ;;  %v1770_v15 = vadd.f32 %v5807_v52, %v1769_v5  ;;  %v2034_v5 = vld [vmem:[%s5651_s20 + $0x2a0] sm:$0xff] }
 0x383   : > { %5157 = vmatpush1.bf16.msra.mxu0 %v5156_v62  ;;  %2190 = vmatprep.mubr.f32.mxu0 %v7694_v32  ;;  %v5880_v47 = vmax.f32 %v1775_v31, 0.0  ;;  %v2020_v62 = vld [vmem:[%s5651_s20 + $0x230] sm:$0xff]  ;;  %v5176_v26 = vpack.c.bf16 %v2042_v6, %v2034_v5  ;;  %v5986_v5 = vpack.c.bf16 %v2077_v59, %v2069_v57 }
 0x384   : > { %v5835_v16 = vpop.f32.mrb[36].mxu1  ;;  %2447 = vmatprep.mubr.f32.mxu1 %v7694_v32  ;;  %5159 = vmatprep.subr.bf16.mxu0 %v5158_v2  ;;  %v5856_v33 = vmax.f32 %v1770_v15, 0.0  ;;  %v5920_v13 = vpack.c.bf16 %v2028_v63, %v2020_v62  ;;  %v2037_v15 = vld [vmem:[%s5651_s20 + $0x2b8] sm:$0xff] }
 0x385   : > { %v1779_v22 = vpop.f32.mrb[37].mxu1  ;;  %5226 = vmatpush1.bf16.msra.mxu1 %v5822_v7  ;;  %v1785_v1 = vadd.f32 %v5835_v16, %v5807_v52  ;;  %v2045_v16 = vld [vmem:[%s5651_s20 + $0x2f8] sm:$0xff] }
 0x386   : > { %2191 = vmatmul.mubr.f32.gmra.mrb[66].mxu0 %v5832_v14  ;;  %2448 = vmatmul.mubr.f32.gmra.mrb[66].mxu1 %v5832_v14  ;;  %v1780_v48 = vadd.f32 %v5807_v52, %v1779_v22  ;;  %v5940_v29 = vpack.c.bf16 %v2045_v16, %v2037_v15 }
 0x387   : > { %2196 = vmatprep.mubr.f32.mxu0 %v7694_v32  ;;  %2453 = vmatprep.mubr.f32.mxu1 %v7694_v32  ;;  %v5931_v22 = vmax.f32 %v1785_v1, 0.0 }
 0x388   : > { %v5858_v34 = vpop.f32.mrb[38].mxu1  ;;  %5161 = vmatpush1.bf16.msra.mxu0 %v5160_v18  ;;  %5219 = vmatprep.subr.bf16.mxu1 %v5840_v21  ;;  %v5907_v2 = vmax.f32 %v1780_v48, 0.0  ;;  %v2059_v18 = vld [vmem:[%s5651_s20 + $0x368] sm:$0xff]  ;;  %v2066_v48 = vld [vmem:[%s5651_s20 + $0x3a0] sm:$0xff] }
 0x389   : > { %v5865_v39 = vpop.f32.mrb[39].mxu1  ;;  %5163 = vmatprep.subr.bf16.mxu0 %v5162_v23  ;;  %5227 = vmatpush1.bf16.msra.mxu1 %v5844_v25  ;;  %v5178_v31 = vpack.c.bf16 %v2059_v18, %v2051_v12  ;;  %v1795_v44 = vadd.f32 %v5858_v34, %v5807_v52  ;;  %v5971_v34 = vpack.c.bf16 %v2060_v43, %v2052_v41 }
 0x38a   : > { %2197 = vmatmul.mubr.f32.gmra.mrb[68].mxu0 %v5856_v33  ;;  %2454 = vmatmul.mubr.f32.gmra.mrb[68].mxu1 %v5856_v33  ;;  %v1790_v23 = vadd.f32 %v5807_v52, %v5865_v39  ;;  %v2061_v39 = vld [vmem:[%s5651_s20 + $0x378] sm:$0xff]  ;;  %v5992_v12 = vpack.c.bf16 %v2076_v61, %v2068_v60 }
 0x38b   : > { %2202 = vmatprep.mubr.f32.mxu0 %v7694_v32  ;;  %2459 = vmatprep.mubr.f32.mxu1 %v7694_v32  ;;  %v5981_v62 = vmax.f32 %v1795_v44, 0.0 }
 0x38c   : > { %v5883_v49 = vpop.f32.mrb[40].mxu1  ;;  %5165 = vmatpush1.bf16.msra.mxu0 %v5164_v35  ;;  %5220 = vmatprep.subr.bf16.mxu1 %v5863_v38  ;;  %v2067_v35 = vld [vmem:[%s5651_s20 + $0x3a8] sm:$0xff]  ;;  %v5959_v10 = vmax.f32 %v1790_v23, 0.0 }
 0x38d   : > { %v5890_v55 = vpop.f32.mrb[41].mxu1  ;;  %5167 = vmatprep.subr.bf16.mxu0 %v5166_v40  ;;  %5228 = vmatpush1.bf16.msra.mxu1 %v5869_v42  ;;  %v2075_v40 = vld [vmem:[%s5651_s20 + $0x3e8] sm:$0xff]  ;;  %v1805_v15 = vadd.f32 %v5883_v49, %v5807_v52 }
 0x38e   : > { %2203 = vmatmul.mubr.f32.gmra.mrb[70].mxu0 %v5880_v47  ;;  %2460 = vmatmul.mubr.f32.gmra.mrb[70].mxu1 %v5880_v47  ;;  %v5182_v53 = vpack.c.bf16 %v2075_v40, %v2067_v35  ;;  %v1800_v63 = vadd.f32 %v5807_v52, %v5890_v55 }
 0x38f   : > { %2208 = vmatprep.mubr.f32.mxu0 %v7694_v32  ;;  %2465 = vmatprep.mubr.f32.mxu1 %v7694_v32  ;;  %v6018_v23 = vmax.f32 %v1805_v15, 0.0 }
 0x390   : > { %v5909_v3 = vpop.f32.mrb[42].mxu1  ;;  %5169 = vmatpush1.bf16.msra.mxu0 %v5168_v50  ;;  %5221 = vmatprep.subr.bf16.mxu1 %v5888_v54  ;;  %v5965_v50 = vpack.c.bf16 %v2061_v39, %v2053_v37  ;;  %v6003_v16 = vmax.f32 %v1800_v63, 0.0 }
 0x391   : > { %v5916_v9 = vpop.f32.mrb[43].mxu1  ;;  %5171 = vmatprep.subr.bf16.mxu0 %v5170_v56  ;;  %5229 = vmatpush1.bf16.msra.mxu1 %v5894_v58  ;;  %v2074_v56 = vld [vmem:[%s5651_s20 + $0x3e0] sm:$0xff]  ;;  %v1815_v35 = vadd.f32 %v5909_v3, %v5807_v52 }
 0x392   : > { %2209 = vmatmul.mubr.f32.gmra.mrb[72].mxu0 %v5907_v2  ;;  %2466 = vmatmul.mubr.f32.gmra.mrb[72].mxu1 %v5907_v2 }
 0x393   : > { %2214 = vmatprep.mubr.f32.mxu0 %v7694_v32  ;;  %2471 = vmatprep.mubr.f32.mxu1 %v7694_v32  ;;  %v6046_v43 = vmax.f32 %v1815_v35, 0.0 }
 0x394   : > { %v5935_v24 = vpop.f32.mrb[44].mxu1  ;;  %5173 = vmatpush1.bf16.msra.mxu0 %v5172_v4  ;;  %5222 = vmatprep.subr.bf16.mxu1 %v5914_v8  ;;  %v5184_v4 = vpack.c.bf16 %v2074_v56, %v2066_v48 }
 0x395   : > { %v5942_v30 = vpop.f32.mrb[45].mxu1  ;;  %5175 = vmatprep.subr.bf16.mxu0 %v5174_v11  ;;  %5230 = vmatpush1.bf16.msra.mxu1 %v5920_v13  ;;  %v1825_v56 = vadd.f32 %v5935_v24, %v5807_v52 }
 0x396   : > { %2215 = vmatmul.mubr.f32.gmra.mrb[74].mxu0 %v5931_v22  ;;  %2472 = vmatmul.mubr.f32.gmra.mrb[74].mxu1 %v5931_v22  ;;  %v1820_v3 = vadd.f32 %v5807_v52, %v5942_v30 }
 0x397   : > { %2220 = vmatprep.mubr.f32.mxu0 %v7694_v32  ;;  %2477 = vmatprep.mubr.f32.mxu1 %v7694_v32  ;;  %v6074_v63 = vmax.f32 %v1825_v56, 0.0 }
 0x398   : > { %v5961_v45 = vpop.f32.mrb[46].mxu1  ;;  %5177 = vmatpush1.bf16.msra.mxu0 %v5176_v26  ;;  %5223 = vmatprep.subr.bf16.mxu1 %v5940_v29  ;;  %v1810_v26 = vadd.f32 %v5807_v52, %v5916_v9  ;;  %v6062_v30 = vmax.f32 %v1820_v3, 0.0 }
 0x399   : > { %v5967_v51 = vpop.f32.mrb[47].mxu1  ;;  %5179 = vmatprep.subr.bf16.mxu0 %v5178_v31  ;;  %5231 = vmatpush1.bf16.msra.mxu1 %v5946_v36 }
 0x39a   : > { %2221 = vmatmul.mubr.f32.gmra.mrb[76].mxu0 %v5959_v10  ;;  %2478 = vmatmul.mubr.f32.gmra.mrb[76].mxu1 %v5959_v10  ;;  %v6034_v9 = vmax.f32 %v1810_v26, 0.0  ;;  %v1830_v24 = vadd.f32 %v5807_v52, %v5967_v51 }
 0x39b   : > { %2226 = vmatprep.mubr.f32.mxu0 %v7694_v32  ;;  %2483 = vmatprep.mubr.f32.mxu1 %v7694_v32 }
 0x39c   : > { %v4972_v1 = vpop.f32.mrb[48].mxu1  ;;  %5181 = vmatpush1.bf16.msra.mxu0 %v5180_v46  ;;  %5224 = vmatprep.subr.bf16.mxu1 %v5965_v50  ;;  %v6090_v51 = vmax.f32 %v1830_v24, 0.0 }
 0x39d   : > { %v5989_v6 = vadd.f32 %v4972_v1, %v5807_v52  ;;  %v1839_v11 = vpop.f32.mrb[49].mxu1  ;;  %5183 = vmatprep.subr.bf16.mxu0 %v5182_v53  ;;  %5232 = vmatpush1.bf16.msra.mxu1 %v5971_v34 }
 0x39e   : > { %2227 = vmatmul.mubr.f32.gmra.mrb[78].mxu0 %v5981_v62  ;;  %2484 = vmatmul.mubr.f32.gmra.mrb[78].mxu1 %v5981_v62  ;;  %v5997_v55 = vadd.f32 %v5807_v52, %v1839_v11 }
 0x39f   : > { %2232 = vmatprep.mubr.f32.mxu0 %v7694_v32  ;;  %2489 = vmatprep.mubr.f32.mxu1 %v7694_v32 }
 0x3a0   : > { %v4975_v18 = vpop.f32.mrb[50].mxu1  ;;  %5185 = vmatpush1.bf16.msra.mxu0 %v5184_v4  ;;  %5225 = vmatprep.subr.bf16.mxu1 %v5986_v5 }
 0x3a1   : > { %v6007_v19 = vadd.f32 %v4975_v18, %v5807_v52  ;;  %v1849_v20 = vpop.f32.mrb[51].mxu1  ;;  %5233 = vmatpush1.bf16.msra.mxu1 %v5992_v12  ;;  %5187 = vmatprep.subr.bf16.mxu0 %v5800_v17  ;;  %v1835_v18 = vadd.f32 %v5961_v45, %v5807_v52  ;;  %v6109_v45 = vmax.f32 %v5997_v55, 0.0 }
 0x3a2   : > { %2233 = vmatmul.mubr.f32.gmra.mrb[80].mxu0 %v6003_v16  ;;  %2490 = vmatmul.mubr.f32.gmra.mrb[80].mxu1 %v6003_v16  ;;  %v6014_v49 = vadd.f32 %v5807_v52, %v1849_v20 }
 0x3a3   : > { %2238 = vmatprep.mubr.f32.mxu0 %v7694_v32  ;;  %2495 = vmatprep.mubr.f32.mxu1 %v7694_v32  ;;  %v6102_v35 = vmax.f32 %v1835_v18, 0.0 }
 0x3a4   : > { %v4978_v27 = vpop.f32.mrb[52].mxu1  ;;  %v6123_v55 = vmax.f32 %v6014_v49, 0.0 }
 0x3a5   : > { %v6023_v28 = vadd.f32 %v4978_v27, %v5807_v52  ;;  %v1859_v17 = vpop.f32.mrb[53].mxu1 }
 0x3a6   : > { %2239 = vmatmul.mubr.f32.gmra.mrb[82].mxu0 %v6018_v23  ;;  %2496 = vmatmul.mubr.f32.gmra.mrb[82].mxu1 %v6018_v23  ;;  %v6028_v31 = vadd.f32 %v5807_v52, %v1859_v17 }
 0x3a7   : > { %2244 = vmatprep.mubr.f32.mxu0 %v7694_v32  ;;  %2501 = vmatprep.mubr.f32.mxu1 %v7694_v32 }
 0x3a8   : > { %v4981_v37 = vpop.f32.mrb[54].mxu1  ;;  %v6137_v49 = vmax.f32 %v6028_v31, 0.0 }
 0x3a9   : > { %v6037_v39 = vadd.f32 %v4981_v37, %v5807_v52  ;;  %v1869_v40 = vpop.f32.mrb[55].mxu1 }
 0x3aa   : > { %2245 = vmatmul.mubr.f32.gmra.mrb[84].mxu0 %v6034_v9  ;;  %2502 = vmatmul.mubr.f32.gmra.mrb[84].mxu1 %v6034_v9  ;;  %v6042_v41 = vadd.f32 %v5807_v52, %v1869_v40 }
 0x3ab   : > { %2250 = vmatprep.mubr.f32.mxu0 %v7694_v32  ;;  %2507 = vmatprep.mubr.f32.mxu1 %v7694_v32 }
 0x3ac   : > { %v4984_v44 = vpop.f32.mrb[56].mxu1  ;;  %v6151_v31 = vmax.f32 %v6042_v41, 0.0 }
 0x3ad   : > { %v6051_v46 = vadd.f32 %v4984_v44, %v5807_v52  ;;  %v1879_v48 = vpop.f32.mrb[57].mxu1 }
 0x3ae   : > { %2251 = vmatmul.mubr.f32.gmra.mrb[86].mxu0 %v6046_v43  ;;  %2508 = vmatmul.mubr.f32.gmra.mrb[86].mxu1 %v6046_v43  ;;  %v6056_v53 = vadd.f32 %v5807_v52, %v1879_v48 }
 0x3af   : > { %2256 = vmatprep.mubr.f32.mxu0 %v7694_v32  ;;  %2513 = vmatprep.mubr.f32.mxu1 %v7694_v32 }
 0x3b0   : > { %v4987_v57 = vpop.f32.mrb[58].mxu1  ;;  %v6165_v37 = vmax.f32 %v6056_v53, 0.0 }
 0x3b1   : > { %v6065_v59 = vadd.f32 %v4987_v57, %v5807_v52  ;;  %v1889_v60 = vpop.f32.mrb[59].mxu1 }
 0x3b2   : > { %2257 = vmatmul.mubr.f32.gmra.mrb[88].mxu0 %v6062_v30  ;;  %2514 = vmatmul.mubr.f32.gmra.mrb[88].mxu1 %v6062_v30  ;;  %v6070_v61 = vadd.f32 %v5807_v52, %v1889_v60 }
 0x3b3   : > { %2262 = vmatprep.mubr.f32.mxu0 %v7694_v32  ;;  %2519 = vmatprep.mubr.f32.mxu1 %v7694_v32  ;;  %v6186_v41 = vmax.f32 %v6065_v59, 0.0 }
 0x3b4   : > { %v4990_v1 = vpop.f32.mrb[60].mxu1  ;;  %v6179_v40 = vmax.f32 %v6070_v61, 0.0 }
 0x3b5   : > { %v6079_v4 = vadd.f32 %v4990_v1, %v5807_v52  ;;  %v1899_v11 = vpop.f32.mrb[61].mxu1 }
 0x3b6   : > { %2263 = vmatmul.mubr.f32.gmra.mrb[90].mxu0 %v6074_v63  ;;  %2520 = vmatmul.mubr.f32.gmra.mrb[90].mxu1 %v6074_v63  ;;  %v6084_v15 = vadd.f32 %v5807_v52, %v1899_v11 }
 0x3b7   : > { %2268 = vmatprep.mubr.f32.mxu0 %v7694_v32  ;;  %2525 = vmatprep.mubr.f32.mxu1 %v7694_v32  ;;  %v6200_v44 = vmax.f32 %v6079_v4, 0.0 }
 0x3b8   : > { %v4993_v20 = vpop.f32.mrb[62].mxu1  ;;  %v6193_v3 = vmax.f32 %v6084_v15, 0.0 }
 0x3b9   : > { %v6093_v26 = vadd.f32 %v4993_v20, %v5807_v52  ;;  %v1909_v27 = vpop.f32.mrb[63].mxu1 }
 0x3ba   : > { %2269 = vmatmul.mubr.f32.gmra.mrb[92].mxu0 %v6090_v51  ;;  %2526 = vmatmul.mubr.f32.gmra.mrb[92].mxu1 %v6090_v51  ;;  %v6098_v17 = vadd.f32 %v5807_v52, %v1909_v27  ;;  %v6116_v52 = vmax.f32 %v5989_v6, 0.0  ;;  %v6130_v6 = vmax.f32 %v6007_v19, 0.0  ;;  %v6144_v19 = vmax.f32 %v6023_v28, 0.0 }
 0x3bb   : > { %2274 = vmatprep.mubr.f32.mxu0 %v7694_v32  ;;  %2531 = vmatprep.mubr.f32.mxu1 %v7694_v32  ;;  %v6158_v28 = vmax.f32 %v6037_v39, 0.0  ;;  %v6172_v39 = vmax.f32 %v6051_v46, 0.0  ;;  %v6214_v48 = vmax.f32 %v6093_v26, 0.0  ;;  %v7780_v26 = vmov 0 }
 0x3bc   : > { %v6207_v46 = vmax.f32 %v6098_v17, 0.0 }
 0x3be   : > { %2275 = vmatmul.mubr.f32.gmra.mrb[94].mxu0 %v6102_v35  ;;  %2532 = vmatmul.mubr.f32.gmra.mrb[94].mxu1 %v6102_v35 }
 0x3bf   : > { %2280 = vmatprep.mubr.f32.mxu0 %v7694_v32  ;;  %2537 = vmatprep.mubr.f32.mxu1 %v7694_v32 }
 0x3c2   : > { %2281 = vmatmul.mubr.f32.gmra.mrb[96].mxu0 %v6109_v45  ;;  %2538 = vmatmul.mubr.f32.gmra.mrb[96].mxu1 %v6109_v45 }
 0x3c3   : > { %2286 = vmatprep.mubr.f32.mxu0 %v7694_v32  ;;  %2543 = vmatprep.mubr.f32.mxu1 %v7694_v32 }
 0x3c6   : > { %2287 = vmatmul.mubr.f32.gmra.mrb[98].mxu0 %v6116_v52  ;;  %2544 = vmatmul.mubr.f32.gmra.mrb[98].mxu1 %v6116_v52 }
 0x3c7   : > { %2292 = vmatprep.mubr.f32.mxu0 %v7694_v32  ;;  %2549 = vmatprep.mubr.f32.mxu1 %v7694_v32 }
 0x3ca   : > { %2293 = vmatmul.mubr.f32.gmra.mrb[100].mxu0 %v6123_v55  ;;  %2550 = vmatmul.mubr.f32.gmra.mrb[100].mxu1 %v6123_v55 }
 0x3cb   : > { %2298 = vmatprep.mubr.f32.mxu0 %v7694_v32  ;;  %2555 = vmatprep.mubr.f32.mxu1 %v7694_v32 }
 0x3ce   : > { %2299 = vmatmul.mubr.f32.gmra.mrb[102].mxu0 %v6130_v6  ;;  %2556 = vmatmul.mubr.f32.gmra.mrb[102].mxu1 %v6130_v6 }
 0x3cf   : > { %2304 = vmatprep.mubr.f32.mxu0 %v7694_v32  ;;  %2561 = vmatprep.mubr.f32.mxu1 %v7694_v32 }
 0x3d2   : > { %2305 = vmatmul.mubr.f32.gmra.mrb[104].mxu0 %v6137_v49  ;;  %2562 = vmatmul.mubr.f32.gmra.mrb[104].mxu1 %v6137_v49 }
 0x3d3   : > { %2310 = vmatprep.mubr.f32.mxu0 %v7694_v32  ;;  %2567 = vmatprep.mubr.f32.mxu1 %v7694_v32 }
 0x3d6   : > { %2311 = vmatmul.mubr.f32.gmra.mrb[106].mxu0 %v6144_v19  ;;  %2568 = vmatmul.mubr.f32.gmra.mrb[106].mxu1 %v6144_v19 }
 0x3d7   : > { %2316 = vmatprep.mubr.f32.mxu0 %v7694_v32  ;;  %2573 = vmatprep.mubr.f32.mxu1 %v7694_v32 }
 0x3da   : > { %2317 = vmatmul.mubr.f32.gmra.mrb[108].mxu0 %v6151_v31  ;;  %2574 = vmatmul.mubr.f32.gmra.mrb[108].mxu1 %v6151_v31 }
 0x3db   : > { %2322 = vmatprep.mubr.f32.mxu0 %v7694_v32  ;;  %2579 = vmatprep.mubr.f32.mxu1 %v7694_v32 }
 0x3de   : > { %2323 = vmatmul.mubr.f32.gmra.mrb[110].mxu0 %v6158_v28  ;;  %2580 = vmatmul.mubr.f32.gmra.mrb[110].mxu1 %v6158_v28 }
 0x3df   : > { %2328 = vmatprep.mubr.f32.mxu0 %v7694_v32  ;;  %2585 = vmatprep.mubr.f32.mxu1 %v7694_v32 }
 0x3e2   : > { %2329 = vmatmul.mubr.f32.gmra.mrb[112].mxu0 %v6165_v37  ;;  %2586 = vmatmul.mubr.f32.gmra.mrb[112].mxu1 %v6165_v37 }
 0x3e3   : > { %2334 = vmatprep.mubr.f32.mxu0 %v7694_v32  ;;  %2591 = vmatprep.mubr.f32.mxu1 %v7694_v32 }
 0x3e6   : > { %2335 = vmatmul.mubr.f32.gmra.mrb[114].mxu0 %v6172_v39  ;;  %2592 = vmatmul.mubr.f32.gmra.mrb[114].mxu1 %v6172_v39 }
 0x3e7   : > { %2340 = vmatprep.mubr.f32.mxu0 %v7694_v32  ;;  %2597 = vmatprep.mubr.f32.mxu1 %v7694_v32 }
 0x3ea   : > { %2341 = vmatmul.mubr.f32.gmra.mrb[116].mxu0 %v6179_v40  ;;  %2598 = vmatmul.mubr.f32.gmra.mrb[116].mxu1 %v6179_v40 }
 0x3eb   : > { %2346 = vmatprep.mubr.f32.mxu0 %v7694_v32  ;;  %2603 = vmatprep.mubr.f32.mxu1 %v7694_v32 }
 0x3ee   : > { %2347 = vmatmul.mubr.f32.gmra.mrb[118].mxu0 %v6186_v41  ;;  %2604 = vmatmul.mubr.f32.gmra.mrb[118].mxu1 %v6186_v41 }
 0x3ef   : > { %2352 = vmatprep.mubr.f32.mxu0 %v7694_v32  ;;  %2609 = vmatprep.mubr.f32.mxu1 %v7694_v32 }
 0x3f2   : > { %2353 = vmatmul.mubr.f32.gmra.mrb[120].mxu0 %v6193_v3  ;;  %2610 = vmatmul.mubr.f32.gmra.mrb[120].mxu1 %v6193_v3 }
 0x3f3   : > { %2358 = vmatprep.mubr.f32.mxu0 %v7694_v32  ;;  %2615 = vmatprep.mubr.f32.mxu1 %v7694_v32 }
 0x3f6   : > { %2359 = vmatmul.mubr.f32.gmra.mrb[122].mxu0 %v6200_v44  ;;  %2616 = vmatmul.mubr.f32.gmra.mrb[122].mxu1 %v6200_v44 }
 0x3f7   : > { %2364 = vmatprep.mubr.f32.mxu0 %v7694_v32  ;;  %2621 = vmatprep.mubr.f32.mxu1 %v7694_v32 }
 0x3fa   : > { %2365 = vmatmul.mubr.f32.gmra.mrb[124].mxu0 %v6207_v46  ;;  %2622 = vmatmul.mubr.f32.gmra.mrb[124].mxu1 %v6207_v46 }
 0x3fb   : > { %2370 = vmatprep.mubr.f32.mxu0 %v7694_v32  ;;  %2627 = vmatprep.mubr.f32.mxu1 %v7694_v32 }
 0x3fe   : > { %2371 = vmatmul.mubr.f32.gmra.mrb[126].mxu0 %v6214_v48  ;;  %2628 = vmatmul.mubr.f32.gmra.mrb[126].mxu1 %v6214_v48 }
 0x3ff   : > { %2698 = vmatprep.mubr.f32.mxu0 %v7694_v32  ;;  %2973 = vmatprep.mubr.f32.mxu1 %v7694_v32 }
 0x402   : > { %2699 = vmatmul.mubr.f32.vlgmr.msra.gmra.mrb[128].mxu0 %v5817_v0  ;;  %2974 = vmatmul.mubr.f32.vlgmr.msra.gmra.mrb[128].mxu1 %v5880_v47 }
 0x403   : > { %5189 = vmatpush1.bf16.msra.mxu0 %v5822_v7  ;;  %2704 = vmatprep.mubr.f32.mxu0 %v7694_v32  ;;  %v2080_v7 = vlaneseq }
 0x404   : > { %2979 = vmatprep.mubr.f32.mxu1 %v7694_v32  ;;  %5191 = vmatprep.subr.bf16.mxu0 %v5840_v21 }
 0x405   : > { %v6309_v21 = vshrl.u32 %v2080_v7, 7 }
 0x406   : > { %2705 = vmatmul.mubr.f32.gmra.mrb[130].mxu0 %v5832_v14  ;;  %2980 = vmatmul.mubr.f32.gmra.mrb[130].mxu1 %v5907_v2 }
 0x407   : > { %2710 = vmatprep.mubr.f32.mxu0 %v7694_v32  ;;  %2985 = vmatprep.mubr.f32.mxu1 %v7694_v32  ;;  %v6387_v53 = vadd.s32 88, %v6309_v21  ;;  %v6390_v56 = vadd.s32 96, %v6309_v21  ;;  %v6393_v59 = vadd.s32 104, %v6309_v21  ;;  %v6396_v60 = vadd.s32 112, %v6309_v21 }
 0x408   : > { %5193 = vmatpush1.bf16.msra.mxu0 %v5844_v25  ;;  %v2082_v25 = vsub.s32 0, %v6309_v21  ;;  %v6399_v61 = vadd.s32 120, %v6309_v21  ;;  %v6409_v15 = vadd.s32 136, %v6309_v21  ;;  %v6412_v18 = vadd.s32 144, %v6309_v21 }
 0x409   : > { %5195 = vmatprep.subr.bf16.mxu0 %v5863_v38  ;;  %v2090_v38 = vsub.s32 2, %v6309_v21  ;;  %v6424_v27 = vadd.s32 152, %v6309_v21  ;;  %v6427_v17 = vadd.s32 160, %v6309_v21 }
 0x40a   : > { %2711 = vmatmul.mubr.f32.gmra.mrb[132].mxu0 %v5856_v33  ;;  %2986 = vmatmul.mubr.f32.gmra.mrb[132].mxu1 %v5931_v22 }
 0x40b   : > { %2716 = vmatprep.mubr.f32.mxu0 %v7694_v32  ;;  %2991 = vmatprep.mubr.f32.mxu1 %v7694_v32 }
 0x40c   : > { %5197 = vmatpush1.bf16.msra.mxu0 %v5869_v42  ;;  %v2086_v42 = vsub.s32 1, %v6309_v21 }
 0x40d   : > { %5199 = vmatprep.subr.bf16.mxu0 %v5888_v54  ;;  %v6329_v54 = vld [vmem:[%s6316_s29] sm:$0xff] }
 0x40e   : > { %2717 = vmatmul.mubr.f32.gmra.mrb[134].mxu0 %v5880_v47  ;;  %2992 = vmatmul.mubr.f32.gmra.mrb[134].mxu1 %v5959_v10  ;;  %v2094_v47 = vsub.s32 3, %v6309_v21 }
 0x40f   : > { %2722 = vmatprep.mubr.f32.mxu0 %v7694_v32  ;;  %2997 = vmatprep.mubr.f32.mxu1 %v7694_v32 }
 0x410   : > { %5201 = vmatpush1.bf16.msra.mxu0 %v5894_v58  ;;  %v6333_v58 = vstv %s3405_s30 }
 0x411   : > { %5203 = vmatprep.subr.bf16.mxu0 %v5914_v8  ;;  %v6337_v8 = vrot.slane %v6329_v54, %v2082_v25  ;;  %vm6352_vm2 = vcmp.lt.s32.totalorder %v6309_v21, %v6333_v58  ;;  %v6436_v25 = vadd.s32 184, %v6309_v21  ;;  %vm6655_vm13 = vcmp.lt.s32.totalorder %v6387_v53, %v6333_v58 }
 0x412   : > { %2723 = vmatmul.mubr.f32.gmra.mrb[136].mxu0 %v5907_v2  ;;  %2998 = vmatmul.mubr.f32.gmra.mrb[136].mxu1 %v5981_v62  ;;  %v3408_v2 = vadd.s32 8, %v6309_v21  ;;  %vm6675_vm14 = vcmp.lt.s32.totalorder %v6390_v56, %v6333_v58  ;;  %vm6695_vm15 = vcmp.lt.s32.totalorder %v6393_v59, %v6333_v58  ;;  %vm6715_vm0 = vcmp.lt.s32.totalorder %v6396_v60, %v6333_v58 }
 0x413   : > { %2728 = vmatprep.mubr.f32.mxu0 %v7694_v32  ;;  %3003 = vmatprep.mubr.f32.mxu1 %v7694_v32  ;;  %vm6734_vm1 = vcmp.lt.s32.totalorder %v6399_v61, %v6333_v58 }
 0x414   : > { %5205 = vmatpush1.bf16.msra.mxu0 %v5920_v13  ;;  %v6340_v13 = vrot.slane %v6329_v54, %v2090_v38  ;;  %vm6364_vm3 = vcmp.lt.s32.totalorder %v3408_v2, %v6333_v58  ;;  %v6439_v38 = vadd.s32 192, %v6309_v21 }
 0x415   : > { %5207 = vmatprep.subr.bf16.mxu0 %v5940_v29  ;;  %v6346_v29 = vrot.slane %v6329_v54, %v2094_v47 }
 0x416   : > { %2729 = vmatmul.mubr.f32.gmra.mrb[138].mxu0 %v5931_v22  ;;  %3004 = vmatmul.mubr.f32.gmra.mrb[138].mxu1 %v6003_v16  ;;  %v6343_v22 = vrot.slane %v6329_v54, %v2086_v42  ;;  %7783 = vst [vmem:[#allocation8_spill] sm:$0xff] %v6439_v38 }
 0x417   : > { %2734 = vmatprep.mubr.f32.mxu0 %v7694_v32  ;;  %3009 = vmatprep.mubr.f32.mxu1 %v7694_v32 }
 0x418   : > { %5209 = vmatpush1.bf16.msra.mxu0 %v5946_v36  ;;  %v7774_v36 = vmov 0 }
 0x419   : > { %5211 = vmatprep.subr.bf16.mxu0 %v5965_v50  ;;  %v7775_v36 = vsel %vm6352_vm2, 4294967295, %v7774_v36  ;;  %v3410_v50 = vadd.s32 24, %v6309_v21 }
 0x41a   : > { %2735 = vmatmul.mubr.f32.gmra.mrb[140].mxu0 %v5959_v10  ;;  %3010 = vmatmul.mubr.f32.gmra.mrb[140].mxu1 %v6018_v23  ;;  %7776 = vst [vmem:[#allocation5_spill] sm:$0xff] %v7775_v36  ;;  %v3409_v10 = vadd.s32 16, %v6309_v21 }
 0x41b   : > { %2740 = vmatprep.mubr.f32.mxu0 %v7694_v32  ;;  %3015 = vmatprep.mubr.f32.mxu1 %v7694_v32  ;;  %vm6456_vm5 = vcmp.lt.s32.totalorder %v3410_v50, %v6333_v58 }
 0x41c   : > { %5213 = vmatpush1.bf16.msra.mxu0 %v5971_v34  ;;  %v6359_v34 = vadd.s32 32, %v6309_v21  ;;  %vm6419_vm4 = vcmp.lt.s32.totalorder %v3409_v10, %v6333_v58 }
 0x41d   : > { %5215 = vmatprep.subr.bf16.mxu0 %v5986_v5  ;;  %v6369_v5 = vadd.s32 40, %v6309_v21  ;;  %v7781_v26 = vsel %vm6419_vm4, 4294967295, %v7780_v26 }
 0x41e   : > { %2741 = vmatmul.mubr.f32.gmra.mrb[142].mxu0 %v5981_v62  ;;  %3016 = vmatmul.mubr.f32.gmra.mrb[142].mxu1 %v6034_v9  ;;  %v7777_v62 = vmov 0  ;;  %7782 = vst [vmem:[#allocation7_spill] sm:$0xff] %v7781_v26  ;;  %vm6492_vm6 = vcmp.lt.s32.totalorder %v6359_v34, %v6333_v58 }
 0x41f   : > { %2746 = vmatprep.mubr.f32.mxu0 %v7694_v32  ;;  %3021 = vmatprep.mubr.f32.mxu1 %v7694_v32  ;;  %v7778_v62 = vsel %vm6364_vm3, 4294967295, %v7777_v62  ;;  %vm6520_vm7 = vcmp.lt.s32.totalorder %v6369_v5, %v6333_v58 }
 0x420   : > { %5217 = vmatpush1.bf16.msra.mxu0 %v5992_v12  ;;  %7779 = vst [vmem:[#allocation6_spill] sm:$0xff] %v7778_v62  ;;  %v6372_v12 = vadd.s32 48, %v6309_v21 }
 0x422   : > { %2747 = vmatmul.mubr.f32.gmra.mrb[144].mxu0 %v6003_v16  ;;  %3022 = vmatmul.mubr.f32.gmra.mrb[144].mxu1 %v6046_v43  ;;  %v6375_v16 = vadd.s32 56, %v6309_v21  ;;  %vm6546_vm8 = vcmp.lt.s32.totalorder %v6372_v12, %v6333_v58 }
 0x423   : > { %2752 = vmatprep.mubr.f32.mxu0 %v7694_v32  ;;  %3027 = vmatprep.mubr.f32.mxu1 %v7694_v32 }
 0x424   : > { %vm6572_vm9 = vcmp.lt.s32.totalorder %v6375_v16, %v6333_v58 }
 0x426   : > { %2753 = vmatmul.mubr.f32.gmra.mrb[146].mxu0 %v6018_v23  ;;  %3028 = vmatmul.mubr.f32.gmra.mrb[146].mxu1 %v6062_v30  ;;  %v6378_v23 = vadd.s32 64, %v6309_v21 }
 0x427   : > { %2758 = vmatprep.mubr.f32.mxu0 %v7694_v32  ;;  %3033 = vmatprep.mubr.f32.mxu1 %v7694_v32 }
 0x428   : > { %vm6594_vm10 = vcmp.lt.s32.totalorder %v6378_v23, %v6333_v58 }
 0x42a   : > { %2759 = vmatmul.mubr.f32.gmra.mrb[148].mxu0 %v6034_v9  ;;  %3034 = vmatmul.mubr.f32.gmra.mrb[148].mxu1 %v6074_v63  ;;  %v6381_v9 = vadd.s32 72, %v6309_v21 }
 0x42b   : > { %2764 = vmatprep.mubr.f32.mxu0 %v7694_v32  ;;  %3039 = vmatprep.mubr.f32.mxu1 %v7694_v32 }
 0x42c   : > { %vm6615_vm11 = vcmp.lt.s32.totalorder %v6381_v9, %v6333_v58 }
 0x42e   : > { %2765 = vmatmul.mubr.f32.gmra.mrb[150].mxu0 %v6046_v43  ;;  %3040 = vmatmul.mubr.f32.gmra.mrb[150].mxu1 %v6090_v51  ;;  %v6384_v43 = vadd.s32 80, %v6309_v21 }
 0x42f   : > { %2770 = vmatprep.mubr.f32.mxu0 %v7694_v32  ;;  %3045 = vmatprep.mubr.f32.mxu1 %v7694_v32 }
 0x430   : > { %vm6635_vm12 = vcmp.lt.s32.totalorder %v6384_v43, %v6333_v58 }
 0x432   : > { %2771 = vmatmul.mubr.f32.gmra.mrb[152].mxu0 %v6062_v30  ;;  %3046 = vmatmul.mubr.f32.gmra.mrb[152].mxu1 %v6102_v35 }
 0x433   : > { %2776 = vmatprep.mubr.f32.mxu0 %v7694_v32  ;;  %3051 = vmatprep.mubr.f32.mxu1 %v7694_v32 }
 0x436   : > { %2777 = vmatmul.mubr.f32.gmra.mrb[154].mxu0 %v6074_v63  ;;  %3052 = vmatmul.mubr.f32.gmra.mrb[154].mxu1 %v6109_v45  ;;  %v6402_v63 = vadd.s32 128, %v6309_v21 }
 0x437   : > { %2782 = vmatprep.mubr.f32.mxu0 %v7694_v32  ;;  %3057 = vmatprep.mubr.f32.mxu1 %v7694_v32 }
 0x43a   : > { %2783 = vmatmul.mubr.f32.gmra.mrb[156].mxu0 %v6090_v51  ;;  %3058 = vmatmul.mubr.f32.gmra.mrb[156].mxu1 %v6116_v52 }
 0x43b   : > { %2788 = vmatprep.mubr.f32.mxu0 %v7694_v32  ;;  %3063 = vmatprep.mubr.f32.mxu1 %v7694_v32 }
 0x43e   : > { %2789 = vmatmul.mubr.f32.gmra.mrb[158].mxu0 %v6102_v35  ;;  %3064 = vmatmul.mubr.f32.gmra.mrb[158].mxu1 %v6123_v55 }
 0x43f   : > { %2794 = vmatprep.mubr.f32.mxu0 %v7694_v32  ;;  %3069 = vmatprep.mubr.f32.mxu1 %v7694_v32 }
 0x442   : > { %2795 = vmatmul.mubr.f32.gmra.mrb[160].mxu0 %v6109_v45  ;;  %3070 = vmatmul.mubr.f32.gmra.mrb[160].mxu1 %v6130_v6 }
 0x443   : > { %2800 = vmatprep.mubr.f32.mxu0 %v7694_v32  ;;  %3075 = vmatprep.mubr.f32.mxu1 %v7694_v32 }
 0x446   : > { %2801 = vmatmul.mubr.f32.gmra.mrb[162].mxu0 %v6116_v52  ;;  %3076 = vmatmul.mubr.f32.gmra.mrb[162].mxu1 %v6137_v49  ;;  %v6430_v52 = vadd.s32 168, %v6309_v21 }
 0x447   : > { %2806 = vmatprep.mubr.f32.mxu0 %v7694_v32  ;;  %3081 = vmatprep.mubr.f32.mxu1 %v7694_v32 }
 0x44a   : > { %2807 = vmatmul.mubr.f32.gmra.mrb[164].mxu0 %v6123_v55  ;;  %3082 = vmatmul.mubr.f32.gmra.mrb[164].mxu1 %v6144_v19  ;;  %v6433_v55 = vadd.s32 176, %v6309_v21 }
 0x44b   : > { %2812 = vmatprep.mubr.f32.mxu0 %v7694_v32  ;;  %3087 = vmatprep.mubr.f32.mxu1 %v7694_v32 }
 0x44e   : > { %2813 = vmatmul.mubr.f32.gmra.mrb[166].mxu0 %v6130_v6  ;;  %3088 = vmatmul.mubr.f32.gmra.mrb[166].mxu1 %v6151_v31 }
 0x44f   : > { %2818 = vmatprep.mubr.f32.mxu0 %v7694_v32  ;;  %3093 = vmatprep.mubr.f32.mxu1 %v7694_v32 }
 0x452   : > { %2819 = vmatmul.mubr.f32.gmra.mrb[168].mxu0 %v6137_v49  ;;  %3094 = vmatmul.mubr.f32.gmra.mrb[168].mxu1 %v6158_v28 }
 0x453   : > { %2824 = vmatprep.mubr.f32.mxu0 %v7694_v32  ;;  %3099 = vmatprep.mubr.f32.mxu1 %v7694_v32 }
 0x455   : > { %v2186_v30 = vpop.f32.mrb[64].mxu0  ;;  %v2443_v57 = vpop.f32.mrb[64].mxu1 }
 0x456   : > { %v2187_v24 = vadd.f32 %v2186_v30, %v6337_v8  ;;  %v2444_v1 = vadd.f32 %v2443_v57, %v6340_v13  ;;  %v2188_v4 = vpop.f32.mrb[65].mxu0  ;;  %v2445_v11 = vpop.f32.mrb[65].mxu1  ;;  %2825 = vmatmul.mubr.f32.gmra.mrb[170].mxu0 %v6144_v19  ;;  %3100 = vmatmul.mubr.f32.gmra.mrb[170].mxu1 %v6165_v37  ;;  %v6446_v30 = vadd.s32 200, %v6309_v21  ;;  %v6449_v57 = vadd.s32 208, %v6309_v21 }
 0x457   : > { %v2189_v51 = vadd.f32 %v2188_v4, %v6343_v22  ;;  %v2446_v20 = vadd.f32 %v2445_v11, %v6346_v29  ;;  %2830 = vmatprep.mubr.f32.mxu0 %v7694_v32  ;;  %3105 = vmatprep.mubr.f32.mxu1 %v7694_v32  ;;  %v7786_v4 = vmov 0  ;;  %v6464_v11 = vadd.s32 224, %v6309_v21 }
 0x458   : > { %v3148_v35 = vmax.f32 %v2187_v24, 0.0  ;;  %v3150_v45 = vmax.f32 %v2444_v1, 0.0  ;;  %7784 = vst [vmem:[#allocation9_spill] sm:$0xff] %v6446_v30  ;;  %7785 = vst [vmem:[#allocation10_spill] sm:$0xff] %v6449_v57  ;;  %v7787_v4 = vsel %vm6456_vm5, 4294967295, %v7786_v4 }
 0x459   : > { %v3149_v6 = vmax.f32 %v2189_v51, 0.0  ;;  %v3151_v49 = vmax.f32 %v2446_v20, 0.0  ;;  %v2192_v19 = vpop.f32.mrb[66].mxu0  ;;  %v2449_v7 = vpop.f32.mrb[66].mxu1  ;;  %7788 = vst [vmem:[#allocation11_spill] sm:$0xff] %v7787_v4  ;;  %7790 = vst [vmem:[#allocation13_spill] sm:$0xff] %v6464_v11 }
 0x45a   : > { %v2193_v42 = vadd.f32 %v2192_v19, %v6337_v8  ;;  %v2450_v47 = vadd.f32 %v2449_v7, %v6340_v13  ;;  %v2194_v2 = vpop.f32.mrb[67].mxu0  ;;  %v2451_v10 = vpop.f32.mrb[67].mxu1  ;;  %2831 = vmatmul.mubr.f32.gmra.mrb[172].mxu0 %v6151_v31  ;;  %3106 = vmatmul.mubr.f32.gmra.mrb[172].mxu1 %v6172_v39  ;;  %v6461_v31 = vadd.s32 216, %v6309_v21  ;;  %v3570_v51 = vsel %vm6352_vm2, %v3148_v35, 0.0 }
 0x45b   : > { %v2195_v24 = vadd.f32 %v2194_v2, %v6343_v22  ;;  %v2452_v1 = vadd.f32 %v2451_v10, %v6346_v29  ;;  %2836 = vmatprep.mubr.f32.mxu0 %v7694_v32  ;;  %3111 = vmatprep.mubr.f32.mxu1 %v7694_v32  ;;  %v3572_v20 = vsel %vm6352_vm2, %v3150_v45, 0.0  ;;  %v3571_v50 = vsel %vm6352_vm2, %v3149_v6, 0.0 }
 0x45c   : > { %7789 = vst [vmem:[#allocation12_spill] sm:$0xff] %v6461_v31  ;;  %v3156_v19 = vmax.f32 %v2193_v42, 0.0  ;;  %v3158_v7 = vmax.f32 %v2450_v47, 0.0  ;;  %v3573_v2 = vsel %vm6352_vm2, %v3151_v49, 0.0 }
 0x45d   : > { %v3157_v10 = vmax.f32 %v2195_v24, 0.0  ;;  %v3159_v32 = vmax.f32 %v2452_v1, 0.0  ;;  %v2198_v31 = vpop.f32.mrb[68].mxu0  ;;  %v2455_v57 = vpop.f32.mrb[68].mxu1 }
 0x45e   : > { %v3578_v11 = vsel %vm6364_vm3, %v3156_v19, 0.0  ;;  %v3580_v35 = vsel %vm6364_vm3, %v3158_v7, 0.0  ;;  %v2199_v45 = vadd.f32 %v2198_v31, %v6337_v8  ;;  %v2456_v42 = vadd.f32 %v2455_v57, %v6340_v13  ;;  %v2200_v47 = vpop.f32.mrb[69].mxu0  ;;  %v2457_v30 = vpop.f32.mrb[69].mxu1  ;;  %2837 = vmatmul.mubr.f32.gmra.mrb[174].mxu0 %v6158_v28  ;;  %3112 = vmatmul.mubr.f32.gmra.mrb[174].mxu1 %v6179_v40 }
 0x45f   : > { %v3827_v6 = vadd.f32 %v3578_v11, %v3570_v51  ;;  %v3901_v49 = vadd.f32 %v3580_v35, %v3572_v20  ;;  %v3579_v24 = vsel %vm6364_vm3, %v3157_v10, 0.0  ;;  %v3581_v1 = vsel %vm6364_vm3, %v3159_v32, 0.0 }
 0x460   : > { %v7791_v19 = vmov 0.0   ;;  %v3864_v31 = vadd.f32 %v3579_v24, %v3571_v50  ;;  %v3938_v57 = vadd.f32 %v3581_v1, %v3573_v2  ;;  %v3164_v7 = vmax.f32 %v2199_v45, 0.0 }
 0x461   : > { %2842 = vmatprep.mubr.f32.mxu0 %v7791_v19  ;;  %3117 = vmatprep.mubr.f32.mxu1 %v7791_v19  ;;  %v3166_v36 = vmax.f32 %v2456_v42, 0.0  ;;  %v2201_v28 = vadd.f32 %v2200_v47, %v6343_v22  ;;  %v2458_v38 = vadd.f32 %v2457_v30, %v6346_v29  ;;  %v2204_v11 = vpop.f32.mrb[70].mxu0  ;;  %v2461_v51 = vpop.f32.mrb[70].mxu1  ;;  %v6497_v32 = vadd.s32 232, %v6309_v21 }
 0x462   : > { %v6500_v50 = vadd.s32 240, %v6309_v21  ;;  %v3586_v2 = vsel %vm6419_vm4, %v3164_v7, 0.0  ;;  %v2205_v10 = vadd.f32 %v2204_v11, %v6337_v8  ;;  %v2462_v35 = vadd.f32 %v2461_v51, %v6340_v13  ;;  %v2206_v34 = vpop.f32.mrb[71].mxu0  ;;  %v2463_v45 = vpop.f32.mrb[71].mxu1  ;;  %2843 = vmatmul.mubr.f32.gmra.mrb[176].mxu0 %v6165_v37  ;;  %3118 = vmatmul.mubr.f32.gmra.mrb[176].mxu1 %v6186_v41 }
 0x463   : > { %v3588_v30 = vsel %vm6419_vm4, %v3166_v36, 0.0  ;;  %v3828_v42 = vadd.f32 %v3827_v6, %v3586_v2  ;;  %v3165_v24 = vmax.f32 %v2201_v28, 0.0  ;;  %v3167_v1 = vmax.f32 %v2458_v38, 0.0  ;;  %2848 = vmatprep.mubr.f32.mxu0 %v7791_v19  ;;  %3123 = vmatprep.mubr.f32.mxu1 %v7791_v19 }
 0x464   : > { %v3902_v47 = vadd.f32 %v3901_v49, %v3588_v30  ;;  %v3172_v7 = vmax.f32 %v2205_v10, 0.0  ;;  %v3174_v36 = vmax.f32 %v2462_v35, 0.0  ;;  %v2207_v11 = vadd.f32 %v2206_v34, %v6343_v22 }
 0x465   : > { %v2464_v51 = vadd.f32 %v2463_v45, %v6346_v29  ;;  %v3587_v62 = vsel %vm6419_vm4, %v3165_v24, 0.0  ;;  %v3589_v37 = vsel %vm6419_vm4, %v3167_v1, 0.0  ;;  %v2210_v6 = vpop.f32.mrb[72].mxu0  ;;  %v2467_v49 = vpop.f32.mrb[72].mxu1  ;;  %v6525_v28 = vadd.s32 248, %v6309_v21 }
 0x466   : > { %v2098_v2 = vsub.s32 4, %v6309_v21  ;;  %v3865_v30 = vadd.f32 %v3864_v31, %v3587_v62  ;;  %v3939_v10 = vadd.f32 %v3938_v57, %v3589_v37  ;;  %v3594_v35 = vsel %vm6456_vm5, %v3172_v7, 0.0  ;;  %v2212_v45 = vpop.f32.mrb[73].mxu0  ;;  %v2469_v24 = vpop.f32.mrb[73].mxu1  ;;  %2849 = vmatmul.mubr.f32.gmra.mrb[178].mxu0 %v6172_v39  ;;  %3124 = vmatmul.mubr.f32.gmra.mrb[178].mxu1 %v6193_v3 }
 0x467   : > { %7796 = vst [vmem:[#allocation14_spill] sm:$0xff] %v6525_v28  ;;  %v3596_v34 = vsel %vm6456_vm5, %v3174_v36, 0.0  ;;  %v3829_v5 = vadd.f32 %v3828_v42, %v3594_v35  ;;  %v3173_v26 = vmax.f32 %v2207_v11, 0.0  ;;  %v3175_v28 = vmax.f32 %v2464_v51, 0.0  ;;  %2854 = vmatprep.mubr.f32.mxu0 %v7791_v19  ;;  %3129 = vmatprep.mubr.f32.mxu1 %v7791_v19 }
 0x468   : > { %v3903_v1 = vadd.f32 %v3902_v47, %v3596_v34  ;;  %v2211_v62 = vadd.f32 %v2210_v6, %v6337_v8  ;;  %v2468_v31 = vadd.f32 %v2467_v49, %v6340_v13  ;;  %v2213_v57 = vadd.f32 %v2212_v45, %v6343_v22 }
 0x469   : > { %v2470_v7 = vadd.f32 %v2469_v24, %v6346_v29  ;;  %v3595_v39 = vsel %vm6456_vm5, %v3173_v26, 0.0  ;;  %v3597_v42 = vsel %vm6456_vm5, %v3175_v28, 0.0  ;;  %v2216_v47 = vpop.f32.mrb[74].mxu0  ;;  %v2473_v36 = vpop.f32.mrb[74].mxu1  ;;  %v6551_v51 = vrot.slane %v6329_v54, %v2098_v2 }
 0x46a   : > { %v2102_v37 = vsub.s32 5, %v6309_v21  ;;  %v3866_v6 = vadd.f32 %v3865_v30, %v3595_v39  ;;  %v3940_v49 = vadd.f32 %v3939_v10, %v3597_v42  ;;  %v3180_v35 = vmax.f32 %v2211_v62, 0.0  ;;  %v2218_v34 = vpop.f32.mrb[75].mxu0  ;;  %v2475_v45 = vpop.f32.mrb[75].mxu1  ;;  %2855 = vmatmul.mubr.f32.gmra.mrb[180].mxu0 %v6179_v40  ;;  %3130 = vmatmul.mubr.f32.gmra.mrb[180].mxu1 %v6200_v44 }
 0x46b   : > { %v3182_v26 = vmax.f32 %v2468_v31, 0.0  ;;  %v3181_v28 = vmax.f32 %v2213_v57, 0.0  ;;  %v3183_v12 = vmax.f32 %v2470_v7, 0.0  ;;  %v2217_v24 = vadd.f32 %v2216_v47, %v6337_v8  ;;  %2860 = vmatprep.mubr.f32.mxu0 %v7791_v19  ;;  %3135 = vmatprep.mubr.f32.mxu1 %v7791_v19 }
 0x46c   : > { %v2474_v4 = vadd.f32 %v2473_v36, %v6340_v13  ;;  %v3602_v54 = vsel %vm6492_vm6, %v3180_v35, 0.0  ;;  %v2219_v40 = vadd.f32 %v2218_v34, %v6343_v22  ;;  %v2476_v30 = vadd.f32 %v2475_v45, %v6346_v29 }
 0x46d   : > { %v3604_v2 = vsel %vm6492_vm6, %v3182_v26, 0.0  ;;  %v3830_v10 = vadd.f32 %v3829_v5, %v3602_v54  ;;  %v3603_v31 = vsel %vm6492_vm6, %v3181_v28, 0.0  ;;  %v3605_v57 = vsel %vm6492_vm6, %v3183_v12, 0.0  ;;  %v2222_v7 = vpop.f32.mrb[76].mxu0  ;;  %v2479_v39 = vpop.f32.mrb[76].mxu1 }
 0x46e   : > { %v3904_v62 = vadd.f32 %v3903_v1, %v3604_v2  ;;  %v3867_v47 = vadd.f32 %v3866_v6, %v3603_v31  ;;  %v3941_v36 = vadd.f32 %v3940_v49, %v3605_v57  ;;  %v3188_v35 = vmax.f32 %v2217_v24, 0.0  ;;  %v2224_v5 = vpop.f32.mrb[77].mxu0  ;;  %v2481_v1 = vpop.f32.mrb[77].mxu1  ;;  %2861 = vmatmul.mubr.f32.gmra.mrb[182].mxu0 %v6186_v41  ;;  %3136 = vmatmul.mubr.f32.gmra.mrb[182].mxu1 %v6207_v46 }
 0x46f   : > { %v3190_v26 = vmax.f32 %v2474_v4, 0.0  ;;  %v3189_v34 = vmax.f32 %v2219_v40, 0.0  ;;  %v3191_v45 = vmax.f32 %v2476_v30, 0.0  ;;  %v2223_v28 = vadd.f32 %v2222_v7, %v6337_v8  ;;  %2866 = vmatprep.mubr.f32.mxu0 %v7791_v19  ;;  %3141 = vmatprep.mubr.f32.mxu1 %v7791_v19 }
 0x470   : > { %v2480_v12 = vadd.f32 %v2479_v39, %v6340_v13  ;;  %v3610_v16 = vsel %vm6520_vm7, %v3188_v35, 0.0  ;;  %v2225_v41 = vadd.f32 %v2224_v5, %v6343_v22  ;;  %v2482_v6 = vadd.f32 %v2481_v1, %v6346_v29 }
 0x471   : > { %v3612_v4 = vsel %vm6520_vm7, %v3190_v26, 0.0  ;;  %v3831_v49 = vadd.f32 %v3830_v10, %v3610_v16  ;;  %v3611_v54 = vsel %vm6520_vm7, %v3189_v34, 0.0  ;;  %v3613_v2 = vsel %vm6520_vm7, %v3191_v45, 0.0  ;;  %v2228_v40 = vpop.f32.mrb[78].mxu0  ;;  %v2485_v30 = vpop.f32.mrb[78].mxu1 }
 0x472   : > { %v3905_v24 = vadd.f32 %v3904_v62, %v3612_v4  ;;  %v3868_v57 = vadd.f32 %v3867_v47, %v3611_v54  ;;  %v3942_v7 = vadd.f32 %v3941_v36, %v3613_v2  ;;  %v3196_v39 = vmax.f32 %v2223_v28, 0.0  ;;  %v2230_v10 = vpop.f32.mrb[79].mxu0  ;;  %v2487_v62 = vpop.f32.mrb[79].mxu1  ;;  %2867 = vmatmul.mubr.f32.gmra.mrb[184].mxu0 %v6193_v3  ;;  %3142 = vmatmul.mubr.f32.gmra.mrb[184].mxu1 %v6214_v48 }
 0x473   : > { %v3198_v35 = vmax.f32 %v2480_v12, 0.0  ;;  %v3197_v26 = vmax.f32 %v2225_v41, 0.0  ;;  %v3199_v5 = vmax.f32 %v2482_v6, 0.0  ;;  %v2229_v1 = vadd.f32 %v2228_v40, %v6337_v8  ;;  %2872 = vmatprep.mubr.f32.mxu0 %v7791_v19 }
 0x474   : > { %v2486_v34 = vadd.f32 %v2485_v30, %v6340_v13  ;;  %v3618_v23 = vsel %vm6546_vm8, %v3196_v39, 0.0  ;;  %v2231_v36 = vadd.f32 %v2230_v10, %v6343_v22  ;;  %v2488_v3 = vadd.f32 %v2487_v62, %v6346_v29 }
 0x475   : > { %v3620_v47 = vsel %vm6546_vm8, %v3198_v35, 0.0  ;;  %v3832_v45 = vadd.f32 %v3831_v49, %v3618_v23  ;;  %v3619_v12 = vsel %vm6546_vm8, %v3197_v26, 0.0  ;;  %v3621_v16 = vsel %vm6546_vm8, %v3199_v5, 0.0  ;;  %v2234_v4 = vpop.f32.mrb[80].mxu0  ;;  %v2491_v41 = vpop.f32.mrb[80].mxu1 }
 0x476   : > { %v3906_v28 = vadd.f32 %v3905_v24, %v3620_v47  ;;  %v3869_v54 = vadd.f32 %v3868_v57, %v3619_v12  ;;  %v3943_v2 = vadd.f32 %v3942_v7, %v3621_v16  ;;  %v3204_v40 = vmax.f32 %v2229_v1, 0.0  ;;  %v2236_v49 = vpop.f32.mrb[81].mxu0  ;;  %v2493_v24 = vpop.f32.mrb[81].mxu1  ;;  %2873 = vmatmul.mubr.f32.gmra.mrb[186].mxu0 %v6200_v44 }
 0x477   : > { %v3206_v30 = vmax.f32 %v2486_v34, 0.0  ;;  %v3205_v39 = vmax.f32 %v2231_v36, 0.0  ;;  %v3207_v35 = vmax.f32 %v2488_v3, 0.0  ;;  %v2235_v10 = vadd.f32 %v2234_v4, %v6337_v8  ;;  %2878 = vmatprep.mubr.f32.mxu0 %v7791_v19 }
 0x478   : > { %v2492_v62 = vadd.f32 %v2491_v41, %v6340_v13  ;;  %v3626_v9 = vsel %vm6572_vm9, %v3204_v40, 0.0  ;;  %v2237_v7 = vadd.f32 %v2236_v49, %v6343_v22  ;;  %v2494_v26 = vadd.f32 %v2493_v24, %v6346_v29 }
 0x479   : > { %v3628_v57 = vsel %vm6572_vm9, %v3206_v30, 0.0  ;;  %v3833_v5 = vadd.f32 %v3832_v45, %v3626_v9  ;;  %v3627_v1 = vsel %vm6572_vm9, %v3205_v39, 0.0  ;;  %v3629_v34 = vsel %vm6572_vm9, %v3207_v35, 0.0  ;;  %v2240_v23 = vpop.f32.mrb[82].mxu0  ;;  %v2497_v47 = vpop.f32.mrb[82].mxu1 }
 0x47a   : > { %v3907_v44 = vadd.f32 %v3906_v28, %v3628_v57  ;;  %v7805_v36 = vmov 0  ;;  %v3870_v3 = vadd.f32 %v3869_v54, %v3627_v1  ;;  %v3944_v12 = vadd.f32 %v3943_v2, %v3629_v34  ;;  %v2242_v45 = vpop.f32.mrb[83].mxu0  ;;  %v2499_v28 = vpop.f32.mrb[83].mxu1  ;;  %2879 = vmatmul.mubr.f32.gmra.mrb[188].mxu0 %v6207_v46 }
 0x47b   : > { %v7806_v36 = vsel %vm6635_vm12, 4294967295, %v7805_v36  ;;  %v3212_v16 = vmax.f32 %v2235_v10, 0.0  ;;  %v3214_v4 = vmax.f32 %v2492_v62, 0.0  ;;  %v3213_v41 = vmax.f32 %v2237_v7, 0.0  ;;  %2884 = vmatprep.mubr.f32.mxu0 %v7791_v19 }
 0x47c   : > { %v3215_v40 = vmax.f32 %v2494_v26, 0.0  ;;  %v2241_v30 = vadd.f32 %v2240_v23, %v6337_v8  ;;  %v2498_v49 = vadd.f32 %v2497_v47, %v6340_v13  ;;  %v2243_v2 = vadd.f32 %v2242_v45, %v6343_v22 }
 0x47d   : > { %v3634_v43 = vsel %vm6594_vm10, %v3212_v16, 0.0  ;;  %v3636_v54 = vsel %vm6594_vm10, %v3214_v4, 0.0  ;;  %v2500_v24 = vadd.f32 %v2499_v28, %v6346_v29  ;;  %v3635_v35 = vsel %vm6594_vm10, %v3213_v41, 0.0  ;;  %v2246_v62 = vpop.f32.mrb[84].mxu0  ;;  %v2503_v9 = vpop.f32.mrb[84].mxu1 }
 0x47e   : > { %v3834_v39 = vadd.f32 %v3833_v5, %v3634_v43  ;;  %v3908_v46 = vadd.f32 %v3907_v44, %v3636_v54  ;;  %v3637_v10 = vsel %vm6594_vm10, %v3215_v40, 0.0  ;;  %v7807_v57 = vmov 0  ;;  %v2248_v5 = vpop.f32.mrb[85].mxu0  ;;  %v2505_v44 = vpop.f32.mrb[85].mxu1  ;;  %2885 = vmatmul.mubr.f32.gmra.mrb[190].mxu0 %v6214_v48 }
 0x47f   : > { %v7808_v57 = vsel %vm6655_vm13, 4294967295, %v7807_v57  ;;  %v3871_v7 = vadd.f32 %v3870_v3, %v3635_v35  ;;  %v3945_v26 = vadd.f32 %v3944_v12, %v3637_v10  ;;  %v3220_v1 = vmax.f32 %v2241_v30, 0.0  ;;  %2955 = vmatprep.mubr.f32.mxu0 %v7791_v19 }
 0x480   : > { %v3222_v34 = vmax.f32 %v2498_v49, 0.0  ;;  %v3221_v23 = vmax.f32 %v2243_v2, 0.0  ;;  %v3223_v47 = vmax.f32 %v2500_v24, 0.0  ;;  %v2247_v16 = vadd.f32 %v2246_v62, %v6337_v8 }
 0x481   : > { %v2504_v4 = vadd.f32 %v2503_v9, %v6340_v13  ;;  %v3642_v53 = vsel %vm6615_vm11, %v3220_v1, 0.0  ;;  %v2249_v12 = vadd.f32 %v2248_v5, %v6343_v22  ;;  %v2506_v45 = vadd.f32 %v2505_v44, %v6346_v29  ;;  %v2252_v30 = vpop.f32.mrb[86].mxu0  ;;  %v2509_v49 = vpop.f32.mrb[86].mxu1 }
 0x482   : > { %v3644_v3 = vsel %vm6615_vm11, %v3222_v34, 0.0  ;;  %v3835_v28 = vadd.f32 %v3834_v39, %v3642_v53  ;;  %v3643_v41 = vsel %vm6615_vm11, %v3221_v23, 0.0  ;;  %v3645_v40 = vsel %vm6615_vm11, %v3223_v47, 0.0  ;;  %v2254_v39 = vpop.f32.mrb[87].mxu0  ;;  %2956 = vmatmul.mubr.f32.vlgmr.msra.gmra.mrb[192].mxu0 %v5817_v0 }
 0x483   : > { %v3909_v48 = vadd.f32 %v3908_v46, %v3644_v3  ;;  %v7809_v43 = vmov 0  ;;  %v3872_v54 = vadd.f32 %v3871_v7, %v3643_v41  ;;  %v3946_v2 = vadd.f32 %v3945_v26, %v3645_v40  ;;  %v2511_v46 = vpop.f32.mrb[87].mxu1  ;;  %2961 = vmatprep.mubr.f32.mxu0 %v7791_v19 }
 0x484   : > { %v7810_v43 = vsel %vm6675_vm14, 4294967295, %v7809_v43  ;;  %v3228_v24 = vmax.f32 %v2247_v16, 0.0  ;;  %v3230_v35 = vmax.f32 %v2504_v4, 0.0  ;;  %v3229_v10 = vmax.f32 %v2249_v12, 0.0 }
 0x485   : > { %v3231_v62 = vmax.f32 %v2506_v45, 0.0  ;;  %v2253_v9 = vadd.f32 %v2252_v30, %v6337_v8  ;;  %v2510_v1 = vadd.f32 %v2509_v49, %v6340_v13  ;;  %v2255_v26 = vadd.f32 %v2254_v39, %v6343_v22  ;;  %v2258_v47 = vpop.f32.mrb[88].mxu0  ;;  %v2515_v16 = vpop.f32.mrb[88].mxu1 }
 0x486   : > { %v3650_v56 = vsel %vm6635_vm12, %v3228_v24, 0.0  ;;  %v3652_v7 = vsel %vm6635_vm12, %v3230_v35, 0.0  ;;  %v2512_v34 = vadd.f32 %v2511_v46, %v6346_v29  ;;  %v3651_v44 = vsel %vm6635_vm12, %v3229_v10, 0.0  ;;  %2962 = vmatmul.mubr.f32.gmra.mrb[194].mxu0 %v5832_v14 }
 0x487   : > { %v3836_v5 = vadd.f32 %v3835_v28, %v3650_v56  ;;  %v3910_v0 = vadd.f32 %v3909_v48, %v3652_v7  ;;  %v3653_v23 = vsel %vm6635_vm12, %v3231_v62, 0.0  ;;  %v7811_v4 = vmov 0  ;;  %v2260_v28 = vpop.f32.mrb[89].mxu0  ;;  %v2517_v48 = vpop.f32.mrb[89].mxu1  ;;  %2967 = vmatprep.mubr.f32.mxu0 %v7791_v19 }
 0x488   : > { %v7812_v4 = vsel %vm6695_vm15, 4294967295, %v7811_v4  ;;  %v3873_v53 = vadd.f32 %v3872_v54, %v3651_v44  ;;  %v3947_v3 = vadd.f32 %v3946_v2, %v3653_v23  ;;  %v3236_v12 = vmax.f32 %v2253_v9, 0.0 }
 0x489   : > { %v3238_v45 = vmax.f32 %v2510_v1, 0.0  ;;  %v3237_v41 = vmax.f32 %v2255_v26, 0.0  ;;  %v3239_v40 = vmax.f32 %v2512_v34, 0.0  ;;  %v2259_v30 = vadd.f32 %v2258_v47, %v6337_v8  ;;  %v2264_v10 = vpop.f32.mrb[90].mxu0  ;;  %v2521_v19 = vpop.f32.mrb[90].mxu1 }
 0x48a   : > { %v2516_v49 = vadd.f32 %v2515_v16, %v6340_v13  ;;  %v3658_v59 = vsel %vm6655_vm13, %v3236_v12, 0.0  ;;  %v2261_v2 = vadd.f32 %v2260_v28, %v6343_v22  ;;  %v2518_v24 = vadd.f32 %v2517_v48, %v6346_v29  ;;  %v2266_v26 = vpop.f32.mrb[91].mxu0  ;;  %v2523_v34 = vpop.f32.mrb[91].mxu1  ;;  %2968 = vmatmul.mubr.f32.gmra.mrb[196].mxu0 %v5856_v33 }
 0x48b   : > { %v3660_v54 = vsel %vm6655_vm13, %v3238_v45, 0.0  ;;  %v3837_v35 = vadd.f32 %v3836_v5, %v3658_v59  ;;  %v3659_v39 = vsel %vm6655_vm13, %v3237_v41, 0.0  ;;  %v3661_v46 = vsel %vm6655_vm13, %v3239_v40, 0.0 }
 0x48c   : > { %v3911_v14 = vadd.f32 %v3910_v0, %v3660_v54  ;;  %v7813_v62 = vmov 0  ;;  %v3874_v9 = vadd.f32 %v3873_v53, %v3659_v39  ;;  %v3948_v1 = vadd.f32 %v3947_v3, %v3661_v46 }
 0x48d   : > { %v7814_v62 = vsel %vm6715_vm0, 4294967295, %v7813_v62  ;;  %v3244_v56 = vmax.f32 %v2259_v30, 0.0  ;;  %v3246_v7 = vmax.f32 %v2516_v49, 0.0  ;;  %v3245_v5 = vmax.f32 %v2261_v2, 0.0  ;;  %v2270_v28 = vpop.f32.mrb[92].mxu0  ;;  %v2527_v48 = vpop.f32.mrb[92].mxu1 }
 0x48e   : > { %v3247_v0 = vmax.f32 %v2518_v24, 0.0  ;;  %v2265_v44 = vadd.f32 %v2264_v10, %v6337_v8  ;;  %v2522_v23 = vadd.f32 %v2521_v19, %v6340_v13  ;;  %v2267_v16 = vadd.f32 %v2266_v26, %v6343_v22  ;;  %v2272_v54 = vpop.f32.mrb[93].mxu0  ;;  %v2529_v2 = vpop.f32.mrb[93].mxu1 }
 0x48f   : > { %v3666_v60 = vsel %vm6675_vm14, %v3244_v56, 0.0  ;;  %v3668_v47 = vsel %vm6675_vm14, %v3246_v7, 0.0  ;;  %v2524_v53 = vadd.f32 %v2523_v34, %v6346_v29  ;;  %v3667_v33 = vsel %vm6675_vm14, %v3245_v5, 0.0 }
 0x490   : > { %v3838_v3 = vadd.f32 %v3837_v35, %v3666_v60  ;;  %v3912_v12 = vadd.f32 %v3911_v14, %v3668_v47  ;;  %v3669_v45 = vsel %vm6675_vm14, %v3247_v0, 0.0  ;;  %v7815_v41 = vmov 0 }
 0x491   : > { %v7816_v41 = vsel %vm6734_vm1, 4294967295, %v7815_v41  ;;  %v3875_v40 = vadd.f32 %v3874_v9, %v3667_v33  ;;  %v3949_v30 = vadd.f32 %v3948_v1, %v3669_v45  ;;  %v3252_v49 = vmax.f32 %v2265_v44, 0.0  ;;  %v2276_v26 = vpop.f32.mrb[94].mxu0  ;;  %v2533_v34 = vpop.f32.mrb[94].mxu1 }
 0x492   : > { %v3254_v59 = vmax.f32 %v2522_v23, 0.0  ;;  %v3253_v24 = vmax.f32 %v2267_v16, 0.0  ;;  %v3255_v35 = vmax.f32 %v2524_v53, 0.0  ;;  %v2271_v14 = vadd.f32 %v2270_v28, %v6337_v8  ;;  %v2278_v47 = vpop.f32.mrb[95].mxu0  ;;  %v2535_v16 = vpop.f32.mrb[95].mxu1 }
 0x493   : > { %v2528_v39 = vadd.f32 %v2527_v48, %v6340_v13  ;;  %v3674_v46 = vsel %vm6695_vm15, %v3252_v49, 0.0  ;;  %v2273_v10 = vadd.f32 %v2272_v54, %v6343_v22  ;;  %v2530_v19 = vadd.f32 %v2529_v2, %v6346_v29 }
 0x494   : > { %v3676_v61 = vsel %vm6695_vm15, %v3254_v59, 0.0  ;;  %v3839_v9 = vadd.f32 %v3838_v3, %v3674_v46  ;;  %v3675_v56 = vsel %vm6695_vm15, %v3253_v24, 0.0  ;;  %v3677_v7 = vsel %vm6695_vm15, %v3255_v35, 0.0 }
 0x495   : > { %v3913_v1 = vadd.f32 %v3912_v12, %v3676_v61  ;;  %vm6752_vm14 = vcmp.lt.s32.totalorder %v6402_v63, %v6333_v58  ;;  %v7817_v5 = vmov 0  ;;  %v3876_v0 = vadd.f32 %v3875_v40, %v3675_v56  ;;  %v2282_v54 = vpop.f32.mrb[96].mxu0  ;;  %v2539_v2 = vpop.f32.mrb[96].mxu1 }
 0x496   : > { %v7818_v5 = vsel %vm6752_vm14, 4294967295, %v7817_v5  ;;  %v3950_v44 = vadd.f32 %v3949_v30, %v3677_v7  ;;  %v3260_v23 = vmax.f32 %v2271_v14, 0.0  ;;  %v3262_v60 = vmax.f32 %v2528_v39, 0.0  ;;  %v2284_v61 = vpop.f32.mrb[97].mxu0 }
 0x497   : > { %v3261_v53 = vmax.f32 %v2273_v10, 0.0  ;;  %v3263_v3 = vmax.f32 %v2530_v19, 0.0  ;;  %v2277_v12 = vadd.f32 %v2276_v26, %v6337_v8  ;;  %v2534_v33 = vadd.f32 %v2533_v34, %v6340_v13  ;;  %v2541_v10 = vpop.f32.mrb[97].mxu1 }
 0x498   : > { %v3682_v45 = vsel %vm6715_vm0, %v3260_v23, 0.0  ;;  %v3684_v63 = vsel %vm6715_vm0, %v3262_v60, 0.0  ;;  %v2279_v28 = vadd.f32 %v2278_v47, %v6343_v22  ;;  %v2536_v48 = vadd.f32 %v2535_v16, %v6346_v29 }
 0x499   : > { %v3840_v40 = vadd.f32 %v3839_v9, %v3682_v45  ;;  %v3914_v30 = vadd.f32 %v3913_v1, %v3684_v63  ;;  %v3683_v49 = vsel %vm6715_vm0, %v3261_v53, 0.0  ;;  %v3685_v59 = vsel %vm6715_vm0, %v3263_v3, 0.0  ;;  %v2288_v47 = vpop.f32.mrb[98].mxu0  ;;  %v2545_v16 = vpop.f32.mrb[98].mxu1 }
 0x49a   : > { %vm6770_vm15 = vcmp.lt.s32.totalorder %v6409_v15, %v6333_v58  ;;  %v7819_v24 = vmov 0  ;;  %v3877_v35 = vadd.f32 %v3876_v0, %v3683_v49  ;;  %v3951_v14 = vadd.f32 %v3950_v44, %v3685_v59  ;;  %v2290_v63 = vpop.f32.mrb[99].mxu0 }
 0x49b   : > { %v7820_v24 = vsel %vm6770_vm15, 4294967295, %v7819_v24  ;;  %v3268_v39 = vmax.f32 %v2277_v12, 0.0  ;;  %v3270_v46 = vmax.f32 %v2534_v33, 0.0  ;;  %v3269_v19 = vmax.f32 %v2279_v28, 0.0  ;;  %v2547_v28 = vpop.f32.mrb[99].mxu1 }
 0x49c   : > { %v3271_v9 = vmax.f32 %v2536_v48, 0.0  ;;  %v2283_v1 = vadd.f32 %v2282_v54, %v6337_v8  ;;  %v2540_v56 = vadd.f32 %v2539_v2, %v6340_v13  ;;  %v2285_v26 = vadd.f32 %v2284_v61, %v6343_v22 }
 0x49d   : > { %v3690_v7 = vsel %vm6734_vm1, %v3268_v39, 0.0  ;;  %v3692_v15 = vsel %vm6734_vm1, %v3270_v46, 0.0  ;;  %v2542_v34 = vadd.f32 %v2541_v10, %v6346_v29  ;;  %v3691_v23 = vsel %vm6734_vm1, %v3269_v19, 0.0  ;;  %v2294_v61 = vpop.f32.mrb[100].mxu0  ;;  %v2551_v10 = vpop.f32.mrb[100].mxu1 }
 0x49e   : > { %v3841_v0 = vadd.f32 %v3840_v40, %v3690_v7  ;;  %v3915_v44 = vadd.f32 %v3914_v30, %v3692_v15  ;;  %v3693_v60 = vsel %vm6734_vm1, %v3271_v9, 0.0  ;;  %vm6788_vm0 = vcmp.lt.s32.totalorder %v6412_v18, %v6333_v58  ;;  %v2296_v15 = vpop.f32.mrb[101].mxu0 }
 0x49f   : > { %v7821_v53 = vmov 0  ;;  %v3878_v3 = vadd.f32 %v3877_v35, %v3691_v23  ;;  %v3952_v12 = vadd.f32 %v3951_v14, %v3693_v60  ;;  %v3276_v33 = vmax.f32 %v2283_v1, 0.0 }
 0x4a0   : > { %v7822_v53 = vsel %vm6788_vm0, 4294967295, %v7821_v53  ;;  %v3278_v45 = vmax.f32 %v2540_v56, 0.0  ;;  %v3277_v48 = vmax.f32 %v2285_v26, 0.0  ;;  %v3279_v40 = vmax.f32 %v2542_v34, 0.0  ;;  %v2553_v26 = vpop.f32.mrb[101].mxu1 }
 0x4a1   : > { %v2289_v30 = vadd.f32 %v2288_v47, %v6337_v8  ;;  %v2546_v49 = vadd.f32 %v2545_v16, %v6340_v13  ;;  %v3698_v59 = vsel %vm6752_vm14, %v3276_v33, 0.0  ;;  %v2291_v54 = vadd.f32 %v2290_v63, %v6343_v22  ;;  %v2300_v63 = vpop.f32.mrb[102].mxu0 }
 0x4a2   : > { %v3700_v18 = vsel %vm6752_vm14, %v3278_v45, 0.0  ;;  %v2548_v2 = vadd.f32 %v2547_v28, %v6346_v29  ;;  %v3842_v35 = vadd.f32 %v3841_v0, %v3698_v59  ;;  %v3699_v39 = vsel %vm6752_vm14, %v3277_v48, 0.0  ;;  %v2557_v28 = vpop.f32.mrb[102].mxu1 }
 0x4a3   : > { %v3916_v14 = vadd.f32 %v3915_v44, %v3700_v18  ;;  %v3701_v46 = vsel %vm6752_vm14, %v3279_v40, 0.0  ;;  %vm6806_vm1 = vcmp.lt.s32.totalorder %v6424_v27, %v6333_v58  ;;  %v7823_v19 = vmov 0  ;;  %v2302_v18 = vpop.f32.mrb[103].mxu0 }
 0x4a4   : > { %v7824_v19 = vsel %vm6806_vm1, 4294967295, %v7823_v19  ;;  %v3879_v9 = vadd.f32 %v3878_v3, %v3699_v39  ;;  %v3953_v1 = vadd.f32 %v3952_v12, %v3701_v46  ;;  %v3284_v56 = vmax.f32 %v2289_v30, 0.0 }
 0x4a5   : > { %v3286_v7 = vmax.f32 %v2546_v49, 0.0  ;;  %v3285_v34 = vmax.f32 %v2291_v54, 0.0  ;;  %v3287_v0 = vmax.f32 %v2548_v2, 0.0  ;;  %v2295_v44 = vadd.f32 %v2294_v61, %v6337_v8  ;;  %v2559_v54 = vpop.f32.mrb[103].mxu1 }
 0x4a6   : > { %v2552_v23 = vadd.f32 %v2551_v10, %v6340_v13  ;;  %v3706_v60 = vsel %vm6770_vm15, %v3284_v56, 0.0  ;;  %v2297_v47 = vadd.f32 %v2296_v15, %v6343_v22  ;;  %v2554_v16 = vadd.f32 %v2553_v26, %v6346_v29  ;;  %v2306_v15 = vpop.f32.mrb[104].mxu0  ;;  %v2563_v26 = vpop.f32.mrb[104].mxu1 }
 0x4a7   : > { %v3708_v27 = vsel %vm6770_vm15, %v3286_v7, 0.0  ;;  %v3843_v3 = vadd.f32 %v3842_v35, %v3706_v60  ;;  %v3707_v33 = vsel %vm6770_vm15, %v3285_v34, 0.0  ;;  %v3709_v45 = vsel %vm6770_vm15, %v3287_v0, 0.0 }
 0x4a8   : > { %v3917_v12 = vadd.f32 %v3916_v14, %v3708_v27  ;;  %vm6824_vm14 = vcmp.lt.s32.totalorder %v6427_v17, %v6333_v58  ;;  %v7825_v48 = vmov 0  ;;  %v3880_v40 = vadd.f32 %v3879_v9, %v3707_v33  ;;  %v2308_v27 = vpop.f32.mrb[105].mxu0 }
 0x4a9   : > { %v7826_v48 = vsel %vm6824_vm14, 4294967295, %v7825_v48  ;;  %v3954_v30 = vadd.f32 %v3953_v1, %v3709_v45  ;;  %v3292_v49 = vmax.f32 %v2295_v44, 0.0  ;;  %v3294_v59 = vmax.f32 %v2552_v23, 0.0 }
 0x4aa   : > { %v3293_v2 = vmax.f32 %v2297_v47, 0.0  ;;  %v3295_v35 = vmax.f32 %v2554_v16, 0.0  ;;  %v2301_v14 = vadd.f32 %v2300_v63, %v6337_v8  ;;  %v2558_v39 = vadd.f32 %v2557_v28, %v6340_v13  ;;  %v2565_v47 = vpop.f32.mrb[105].mxu1 }
 0x4ab   : > { %v3714_v46 = vsel %vm6788_vm0, %v3292_v49, 0.0  ;;  %v3716_v17 = vsel %vm6788_vm0, %v3294_v59, 0.0  ;;  %v2303_v61 = vadd.f32 %v2302_v18, %v6343_v22  ;;  %v2560_v10 = vadd.f32 %v2559_v54, %v6346_v29  ;;  %v2312_v18 = vpop.f32.mrb[106].mxu0  ;;  %v2569_v54 = vpop.f32.mrb[106].mxu1 }
 0x4ac   : > { %v3844_v9 = vadd.f32 %v3843_v3, %v3714_v46  ;;  %v3918_v1 = vadd.f32 %v3917_v12, %v3716_v17  ;;  %v3715_v56 = vsel %vm6788_vm0, %v3293_v2, 0.0  ;;  %v3717_v7 = vsel %vm6788_vm0, %v3295_v35, 0.0  ;;  %v2314_v17 = vpop.f32.mrb[107].mxu0 }
 0x4ad   : > { %vm6842_vm15 = vcmp.lt.s32.totalorder %v6430_v52, %v6333_v58  ;;  %v7827_v34 = vmov 0  ;;  %v3881_v0 = vadd.f32 %v3880_v40, %v3715_v56  ;;  %v3955_v44 = vadd.f32 %v3954_v30, %v3717_v7 }
 0x4ae   : > { %v7828_v34 = vsel %vm6842_vm15, 4294967295, %v7827_v34  ;;  %v3300_v23 = vmax.f32 %v2301_v14, 0.0  ;;  %v3302_v60 = vmax.f32 %v2558_v39, 0.0  ;;  %v3301_v16 = vmax.f32 %v2303_v61, 0.0  ;;  %v2571_v61 = vpop.f32.mrb[107].mxu1 }
 0x4af   : > { %v3303_v3 = vmax.f32 %v2560_v10, 0.0  ;;  %v2307_v12 = vadd.f32 %v2306_v15, %v6337_v8  ;;  %v2564_v33 = vadd.f32 %v2563_v26, %v6340_v13  ;;  %v2309_v63 = vadd.f32 %v2308_v27, %v6343_v22  ;;  %v2318_v27 = vpop.f32.mrb[108].mxu0 }
 0x4b0   : > { %v3722_v45 = vsel %vm6806_vm1, %v3300_v23, 0.0  ;;  %v3724_v52 = vsel %vm6806_vm1, %v3302_v60, 0.0  ;;  %v2566_v28 = vadd.f32 %v2565_v47, %v6346_v29  ;;  %v3723_v49 = vsel %vm6806_vm1, %v3301_v16, 0.0  ;;  %v2575_v47 = vpop.f32.mrb[108].mxu1 }
 0x4b1   : > { %v3845_v40 = vadd.f32 %v3844_v9, %v3722_v45  ;;  %v3919_v30 = vadd.f32 %v3918_v1, %v3724_v52  ;;  %v3725_v59 = vsel %vm6806_vm1, %v3303_v3, 0.0  ;;  %vm6860_vm0 = vcmp.lt.s32.totalorder %v6433_v55, %v6333_v58  ;;  %v2320_v52 = vpop.f32.mrb[109].mxu0 }
 0x4b2   : > { %v7829_v2 = vmov 0  ;;  %v3882_v35 = vadd.f32 %v3881_v0, %v3723_v49  ;;  %v3956_v14 = vadd.f32 %v3955_v44, %v3725_v59  ;;  %v3308_v39 = vmax.f32 %v2307_v12, 0.0 }
 0x4b3   : > { %v7830_v2 = vsel %vm6860_vm0, 4294967295, %v7829_v2  ;;  %v3310_v46 = vmax.f32 %v2564_v33, 0.0  ;;  %v3309_v10 = vmax.f32 %v2309_v63, 0.0  ;;  %v3311_v9 = vmax.f32 %v2566_v28, 0.0  ;;  %v2577_v63 = vpop.f32.mrb[109].mxu1 }
 0x4b4   : > { %v2313_v1 = vadd.f32 %v2312_v18, %v6337_v8  ;;  %v2570_v56 = vadd.f32 %v2569_v54, %v6340_v13  ;;  %v3730_v7 = vsel %vm6824_vm14, %v3308_v39, 0.0  ;;  %v2315_v15 = vadd.f32 %v2314_v17, %v6343_v22  ;;  %v2324_v17 = vpop.f32.mrb[110].mxu0 }
 0x4b5   : > { %v3732_v55 = vsel %vm6824_vm14, %v3310_v46, 0.0  ;;  %v2572_v26 = vadd.f32 %v2571_v61, %v6346_v29  ;;  %v3846_v0 = vadd.f32 %v3845_v40, %v3730_v7  ;;  %v3731_v23 = vsel %vm6824_vm14, %v3309_v10, 0.0  ;;  %v2581_v61 = vpop.f32.mrb[110].mxu1  ;;  %v7833_v10 = vld [vmem:[#allocation8_spill] sm:$0xff] }
 0x4b6   : > { %v3920_v44 = vadd.f32 %v3919_v30, %v3732_v55  ;;  %v3733_v60 = vsel %vm6824_vm14, %v3311_v9, 0.0  ;;  %vm6878_vm1 = vcmp.lt.s32.totalorder %v6436_v25, %v6333_v58  ;;  %v7831_v16 = vmov 0 }
 0x4b7   : > { %v7832_v16 = vsel %vm6878_vm1, 4294967295, %v7831_v16  ;;  %v3883_v3 = vadd.f32 %v3882_v35, %v3731_v23  ;;  %v3957_v12 = vadd.f32 %v3956_v14, %v3733_v60  ;;  %v3316_v33 = vmax.f32 %v2313_v1, 0.0 }
 0x4b8   : > { %v3318_v45 = vmax.f32 %v2570_v56, 0.0  ;;  %v3317_v28 = vmax.f32 %v2315_v15, 0.0  ;;  %v3319_v40 = vmax.f32 %v2572_v26, 0.0  ;;  %v2319_v30 = vadd.f32 %v2318_v27, %v6337_v8  ;;  %v2326_v15 = vpop.f32.mrb[111].mxu0  ;;  %v2583_v26 = vpop.f32.mrb[111].mxu1 }
 0x4b9   : > { %v2576_v49 = vadd.f32 %v2575_v47, %v6340_v13  ;;  %v3738_v59 = vsel %vm6842_vm15, %v3316_v33, 0.0  ;;  %v2321_v18 = vadd.f32 %v2320_v52, %v6343_v22  ;;  %v2578_v54 = vadd.f32 %v2577_v63, %v6346_v29 }
 0x4ba   : > { %v3740_v25 = vsel %vm6842_vm15, %v3318_v45, 0.0  ;;  %v3847_v35 = vadd.f32 %v3846_v0, %v3738_v59  ;;  %v3739_v39 = vsel %vm6842_vm15, %v3317_v28, 0.0  ;;  %v3741_v46 = vsel %vm6842_vm15, %v3319_v40, 0.0  ;;  %v2330_v28 = vpop.f32.mrb[112].mxu0  ;;  %v2587_v40 = vpop.f32.mrb[112].mxu1 }
 0x4bb   : > { %v3921_v14 = vadd.f32 %v3920_v44, %v3740_v25  ;;  %vm6896_vm14 = vcmp.lt.s32.totalorder %v7833_v10, %v6333_v58  ;;  %v7834_v9 = vmov 0  ;;  %v3884_v1 = vadd.f32 %v3883_v3, %v3739_v39 }
 0x4bc   : > { %v7835_v9 = vsel %vm6896_vm14, 4294967295, %v7834_v9  ;;  %v3958_v56 = vadd.f32 %v3957_v12, %v3741_v46  ;;  %v3324_v7 = vmax.f32 %v2319_v30, 0.0  ;;  %v3326_v55 = vmax.f32 %v2576_v49, 0.0  ;;  %v7836_v30 = vld [vmem:[#allocation9_spill] sm:$0xff] }
 0x4bd   : > { %v3325_v0 = vmax.f32 %v2321_v18, 0.0  ;;  %v3327_v44 = vmax.f32 %v2578_v54, 0.0  ;;  %v2325_v23 = vadd.f32 %v2324_v17, %v6337_v8  ;;  %v2582_v60 = vadd.f32 %v2581_v61, %v6340_v13 }
 0x4be   : > { %v3746_v27 = vsel %vm6860_vm0, %v3324_v7, 0.0  ;;  %v3748_v47 = vsel %vm6860_vm0, %v3326_v55, 0.0  ;;  %v2327_v33 = vadd.f32 %v2326_v15, %v6343_v22  ;;  %v2584_v3 = vadd.f32 %v2583_v26, %v6346_v29 }
 0x4bf   : > { %v3848_v12 = vadd.f32 %v3847_v35, %v3746_v27  ;;  %v3922_v45 = vadd.f32 %v3921_v14, %v3748_v47  ;;  %v3747_v52 = vsel %vm6860_vm0, %v3325_v0, 0.0  ;;  %v3749_v63 = vsel %vm6860_vm0, %v3327_v44, 0.0  ;;  %v2332_v35 = vpop.f32.mrb[113].mxu0  ;;  %v2589_v14 = vpop.f32.mrb[113].mxu1 }
 0x4c0   : > { %vm6914_vm15 = vcmp.lt.s32.totalorder %v7836_v30, %v6333_v58  ;;  %v7837_v49 = vmov 0  ;;  %v3885_v59 = vadd.f32 %v3884_v1, %v3747_v52  ;;  %v3959_v25 = vadd.f32 %v3958_v56, %v3749_v63  ;;  %v2336_v44 = vpop.f32.mrb[114].mxu0 }
 0x4c1   : > { %v7838_v49 = vsel %vm6914_vm15, 4294967295, %v7837_v49  ;;  %v3332_v18 = vmax.f32 %v2325_v23, 0.0  ;;  %v3334_v54 = vmax.f32 %v2582_v60, 0.0  ;;  %v3333_v39 = vmax.f32 %v2327_v33, 0.0  ;;  %v2593_v23 = vpop.f32.mrb[114].mxu1  ;;  %v7839_v60 = vld [vmem:[#allocation10_spill] sm:$0xff] }
 0x4c2   : > { %v3335_v46 = vmax.f32 %v2584_v3, 0.0  ;;  %v2331_v17 = vadd.f32 %v2330_v28, %v6337_v8  ;;  %v2588_v61 = vadd.f32 %v2587_v40, %v6340_v13  ;;  %v2333_v55 = vadd.f32 %v2332_v35, %v6343_v22 }
 0x4c3   : > { %v3754_v10 = vsel %vm6878_vm1, %v3332_v18, 0.0  ;;  %v3756_v7 = vsel %vm6878_vm1, %v3334_v54, 0.0  ;;  %v2590_v1 = vadd.f32 %v2589_v14, %v6346_v29  ;;  %v3755_v26 = vsel %vm6878_vm1, %v3333_v39, 0.0 }
 0x4c4   : > { %v3849_v56 = vadd.f32 %v3848_v12, %v3754_v10  ;;  %v3923_v15 = vadd.f32 %v3922_v45, %v3756_v7  ;;  %v3757_v0 = vsel %vm6878_vm1, %v3335_v46, 0.0  ;;  %vm6932_vm0 = vcmp.lt.s32.totalorder %v7839_v60, %v6333_v58  ;;  %v2338_v12 = vpop.f32.mrb[115].mxu0  ;;  %v2595_v45 = vpop.f32.mrb[115].mxu1  ;;  %v7843_v10 = vld [vmem:[#allocation12_spill] sm:$0xff] }
 0x4c5   : > { %v7840_v27 = vmov 0  ;;  %v3886_v47 = vadd.f32 %v3885_v59, %v3755_v26  ;;  %v3960_v33 = vadd.f32 %v3959_v25, %v3757_v0  ;;  %v3340_v3 = vmax.f32 %v2331_v17, 0.0  ;;  %v2342_v17 = vpop.f32.mrb[116].mxu0 }
 0x4c6   : > { %v7841_v27 = vsel %vm6932_vm0, 4294967295, %v7840_v27  ;;  %v3342_v52 = vmax.f32 %v2588_v61, 0.0  ;;  %v3341_v63 = vmax.f32 %v2333_v55, 0.0  ;;  %v3343_v28 = vmax.f32 %v2590_v1, 0.0  ;;  %v2599_v61 = vpop.f32.mrb[116].mxu1 }
 0x4c7   : > { %7842 = vst [vmem:[#allocation8_spill] sm:$0xff] %v7841_v27  ;;  %v2337_v40 = vadd.f32 %v2336_v44, %v6337_v8  ;;  %v2594_v30 = vadd.f32 %v2593_v23, %v6340_v13  ;;  %v3762_v18 = vsel %vm6896_vm14, %v3340_v3, 0.0  ;;  %v2339_v35 = vadd.f32 %v2338_v12, %v6343_v22 }
 0x4c8   : > { %v3764_v54 = vsel %vm6896_vm14, %v3342_v52, 0.0  ;;  %v2596_v59 = vadd.f32 %v2595_v45, %v6346_v29  ;;  %v3850_v25 = vadd.f32 %v3849_v56, %v3762_v18  ;;  %v3763_v39 = vsel %vm6896_vm14, %v3341_v63, 0.0  ;;  %v2344_v56 = vpop.f32.mrb[117].mxu0 }
 0x4c9   : > { %v3924_v14 = vadd.f32 %v3923_v15, %v3764_v54  ;;  %v3765_v46 = vsel %vm6896_vm14, %v3343_v28, 0.0  ;;  %vm6950_vm1 = vcmp.lt.s32.totalorder %v7843_v10, %v6333_v58  ;;  %v7844_v7 = vmov 0  ;;  %v2601_v15 = vpop.f32.mrb[117].mxu1  ;;  %v7847_v54 = vld [vmem:[#allocation13_spill] sm:$0xff] }
 0x4ca   : > { %v7845_v7 = vsel %vm6950_vm1, 4294967295, %v7844_v7  ;;  %v3887_v55 = vadd.f32 %v3886_v47, %v3763_v39  ;;  %v3961_v1 = vadd.f32 %v3960_v33, %v3765_v46  ;;  %v3348_v26 = vmax.f32 %v2337_v40, 0.0  ;;  %v2605_v18 = vpop.f32.mrb[118].mxu1 }
 0x4cb   : > { %7846 = vst [vmem:[#allocation9_spill] sm:$0xff] %v7845_v7  ;;  %v3350_v0 = vmax.f32 %v2594_v30, 0.0  ;;  %v3349_v44 = vmax.f32 %v2339_v35, 0.0  ;;  %v3351_v23 = vmax.f32 %v2596_v59, 0.0  ;;  %v2343_v60 = vadd.f32 %v2342_v17, %v6337_v8  ;;  %v2348_v30 = vpop.f32.mrb[118].mxu0 }
 0x4cc   : > { %v2600_v3 = vadd.f32 %v2599_v61, %v6340_v13  ;;  %v3770_v52 = vsel %vm6914_vm15, %v3348_v26, 0.0  ;;  %v2345_v45 = vadd.f32 %v2344_v56, %v6343_v22  ;;  %v2602_v47 = vadd.f32 %v2601_v15, %v6346_v29 }
 0x4cd   : > { %v3772_v12 = vsel %vm6914_vm15, %v3350_v0, 0.0  ;;  %v3851_v33 = vadd.f32 %v3850_v25, %v3770_v52  ;;  %v3771_v28 = vsel %vm6914_vm15, %v3349_v44, 0.0  ;;  %v3773_v40 = vsel %vm6914_vm15, %v3351_v23, 0.0  ;;  %v2350_v25 = vpop.f32.mrb[119].mxu0 }
 0x4ce   : > { %v3925_v63 = vadd.f32 %v3924_v14, %v3772_v12  ;;  %vm6968_vm14 = vcmp.lt.s32.totalorder %v7847_v54, %v6333_v58  ;;  %v7848_v35 = vmov 0  ;;  %v3888_v59 = vadd.f32 %v3887_v55, %v3771_v28  ;;  %v2607_v14 = vpop.f32.mrb[119].mxu1  ;;  %v2354_v52 = vpop.f32.mrb[120].mxu0 }
 0x4cf   : > { %v7849_v35 = vsel %vm6968_vm14, 4294967295, %v7848_v35  ;;  %v3962_v39 = vadd.f32 %v3961_v1, %v3773_v40  ;;  %v3356_v46 = vmax.f32 %v2343_v60, 0.0  ;;  %v3358_v17 = vmax.f32 %v2600_v3, 0.0  ;;  %v2611_v12 = vpop.f32.mrb[120].mxu1 }
 0x4d0   : > { %7850 = vst [vmem:[#allocation10_spill] sm:$0xff] %v7849_v35  ;;  %v3357_v61 = vmax.f32 %v2345_v45, 0.0  ;;  %v3359_v10 = vmax.f32 %v2602_v47, 0.0  ;;  %v2349_v26 = vadd.f32 %v2348_v30, %v6337_v8  ;;  %v2606_v0 = vadd.f32 %v2605_v18, %v6340_v13 }
 0x4d1   : > { %v3778_v56 = vsel %vm6932_vm0, %v3356_v46, 0.0  ;;  %v3780_v15 = vsel %vm6932_vm0, %v3358_v17, 0.0  ;;  %v2351_v44 = vadd.f32 %v2350_v25, %v6343_v22  ;;  %v2608_v55 = vadd.f32 %v2607_v14, %v6346_v29 }
 0x4d2   : > { %v3852_v1 = vadd.f32 %v3851_v33, %v3778_v56  ;;  %v3926_v23 = vadd.f32 %v3925_v63, %v3780_v15  ;;  %v3779_v60 = vsel %vm6932_vm0, %v3357_v61, 0.0  ;;  %v3781_v3 = vsel %vm6932_vm0, %v3359_v10, 0.0  ;;  %v2356_v33 = vpop.f32.mrb[121].mxu0  ;;  %v2613_v63 = vpop.f32.mrb[121].mxu1 }
 0x4d3   : > { %vm6986_vm15 = vcmp.lt.s32.totalorder %v6497_v32, %v6333_v58  ;;  %v7851_v45 = vmov 0  ;;  %v3889_v47 = vadd.f32 %v3888_v59, %v3779_v60  ;;  %v3963_v28 = vadd.f32 %v3962_v39, %v3781_v3  ;;  %v2617_v56 = vpop.f32.mrb[122].mxu1 }
 0x4d4   : > { %v7852_v45 = vsel %vm6986_vm15, 4294967295, %v7851_v45  ;;  %v3364_v40 = vmax.f32 %v2349_v26, 0.0  ;;  %v3366_v30 = vmax.f32 %v2606_v0, 0.0  ;;  %v3365_v18 = vmax.f32 %v2351_v44, 0.0  ;;  %v2360_v0 = vpop.f32.mrb[122].mxu0 }
 0x4d5   : > { %7853 = vst [vmem:[#allocation12_spill] sm:$0xff] %v7852_v45  ;;  %v3367_v54 = vmax.f32 %v2608_v55, 0.0  ;;  %v2355_v46 = vadd.f32 %v2354_v52, %v6337_v8  ;;  %v2612_v17 = vadd.f32 %v2611_v12, %v6340_v13  ;;  %v2357_v14 = vadd.f32 %v2356_v33, %v6343_v22 }
 0x4d6   : > { %v3786_v25 = vsel %vm6950_vm1, %v3364_v40, 0.0  ;;  %v3788_v32 = vsel %vm6950_vm1, %v3366_v30, 0.0  ;;  %v2614_v59 = vadd.f32 %v2613_v63, %v6346_v29  ;;  %v3787_v10 = vsel %vm6950_vm1, %v3365_v18, 0.0 }
 0x4d7   : > { %v3853_v39 = vadd.f32 %v3852_v1, %v3786_v25  ;;  %v3927_v61 = vadd.f32 %v3926_v23, %v3788_v32  ;;  %v3789_v26 = vsel %vm6950_vm1, %v3367_v54, 0.0  ;;  %vm7004_vm0 = vcmp.lt.s32.totalorder %v6500_v50, %v6333_v58  ;;  %v2362_v1 = vpop.f32.mrb[123].mxu0  ;;  %v2619_v23 = vpop.f32.mrb[123].mxu1  ;;  %v7857_v32 = vld [vmem:[#allocation14_spill] sm:$0xff] }
 0x4d8   : > { %v7854_v15 = vmov 0  ;;  %v3890_v44 = vadd.f32 %v3889_v47, %v3787_v10  ;;  %v3964_v55 = vadd.f32 %v3963_v28, %v3789_v26  ;;  %v3372_v60 = vmax.f32 %v2355_v46, 0.0  ;;  %v2623_v25 = vpop.f32.mrb[124].mxu1 }
 0x4d9   : > { %v7855_v15 = vsel %vm7004_vm0, 4294967295, %v7854_v15  ;;  %v3374_v3 = vmax.f32 %v2612_v17, 0.0  ;;  %v3373_v52 = vmax.f32 %v2357_v14, 0.0  ;;  %v3375_v12 = vmax.f32 %v2614_v59, 0.0  ;;  %v2366_v17 = vpop.f32.mrb[124].mxu0 }
 0x4da   : > { %7856 = vst [vmem:[#allocation13_spill] sm:$0xff] %v7855_v15  ;;  %v2361_v40 = vadd.f32 %v2360_v0, %v6337_v8  ;;  %v2618_v30 = vadd.f32 %v2617_v56, %v6340_v13  ;;  %v3794_v33 = vsel %vm6968_vm14, %v3372_v60, 0.0  ;;  %v2363_v63 = vadd.f32 %v2362_v1, %v6343_v22 }
 0x4db   : > { %v3796_v50 = vsel %vm6968_vm14, %v3374_v3, 0.0  ;;  %v2620_v47 = vadd.f32 %v2619_v23, %v6346_v29  ;;  %v3854_v28 = vadd.f32 %v3853_v39, %v3794_v33  ;;  %v3795_v54 = vsel %vm6968_vm14, %v3373_v52, 0.0  ;;  %v2368_v39 = vpop.f32.mrb[125].mxu0 }
 0x4dc   : > { %v3928_v18 = vadd.f32 %v3927_v61, %v3796_v50  ;;  %v3797_v46 = vsel %vm6968_vm14, %v3375_v12, 0.0  ;;  %vm7022_vm1 = vcmp.lt.s32.totalorder %v7857_v32, %v6333_v58  ;;  %v7858_v14 = vmov 0  ;;  %v2625_v61 = vpop.f32.mrb[125].mxu1  ;;  %v2372_v33 = vpop.f32.mrb[126].mxu0 }
 0x4dd   : > { %v7859_v14 = vsel %vm7022_vm1, 4294967295, %v7858_v14  ;;  %v3891_v59 = vadd.f32 %v3890_v44, %v3795_v54  ;;  %v3965_v10 = vadd.f32 %v3964_v55, %v3797_v46  ;;  %v3380_v26 = vmax.f32 %v2361_v40, 0.0  ;;  %v2629_v50 = vpop.f32.mrb[126].mxu1 }
 0x4de   : > { %7860 = vst [vmem:[#allocation14_spill] sm:$0xff] %v7859_v14  ;;  %v3382_v0 = vmax.f32 %v2618_v30, 0.0  ;;  %v3381_v56 = vmax.f32 %v2363_v63, 0.0  ;;  %v3383_v60 = vmax.f32 %v2620_v47, 0.0  ;;  %v2367_v3 = vadd.f32 %v2366_v17, %v6337_v8  ;;  %v2374_v17 = vpop.f32.mrb[127].mxu0 }
 0x4df   : > { %v2624_v1 = vadd.f32 %v2623_v25, %v6340_v13  ;;  %v3802_v23 = vsel %vm6986_vm15, %v3380_v26, 0.0  ;;  %v2369_v52 = vadd.f32 %v2368_v39, %v6343_v22  ;;  %v2626_v44 = vadd.f32 %v2625_v61, %v6346_v29  ;;  %v2631_v25 = vpop.f32.mrb[127].mxu1 }
 0x4e0   : > { %v3804_v58 = vsel %vm6986_vm15, %v3382_v0, 0.0  ;;  %v3855_v55 = vadd.f32 %v3854_v28, %v3802_v23  ;;  %v3803_v40 = vsel %vm6986_vm15, %v3381_v56, 0.0  ;;  %v3805_v30 = vsel %vm6986_vm15, %v3383_v60, 0.0 }
 0x4e1   : > { %v3929_v12 = vadd.f32 %v3928_v18, %v3804_v58  ;;  %v3892_v63 = vadd.f32 %v3891_v59, %v3803_v40  ;;  %v3966_v47 = vadd.f32 %v3965_v10, %v3805_v30  ;;  %v3388_v54 = vmax.f32 %v2367_v3, 0.0  ;;  %v7046_v59 = vld [vmem:[%s6316_s29] sm:$0xff]  ;;  %v2700_v3 = vpop.f32.mrb[128].mxu0 }
 0x4e2   : > { %v3390_v46 = vmax.f32 %v2624_v1, 0.0  ;;  %v3389_v32 = vmax.f32 %v2369_v52, 0.0  ;;  %v3391_v26 = vmax.f32 %v2626_v44, 0.0  ;;  %v2373_v28 = vadd.f32 %v2372_v33, %v6337_v8  ;;  %v7057_v1 = vpop.f32.mrb[128].mxu1  ;;  %v2702_v44 = vpop.f32.mrb[129].mxu0 }
 0x4e3   : > { %v2630_v18 = vadd.f32 %v2629_v50, %v6340_v13  ;;  %v3810_v0 = vsel %vm7004_vm0, %v3388_v54, 0.0  ;;  %v2375_v61 = vadd.f32 %v2374_v17, %v6343_v22  ;;  %v7051_v10 = vrot.slane %v7046_v59, %v2102_v37  ;;  %v7059_v40 = vpop.f32.mrb[129].mxu1 }
 0x4e4   : > { %v3812_v39 = vsel %vm7004_vm0, %v3390_v46, 0.0  ;;  %v3856_v56 = vadd.f32 %v3855_v55, %v3810_v0  ;;  %v3811_v8 = vsel %vm7004_vm0, %v3389_v32, 0.0  ;;  %v3813_v13 = vsel %vm7004_vm0, %v3391_v26, 0.0  ;;  %v2706_v46 = vpop.f32.mrb[130].mxu0  ;;  %v7069_v17 = vpop.f32.mrb[130].mxu1 }
 0x4e5   : > { %v3930_v60 = vadd.f32 %v3929_v12, %v3812_v39  ;;  %v3893_v23 = vadd.f32 %v3892_v63, %v3811_v8  ;;  %v3967_v22 = vadd.f32 %v3966_v47, %v3813_v13  ;;  %v3396_v58 = vmax.f32 %v2373_v28, 0.0  ;;  %7861 = vst [vmem:[#allocation15_spill] sm:$0xff] %v7069_v17  ;;  %v7072_v26 = vpop.f32.mrb[131].mxu1 }
 0x4e6   : > { %v3398_v52 = vmax.f32 %v2630_v18, 0.0  ;;  %v3397_v37 = vmax.f32 %v2375_v61, 0.0  ;;  %v2632_v55 = vadd.f32 %v2631_v25, %v6346_v29  ;;  %v2701_v33 = vadd.f32 %v2700_v3, %v6551_v51  ;;  %v2708_v25 = vpop.f32.mrb[131].mxu0  ;;  %7862 = vst [vmem:[#allocation16_spill] sm:$0xff] %v7072_v26 }
 0x4e7   : > { %v3818_v12 = vsel %vm7022_vm1, %v3396_v58, 0.0  ;;  %v2703_v29 = vadd.f32 %v2702_v44, %v7051_v10  ;;  %v5318_v61 = vmov 1966171168   ;;  %v2712_v58 = vpop.f32.mrb[132].mxu0  ;;  %v2709_v26 = vadd.f32 %v2708_v25, %v7051_v10 }
 0x4e8   : > { %v3820_v30 = vsel %vm7022_vm1, %v3398_v52, 0.0  ;;  %v3857_v50 = vadd.f32 %v3856_v56, %v3818_v12  ;;  %v3819_v63 = vsel %vm7022_vm1, %v3397_v37, 0.0  ;;  %v3399_v47 = vmax.f32 %v2632_v55, 0.0  ;;  %v7076_v52 = vpop.f32.mrb[132].mxu1  ;;  %v2714_v12 = vpop.f32.mrb[133].mxu0 }
 0x4e9   : > { %v3931_v54 = vadd.f32 %v3930_v60, %v3820_v30  ;;  %v3894_v32 = vadd.f32 %v3893_v23, %v3819_v63  ;;  %v4136_v56 = vunpack.c.l.s4 %v5318_v61  ;;  %v3152_v3 = vmax.f32 %v2701_v33, 0.0  ;;  %7863 = vst [vmem:[#allocation17_spill] sm:$0xff] %v7076_v52  ;;  %v7079_v30 = vpop.f32.mrb[133].mxu1 }
 0x4ea   : > { %v3858_v28 = vrot.slane %v3857_v50, 4  ;;  %v3821_v0 = vsel %vm7022_vm1, %v3399_v47, 0.0  ;;  %v3153_v37 = vmax.f32 %v2703_v29, 0.0  ;;  %v2707_v55 = vadd.f32 %v2706_v46, %v6551_v51  ;;  %7864 = vst [vmem:[#allocation18_spill] sm:$0xff] %v7079_v30  ;;  %v2718_v29 = vpop.f32.mrb[134].mxu0 }
 0x4eb   : > { %v3932_v18 = vrot.slane %v3931_v54, 4  ;;  %v3895_v39 = vrot.slane %v3894_v32, 4  ;;  %v3968_v60 = vadd.f32 %v3967_v22, %v3821_v0  ;;  %v4137_v22 = vunpack.c.0.s8 %v4136_v56  ;;  %v2720_v56 = vpop.f32.mrb[135].mxu0 }
 0x4ec   : > { %v3859_v8 = vadd.f32 %v3858_v28, %v3857_v50  ;;  %v3161_v0 = vmax.f32 %v2709_v26, 0.0  ;;  %v3575_v30 = vsel %vm6352_vm2, %v3153_v37, 0.0  ;;  %v2713_v37 = vadd.f32 %v2712_v58, %v6551_v51 }
 0x4ed   : > { %v3933_v13 = vadd.f32 %v3932_v18, %v3931_v54  ;;  %v3896_v23 = vadd.f32 %v3895_v39, %v3894_v32  ;;  %v3969_v44 = vrot.slane %v3968_v60, 4  ;;  %v3160_v54 = vmax.f32 %v2707_v55, 0.0  ;;  %v7084_v39 = vpop.f32.mrb[134].mxu1 }
 0x4ee   : > { %v3860_v63 = vrot.slane %v3859_v8, 2  ;;  %v3574_v32 = vsel %vm6352_vm2, %v3152_v3, 0.0  ;;  %7866 = vst [vmem:[#allocation19_spill] sm:$0xff] %v7084_v39  ;;  %v3583_v26 = vsel %vm6364_vm3, %v3161_v0, 0.0  ;;  %v3168_v0 = vmax.f32 %v2713_v37, 0.0 }
 0x4ef   : > { %v3934_v47 = vrot.slane %v3933_v13, 2  ;;  %v3897_v61 = vrot.slane %v3896_v23, 2  ;;  %v3970_v50 = vadd.f32 %v3969_v44, %v3968_v60  ;;  %v3582_v25 = vsel %vm6364_vm3, %v3160_v54, 0.0  ;;  %v7090_v60 = vpop.f32.mrb[135].mxu1 }
 0x4f0   : > { %v3861_v33 = vadd.f32 %v3860_v63, %v3859_v8  ;;  %7868 = vst [vmem:[#allocation20_spill] sm:$0xff] %v7090_v60  ;;  %v3975_v44 = vadd.f32 %v3582_v25, %v3574_v32  ;;  %v4012_v63 = vadd.f32 %v3583_v26, %v3575_v30  ;;  %v7098_v54 = vpop.f32.mrb[136].mxu1  ;;  %v2715_v32 = vadd.f32 %v2714_v12, %v7051_v10 }
 0x4f1   : > { %v3935_v28 = vadd.f32 %v3934_v47, %v3933_v13  ;;  %v3898_v46 = vadd.f32 %v3897_v61, %v3896_v23  ;;  %v3971_v52 = vrot.slane %v3970_v50, 2  ;;  %v7095_v47 = vsub.s32 %v4137_v22, %v6309_v21  ;;  %v2724_v61 = vpop.f32.mrb[136].mxu0  ;;  %7870 = vst [vmem:[#allocation22_spill] sm:$0xff] %v7098_v54  ;;  %v7101_v17 = vpop.f32.mrb[137].mxu1  ;;  %v7936_v35 = vld [vmem:[#allocation18_spill] sm:$0xff] }
 0x4f2   : > { %v3862_v8 = vrot.slane %v3861_v33, 1  ;;  %v2726_v25 = vpop.f32.mrb[137].mxu0  ;;  %v3169_v22 = vmax.f32 %v2715_v32, 0.0  ;;  %v3590_v58 = vsel %vm6419_vm4, %v3168_v0, 0.0  ;;  %v7106_v54 = vpop.f32.mrb[138].mxu1  ;;  %v2721_v32 = vadd.f32 %v2720_v56, %v7051_v10 }
 0x4f3   : > { %v3936_v13 = vrot.slane %v3935_v28, 1  ;;  %v3899_v3 = vrot.slane %v3898_v46, 1  ;;  %v3972_v55 = vadd.f32 %v3971_v52, %v3970_v50  ;;  %7869 = vst [vmem:[#allocation21_spill] sm:$0xff] %v7095_v47  ;;  %v2719_v52 = vadd.f32 %v2718_v29, %v6551_v51  ;;  %v2730_v26 = vpop.f32.mrb[138].mxu0  ;;  %v7113_v29 = vpop.f32.mrb[139].mxu1 }
 0x4f4   : > { %v3863_v23 = vadd.f32 %v3862_v8, %v3861_v33  ;;  %v2725_v0 = vadd.f32 %v2724_v61, %v6551_v51 }
 0x4f5   : > { %v3937_v39 = vadd.f32 %v3936_v13, %v3935_v28  ;;  %v3900_v60 = vadd.f32 %v3899_v3, %v3898_v46  ;;  %v3973_v18 = vrot.slane %v3972_v55, 1  ;;  %v3176_v8 = vmax.f32 %v2719_v52, 0.0  ;;  %v2732_v3 = vpop.f32.mrb[139].mxu0  ;;  %v7123_v52 = vpop.f32.mrb[140].mxu1 }
 0x4f6   : > { %v3976_v46 = vadd.f32 %v3975_v44, %v3590_v58  ;;  %v3591_v13 = vsel %vm6419_vm4, %v3169_v22, 0.0  ;;  %v2736_v44 = vpop.f32.mrb[140].mxu0  ;;  %v7127_v22 = vpop.f32.mrb[141].mxu1  ;;  %v3184_v58 = vmax.f32 %v2725_v0, 0.0 }
 0x4f7   : > { %v4131_v30 = vcombine.low %v3863_v23, %v3900_v60  ;;  %v3974_v50 = vadd.f32 %v3973_v18, %v3972_v55  ;;  %v4013_v18 = vadd.f32 %v4012_v63, %v3591_v13  ;;  %v3598_v55 = vsel %vm6456_vm5, %v3176_v8, 0.0  ;;  %v7938_v60 = vld [vmem:[#allocation20_spill] sm:$0xff] }
 0x4f8   : > { %v3977_v37 = vadd.f32 %v3976_v46, %v3598_v55  ;;  %v3177_v63 = vmax.f32 %v2721_v32, 0.0  ;;  %v7136_v55 = vpop.f32.mrb[142].mxu1 }
 0x4f9   : > { %v7109_v28 = vrot.slane %v4131_v30, %v7095_v47  ;;  %v4132_v12 = vcombine.low %v3937_v39, %v3974_v50  ;;  %v2727_v39 = vadd.f32 %v2726_v25, %v7051_v10  ;;  %v2738_v50 = vpop.f32.mrb[141].mxu0  ;;  %v3606_v25 = vsel %vm6492_vm6, %v3184_v58, 0.0  ;;  %7875 = vst [vmem:[#allocation23_spill] sm:$0xff] %v7136_v55  ;;  %v7138_v0 = vpop.f32.mrb[143].mxu1 }
 0x4fa   : > { %v3599_v56 = vsel %vm6456_vm5, %v3177_v63, 0.0  ;;  %v2742_v13 = vpop.f32.mrb[142].mxu0  ;;  %v3978_v32 = vadd.f32 %v3977_v37, %v3606_v25  ;;  %v2737_v63 = vadd.f32 %v2736_v44, %v6551_v51  ;;  %v2739_v58 = vadd.f32 %v2738_v50, %v7051_v10  ;;  %v7145_v55 = vpop.f32.mrb[144].mxu1 }
 0x4fb   : > { %7872 = vst [vmem:[#allocation7_spill] sm:$0xff] %v7109_v28  ;;  %v7118_v23 = vrot.slane %v4132_v12, %v7095_v47  ;;  %v3185_v8 = vmax.f32 %v2727_v39, 0.0  ;;  %v2731_v12 = vadd.f32 %v2730_v26, %v6551_v51  ;;  %v4014_v61 = vadd.f32 %v4013_v18, %v3599_v56  ;;  %7876 = vst [vmem:[#allocation24_spill] sm:$0xff] %v7145_v55  ;;  %v7147_v25 = vpop.f32.mrb[145].mxu1 }
 0x4fc   : > { %v2733_v26 = vadd.f32 %v2732_v3, %v7051_v10  ;;  %v3200_v28 = vmax.f32 %v2737_v63, 0.0  ;;  %v3201_v37 = vmax.f32 %v2739_v58, 0.0  ;;  %7877 = vst [vmem:[#allocation25_spill] sm:$0xff] %v7147_v25 }
 0x4fd   : > { %7874 = vst [vmem:[#allocation11_spill] sm:$0xff] %v7118_v23  ;;  %v3607_v46 = vsel %vm6492_vm6, %v3185_v8, 0.0  ;;  %v3192_v30 = vmax.f32 %v2731_v12, 0.0  ;;  %v2744_v23 = vpop.f32.mrb[143].mxu0 }
 0x4fe   : > { %v4015_v39 = vadd.f32 %v4014_v61, %v3607_v46  ;;  %v3193_v8 = vmax.f32 %v2733_v26, 0.0  ;;  %v2748_v47 = vpop.f32.mrb[144].mxu0  ;;  %v3622_v44 = vsel %vm6546_vm8, %v3200_v28, 0.0  ;;  %v3623_v46 = vsel %vm6546_vm8, %v3201_v37, 0.0 }
 0x4ff   : > { %v3614_v18 = vsel %vm6520_vm7, %v3192_v30, 0.0  ;;  %v2750_v12 = vpop.f32.mrb[145].mxu0  ;;  %v2743_v30 = vadd.f32 %v2742_v13, %v6551_v51  ;;  %v2745_v26 = vadd.f32 %v2744_v23, %v7051_v10  ;;  %v2749_v25 = vadd.f32 %v2748_v47, %v6551_v51 }
 0x500   : > { %v3979_v56 = vadd.f32 %v3978_v32, %v3614_v18  ;;  %v3615_v3 = vsel %vm6520_vm7, %v3193_v8, 0.0  ;;  %v2754_v63 = vpop.f32.mrb[146].mxu0  ;;  %v7157_v18 = vpop.f32.mrb[146].mxu1  ;;  %v2751_v23 = vadd.f32 %v2750_v12, %v7051_v10 }
 0x501   : > { %v4016_v61 = vadd.f32 %v4015_v39, %v3615_v3  ;;  %v3208_v32 = vmax.f32 %v2743_v30, 0.0  ;;  %7878 = vst [vmem:[#allocation26_spill] sm:$0xff] %v7157_v18  ;;  %v2756_v8 = vpop.f32.mrb[147].mxu0  ;;  %v7160_v55 = vpop.f32.mrb[147].mxu1  ;;  %v3209_v13 = vmax.f32 %v2745_v26, 0.0 }
 0x502   : > { %v3980_v50 = vadd.f32 %v3979_v56, %v3622_v44  ;;  %7879 = vst [vmem:[#allocation27_spill] sm:$0xff] %v7160_v55  ;;  %v3216_v56 = vmax.f32 %v2749_v25, 0.0  ;;  %v2760_v3 = vpop.f32.mrb[148].mxu0  ;;  %v7167_v44 = vpop.f32.mrb[148].mxu1  ;;  %v2757_v25 = vadd.f32 %v2756_v8, %v7051_v10 }
 0x503   : > { %v4017_v58 = vadd.f32 %v4016_v61, %v3623_v46  ;;  %v3630_v28 = vsel %vm6572_vm9, %v3208_v32, 0.0  ;;  %v3631_v37 = vsel %vm6572_vm9, %v3209_v13, 0.0  ;;  %7880 = vst [vmem:[#allocation28_spill] sm:$0xff] %v7167_v44  ;;  %v2762_v61 = vpop.f32.mrb[149].mxu0  ;;  %v7171_v46 = vpop.f32.mrb[149].mxu1  ;;  %v3217_v32 = vmax.f32 %v2751_v23, 0.0 }
 0x504   : > { %v3981_v39 = vadd.f32 %v3980_v50, %v3630_v28  ;;  %v3638_v47 = vsel %vm6594_vm10, %v3216_v56, 0.0  ;;  %v2755_v50 = vadd.f32 %v2754_v63, %v6551_v51  ;;  %v2761_v26 = vadd.f32 %v2760_v3, %v6551_v51  ;;  %v2766_v13 = vpop.f32.mrb[150].mxu0  ;;  %v7942_v11 = vld [vmem:[#allocation25_spill] sm:$0xff] }
 0x505   : > { %v4018_v30 = vadd.f32 %v4017_v58, %v3631_v37  ;;  %v3639_v12 = vsel %vm6594_vm10, %v3217_v32, 0.0  ;;  %v7178_v58 = vpop.f32.mrb[150].mxu1  ;;  %v3225_v56 = vmax.f32 %v2757_v25, 0.0  ;;  %v2768_v44 = vpop.f32.mrb[151].mxu0  ;;  %v2763_v8 = vadd.f32 %v2762_v61, %v7051_v10 }
 0x506   : > { %v3982_v55 = vadd.f32 %v3981_v39, %v3638_v47  ;;  %v3224_v28 = vmax.f32 %v2755_v50, 0.0  ;;  %7881 = vst [vmem:[#allocation29_spill] sm:$0xff] %v7178_v58  ;;  %v7180_v18 = vpop.f32.mrb[151].mxu1  ;;  %v3232_v63 = vmax.f32 %v2761_v26, 0.0  ;;  %v2769_v61 = vadd.f32 %v2768_v44, %v7051_v10 }
 0x507   : > { %v4019_v37 = vadd.f32 %v4018_v30, %v3639_v12  ;;  %7882 = vst [vmem:[#allocation30_spill] sm:$0xff] %v7180_v18  ;;  %v3647_v3 = vsel %vm6615_vm11, %v3225_v56, 0.0  ;;  %v3233_v50 = vmax.f32 %v2763_v8, 0.0  ;;  %v2772_v30 = vpop.f32.mrb[152].mxu0  ;;  %v7189_v25 = vpop.f32.mrb[152].mxu1  ;;  %v2767_v18 = vadd.f32 %v2766_v13, %v6551_v51 }
 0x508   : > { %v3646_v39 = vsel %vm6615_vm11, %v3224_v28, 0.0  ;;  %v3654_v32 = vsel %vm6635_vm12, %v3232_v63, 0.0  ;;  %7883 = vst [vmem:[#allocation31_spill] sm:$0xff] %v7189_v25  ;;  %v2774_v58 = vpop.f32.mrb[153].mxu0  ;;  %v7192_v28 = vpop.f32.mrb[153].mxu1  ;;  %v2773_v26 = vadd.f32 %v2772_v30, %v6551_v51 }
 0x509   : > { %v3983_v23 = vadd.f32 %v3982_v55, %v3646_v39  ;;  %v4020_v47 = vadd.f32 %v4019_v37, %v3647_v3  ;;  %7884 = vst [vmem:[#allocation32_spill] sm:$0xff] %v7192_v28  ;;  %v3655_v55 = vsel %vm6635_vm12, %v3233_v50, 0.0  ;;  %v3240_v56 = vmax.f32 %v2767_v18, 0.0  ;;  %v2778_v8 = vpop.f32.mrb[154].mxu0  ;;  %v7198_v3 = vpop.f32.mrb[154].mxu1  ;;  %v7944_v42 = vld [vmem:[#allocation27_spill] sm:$0xff] }
 0x50a   : > { %v3241_v39 = vmax.f32 %v2769_v61, 0.0  ;;  %v3248_v63 = vmax.f32 %v2773_v26, 0.0  ;;  %7885 = vst [vmem:[#allocation33_spill] sm:$0xff] %v7198_v3  ;;  %v7203_v28 = vpop.f32.mrb[155].mxu1  ;;  %vm7887_vm12 = vnez %v7810_v43  ;;  %v2779_v61 = vadd.f32 %v2778_v8, %v6551_v51 }
 0x50b   : > { %v3984_v12 = vadd.f32 %v3983_v23, %v3654_v32  ;;  %v4021_v37 = vadd.f32 %v4020_v47, %v3655_v55  ;;  %v3662_v13 = vsel %vm6655_vm13, %v3240_v56, 0.0  ;;  %v2775_v23 = vadd.f32 %v2774_v58, %v7051_v10  ;;  %v2780_v32 = vpop.f32.mrb[155].mxu0  ;;  %7886 = vst [vmem:[#allocation34_spill] sm:$0xff] %v7203_v28 }
 0x50c   : > { %v3663_v44 = vsel %vm6655_vm13, %v3241_v39, 0.0  ;;  %v3670_v18 = vsel %vm7887_vm12, %v3248_v63, 0.0  ;;  %v2781_v26 = vadd.f32 %v2780_v32, %v7051_v10  ;;  %v3256_v28 = vmax.f32 %v2779_v61, 0.0 }
 0x50d   : > { %v3985_v50 = vadd.f32 %v3984_v12, %v3662_v13  ;;  %v4022_v47 = vadd.f32 %v4021_v37, %v3663_v44  ;;  %v3249_v30 = vmax.f32 %v2775_v23, 0.0  ;;  %v2784_v56 = vpop.f32.mrb[156].mxu0  ;;  %v7211_v3 = vpop.f32.mrb[156].mxu1  ;;  %vm7889_vm13 = vnez %v7812_v4 }
 0x50e   : > { %v2786_v12 = vpop.f32.mrb[157].mxu0  ;;  %v7215_v13 = vpop.f32.mrb[157].mxu1  ;;  %v3257_v25 = vmax.f32 %v2781_v26, 0.0  ;;  %v2785_v37 = vadd.f32 %v2784_v56, %v6551_v51  ;;  %v3678_v63 = vsel %vm7889_vm13, %v3256_v28, 0.0  ;;  %v7948_v6 = vld [vmem:[#allocation30_spill] sm:$0xff] }
 0x50f   : > { %v3986_v55 = vadd.f32 %v3985_v50, %v3670_v18  ;;  %v3671_v58 = vsel %vm7887_vm12, %v3249_v30, 0.0  ;;  %7888 = vst [vmem:[#allocation35_spill] sm:$0xff] %v7215_v13  ;;  %v2787_v23 = vadd.f32 %v2786_v12, %v7051_v10  ;;  %vm7891_vm12 = vnez %v7814_v62 }
 0x510   : > { %v4023_v39 = vadd.f32 %v4022_v47, %v3671_v58  ;;  %v3679_v8 = vsel %vm7889_vm13, %v3257_v25, 0.0  ;;  %v3264_v30 = vmax.f32 %v2785_v37, 0.0  ;;  %vm7894_vm13 = vnez %v7816_v41 }
 0x511   : > { %v2790_v32 = vpop.f32.mrb[158].mxu0  ;;  %v7223_v50 = vpop.f32.mrb[158].mxu1  ;;  %v3987_v44 = vadd.f32 %v3986_v55, %v3678_v63  ;;  %v3265_v61 = vmax.f32 %v2787_v23, 0.0 }
 0x512   : > { %7890 = vst [vmem:[#allocation36_spill] sm:$0xff] %v7223_v50  ;;  %v4024_v18 = vadd.f32 %v4023_v39, %v3679_v8  ;;  %v2792_v13 = vpop.f32.mrb[159].mxu0  ;;  %v7225_v47 = vpop.f32.mrb[159].mxu1  ;;  %v2791_v26 = vadd.f32 %v2790_v32, %v6551_v51  ;;  %v3686_v28 = vsel %vm7891_vm12, %v3264_v30, 0.0 }
 0x513   : > { %v2793_v56 = vadd.f32 %v2792_v13, %v7051_v10  ;;  %v3988_v25 = vadd.f32 %v3987_v44, %v3686_v28  ;;  %v3687_v58 = vsel %vm7891_vm12, %v3265_v61, 0.0  ;;  %vm7897_vm12 = vnez %v7818_v5 }
 0x514   : > { %v4025_v55 = vadd.f32 %v4024_v18, %v3687_v58  ;;  %v3272_v39 = vmax.f32 %v2791_v26, 0.0 }
 0x515   : > { %v2796_v12 = vpop.f32.mrb[160].mxu0  ;;  %v7233_v50 = vpop.f32.mrb[160].mxu1  ;;  %v3273_v37 = vmax.f32 %v2793_v56, 0.0 }
 0x516   : > { %7892 = vst [vmem:[#allocation37_spill] sm:$0xff] %v7233_v50  ;;  %v2798_v63 = vpop.f32.mrb[161].mxu0  ;;  %v7235_v8 = vpop.f32.mrb[161].mxu1  ;;  %v2797_v23 = vadd.f32 %v2796_v12, %v6551_v51  ;;  %v3694_v32 = vsel %vm7894_vm13, %v3272_v39, 0.0 }
 0x517   : > { %7893 = vst [vmem:[#allocation38_spill] sm:$0xff] %v7235_v8  ;;  %v3695_v13 = vsel %vm7894_vm13, %v3273_v37, 0.0  ;;  %v2799_v44 = vadd.f32 %v2798_v63, %v7051_v10  ;;  %v3989_v30 = vadd.f32 %v3988_v25, %v3694_v32  ;;  %vm7900_vm13 = vnez %v7820_v24 }
 0x518   : > { %v4026_v61 = vadd.f32 %v4025_v55, %v3695_v13  ;;  %v3280_v28 = vmax.f32 %v2797_v23, 0.0 }
 0x519   : > { %v2802_v50 = vpop.f32.mrb[162].mxu0  ;;  %v7243_v18 = vpop.f32.mrb[162].mxu1  ;;  %v3281_v26 = vmax.f32 %v2799_v44, 0.0 }
 0x51a   : > { %7895 = vst [vmem:[#allocation39_spill] sm:$0xff] %v7243_v18  ;;  %v2803_v56 = vadd.f32 %v2802_v50, %v6551_v51  ;;  %v2804_v58 = vpop.f32.mrb[163].mxu0  ;;  %v7246_v8 = vpop.f32.mrb[163].mxu1  ;;  %v3702_v12 = vsel %vm7897_vm12, %v3280_v28, 0.0 }
 0x51b   : > { %7896 = vst [vmem:[#allocation40_spill] sm:$0xff] %v7246_v8  ;;  %v2805_v39 = vadd.f32 %v2804_v58, %v7051_v10  ;;  %v3990_v37 = vadd.f32 %v3989_v30, %v3702_v12  ;;  %v3703_v25 = vsel %vm7897_vm12, %v3281_v26, 0.0  ;;  %vm7902_vm12 = vnez %v7822_v53 }
 0x51c   : > { %v4027_v55 = vadd.f32 %v4026_v61, %v3703_v25  ;;  %v3288_v63 = vmax.f32 %v2803_v56, 0.0 }
 0x51d   : > { %v3289_v23 = vmax.f32 %v2805_v39, 0.0  ;;  %v2808_v32 = vpop.f32.mrb[164].mxu0  ;;  %v7253_v13 = vpop.f32.mrb[164].mxu1 }
 0x51e   : > { %7898 = vst [vmem:[#allocation41_spill] sm:$0xff] %v7253_v13  ;;  %v2809_v50 = vadd.f32 %v2808_v32, %v6551_v51  ;;  %v2810_v44 = vpop.f32.mrb[165].mxu0  ;;  %v7256_v18 = vpop.f32.mrb[165].mxu1  ;;  %v3710_v28 = vsel %vm7900_vm13, %v3288_v63, 0.0 }
 0x51f   : > { %7899 = vst [vmem:[#allocation42_spill] sm:$0xff] %v7256_v18  ;;  %v3711_v30 = vsel %vm7900_vm13, %v3289_v23, 0.0  ;;  %v2811_v58 = vadd.f32 %v2810_v44, %v7051_v10  ;;  %v3991_v26 = vadd.f32 %v3990_v37, %v3710_v28  ;;  %vm7905_vm13 = vnez %v7824_v19 }
 0x520   : > { %v4028_v61 = vadd.f32 %v4027_v55, %v3711_v30  ;;  %v3296_v56 = vmax.f32 %v2809_v50, 0.0 }
 0x521   : > { %v3297_v12 = vmax.f32 %v2811_v58, 0.0  ;;  %v2814_v39 = vpop.f32.mrb[166].mxu0  ;;  %v7263_v25 = vpop.f32.mrb[166].mxu1 }
 0x522   : > { %7901 = vst [vmem:[#allocation43_spill] sm:$0xff] %v7263_v25  ;;  %v3718_v32 = vsel %vm7902_vm12, %v3296_v56, 0.0  ;;  %v2815_v18 = vadd.f32 %v2814_v39, %v6551_v51  ;;  %v2816_v13 = vpop.f32.mrb[167].mxu0  ;;  %v7268_v8 = vpop.f32.mrb[167].mxu1 }
 0x523   : > { %7903 = vst [vmem:[#allocation44_spill] sm:$0xff] %v7268_v8  ;;  %v3992_v63 = vadd.f32 %v3991_v26, %v3718_v32  ;;  %v3719_v23 = vsel %vm7902_vm12, %v3297_v12, 0.0  ;;  %v2817_v55 = vadd.f32 %v2816_v13, %v7051_v10  ;;  %vm7908_vm12 = vnez %v7826_v48 }
 0x524   : > { %v4029_v44 = vadd.f32 %v4028_v61, %v3719_v23  ;;  %v3304_v37 = vmax.f32 %v2815_v18, 0.0 }
 0x525   : > { %v2820_v50 = vpop.f32.mrb[168].mxu0  ;;  %v7273_v28 = vpop.f32.mrb[168].mxu1  ;;  %v3305_v58 = vmax.f32 %v2817_v55, 0.0 }
 0x526   : > { %7904 = vst [vmem:[#allocation45_spill] sm:$0xff] %v7273_v28  ;;  %v3726_v30 = vsel %vm7905_vm13, %v3304_v37, 0.0  ;;  %v2821_v56 = vadd.f32 %v2820_v50, %v6551_v51  ;;  %v2822_v39 = vpop.f32.mrb[169].mxu0  ;;  %v7278_v25 = vpop.f32.mrb[169].mxu1 }
 0x527   : > { %7906 = vst [vmem:[#allocation46_spill] sm:$0xff] %v7278_v25  ;;  %v3993_v26 = vadd.f32 %v3992_v63, %v3726_v30  ;;  %v2823_v32 = vadd.f32 %v2822_v39, %v7051_v10  ;;  %v3727_v18 = vsel %vm7905_vm13, %v3305_v58, 0.0  ;;  %vm7911_vm13 = vnez %v7828_v34 }
 0x528   : > { %v3312_v61 = vmax.f32 %v2821_v56, 0.0  ;;  %v4030_v13 = vadd.f32 %v4029_v44, %v3727_v18 }
 0x529   : > { %v3313_v12 = vmax.f32 %v2823_v32, 0.0  ;;  %v2826_v23 = vpop.f32.mrb[170].mxu0  ;;  %v7283_v28 = vpop.f32.mrb[170].mxu1 }
 0x52a   : > { %7907 = vst [vmem:[#allocation47_spill] sm:$0xff] %v7283_v28  ;;  %v3734_v37 = vsel %vm7908_vm12, %v3312_v61, 0.0  ;;  %v2827_v55 = vadd.f32 %v2826_v23, %v6551_v51  ;;  %v2828_v50 = vpop.f32.mrb[171].mxu0  ;;  %v7288_v8 = vpop.f32.mrb[171].mxu1 }
 0x52b   : > { %7909 = vst [vmem:[#allocation48_spill] sm:$0xff] %v7288_v8  ;;  %v3994_v63 = vadd.f32 %v3993_v26, %v3734_v37  ;;  %v3735_v30 = vsel %vm7908_vm12, %v3313_v12, 0.0  ;;  %v2829_v58 = vadd.f32 %v2828_v50, %v7051_v10  ;;  %vm7914_vm12 = vnez %v7830_v2 }
 0x52c   : > { %v4031_v56 = vadd.f32 %v4030_v13, %v3735_v30  ;;  %v3320_v44 = vmax.f32 %v2827_v55, 0.0 }
 0x52d   : > { %v3321_v39 = vmax.f32 %v2829_v58, 0.0  ;;  %v2832_v32 = vpop.f32.mrb[172].mxu0  ;;  %v7293_v18 = vpop.f32.mrb[172].mxu1 }
 0x52e   : > { %7910 = vst [vmem:[#allocation49_spill] sm:$0xff] %v7293_v18  ;;  %v3742_v61 = vsel %vm7911_vm13, %v3320_v44, 0.0  ;;  %v2833_v23 = vadd.f32 %v2832_v32, %v6551_v51  ;;  %v2834_v28 = vpop.f32.mrb[173].mxu0  ;;  %v7298_v25 = vpop.f32.mrb[173].mxu1 }
 0x52f   : > { %7912 = vst [vmem:[#allocation50_spill] sm:$0xff] %v7298_v25  ;;  %v3995_v26 = vadd.f32 %v3994_v63, %v3742_v61  ;;  %v3743_v12 = vsel %vm7911_vm13, %v3321_v39, 0.0  ;;  %v2835_v37 = vadd.f32 %v2834_v28, %v7051_v10  ;;  %vm7917_vm13 = vnez %v7832_v16 }
 0x530   : > { %v4032_v13 = vadd.f32 %v4031_v56, %v3743_v12  ;;  %v3328_v55 = vmax.f32 %v2833_v23, 0.0 }
 0x531   : > { %v3329_v50 = vmax.f32 %v2835_v37, 0.0  ;;  %v2838_v30 = vpop.f32.mrb[174].mxu0  ;;  %v7303_v58 = vpop.f32.mrb[174].mxu1 }
 0x532   : > { %7913 = vst [vmem:[#allocation51_spill] sm:$0xff] %v7303_v58  ;;  %v3750_v44 = vsel %vm7914_vm12, %v3328_v55, 0.0  ;;  %v2839_v32 = vadd.f32 %v2838_v30, %v6551_v51  ;;  %v2840_v18 = vpop.f32.mrb[175].mxu0  ;;  %v7308_v8 = vpop.f32.mrb[175].mxu1 }
 0x533   : > { %7915 = vst [vmem:[#allocation52_spill] sm:$0xff] %v7308_v8  ;;  %v3996_v63 = vadd.f32 %v3995_v26, %v3750_v44  ;;  %v3751_v39 = vsel %vm7914_vm12, %v3329_v50, 0.0  ;;  %v2841_v28 = vadd.f32 %v2840_v18, %v7051_v10  ;;  %vm7920_vm12 = vnez %v7835_v9 }
 0x534   : > { %v4033_v56 = vadd.f32 %v4032_v13, %v3751_v39  ;;  %v3336_v61 = vmax.f32 %v2839_v32, 0.0 }
 0x535   : > { %v3337_v23 = vmax.f32 %v2841_v28, 0.0  ;;  %v2844_v12 = vpop.f32.mrb[176].mxu0  ;;  %v7313_v37 = vpop.f32.mrb[176].mxu1 }
 0x536   : > { %7916 = vst [vmem:[#allocation53_spill] sm:$0xff] %v7313_v37  ;;  %v3758_v55 = vsel %vm7917_vm13, %v3336_v61, 0.0  ;;  %v2845_v30 = vadd.f32 %v2844_v12, %v6551_v51  ;;  %v2846_v58 = vpop.f32.mrb[177].mxu0  ;;  %v7318_v25 = vpop.f32.mrb[177].mxu1 }
 0x537   : > { %7918 = vst [vmem:[#allocation54_spill] sm:$0xff] %v7318_v25  ;;  %v3997_v26 = vadd.f32 %v3996_v63, %v3758_v55  ;;  %v3759_v50 = vsel %vm7917_vm13, %v3337_v23, 0.0  ;;  %v2847_v18 = vadd.f32 %v2846_v58, %v7051_v10  ;;  %vm7923_vm13 = vnez %v7838_v49 }
 0x538   : > { %v4034_v13 = vadd.f32 %v4033_v56, %v3759_v50  ;;  %v3344_v44 = vmax.f32 %v2845_v30, 0.0 }
 0x539   : > { %v3345_v32 = vmax.f32 %v2847_v18, 0.0  ;;  %v2850_v39 = vpop.f32.mrb[178].mxu0  ;;  %v7323_v28 = vpop.f32.mrb[178].mxu1 }
 0x53a   : > { %7919 = vst [vmem:[#allocation55_spill] sm:$0xff] %v7323_v28  ;;  %v3766_v61 = vsel %vm7920_vm12, %v3344_v44, 0.0  ;;  %v2851_v12 = vadd.f32 %v2850_v39, %v6551_v51  ;;  %v2852_v37 = vpop.f32.mrb[179].mxu0  ;;  %v7328_v8 = vpop.f32.mrb[179].mxu1 }
 0x53b   : > { %7921 = vst [vmem:[#allocation56_spill] sm:$0xff] %v7328_v8  ;;  %v3998_v63 = vadd.f32 %v3997_v26, %v3766_v61  ;;  %v3767_v23 = vsel %vm7920_vm12, %v3345_v32, 0.0  ;;  %v2853_v58 = vadd.f32 %v2852_v37, %v7051_v10  ;;  %vm7926_vm12 = vnez %v7841_v27 }
 0x53c   : > { %v4035_v56 = vadd.f32 %v4034_v13, %v3767_v23  ;;  %v3352_v55 = vmax.f32 %v2851_v12, 0.0 }
 0x53d   : > { %v3353_v30 = vmax.f32 %v2853_v58, 0.0  ;;  %v2856_v50 = vpop.f32.mrb[180].mxu0  ;;  %v7333_v18 = vpop.f32.mrb[180].mxu1 }
 0x53e   : > { %7922 = vst [vmem:[#allocation57_spill] sm:$0xff] %v7333_v18  ;;  %v3774_v44 = vsel %vm7923_vm13, %v3352_v55, 0.0  ;;  %v2857_v39 = vadd.f32 %v2856_v50, %v6551_v51  ;;  %v2858_v28 = vpop.f32.mrb[181].mxu0  ;;  %v7338_v25 = vpop.f32.mrb[181].mxu1 }
 0x53f   : > { %7924 = vst [vmem:[#allocation58_spill] sm:$0xff] %v7338_v25  ;;  %v3999_v26 = vadd.f32 %v3998_v63, %v3774_v44  ;;  %v3775_v32 = vsel %vm7923_vm13, %v3353_v30, 0.0  ;;  %v2859_v37 = vadd.f32 %v2858_v28, %v7051_v10  ;;  %vm7929_vm13 = vnez %v7845_v7 }
 0x540   : > { %v4036_v13 = vadd.f32 %v4035_v56, %v3775_v32  ;;  %v3360_v61 = vmax.f32 %v2857_v39, 0.0 }
 0x541   : > { %v3361_v12 = vmax.f32 %v2859_v37, 0.0  ;;  %v2862_v23 = vpop.f32.mrb[182].mxu0  ;;  %v7343_v58 = vpop.f32.mrb[182].mxu1 }
 0x542   : > { %7925 = vst [vmem:[#allocation59_spill] sm:$0xff] %v7343_v58  ;;  %v3782_v55 = vsel %vm7926_vm12, %v3360_v61, 0.0  ;;  %v2863_v50 = vadd.f32 %v2862_v23, %v6551_v51  ;;  %v2864_v18 = vpop.f32.mrb[183].mxu0  ;;  %v7348_v8 = vpop.f32.mrb[183].mxu1 }
 0x543   : > { %7927 = vst [vmem:[#allocation60_spill] sm:$0xff] %v7348_v8  ;;  %v4000_v63 = vadd.f32 %v3999_v26, %v3782_v55  ;;  %v3783_v30 = vsel %vm7926_vm12, %v3361_v12, 0.0  ;;  %v2865_v28 = vadd.f32 %v2864_v18, %v7051_v10 }
 0x544   : > { %v4037_v56 = vadd.f32 %v4036_v13, %v3783_v30  ;;  %v3368_v44 = vmax.f32 %v2863_v50, 0.0 }
 0x545   : > { %v3369_v39 = vmax.f32 %v2865_v28, 0.0  ;;  %v2868_v32 = vpop.f32.mrb[184].mxu0  ;;  %v7353_v37 = vpop.f32.mrb[184].mxu1 }
 0x546   : > { %7928 = vst [vmem:[#allocation61_spill] sm:$0xff] %v7353_v37  ;;  %v3790_v61 = vsel %vm7929_vm13, %v3368_v44, 0.0  ;;  %v2869_v23 = vadd.f32 %v2868_v32, %v6551_v51  ;;  %v2870_v58 = vpop.f32.mrb[185].mxu0  ;;  %v7358_v25 = vpop.f32.mrb[185].mxu1  ;;  %v2106_v32 = vsub.s32 6, %v6309_v21 }
 0x547   : > { %7930 = vst [vmem:[#allocation62_spill] sm:$0xff] %v7358_v25  ;;  %v4001_v26 = vadd.f32 %v4000_v63, %v3790_v61  ;;  %v3791_v12 = vsel %vm7929_vm13, %v3369_v39, 0.0  ;;  %v2871_v18 = vadd.f32 %v2870_v58, %v7051_v10  ;;  %v2110_v58 = vsub.s32 7, %v6309_v21 }
 0x548   : > { %v4038_v13 = vadd.f32 %v4037_v56, %v3791_v12  ;;  %v3376_v55 = vmax.f32 %v2869_v23, 0.0  ;;  %v7375_v25 = vrot.slane %v7046_v59, %v2106_v32 }
 0x549   : > { %v3377_v50 = vmax.f32 %v2871_v18, 0.0  ;;  %v2874_v30 = vpop.f32.mrb[186].mxu0  ;;  %v7381_v21 = vrot.slane %v7046_v59, %v2110_v58 }
 0x54a   : > { %v3798_v28 = vsel %vm6968_vm14, %v3376_v55, 0.0  ;;  %v2875_v44 = vadd.f32 %v2874_v30, %v6551_v51  ;;  %v2876_v37 = vpop.f32.mrb[187].mxu0  ;;  %v3006_v33 = vadd.f32 %v7106_v54, %v7375_v25 }
 0x54b   : > { %v4002_v8 = vadd.f32 %v4001_v26, %v3798_v28  ;;  %v3799_v63 = vsel %vm6968_vm14, %v3377_v50, 0.0  ;;  %v2877_v39 = vadd.f32 %v2876_v37, %v7051_v10  ;;  %v2978_v58 = vadd.f32 %v7059_v40, %v7381_v21 }
 0x54c   : > { %v4039_v56 = vadd.f32 %v4038_v13, %v3799_v63  ;;  %v3384_v61 = vmax.f32 %v2875_v44, 0.0  ;;  %v3014_v20 = vadd.f32 %v7127_v22, %v7381_v21  ;;  %v3020_v38 = vadd.f32 %v7138_v0, %v7381_v21 }
 0x54d   : > { %v3385_v23 = vmax.f32 %v2877_v39, 0.0  ;;  %v2880_v12 = vpop.f32.mrb[188].mxu0  ;;  %v3038_v31 = vadd.f32 %v7171_v46, %v7381_v21 }
 0x54e   : > { %v3806_v18 = vsel %vm6986_vm15, %v3384_v61, 0.0  ;;  %v2881_v55 = vadd.f32 %v2880_v12, %v6551_v51  ;;  %v2882_v30 = vpop.f32.mrb[189].mxu0 }
 0x54f   : > { %v4003_v26 = vadd.f32 %v4002_v8, %v3806_v18  ;;  %v3807_v50 = vsel %vm6986_vm15, %v3385_v23, 0.0  ;;  %v2883_v37 = vadd.f32 %v2882_v30, %v7051_v10  ;;  %v2976_v8 = vadd.f32 %v7057_v1, %v7375_v25 }
 0x550   : > { %v4040_v13 = vadd.f32 %v4039_v56, %v3807_v50  ;;  %v3392_v28 = vmax.f32 %v2881_v55, 0.0 }
 0x551   : > { %v3393_v44 = vmax.f32 %v2883_v37, 0.0  ;;  %v2886_v63 = vpop.f32.mrb[190].mxu0  ;;  %v3178_v1 = vmax.f32 %v2976_v8, 0.0 }
 0x552   : > { %v3814_v39 = vsel %vm7004_vm0, %v3392_v28, 0.0  ;;  %v2887_v61 = vadd.f32 %v2886_v63, %v6551_v51  ;;  %v2888_v32 = vpop.f32.mrb[191].mxu0 }
 0x553   : > { %v4004_v12 = vadd.f32 %v4003_v26, %v3814_v39  ;;  %v3815_v23 = vsel %vm7004_vm0, %v3393_v44, 0.0  ;;  %v2889_v59 = vadd.f32 %v2888_v32, %v7051_v10  ;;  %v3179_v44 = vmax.f32 %v2978_v58, 0.0  ;;  %v7931_v58 = vld [vmem:[#allocation15_spill] sm:$0xff] }
 0x554   : > { %v4041_v56 = vadd.f32 %v4040_v13, %v3815_v23  ;;  %v3400_v18 = vmax.f32 %v2887_v61, 0.0 }
 0x555   : > { %v3401_v55 = vmax.f32 %v2889_v59, 0.0  ;;  %v2957_v30 = vpop.f32.mrb[192].mxu0 }
 0x556   : > { %v3822_v51 = vsel %vm7022_vm1, %v3400_v18, 0.0  ;;  %v2958_v50 = vadd.f32 %v2957_v30, %v7375_v25  ;;  %v2959_v37 = vpop.f32.mrb[193].mxu0  ;;  %v3600_v18 = vsel %vm6456_vm5, %v3178_v1, 0.0 }
 0x557   : > { %v4005_v26 = vadd.f32 %v4004_v12, %v3822_v51  ;;  %v3823_v28 = vsel %vm7022_vm1, %v3401_v55, 0.0  ;;  %v2960_v10 = vadd.f32 %v2959_v37, %v7381_v21  ;;  %v3601_v55 = vsel %vm6456_vm5, %v3179_v44, 0.0 }
 0x558   : > { %v4042_v63 = vadd.f32 %v4041_v56, %v3823_v28  ;;  %v3154_v13 = vmax.f32 %v2958_v50, 0.0  ;;  %v2982_v56 = vadd.f32 %v7931_v58, %v7375_v25  ;;  %v7932_v50 = vld [vmem:[#allocation16_spill] sm:$0xff]  ;;  %vm7955_vm5 = vnez %v7812_v4 }
 0x559   : > { %v4006_v40 = vrot.slane %v4005_v26, 4  ;;  %v2963_v39 = vpop.f32.mrb[194].mxu0  ;;  %v3155_v32 = vmax.f32 %v2960_v10, 0.0  ;;  %v2984_v37 = vadd.f32 %v7932_v50, %v7381_v21  ;;  %v3068_v4 = vadd.f32 %v7225_v47, %v7381_v21 }
 0x55a   : > { %v4043_v61 = vrot.slane %v4042_v63, 4  ;;  %v2964_v23 = vadd.f32 %v2963_v39, %v7375_v25  ;;  %v2965_v59 = vpop.f32.mrb[195].mxu0  ;;  %v3576_v39 = vsel %vm6352_vm2, %v3154_v13, 0.0  ;;  %v7935_v13 = vld [vmem:[#allocation17_spill] sm:$0xff] }
 0x55b   : > { %v4007_v8 = vadd.f32 %v4006_v40, %v4005_v26  ;;  %v2966_v12 = vadd.f32 %v2965_v59, %v7381_v21  ;;  %v3577_v40 = vsel %vm6352_vm2, %v3155_v32, 0.0  ;;  %v3186_v32 = vmax.f32 %v2982_v56, 0.0 }
 0x55c   : > { %v4044_v30 = vadd.f32 %v4043_v61, %v4042_v63  ;;  %v3162_v51 = vmax.f32 %v2964_v23, 0.0  ;;  %v3187_v27 = vmax.f32 %v2984_v37, 0.0  ;;  %vm7946_vm2 = vnez %v7806_v36  ;;  %v7951_v36 = vld [vmem:[#allocation32_spill] sm:$0xff] }
 0x55d   : > { %v4008_v28 = vrot.slane %v4007_v8, 2  ;;  %v3163_v14 = vmax.f32 %v2966_v12, 0.0  ;;  %v2969_v1 = vpop.f32.mrb[196].mxu0  ;;  %v2988_v12 = vadd.f32 %v7935_v13, %v7375_v25  ;;  %v3002_v13 = vadd.f32 %v7101_v17, %v7381_v21 }
 0x55e   : > { %v4045_v26 = vrot.slane %v4044_v30, 2  ;;  %v3584_v44 = vsel %vm6364_vm3, %v3162_v51, 0.0  ;;  %v2970_v59 = vadd.f32 %v2969_v1, %v7375_v25  ;;  %v2971_v63 = vpop.f32.mrb[197].mxu0  ;;  %v2990_v51 = vadd.f32 %v7936_v35, %v7381_v21 }
 0x55f   : > { %v4009_v61 = vadd.f32 %v4008_v28, %v4007_v8  ;;  %v4049_v23 = vadd.f32 %v3584_v44, %v3576_v39  ;;  %v3585_v58 = vsel %vm6364_vm3, %v3163_v14, 0.0  ;;  %v2972_v50 = vadd.f32 %v2971_v63, %v7381_v21  ;;  %v7937_v8 = vld [vmem:[#allocation19_spill] sm:$0xff] }
 0x560   : > { %v4046_v15 = vadd.f32 %v4045_v26, %v4044_v30  ;;  %v4086_v45 = vadd.f32 %v3585_v58, %v3577_v40  ;;  %v3170_v10 = vmax.f32 %v2970_v59, 0.0  ;;  %v2994_v28 = vadd.f32 %v7937_v8, %v7375_v25  ;;  %v7939_v40 = vld [vmem:[#allocation22_spill] sm:$0xff] }
 0x561   : > { %v4010_v7 = vrot.slane %v4009_v61, 1  ;;  %v3171_v1 = vmax.f32 %v2972_v50, 0.0  ;;  %v2996_v44 = vadd.f32 %v7938_v60, %v7381_v21  ;;  %v3194_v35 = vmax.f32 %v2988_v12, 0.0 }
 0x562   : > { %v4047_v39 = vrot.slane %v4046_v15, 1  ;;  %v3592_v14 = vsel %vm6419_vm4, %v3170_v10, 0.0  ;;  %v3000_v37 = vadd.f32 %v7939_v40, %v7375_v25  ;;  %v3608_v58 = vsel %vm6492_vm6, %v3186_v32, 0.0 }
 0x563   : > { %v7429_v30 = vadd.f32 %v4010_v7, %v4009_v61  ;;  %v4050_v26 = vadd.f32 %v4049_v23, %v3592_v14  ;;  %v3593_v56 = vsel %vm6419_vm4, %v3171_v1, 0.0  ;;  %v3195_v50 = vmax.f32 %v2990_v51, 0.0 }
 0x564   : > { %v7435_v59 = vadd.f32 %v4047_v39, %v4046_v15  ;;  %v4087_v63 = vadd.f32 %v4086_v45, %v3593_v56  ;;  %v3202_v61 = vmax.f32 %v2994_v28, 0.0  ;;  %v3609_v15 = vsel %vm6492_vm6, %v3187_v27, 0.0  ;;  %v7940_v28 = vld [vmem:[#allocation23_spill] sm:$0xff]  ;;  %v7941_v56 = vld [vmem:[#allocation24_spill] sm:$0xff] }
 0x565   : > { %v4051_v7 = vadd.f32 %v4050_v26, %v3600_v18  ;;  %v3203_v45 = vmax.f32 %v2996_v44, 0.0  ;;  %v3008_v10 = vadd.f32 %v7113_v29, %v7381_v21  ;;  %v3616_v17 = vsel %vm6520_vm7, %v3194_v35, 0.0 }
 0x566   : > { %v4133_v23 = vcombine.low %v7429_v30, %v7435_v59  ;;  %v4088_v12 = vadd.f32 %v4087_v63, %v3601_v55  ;;  %v3210_v18 = vmax.f32 %v3000_v37, 0.0  ;;  %v3012_v51 = vadd.f32 %v7123_v52, %v7375_v25 }
 0x567   : > { %v4052_v32 = vadd.f32 %v4051_v7, %v3608_v58  ;;  %v3617_v1 = vsel %vm6520_vm7, %v3195_v50, 0.0  ;;  %v3211_v55 = vmax.f32 %v3002_v13, 0.0  ;;  %v3624_v29 = vsel %vm6546_vm8, %v3202_v61, 0.0  ;;  %v7943_v7 = vld [vmem:[#allocation26_spill] sm:$0xff] }
 0x568   : > { %v4089_v54 = vadd.f32 %v4088_v12, %v3609_v15  ;;  %v3218_v8 = vmax.f32 %v3006_v33, 0.0  ;;  %v3018_v39 = vadd.f32 %v7940_v28, %v7375_v25  ;;  %v3625_v52 = vsel %vm6546_vm8, %v3203_v45, 0.0 }
 0x569   : > { %v4053_v27 = vadd.f32 %v4052_v32, %v3616_v17  ;;  %v3219_v60 = vmax.f32 %v3008_v10, 0.0  ;;  %v3632_v22 = vsel %vm6572_vm9, %v3210_v18, 0.0  ;;  %v3226_v26 = vmax.f32 %v3012_v51, 0.0  ;;  %v7945_v18 = vld [vmem:[#allocation28_spill] sm:$0xff] }
 0x56a   : > { %v4090_v14 = vadd.f32 %v4089_v54, %v3617_v1  ;;  %v3024_v35 = vadd.f32 %v7941_v56, %v7375_v25  ;;  %v3633_v37 = vsel %vm6572_vm9, %v3211_v55, 0.0  ;;  %v3227_v63 = vmax.f32 %v3014_v20, 0.0 }
 0x56b   : > { %v4054_v44 = vadd.f32 %v4053_v27, %v3624_v29  ;;  %v3026_v58 = vadd.f32 %v7942_v11, %v7381_v21  ;;  %v3640_v0 = vsel %vm6594_vm10, %v3218_v8, 0.0  ;;  %v3234_v13 = vmax.f32 %v3018_v39, 0.0  ;;  %v7947_v8 = vld [vmem:[#allocation29_spill] sm:$0xff] }
 0x56c   : > { %v4091_v40 = vadd.f32 %v4090_v14, %v3625_v52  ;;  %v3030_v61 = vadd.f32 %v7943_v7, %v7375_v25  ;;  %v3641_v12 = vsel %vm6594_vm10, %v3219_v60, 0.0  ;;  %v3235_v15 = vmax.f32 %v3020_v38, 0.0 }
 0x56d   : > { %v4055_v50 = vadd.f32 %v4054_v44, %v3632_v22  ;;  %v3032_v45 = vadd.f32 %v7944_v42, %v7381_v21  ;;  %v3648_v32 = vsel %vm6615_vm11, %v3226_v26, 0.0  ;;  %v3242_v17 = vmax.f32 %v3024_v35, 0.0  ;;  %v7950_v22 = vld [vmem:[#allocation31_spill] sm:$0xff] }
 0x56e   : > { %v4092_v33 = vadd.f32 %v4091_v40, %v3633_v37  ;;  %v3036_v51 = vadd.f32 %v7945_v18, %v7375_v25  ;;  %v3649_v1 = vsel %vm6615_vm11, %v3227_v63, 0.0  ;;  %v3243_v55 = vmax.f32 %v3026_v58, 0.0 }
 0x56f   : > { %v4056_v10 = vadd.f32 %v4055_v50, %v3640_v0  ;;  %v3656_v27 = vsel %vm7946_vm2, %v3234_v13, 0.0  ;;  %v3250_v29 = vmax.f32 %v3030_v61, 0.0  ;;  %v3042_v28 = vadd.f32 %v7947_v8, %v7375_v25  ;;  %v7953_v50 = vld [vmem:[#allocation33_spill] sm:$0xff] }
 0x570   : > { %v4093_v54 = vadd.f32 %v4092_v33, %v3641_v12  ;;  %v3657_v14 = vsel %vm7946_vm2, %v3235_v15, 0.0  ;;  %v3251_v52 = vmax.f32 %v3032_v45, 0.0  ;;  %v3044_v60 = vadd.f32 %v7948_v6, %v7381_v21 }
 0x571   : > { %v4057_v20 = vadd.f32 %v4056_v10, %v3648_v32  ;;  %vm7949_vm3 = vnez %v7808_v57  ;;  %v3258_v44 = vmax.f32 %v3036_v51, 0.0  ;;  %v3048_v26 = vadd.f32 %v7950_v22, %v7375_v25  ;;  %v7954_v57 = vld [vmem:[#allocation34_spill] sm:$0xff]  ;;  %v7963_v22 = vld [vmem:[#allocation39_spill] sm:$0xff] }
 0x572   : > { %v4094_v39 = vadd.f32 %v4093_v54, %v3649_v1  ;;  %v3664_v46 = vsel %vm7949_vm3, %v3242_v17, 0.0  ;;  %v3665_v35 = vsel %vm7949_vm3, %v3243_v55, 0.0  ;;  %v3259_v40 = vmax.f32 %v3038_v31, 0.0  ;;  %v7958_v55 = vld [vmem:[#allocation36_spill] sm:$0xff] }
 0x573   : > { %v4058_v38 = vadd.f32 %v4057_v20, %v3656_v27  ;;  %v3050_v37 = vadd.f32 %v7951_v36, %v7381_v21  ;;  %vm7952_vm4 = vnez %v7810_v43  ;;  %v3266_v58 = vmax.f32 %v3042_v28, 0.0  ;;  %v7956_v43 = vld [vmem:[#allocation35_spill] sm:$0xff] }
 0x574   : > { %v4095_v56 = vadd.f32 %v4094_v39, %v3657_v14  ;;  %v3672_v11 = vsel %vm7952_vm4, %v3250_v29, 0.0  ;;  %v3054_v0 = vadd.f32 %v7953_v50, %v7375_v25  ;;  %v3673_v7 = vsel %vm7952_vm4, %v3251_v52, 0.0  ;;  %v7960_v39 = vld [vmem:[#allocation37_spill] sm:$0xff] }
 0x575   : > { %v4059_v63 = vadd.f32 %v4058_v38, %v3664_v46  ;;  %v3267_v61 = vmax.f32 %v3044_v60, 0.0  ;;  %v3056_v33 = vadd.f32 %v7954_v57, %v7381_v21  ;;  %v3680_v15 = vsel %vm7955_vm5, %v3258_v44, 0.0 }
 0x576   : > { %v4096_v13 = vadd.f32 %v4095_v56, %v3665_v35  ;;  %v3274_v42 = vmax.f32 %v3048_v26, 0.0  ;;  %v3060_v45 = vadd.f32 %v7211_v3, %v7375_v25  ;;  %v3681_v32 = vsel %vm7955_vm5, %v3259_v40, 0.0 }
 0x577   : > { %v4060_v12 = vadd.f32 %v4059_v63, %v3672_v11  ;;  %v3275_v17 = vmax.f32 %v3050_v37, 0.0  ;;  %v3062_v18 = vadd.f32 %v7956_v43, %v7381_v21  ;;  %vm7957_vm6 = vnez %v7814_v62  ;;  %v7961_v62 = vld [vmem:[#allocation38_spill] sm:$0xff] }
 0x578   : > { %v4097_v10 = vadd.f32 %v4096_v13, %v3673_v7  ;;  %v3688_v54 = vsel %vm7957_vm6, %v3266_v58, 0.0  ;;  %v3282_v1 = vmax.f32 %v3054_v0, 0.0  ;;  %v3066_v31 = vadd.f32 %v7958_v55, %v7375_v25  ;;  %v7966_v58 = vld [vmem:[#allocation41_spill] sm:$0xff] }
 0x579   : > { %v4061_v51 = vadd.f32 %v4060_v12, %v3680_v15  ;;  %v3689_v3 = vsel %vm7957_vm6, %v3267_v61, 0.0  ;;  %v3283_v27 = vmax.f32 %v3056_v33, 0.0  ;;  %vm7959_vm7 = vnez %v7816_v41  ;;  %v7964_v41 = vld [vmem:[#allocation40_spill] sm:$0xff]  ;;  %v7969_v15 = vld [vmem:[#allocation43_spill] sm:$0xff] }
 0x57a   : > { %v4098_v20 = vadd.f32 %v4097_v10, %v3681_v32  ;;  %v3696_v8 = vsel %vm7959_vm7, %v3274_v42, 0.0  ;;  %v3290_v28 = vmax.f32 %v3060_v45, 0.0  ;;  %v3072_v14 = vadd.f32 %v7960_v39, %v7375_v25 }
 0x57b   : > { %v4062_v29 = vadd.f32 %v4061_v51, %v3688_v54  ;;  %v3697_v6 = vsel %vm7959_vm7, %v3275_v17, 0.0  ;;  %v3291_v60 = vmax.f32 %v3062_v18, 0.0  ;;  %v3074_v38 = vadd.f32 %v7961_v62, %v7381_v21  ;;  %v7972_v54 = vld [vmem:[#allocation45_spill] sm:$0xff] }
 0x57c   : > { %v4099_v52 = vadd.f32 %v4098_v20, %v3689_v3  ;;  %vm7962_vm8 = vnez %v7818_v5  ;;  %v3298_v44 = vmax.f32 %v3066_v31, 0.0  ;;  %v3078_v26 = vadd.f32 %v7963_v22, %v7375_v25  ;;  %v7967_v5 = vld [vmem:[#allocation42_spill] sm:$0xff] }
 0x57d   : > { %v4063_v46 = vadd.f32 %v4062_v29, %v3696_v8  ;;  %v3704_v47 = vsel %vm7962_vm8, %v3282_v1, 0.0  ;;  %v3705_v35 = vsel %vm7962_vm8, %v3283_v27, 0.0  ;;  %v3299_v40 = vmax.f32 %v3068_v4, 0.0  ;;  %v7975_v8 = vld [vmem:[#allocation47_spill] sm:$0xff] }
 0x57e   : > { %v4100_v56 = vadd.f32 %v4099_v52, %v3697_v6  ;;  %v3080_v36 = vadd.f32 %v7964_v41, %v7381_v21  ;;  %vm7965_vm9 = vnez %v7820_v24  ;;  %v3306_v11 = vmax.f32 %v3072_v14, 0.0  ;;  %v7970_v24 = vld [vmem:[#allocation44_spill] sm:$0xff] }
 0x57f   : > { %v4064_v37 = vadd.f32 %v4063_v46, %v3704_v47  ;;  %v3712_v63 = vsel %vm7965_vm9, %v3290_v28, 0.0  ;;  %v3084_v50 = vadd.f32 %v7966_v58, %v7375_v25  ;;  %v3713_v13 = vsel %vm7965_vm9, %v3291_v60, 0.0  ;;  %v7978_v46 = vld [vmem:[#allocation49_spill] sm:$0xff] }
 0x580   : > { %v4101_v0 = vadd.f32 %v4100_v56, %v3705_v35  ;;  %v3307_v7 = vmax.f32 %v3074_v38, 0.0  ;;  %v3086_v61 = vadd.f32 %v7967_v5, %v7381_v21  ;;  %vm7968_vm10 = vnez %v7822_v53  ;;  %v7973_v53 = vld [vmem:[#allocation46_spill] sm:$0xff]  ;;  %v7984_v5 = vld [vmem:[#allocation53_spill] sm:$0xff] }
 0x581   : > { %v4065_v57 = vadd.f32 %v4064_v37, %v3712_v63  ;;  %v3720_v33 = vsel %vm7968_vm10, %v3298_v44, 0.0  ;;  %v3314_v12 = vmax.f32 %v3078_v26, 0.0  ;;  %v3090_v42 = vadd.f32 %v7969_v15, %v7375_v25 }
 0x582   : > { %v4102_v45 = vadd.f32 %v4101_v0, %v3713_v13  ;;  %v3721_v10 = vsel %vm7968_vm10, %v3299_v40, 0.0  ;;  %v3315_v32 = vmax.f32 %v3080_v36, 0.0  ;;  %v3092_v17 = vadd.f32 %v7970_v24, %v7381_v21  ;;  %v7981_v36 = vld [vmem:[#allocation51_spill] sm:$0xff] }
 0x583   : > { %v4066_v43 = vadd.f32 %v4065_v57, %v3720_v33  ;;  %vm7971_vm11 = vnez %v7824_v19  ;;  %v3322_v51 = vmax.f32 %v3084_v50, 0.0  ;;  %v3096_v1 = vadd.f32 %v7972_v54, %v7375_v25  ;;  %v7976_v19 = vld [vmem:[#allocation48_spill] sm:$0xff] }
 0x584   : > { %v3728_v18 = vsel %vm7971_vm11, %v3306_v11, 0.0  ;;  %v4103_v55 = vadd.f32 %v4102_v45, %v3721_v10  ;;  %v3729_v31 = vsel %vm7971_vm11, %v3307_v7, 0.0  ;;  %v3323_v20 = vmax.f32 %v3086_v61, 0.0 }
 0x585   : > { %v3098_v3 = vadd.f32 %v7973_v53, %v7381_v21  ;;  %v4067_v27 = vadd.f32 %v4066_v43, %v3728_v18  ;;  %vm7974_vm2 = vnez %v7826_v48  ;;  %v3330_v29 = vmax.f32 %v3090_v42, 0.0  ;;  %v7979_v48 = vld [vmem:[#allocation50_spill] sm:$0xff] }
 0x586   : > { %v3736_v4 = vsel %vm7974_vm2, %v3314_v12, 0.0  ;;  %v3102_v28 = vadd.f32 %v7975_v8, %v7375_v25  ;;  %v4104_v39 = vadd.f32 %v4103_v55, %v3729_v31  ;;  %v3737_v14 = vsel %vm7974_vm2, %v3315_v32, 0.0  ;;  %v7987_v32 = vld [vmem:[#allocation55_spill] sm:$0xff]  ;;  %v7990_v31 = vld [vmem:[#allocation57_spill] sm:$0xff] }
 0x587   : > { %v3331_v52 = vmax.f32 %v3092_v17, 0.0  ;;  %v3104_v6 = vadd.f32 %v7976_v19, %v7381_v21  ;;  %v4068_v60 = vadd.f32 %v4067_v27, %v3736_v4  ;;  %vm7977_vm3 = vnez %v7828_v34  ;;  %v7982_v34 = vld [vmem:[#allocation52_spill] sm:$0xff] }
 0x588   : > { %v3744_v62 = vsel %vm7977_vm3, %v3322_v51, 0.0  ;;  %v3338_v38 = vmax.f32 %v3096_v1, 0.0  ;;  %v3108_v47 = vadd.f32 %v7978_v46, %v7375_v25  ;;  %v4105_v44 = vadd.f32 %v4104_v39, %v3737_v14  ;;  %v7993_v14 = vld [vmem:[#allocation59_spill] sm:$0xff] }
 0x589   : > { %v3745_v22 = vsel %vm7977_vm3, %v3323_v20, 0.0  ;;  %v3339_v26 = vmax.f32 %v3098_v3, 0.0  ;;  %v3110_v56 = vadd.f32 %v7979_v48, %v7381_v21  ;;  %v4069_v35 = vadd.f32 %v4068_v60, %v3744_v62 }
 0x58a   : > { %vm7980_vm4 = vnez %v7830_v2  ;;  %v3346_v41 = vmax.f32 %v3102_v28, 0.0  ;;  %v3114_v37 = vadd.f32 %v7981_v36, %v7375_v25  ;;  %v4106_v63 = vadd.f32 %v4105_v44, %v3745_v22  ;;  %v7985_v2 = vld [vmem:[#allocation54_spill] sm:$0xff]  ;;  %v7996_v22 = vld [vmem:[#allocation61_spill] sm:$0xff] }
 0x58b   : > { %v3752_v40 = vsel %vm7980_vm4, %v3330_v29, 0.0  ;;  %v3753_v11 = vsel %vm7980_vm4, %v3331_v52, 0.0  ;;  %v3347_v58 = vmax.f32 %v3104_v6, 0.0  ;;  %v3116_v50 = vadd.f32 %v7982_v34, %v7381_v21 }
 0x58c   : > { %v4070_v0 = vadd.f32 %v4069_v35, %v3752_v40  ;;  %vm7983_vm5 = vnez %v7832_v16  ;;  %v3354_v7 = vmax.f32 %v3108_v47, 0.0  ;;  %v3120_v61 = vadd.f32 %v7984_v5, %v7375_v25  ;;  %v7988_v16 = vld [vmem:[#allocation56_spill] sm:$0xff]  ;;  %v7997_v40 = vld [vmem:[#allocation62_spill] sm:$0xff] }
 0x58d   : > { %v3760_v13 = vsel %vm7983_vm5, %v3338_v38, 0.0  ;;  %v4107_v57 = vadd.f32 %v4106_v63, %v3753_v11  ;;  %v3761_v33 = vsel %vm7983_vm5, %v3339_v26, 0.0  ;;  %v3355_v12 = vmax.f32 %v3110_v56, 0.0 }
 0x58e   : > { %v3122_v15 = vadd.f32 %v7985_v2, %v7381_v21  ;;  %v4071_v42 = vadd.f32 %v4070_v0, %v3760_v13  ;;  %vm7986_vm6 = vnez %v7835_v9  ;;  %v3362_v10 = vmax.f32 %v3114_v37, 0.0  ;;  %v7991_v9 = vld [vmem:[#allocation58_spill] sm:$0xff] }
 0x58f   : > { %v3768_v45 = vsel %vm7986_vm6, %v3346_v41, 0.0  ;;  %v3126_v24 = vadd.f32 %v7987_v32, %v7375_v25  ;;  %v4108_v17 = vadd.f32 %v4107_v57, %v3761_v33  ;;  %v3769_v43 = vsel %vm7986_vm6, %v3347_v58, 0.0 }
 0x590   : > { %v3363_v18 = vmax.f32 %v3116_v50, 0.0  ;;  %v3128_v51 = vadd.f32 %v7988_v16, %v7381_v21  ;;  %v4072_v54 = vadd.f32 %v4071_v42, %v3768_v45  ;;  %vm7989_vm7 = vnez %v7838_v49  ;;  %v7994_v49 = vld [vmem:[#allocation60_spill] sm:$0xff] }
 0x591   : > { %v3776_v1 = vsel %vm7989_vm7, %v3354_v7, 0.0  ;;  %v3370_v55 = vmax.f32 %v3120_v61, 0.0  ;;  %v3132_v20 = vadd.f32 %v7990_v31, %v7375_v25  ;;  %v4109_v53 = vadd.f32 %v4108_v17, %v3769_v43 }
 0x592   : > { %v3777_v3 = vsel %vm7989_vm7, %v3355_v12, 0.0  ;;  %v3371_v27 = vmax.f32 %v3122_v15, 0.0  ;;  %v3134_v4 = vadd.f32 %v7991_v9, %v7381_v21  ;;  %v4073_v29 = vadd.f32 %v4072_v54, %v3776_v1 }
 0x593   : > { %v3784_v28 = vsel %vm7926_vm12, %v3362_v10, 0.0  ;;  %v3378_v39 = vmax.f32 %v3126_v24, 0.0  ;;  %v3138_v52 = vadd.f32 %v7993_v14, %v7375_v25  ;;  %v4110_v19 = vadd.f32 %v4109_v53, %v3777_v3  ;;  %v8003_v14 = vld [vmem:[#allocation7_spill] sm:$0xff] }
 0x594   : > { %v3785_v6 = vsel %vm7926_vm12, %v3363_v18, 0.0  ;;  %v3379_v60 = vmax.f32 %v3128_v51, 0.0  ;;  %v3140_v62 = vadd.f32 %v7994_v49, %v7381_v21  ;;  %v4074_v38 = vadd.f32 %v4073_v29, %v3784_v28  ;;  %v8002_v29 = vld [vmem:[#allocation21_spill] sm:$0xff] }
 0x595   : > { %v3792_v47 = vsel %vm7929_vm13, %v3370_v55, 0.0  ;;  %v3386_v44 = vmax.f32 %v3132_v20, 0.0  ;;  %v3144_v26 = vadd.f32 %v7996_v22, %v7375_v25  ;;  %v4111_v48 = vadd.f32 %v4110_v19, %v3785_v6 }
 0x596   : > { %v3793_v56 = vsel %vm7929_vm13, %v3371_v27, 0.0  ;;  %v3387_v35 = vmax.f32 %v3134_v4, 0.0  ;;  %v3146_v41 = vadd.f32 %v7997_v40, %v7381_v21  ;;  %v4075_v36 = vadd.f32 %v4074_v38, %v3792_v47 }
 0x597   : > { %v3800_v63 = vsel %vm6968_vm14, %v3378_v39, 0.0  ;;  %v3394_v11 = vmax.f32 %v3138_v52, 0.0  ;;  %v4112_v58 = vadd.f32 %v4111_v48, %v3793_v56  ;;  %v3801_v34 = vsel %vm6968_vm14, %v3379_v60, 0.0  ;;  %v8004_v52 = vld [vmem:[#allocation11_spill] sm:$0xff] }
 0x598   : > { %v3395_v50 = vmax.f32 %v3140_v62, 0.0  ;;  %v4076_v0 = vadd.f32 %v4075_v36, %v3800_v63  ;;  %v3808_v13 = vsel %vm6986_vm15, %v3386_v44, 0.0  ;;  %v3402_v7 = vmax.f32 %v3144_v26, 0.0 }
 0x599   : > { %v4113_v5 = vadd.f32 %v4112_v58, %v3801_v34  ;;  %v3809_v61 = vsel %vm6986_vm15, %v3387_v35, 0.0  ;;  %v3403_v21 = vmax.f32 %v3146_v41, 0.0  ;;  %v3816_v12 = vsel %vm7004_vm0, %v3394_v11, 0.0 }
 0x59a   : > { %v4077_v57 = vadd.f32 %v4076_v0, %v3808_v13  ;;  %v3817_v15 = vsel %vm7004_vm0, %v3395_v50, 0.0  ;;  %v3824_v10 = vsel %vm7022_vm1, %v3402_v7, 0.0  ;;  %v4155_v8 = vrot.slane %v4133_v23, %v8002_v29 }
 0x59b   : > { %v4114_v2 = vadd.f32 %v4113_v5, %v3809_v61  ;;  %v3825_v24 = vsel %vm7022_vm1, %v3403_v21, 0.0  ;;  %v8005_v19 = vcombine.low %v8003_v14, %v8004_v52  ;;  %v4188_v49 = vstv %s4186_s27 }
 0x59c   : > { %v4078_v42 = vadd.f32 %v4077_v57, %v3816_v12 }
 0x59d   : > { %v4115_v32 = vadd.f32 %v4114_v2, %v3817_v15  ;;  %v4171_v6 = vrot.slane %v8005_v19, %v8002_v29 }
 0x59e   : > { %v4079_v17 = vadd.f32 %v4078_v42, %v3824_v10 }
 0x59f   : > { %v4116_v43 = vadd.f32 %v4115_v32, %v3825_v24 }
 0x5a0   : > { %v4080_v18 = vrot.slane %v4079_v17, 4 }
 0x5a1   : > { %v4117_v16 = vrot.slane %v4116_v43, 4 }
 0x5a2   : > { %v4081_v51 = vadd.f32 %v4080_v18, %v4079_v17 }
 0x5a3   : > { %v4118_v54 = vadd.f32 %v4117_v16, %v4116_v43 }
 0x5a4   : > { %v4082_v1 = vrot.slane %v4081_v51, 2 }
 0x5a5   : > { %v4119_v55 = vrot.slane %v4118_v54, 2 }
 0x5a6   : > { %v4083_v31 = vadd.f32 %v4082_v1, %v4081_v51 }
 0x5a7   : > { %v4120_v20 = vadd.f32 %v4119_v55, %v4118_v54 }
 0x5a8   : > { %v4084_v53 = vrot.slane %v4083_v31, 1 }
 0x5a9   : > { %v4121_v3 = vrot.slane %v4120_v20, 1 }
 0x5aa   : > { %v4085_v27 = vadd.f32 %v4084_v53, %v4083_v31 }
 0x5ab   : > { %v4122_v9 = vadd.f32 %v4121_v3, %v4120_v20 }
 0x5ad   : > { %v4134_v4 = vcombine.low %v4085_v27, %v4122_v9 }
 0x5af   : > { %v4162_v28 = vrot.slane %v4134_v4, %v8002_v29 }
 0x5b1   : > { %v4164_v39 = vcombine.low %v4155_v8, %v4162_v28 }
 0x5b3   : > { %v4178_v60 = vrot.slane %v4164_v39, %v8002_v29 }
 0x5b5   : > { %v4179_v62 = vcombine.low %v4171_v6, %v4178_v60 }
 0x5b7   : > { %v4189_v30 = vmul.f32 %v4188_v49, %v4179_v62 }
 0x5b9   : > { %4190 = vst [vmem:[%s674_s21] sm:$0xff] %v4189_v30 }
 0x5ba PF: > { %s23_s25 = sadd.s32 1, %s5315_s25   ;;  %s8006_s28 = sld [smem:[#allocation3_spill]] }
 0x5bb   : > { %p20_p8 = scmp.ge.s32.totalorder %s23_s25, 6   ;;  %s8007_s15 = sld [smem:[#allocation4_spill]] }
 0x5bc   : > { %s8008_s21 = smov %s5307_s23  ;;  %s8009_s22 = smov %s5311_s24 }
 0x5bd   :  { %22 = sbr.rel (!%p20_p8) target bundleno = 3 (0x3), region = 144 }
 0x5c0   : > { %s8010_s23 = smov %s8006_s28 }
 0x5c1   : > { %s8011_s24 = smov %s8007_s15 }

</bundles_post_ra>
